<compile_context>
chip_gen: v7x
topology: tpu7x:2x2x1
jax: 0.10.0
libtpu: 0.0.40
codegen_flags: <defaults>
</compile_context>

<pallas_src>
import jax
import jax.numpy as jnp
import numpy as np
from jax.experimental import pallas as pl
from jax.experimental.pallas import tpu as pltpu

# Model dims (fixed by the PyTorch module).
H = W = 8
HW = H * W                 # 64 spatial positions
CIN = 13
COUT = 64                  # conv output channels
KFEAT = CIN * 9            # 117 im2col features
KPAD = 128                 # padded to lane width
D_FC1_IN = COUT * HW       # 4096
N1 = 1024
N2 = 512
TK = 2048                  # fc1 K-chunk per grid step (2 steps; safe on v5e/v6e/v7x)
HW_STEP = TK // COUT       # 32 spatial positions handled per grid step


# ----------------------------------------------------------------------------
# Fused kernel: [conv+bn1+relu prologue] -> fc1(+bn2+relu) -> fc2(+bn3+relu)
#               -> dropout(eval)=identity -> fc3 -> tanh
# ----------------------------------------------------------------------------
def _fused_kernel(patches_ref, wconv_ref, bn1_ref, w1_ref, bn2_ref, w2_ref,
                  pk3_ref, o_ref, acc_ref, xstep_ref, hconv_ref):
    k = pl.program_id(0)
    B = xstep_ref.shape[0]

    @pl.when(k == 0)
    def _():
        acc_ref[...] = jnp.zeros_like(acc_ref)

    # --- conv + bn1 + relu for this step's HW_STEP spatial positions ---------
    # patches rows are ordered (hw, b); columns are (kh, kw, cin) padded to 128.
    h = jnp.dot(patches_ref[...], wconv_ref[...],
                preferred_element_type=jnp.float32)          # (HW_STEP*B, COUT)
    h = jnp.maximum(h * bn1_ref[0:1, :] + bn1_ref[1:2, :], 0.0)
    hconv_ref[...] = h

    # Relayout rows(hw,b) x lanes(c)  ->  rows(b) x lanes(j*64 + c), which is
    # exactly the fc1-activation column order hw*64 + c (w_fc1 rows permuted to
    # match host-side).  32 tiny static VMEM copies, hidden under the w1 DMA.
    for j in range(HW_STEP):
        xstep_ref[:, j * COUT:(j + 1) * COUT] = hconv_ref[j * B:(j + 1) * B, :]

    # --- fc1 partial sum over this K-chunk (bf16 operands, f32 accumulation) --
    acc_ref[...] += jnp.dot(xstep_ref[...].astype(jnp.bfloat16), w1_ref[...],
                            preferred_element_type=jnp.float32)

    @pl.when(k == pl.num_programs(0) - 1)
    def _():
        # bn2 + relu
        h1 = jnp.maximum(acc_ref[...] * bn2_ref[0:1, :] + bn2_ref[1:2, :], 0.0)
        # fc2 + bn3 + relu
        h2 = jnp.dot(h1.astype(jnp.bfloat16), w2_ref[...],
                     preferred_element_type=jnp.float32)
        h2 = jnp.maximum(h2 * pk3_ref[0:1, :] + pk3_ref[1:2, :], 0.0)
        # dropout (eval) = identity; fc3 (512 -> 1) on VPU/XLU + tanh
        y = jnp.sum(h2 * pk3_ref[2:3, :], axis=-1, keepdims=True) \
            + pk3_ref[3:4, 0:1]
        o_ref[...] = jnp.tanh(y).astype(o_ref.dtype)


def fused_forward(patches, wconv, bn1, w1, bn2, w2, pk3):
    M, _ = patches.shape              # (B*HW, KPAD), rows ordered (hw, b)
    B = M // HW
    n_steps = D_FC1_IN // TK

    return pl.pallas_call(
        _fused_kernel,
        out_shape=jax.ShapeDtypeStruct((B, 1), jnp.float32),
        grid_spec=pltpu.PrefetchScalarGridSpec(
            num_scalar_prefetch=0,
            grid=(n_steps,),
            in_specs=[
                pl.BlockSpec((HW_STEP * B, KPAD), lambda k: (k, 0)),  # patches chunk
                pl.BlockSpec((KPAD, COUT), lambda k: (0, 0)),         # conv weight
                pl.BlockSpec((2, COUT), lambda k: (0, 0)),            # bn1 scale/shift
                pl.BlockSpec((TK, N1), lambda k: (k, 0)),             # fc1 weight chunk
                pl.BlockSpec((2, N1), lambda k: (0, 0)),              # bn2 scale/shift
                pl.BlockSpec((N1, N2), lambda k: (0, 0)),             # fc2 weight (resident)
                pl.BlockSpec((4, N2), lambda k: (0, 0)),              # bn3 + fc3 row + fc3 bias
            ],
            out_specs=pl.BlockSpec((B, 1), lambda k: (0, 0)),
            scratch_shapes=[
                pltpu.VMEM((B, N1), jnp.float32),              # fc1 accumulator
                pltpu.VMEM((B, TK), jnp.float32),              # per-step fc1 activation
                pltpu.VMEM((HW_STEP * B, COUT), jnp.float32),  # per-step conv output
            ],
        ),
        compiler_params=pltpu.CompilerParams(
            dimension_semantics=("arbitrary",)),
    )(patches, wconv, bn1, w1, bn2, w2, pk3)


# ----------------------------------------------------------------------------
# Parameter construction (deterministic, synthetic), bias+BN folding, packing
# ----------------------------------------------------------------------------
def _bn_fold(gamma, beta, mean, var, bias, eps=1e-5):
    """Fold (conv/linear bias) + eval-mode BatchNorm into [scale; shift] (2, n)."""
    s = gamma / jnp.sqrt(var + eps)
    shift = (bias - mean) * s + beta
    return jnp.stack([s, shift], axis=0).astype(jnp.float32)


def init_params(key):
    ks = jax.random.split(key, 24)
    p = {}

    def dense(kw, kb, fan_in, shape_w, shape_b):
        w = jax.random.normal(kw, shape_w, jnp.float32) / np.sqrt(fan_in)
        b = jax.random.normal(kb, shape_b, jnp.float32) * 0.01
        return w, b

    def bn(kg, kb, km, kv, n):
        gamma = jax.random.uniform(kg, (n,), jnp.float32, 0.5, 1.5)
        beta = jax.random.normal(kb, (n,), jnp.float32) * 0.01
        mean = jax.random.normal(km, (n,), jnp.float32) * 0.01
        var = jax.random.uniform(kv, (n,), jnp.float32, 0.5, 1.5)
        return gamma, beta, mean, var

    # conv1: Conv2d(13, 64, k=3, p=1) + bn1.  Weight rows reordered to the
    # (kh, kw, cin) im2col column order used by the wrapper, padded 117 -> 128.
    w_conv = jax.random.normal(ks[0], (COUT, CIN, 3, 3), jnp.float32) / np.sqrt(CIN * 9)
    b_conv = jax.random.normal(ks[1], (COUT,), jnp.float32) * 0.01
    w_conv_mat = jnp.transpose(w_conv, (2, 3, 1, 0)).reshape(KFEAT, COUT)
    w_conv_mat = jnp.pad(w_conv_mat, ((0, KPAD - KFEAT), (0, 0)))
    p["w_conv"] = w_conv_mat.astype(jnp.bfloat16)
    p["bn1"] = _bn_fold(*bn(ks[2], ks[3], ks[4], ks[5], COUT), b_conv)

    # fc1: Linear(4096, 1024) + bn2.  Rows permuted from PyTorch's NCHW-flatten
    # order (c*64 + hw) to (hw*64 + c) to match the kernel's activation layout.
    w1, b1 = dense(ks[6], ks[7], D_FC1_IN, (D_FC1_IN, N1), (N1,))
    w1p = jnp.transpose(w1.reshape(COUT, HW, N1), (1, 0, 2)).reshape(D_FC1_IN, N1)
    p["w_fc1"] = w1p.astype(jnp.bfloat16)
    p["bn2"] = _bn_fold(*bn(ks[8], ks[9], ks[10], ks[11], N1), b1)

    # fc2: Linear(1024, 512) + bn3;  fc3: Linear(512, 1) (no BN).
    w2, b2 = dense(ks[12], ks[13], N1, (N1, N2), (N2,))
    p["w_fc2"] = w2.astype(jnp.bfloat16)
    bn3 = _bn_fold(*bn(ks[14], ks[15], ks[16], ks[17], N2), b2)
    w3, b3 = dense(ks[18], ks[19], N2, (N2, 1), (1,))
    p["pk3"] = jnp.concatenate(
        [bn3, w3.reshape(1, N2), jnp.full((1, N2), b3[0], jnp.float32)], axis=0)
    return p


# ----------------------------------------------------------------------------
# Forward pass (minimal im2col glue in plain JAX, everything heavy in 1 call)
# ----------------------------------------------------------------------------
@jax.jit
def chess_value_forward(x, params):
    # x: (B, 8, 8, 13) float32 (matches the torch module's pre-permute input)
    B = x.shape[0]
    x_pad = jnp.pad(x, ((0, 0), (1, 1), (1, 1), (0, 0)))        # (B, 10, 10, 13) NHWC
    cols = jnp.stack(
        [x_pad[:, di:di + H, dj:dj + W, :] for di in range(3) for dj in range(3)],
        axis=3)                                                 # (B, 8, 8, 9, 13)
    # rows ordered (h, w, b); columns ordered (kh, kw, cin); pad K 117 -> 128
    patches = jnp.transpose(cols, (1, 2, 0, 3, 4)).reshape(HW * B, KFEAT)
    patches = jnp.pad(patches, ((0, 0), (0, KPAD - KFEAT))).astype(jnp.bfloat16)

    return fused_forward(patches, params["w_conv"], params["bn1"],
                         params["w_fc1"], params["bn2"],
                         params["w_fc2"], params["pk3"])        # (B, 1) float32


if __name__ == "__main__":
    key = jax.random.PRNGKey(0)
    k_param, k_input = jax.random.split(key)

    params = init_params(k_param)
    x = jax.random.normal(k_input, (2, 8, 8, 13), jnp.float32)

    out = chess_value_forward(x, params)
    out = jax.block_until_ready(out)
    assert out.shape == (2, 1), out.shape
    assert bool(jnp.all(jnp.isfinite(out)))
    print("KERNEL_OK")
</pallas_src>

<mosaic_0001>
module attributes {stable_mosaic.version = 11 : i64} {
  func.func @_fused_kernel(%arg0: i32, %arg1: memref<64x128xbf16, #tpu.memory_space<vmem>>, %arg2: memref<128x64xbf16, #tpu.memory_space<vmem>>, %arg3: memref<2x64xf32, #tpu.memory_space<vmem>>, %arg4: memref<2048x1024xbf16, #tpu.memory_space<vmem>>, %arg5: memref<2x1024xf32, #tpu.memory_space<vmem>>, %arg6: memref<1024x512xbf16, #tpu.memory_space<vmem>>, %arg7: memref<4x512xf32, #tpu.memory_space<vmem>>, %arg8: memref<2x1xf32, #tpu.memory_space<vmem>>, %arg9: memref<2x1024xf32, #tpu.memory_space<vmem>>, %arg10: memref<2x2048xf32, #tpu.memory_space<vmem>>, %arg11: memref<64x64xf32, #tpu.memory_space<vmem>>) attributes {dimension_semantics = [#tpu.dimension_semantics<arbitrary>], iteration_bounds = array<i64: 2>, scalar_prefetch = 0 : i64, scratch_operands = 3 : i64, tpu.core_type = #tpu.core_type<tc>, window_params = [{transform_indices = @transform_0, window_bounds = array<i64: 64, 128>}, {pipeline_mode = #tpu.pipeline_mode<synchronous>, transform_indices = @transform_1, window_bounds = array<i64: 128, 64>}, {pipeline_mode = #tpu.pipeline_mode<synchronous>, transform_indices = @transform_2, window_bounds = array<i64: 2, 64>}, {transform_indices = @transform_3, window_bounds = array<i64: 2048, 1024>}, {pipeline_mode = #tpu.pipeline_mode<synchronous>, transform_indices = @transform_4, window_bounds = array<i64: 2, 1024>}, {pipeline_mode = #tpu.pipeline_mode<synchronous>, transform_indices = @transform_5, window_bounds = array<i64: 1024, 512>}, {pipeline_mode = #tpu.pipeline_mode<synchronous>, transform_indices = @transform_6, window_bounds = array<i64: 4, 512>}, {pipeline_mode = #tpu.pipeline_mode<synchronous>, transform_indices = @transform_7, window_bounds = array<i64: 2, 1>}]} {
    %c0_i32 = arith.constant 0 : i32
    %0 = arith.cmpi eq, %arg0, %c0_i32 : i32
    %1 = arith.extui %0 : i1 to i32
    %c0_i32_0 = arith.constant 0 : i32
    %2 = arith.cmpi ne, %1, %c0_i32_0 : i32
    scf.if %2 {
      %cst_86 = arith.constant 0.000000e+00 : f32
      %89 = vector.broadcast %cst_86 : f32 to vector<2x1024xf32>
      %c0_87 = arith.constant 0 : index
      %c0_88 = arith.constant 0 : index
      %90 = vector.load %arg9[%c0_87, %c0_88] : memref<2x1024xf32, #tpu.memory_space<vmem>>, vector<2x1024xf32>
      tpu.vector_store %arg9[%c0_87, %c0_88], %89 {strides = array<i32>} : memref<2x1024xf32, #tpu.memory_space<vmem>>, vector<2x1024xf32>,
    } else {
    }
    %c0 = arith.constant 0 : index
    %c0_1 = arith.constant 0 : index
    %3 = vector.load %arg1[%c0, %c0_1] : memref<64x128xbf16, #tpu.memory_space<vmem>>, vector<64x128xbf16>
    %c0_2 = arith.constant 0 : index
    %c0_3 = arith.constant 0 : index
    %4 = vector.load %arg2[%c0_2, %c0_3] : memref<128x64xbf16, #tpu.memory_space<vmem>>, vector<128x64xbf16>
    %cst = arith.constant dense<0.000000e+00> : vector<64x64xf32>
    %5 = tpu.matmul %3, %4, %cst {dimension_numbers = #tpu.dot_dimension_numbers<[1], [0], [0], [1], [0, 0, 1, 1], [], []>} : vector<64x128xbf16>, vector<128x64xbf16>, vector<64x64xf32> -> vector<64x64xf32>
    %c0_4 = arith.constant 0 : index
    %c0_5 = arith.constant 0 : index
    %6 = vector.load %arg3[%c0_4, %c0_5] : memref<2x64xf32, #tpu.memory_space<vmem>>, vector<1x64xf32>
    %7 = vector.broadcast %6 : vector<1x64xf32> to vector<64x64xf32>
    %8 = arith.mulf %5, %7 : vector<64x64xf32>
    %c1 = arith.constant 1 : index
    %c0_6 = arith.constant 0 : index
    %9 = vector.load %arg3[%c1, %c0_6] : memref<2x64xf32, #tpu.memory_space<vmem>>, vector<1x64xf32>
    %10 = vector.broadcast %9 : vector<1x64xf32> to vector<64x64xf32>
    %11 = arith.addf %8, %10 : vector<64x64xf32>
    %cst_7 = arith.constant 0.000000e+00 : f32
    %12 = vector.broadcast %cst_7 : f32 to vector<64x64xf32>
    %13 = arith.maximumf %11, %12 : vector<64x64xf32>
    %c0_8 = arith.constant 0 : index
    %c0_9 = arith.constant 0 : index
    %14 = vector.load %arg11[%c0_8, %c0_9] : memref<64x64xf32, #tpu.memory_space<vmem>>, vector<64x64xf32>
    tpu.vector_store %arg11[%c0_8, %c0_9], %13 {strides = array<i32>} : memref<64x64xf32, #tpu.memory_space<vmem>>, vector<64x64xf32>,
    %c0_10 = arith.constant 0 : index
    %c0_11 = arith.constant 0 : index
    %15 = vector.load %arg11[%c0_10, %c0_11] : memref<64x64xf32, #tpu.memory_space<vmem>>, vector<2x64xf32>
    %c0_12 = arith.constant 0 : index
    %c0_13 = arith.constant 0 : index
    %16 = vector.load %arg10[%c0_12, %c0_13] : memref<2x2048xf32, #tpu.memory_space<vmem>>, vector<2x64xf32>
    tpu.vector_store %arg10[%c0_12, %c0_13], %15 {strides = array<i32>} : memref<2x2048xf32, #tpu.memory_space<vmem>>, vector<2x64xf32>,
    %c2 = arith.constant 2 : index
    %c0_14 = arith.constant 0 : index
    %17 = vector.load %arg11[%c2, %c0_14] : memref<64x64xf32, #tpu.memory_space<vmem>>, vector<2x64xf32>
    %c0_15 = arith.constant 0 : index
    %c64 = arith.constant 64 : index
    %18 = vector.load %arg10[%c0_15, %c64] : memref<2x2048xf32, #tpu.memory_space<vmem>>, vector<2x64xf32>
    tpu.vector_store %arg10[%c0_15, %c64], %17 {strides = array<i32>} : memref<2x2048xf32, #tpu.memory_space<vmem>>, vector<2x64xf32>,
    %c4 = arith.constant 4 : index
    %c0_16 = arith.constant 0 : index
    %19 = vector.load %arg11[%c4, %c0_16] : memref<64x64xf32, #tpu.memory_space<vmem>>, vector<2x64xf32>
    %c0_17 = arith.constant 0 : index
    %c128 = arith.constant 128 : index
    %20 = vector.load %arg10[%c0_17, %c128] : memref<2x2048xf32, #tpu.memory_space<vmem>>, vector<2x64xf32>
    tpu.vector_store %arg10[%c0_17, %c128], %19 {strides = array<i32>} : memref<2x2048xf32, #tpu.memory_space<vmem>>, vector<2x64xf32>,
    %c6 = arith.constant 6 : index
    %c0_18 = arith.constant 0 : index
    %21 = vector.load %arg11[%c6, %c0_18] : memref<64x64xf32, #tpu.memory_space<vmem>>, vector<2x64xf32>
    %c0_19 = arith.constant 0 : index
    %c192 = arith.constant 192 : index
    %22 = vector.load %arg10[%c0_19, %c192] : memref<2x2048xf32, #tpu.memory_space<vmem>>, vector<2x64xf32>
    tpu.vector_store %arg10[%c0_19, %c192], %21 {strides = array<i32>} : memref<2x2048xf32, #tpu.memory_space<vmem>>, vector<2x64xf32>,
    %c8 = arith.constant 8 : index
    %c0_20 = arith.constant 0 : index
    %23 = vector.load %arg11[%c8, %c0_20] : memref<64x64xf32, #tpu.memory_space<vmem>>, vector<2x64xf32>
    %c0_21 = arith.constant 0 : index
    %c256 = arith.constant 256 : index
    %24 = vector.load %arg10[%c0_21, %c256] : memref<2x2048xf32, #tpu.memory_space<vmem>>, vector<2x64xf32>
    tpu.vector_store %arg10[%c0_21, %c256], %23 {strides = array<i32>} : memref<2x2048xf32, #tpu.memory_space<vmem>>, vector<2x64xf32>,
    %c10 = arith.constant 10 : index
    %c0_22 = arith.constant 0 : index
    %25 = vector.load %arg11[%c10, %c0_22] : memref<64x64xf32, #tpu.memory_space<vmem>>, vector<2x64xf32>
    %c0_23 = arith.constant 0 : index
    %c320 = arith.constant 320 : index
    %26 = vector.load %arg10[%c0_23, %c320] : memref<2x2048xf32, #tpu.memory_space<vmem>>, vector<2x64xf32>
    tpu.vector_store %arg10[%c0_23, %c320], %25 {strides = array<i32>} : memref<2x2048xf32, #tpu.memory_space<vmem>>, vector<2x64xf32>,
    %c12 = arith.constant 12 : index
    %c0_24 = arith.constant 0 : index
    %27 = vector.load %arg11[%c12, %c0_24] : memref<64x64xf32, #tpu.memory_space<vmem>>, vector<2x64xf32>
    %c0_25 = arith.constant 0 : index
    %c384 = arith.constant 384 : index
    %28 = vector.load %arg10[%c0_25, %c384] : memref<2x2048xf32, #tpu.memory_space<vmem>>, vector<2x64xf32>
    tpu.vector_store %arg10[%c0_25, %c384], %27 {strides = array<i32>} : memref<2x2048xf32, #tpu.memory_space<vmem>>, vector<2x64xf32>,
    %c14 = arith.constant 14 : index
    %c0_26 = arith.constant 0 : index
    %29 = vector.load %arg11[%c14, %c0_26] : memref<64x64xf32, #tpu.memory_space<vmem>>, vector<2x64xf32>
    %c0_27 = arith.constant 0 : index
    %c448 = arith.constant 448 : index
    %30 = vector.load %arg10[%c0_27, %c448] : memref<2x2048xf32, #tpu.memory_space<vmem>>, vector<2x64xf32>
    tpu.vector_store %arg10[%c0_27, %c448], %29 {strides = array<i32>} : memref<2x2048xf32, #tpu.memory_space<vmem>>, vector<2x64xf32>,
    %c16 = arith.constant 16 : index
    %c0_28 = arith.constant 0 : index
    %31 = vector.load %arg11[%c16, %c0_28] : memref<64x64xf32, #tpu.memory_space<vmem>>, vector<2x64xf32>
    %c0_29 = arith.constant 0 : index
    %c512 = arith.constant 512 : index
    %32 = vector.load %arg10[%c0_29, %c512] : memref<2x2048xf32, #tpu.memory_space<vmem>>, vector<2x64xf32>
    tpu.vector_store %arg10[%c0_29, %c512], %31 {strides = array<i32>} : memref<2x2048xf32, #tpu.memory_space<vmem>>, vector<2x64xf32>,
    %c18 = arith.constant 18 : index
    %c0_30 = arith.constant 0 : index
    %33 = vector.load %arg11[%c18, %c0_30] : memref<64x64xf32, #tpu.memory_space<vmem>>, vector<2x64xf32>
    %c0_31 = arith.constant 0 : index
    %c576 = arith.constant 576 : index
    %34 = vector.load %arg10[%c0_31, %c576] : memref<2x2048xf32, #tpu.memory_space<vmem>>, vector<2x64xf32>
    tpu.vector_store %arg10[%c0_31, %c576], %33 {strides = array<i32>} : memref<2x2048xf32, #tpu.memory_space<vmem>>, vector<2x64xf32>,
    %c20 = arith.constant 20 : index
    %c0_32 = arith.constant 0 : index
    %35 = vector.load %arg11[%c20, %c0_32] : memref<64x64xf32, #tpu.memory_space<vmem>>, vector<2x64xf32>
    %c0_33 = arith.constant 0 : index
    %c640 = arith.constant 640 : index
    %36 = vector.load %arg10[%c0_33, %c640] : memref<2x2048xf32, #tpu.memory_space<vmem>>, vector<2x64xf32>
    tpu.vector_store %arg10[%c0_33, %c640], %35 {strides = array<i32>} : memref<2x2048xf32, #tpu.memory_space<vmem>>, vector<2x64xf32>,
    %c22 = arith.constant 22 : index
    %c0_34 = arith.constant 0 : index
    %37 = vector.load %arg11[%c22, %c0_34] : memref<64x64xf32, #tpu.memory_space<vmem>>, vector<2x64xf32>
    %c0_35 = arith.constant 0 : index
    %c704 = arith.constant 704 : index
    %38 = vector.load %arg10[%c0_35, %c704] : memref<2x2048xf32, #tpu.memory_space<vmem>>, vector<2x64xf32>
    tpu.vector_store %arg10[%c0_35, %c704], %37 {strides = array<i32>} : memref<2x2048xf32, #tpu.memory_space<vmem>>, vector<2x64xf32>,
    %c24 = arith.constant 24 : index
    %c0_36 = arith.constant 0 : index
    %39 = vector.load %arg11[%c24, %c0_36] : memref<64x64xf32, #tpu.memory_space<vmem>>, vector<2x64xf32>
    %c0_37 = arith.constant 0 : index
    %c768 = arith.constant 768 : index
    %40 = vector.load %arg10[%c0_37, %c768] : memref<2x2048xf32, #tpu.memory_space<vmem>>, vector<2x64xf32>
    tpu.vector_store %arg10[%c0_37, %c768], %39 {strides = array<i32>} : memref<2x2048xf32, #tpu.memory_space<vmem>>, vector<2x64xf32>,
    %c26 = arith.constant 26 : index
    %c0_38 = arith.constant 0 : index
    %41 = vector.load %arg11[%c26, %c0_38] : memref<64x64xf32, #tpu.memory_space<vmem>>, vector<2x64xf32>
    %c0_39 = arith.constant 0 : index
    %c832 = arith.constant 832 : index
    %42 = vector.load %arg10[%c0_39, %c832] : memref<2x2048xf32, #tpu.memory_space<vmem>>, vector<2x64xf32>
    tpu.vector_store %arg10[%c0_39, %c832], %41 {strides = array<i32>} : memref<2x2048xf32, #tpu.memory_space<vmem>>, vector<2x64xf32>,
    %c28 = arith.constant 28 : index
    %c0_40 = arith.constant 0 : index
    %43 = vector.load %arg11[%c28, %c0_40] : memref<64x64xf32, #tpu.memory_space<vmem>>, vector<2x64xf32>
    %c0_41 = arith.constant 0 : index
    %c896 = arith.constant 896 : index
    %44 = vector.load %arg10[%c0_41, %c896] : memref<2x2048xf32, #tpu.memory_space<vmem>>, vector<2x64xf32>
    tpu.vector_store %arg10[%c0_41, %c896], %43 {strides = array<i32>} : memref<2x2048xf32, #tpu.memory_space<vmem>>, vector<2x64xf32>,
    %c30 = arith.constant 30 : index
    %c0_42 = arith.constant 0 : index
    %45 = vector.load %arg11[%c30, %c0_42] : memref<64x64xf32, #tpu.memory_space<vmem>>, vector<2x64xf32>
    %c0_43 = arith.constant 0 : index
    %c960 = arith.constant 960 : index
    %46 = vector.load %arg10[%c0_43, %c960] : memref<2x2048xf32, #tpu.memory_space<vmem>>, vector<2x64xf32>
    tpu.vector_store %arg10[%c0_43, %c960], %45 {strides = array<i32>} : memref<2x2048xf32, #tpu.memory_space<vmem>>, vector<2x64xf32>,
    %c32 = arith.constant 32 : index
    %c0_44 = arith.constant 0 : index
    %47 = vector.load %arg11[%c32, %c0_44] : memref<64x64xf32, #tpu.memory_space<vmem>>, vector<2x64xf32>
    %c0_45 = arith.constant 0 : index
    %c1024 = arith.constant 1024 : index
    %48 = vector.load %arg10[%c0_45, %c1024] : memref<2x2048xf32, #tpu.memory_space<vmem>>, vector<2x64xf32>
    tpu.vector_store %arg10[%c0_45, %c1024], %47 {strides = array<i32>} : memref<2x2048xf32, #tpu.memory_space<vmem>>, vector<2x64xf32>,
    %c34 = arith.constant 34 : index
    %c0_46 = arith.constant 0 : index
    %49 = vector.load %arg11[%c34, %c0_46] : memref<64x64xf32, #tpu.memory_space<vmem>>, vector<2x64xf32>
    %c0_47 = arith.constant 0 : index
    %c1088 = arith.constant 1088 : index
    %50 = vector.load %arg10[%c0_47, %c1088] : memref<2x2048xf32, #tpu.memory_space<vmem>>, vector<2x64xf32>
    tpu.vector_store %arg10[%c0_47, %c1088], %49 {strides = array<i32>} : memref<2x2048xf32, #tpu.memory_space<vmem>>, vector<2x64xf32>,
    %c36 = arith.constant 36 : index
    %c0_48 = arith.constant 0 : index
    %51 = vector.load %arg11[%c36, %c0_48] : memref<64x64xf32, #tpu.memory_space<vmem>>, vector<2x64xf32>
    %c0_49 = arith.constant 0 : index
    %c1152 = arith.constant 1152 : index
    %52 = vector.load %arg10[%c0_49, %c1152] : memref<2x2048xf32, #tpu.memory_space<vmem>>, vector<2x64xf32>
    tpu.vector_store %arg10[%c0_49, %c1152], %51 {strides = array<i32>} : memref<2x2048xf32, #tpu.memory_space<vmem>>, vector<2x64xf32>,
    %c38 = arith.constant 38 : index
    %c0_50 = arith.constant 0 : index
    %53 = vector.load %arg11[%c38, %c0_50] : memref<64x64xf32, #tpu.memory_space<vmem>>, vector<2x64xf32>
    %c0_51 = arith.constant 0 : index
    %c1216 = arith.constant 1216 : index
    %54 = vector.load %arg10[%c0_51, %c1216] : memref<2x2048xf32, #tpu.memory_space<vmem>>, vector<2x64xf32>
    tpu.vector_store %arg10[%c0_51, %c1216], %53 {strides = array<i32>} : memref<2x2048xf32, #tpu.memory_space<vmem>>, vector<2x64xf32>,
    %c40 = arith.constant 40 : index
    %c0_52 = arith.constant 0 : index
    %55 = vector.load %arg11[%c40, %c0_52] : memref<64x64xf32, #tpu.memory_space<vmem>>, vector<2x64xf32>
    %c0_53 = arith.constant 0 : index
    %c1280 = arith.constant 1280 : index
    %56 = vector.load %arg10[%c0_53, %c1280] : memref<2x2048xf32, #tpu.memory_space<vmem>>, vector<2x64xf32>
    tpu.vector_store %arg10[%c0_53, %c1280], %55 {strides = array<i32>} : memref<2x2048xf32, #tpu.memory_space<vmem>>, vector<2x64xf32>,
    %c42 = arith.constant 42 : index
    %c0_54 = arith.constant 0 : index
    %57 = vector.load %arg11[%c42, %c0_54] : memref<64x64xf32, #tpu.memory_space<vmem>>, vector<2x64xf32>
    %c0_55 = arith.constant 0 : index
    %c1344 = arith.constant 1344 : index
    %58 = vector.load %arg10[%c0_55, %c1344] : memref<2x2048xf32, #tpu.memory_space<vmem>>, vector<2x64xf32>
    tpu.vector_store %arg10[%c0_55, %c1344], %57 {strides = array<i32>} : memref<2x2048xf32, #tpu.memory_space<vmem>>, vector<2x64xf32>,
    %c44 = arith.constant 44 : index
    %c0_56 = arith.constant 0 : index
    %59 = vector.load %arg11[%c44, %c0_56] : memref<64x64xf32, #tpu.memory_space<vmem>>, vector<2x64xf32>
    %c0_57 = arith.constant 0 : index
    %c1408 = arith.constant 1408 : index
    %60 = vector.load %arg10[%c0_57, %c1408] : memref<2x2048xf32, #tpu.memory_space<vmem>>, vector<2x64xf32>
    tpu.vector_store %arg10[%c0_57, %c1408], %59 {strides = array<i32>} : memref<2x2048xf32, #tpu.memory_space<vmem>>, vector<2x64xf32>,
    %c46 = arith.constant 46 : index
    %c0_58 = arith.constant 0 : index
    %61 = vector.load %arg11[%c46, %c0_58] : memref<64x64xf32, #tpu.memory_space<vmem>>, vector<2x64xf32>
    %c0_59 = arith.constant 0 : index
    %c1472 = arith.constant 1472 : index
    %62 = vector.load %arg10[%c0_59, %c1472] : memref<2x2048xf32, #tpu.memory_space<vmem>>, vector<2x64xf32>
    tpu.vector_store %arg10[%c0_59, %c1472], %61 {strides = array<i32>} : memref<2x2048xf32, #tpu.memory_space<vmem>>, vector<2x64xf32>,
    %c48 = arith.constant 48 : index
    %c0_60 = arith.constant 0 : index
    %63 = vector.load %arg11[%c48, %c0_60] : memref<64x64xf32, #tpu.memory_space<vmem>>, vector<2x64xf32>
    %c0_61 = arith.constant 0 : index
    %c1536 = arith.constant 1536 : index
    %64 = vector.load %arg10[%c0_61, %c1536] : memref<2x2048xf32, #tpu.memory_space<vmem>>, vector<2x64xf32>
    tpu.vector_store %arg10[%c0_61, %c1536], %63 {strides = array<i32>} : memref<2x2048xf32, #tpu.memory_space<vmem>>, vector<2x64xf32>,
    %c50 = arith.constant 50 : index
    %c0_62 = arith.constant 0 : index
    %65 = vector.load %arg11[%c50, %c0_62] : memref<64x64xf32, #tpu.memory_space<vmem>>, vector<2x64xf32>
    %c0_63 = arith.constant 0 : index
    %c1600 = arith.constant 1600 : index
    %66 = vector.load %arg10[%c0_63, %c1600] : memref<2x2048xf32, #tpu.memory_space<vmem>>, vector<2x64xf32>
    tpu.vector_store %arg10[%c0_63, %c1600], %65 {strides = array<i32>} : memref<2x2048xf32, #tpu.memory_space<vmem>>, vector<2x64xf32>,
    %c52 = arith.constant 52 : index
    %c0_64 = arith.constant 0 : index
    %67 = vector.load %arg11[%c52, %c0_64] : memref<64x64xf32, #tpu.memory_space<vmem>>, vector<2x64xf32>
    %c0_65 = arith.constant 0 : index
    %c1664 = arith.constant 1664 : index
    %68 = vector.load %arg10[%c0_65, %c1664] : memref<2x2048xf32, #tpu.memory_space<vmem>>, vector<2x64xf32>
    tpu.vector_store %arg10[%c0_65, %c1664], %67 {strides = array<i32>} : memref<2x2048xf32, #tpu.memory_space<vmem>>, vector<2x64xf32>,
    %c54 = arith.constant 54 : index
    %c0_66 = arith.constant 0 : index
    %69 = vector.load %arg11[%c54, %c0_66] : memref<64x64xf32, #tpu.memory_space<vmem>>, vector<2x64xf32>
    %c0_67 = arith.constant 0 : index
    %c1728 = arith.constant 1728 : index
    %70 = vector.load %arg10[%c0_67, %c1728] : memref<2x2048xf32, #tpu.memory_space<vmem>>, vector<2x64xf32>
    tpu.vector_store %arg10[%c0_67, %c1728], %69 {strides = array<i32>} : memref<2x2048xf32, #tpu.memory_space<vmem>>, vector<2x64xf32>,
    %c56 = arith.constant 56 : index
    %c0_68 = arith.constant 0 : index
    %71 = vector.load %arg11[%c56, %c0_68] : memref<64x64xf32, #tpu.memory_space<vmem>>, vector<2x64xf32>
    %c0_69 = arith.constant 0 : index
    %c1792 = arith.constant 1792 : index
    %72 = vector.load %arg10[%c0_69, %c1792] : memref<2x2048xf32, #tpu.memory_space<vmem>>, vector<2x64xf32>
    tpu.vector_store %arg10[%c0_69, %c1792], %71 {strides = array<i32>} : memref<2x2048xf32, #tpu.memory_space<vmem>>, vector<2x64xf32>,
    %c58 = arith.constant 58 : index
    %c0_70 = arith.constant 0 : index
    %73 = vector.load %arg11[%c58, %c0_70] : memref<64x64xf32, #tpu.memory_space<vmem>>, vector<2x64xf32>
    %c0_71 = arith.constant 0 : index
    %c1856 = arith.constant 1856 : index
    %74 = vector.load %arg10[%c0_71, %c1856] : memref<2x2048xf32, #tpu.memory_space<vmem>>, vector<2x64xf32>
    tpu.vector_store %arg10[%c0_71, %c1856], %73 {strides = array<i32>} : memref<2x2048xf32, #tpu.memory_space<vmem>>, vector<2x64xf32>,
    %c60 = arith.constant 60 : index
    %c0_72 = arith.constant 0 : index
    %75 = vector.load %arg11[%c60, %c0_72] : memref<64x64xf32, #tpu.memory_space<vmem>>, vector<2x64xf32>
    %c0_73 = arith.constant 0 : index
    %c1920 = arith.constant 1920 : index
    %76 = vector.load %arg10[%c0_73, %c1920] : memref<2x2048xf32, #tpu.memory_space<vmem>>, vector<2x64xf32>
    tpu.vector_store %arg10[%c0_73, %c1920], %75 {strides = array<i32>} : memref<2x2048xf32, #tpu.memory_space<vmem>>, vector<2x64xf32>,
    %c62 = arith.constant 62 : index
    %c0_74 = arith.constant 0 : index
    %77 = vector.load %arg11[%c62, %c0_74] : memref<64x64xf32, #tpu.memory_space<vmem>>, vector<2x64xf32>
    %c0_75 = arith.constant 0 : index
    %c1984 = arith.constant 1984 : index
    %78 = vector.load %arg10[%c0_75, %c1984] : memref<2x2048xf32, #tpu.memory_space<vmem>>, vector<2x64xf32>
    tpu.vector_store %arg10[%c0_75, %c1984], %77 {strides = array<i32>} : memref<2x2048xf32, #tpu.memory_space<vmem>>, vector<2x64xf32>,
    %c0_76 = arith.constant 0 : index
    %c0_77 = arith.constant 0 : index
    %79 = vector.load %arg9[%c0_76, %c0_77] : memref<2x1024xf32, #tpu.memory_space<vmem>>, vector<2x1024xf32>
    %c0_78 = arith.constant 0 : index
    %c0_79 = arith.constant 0 : index
    %80 = vector.load %arg10[%c0_78, %c0_79] : memref<2x2048xf32, #tpu.memory_space<vmem>>, vector<2x2048xf32>
    %81 = arith.truncf %80 : vector<2x2048xf32> to vector<2x2048xbf16>
    %c0_80 = arith.constant 0 : index
    %c0_81 = arith.constant 0 : index
    %82 = vector.load %arg4[%c0_80, %c0_81] : memref<2048x1024xbf16, #tpu.memory_space<vmem>>, vector<2048x1024xbf16>
    %cst_82 = arith.constant dense<0.000000e+00> : vector<2x1024xf32>
    %83 = tpu.matmul %81, %82, %cst_82 {dimension_numbers = #tpu.dot_dimension_numbers<[1], [0], [0], [1], [0, 0, 1, 1], [], []>} : vector<2x2048xbf16>, vector<2048x1024xbf16>, vector<2x1024xf32> -> vector<2x1024xf32>
    %84 = arith.addf %79, %83 : vector<2x1024xf32>
    %c0_83 = arith.constant 0 : index
    %c0_84 = arith.constant 0 : index
    %85 = vector.load %arg9[%c0_83, %c0_84] : memref<2x1024xf32, #tpu.memory_space<vmem>>, vector<2x1024xf32>
    tpu.vector_store %arg9[%c0_83, %c0_84], %84 {strides = array<i32>} : memref<2x1024xf32, #tpu.memory_space<vmem>>, vector<2x1024xf32>,
    %c1_i32 = arith.constant 1 : i32
    %86 = arith.cmpi eq, %arg0, %c1_i32 : i32
    %87 = arith.extui %86 : i1 to i32
    %c0_i32_85 = arith.constant 0 : i32
    %88 = arith.cmpi ne, %87, %c0_i32_85 : i32
    scf.if %88 {
      %c0_86 = arith.constant 0 : index
      %c0_87 = arith.constant 0 : index
      %89 = vector.load %arg9[%c0_86, %c0_87] : memref<2x1024xf32, #tpu.memory_space<vmem>>, vector<2x1024xf32>
      %c0_88 = arith.constant 0 : index
      %c0_89 = arith.constant 0 : index
      %90 = vector.load %arg5[%c0_88, %c0_89] : memref<2x1024xf32, #tpu.memory_space<vmem>>, vector<1x1024xf32>
      %91 = vector.broadcast %90 : vector<1x1024xf32> to vector<2x1024xf32>
      %92 = arith.mulf %89, %91 : vector<2x1024xf32>
      %c1_90 = arith.constant 1 : index
      %c0_91 = arith.constant 0 : index
      %93 = vector.load %arg5[%c1_90, %c0_91] : memref<2x1024xf32, #tpu.memory_space<vmem>>, vector<1x1024xf32>
      %94 = vector.broadcast %93 : vector<1x1024xf32> to vector<2x1024xf32>
      %95 = arith.addf %92, %94 : vector<2x1024xf32>
      %cst_92 = arith.constant 0.000000e+00 : f32
      %96 = vector.broadcast %cst_92 : f32 to vector<2x1024xf32>
      %97 = arith.maximumf %95, %96 : vector<2x1024xf32>
      %98 = arith.truncf %97 : vector<2x1024xf32> to vector<2x1024xbf16>
      %c0_93 = arith.constant 0 : index
      %c0_94 = arith.constant 0 : index
      %99 = vector.load %arg6[%c0_93, %c0_94] : memref<1024x512xbf16, #tpu.memory_space<vmem>>, vector<1024x512xbf16>
      %cst_95 = arith.constant dense<0.000000e+00> : vector<2x512xf32>
      %100 = tpu.matmul %98, %99, %cst_95 {dimension_numbers = #tpu.dot_dimension_numbers<[1], [0], [0], [1], [0, 0, 1, 1], [], []>} : vector<2x1024xbf16>, vector<1024x512xbf16>, vector<2x512xf32> -> vector<2x512xf32>
      %c0_96 = arith.constant 0 : index
      %c0_97 = arith.constant 0 : index
      %101 = vector.load %arg7[%c0_96, %c0_97] : memref<4x512xf32, #tpu.memory_space<vmem>>, vector<1x512xf32>
      %102 = vector.broadcast %101 : vector<1x512xf32> to vector<2x512xf32>
      %103 = arith.mulf %100, %102 : vector<2x512xf32>
      %c1_98 = arith.constant 1 : index
      %c0_99 = arith.constant 0 : index
      %104 = vector.load %arg7[%c1_98, %c0_99] : memref<4x512xf32, #tpu.memory_space<vmem>>, vector<1x512xf32>
      %105 = vector.broadcast %104 : vector<1x512xf32> to vector<2x512xf32>
      %106 = arith.addf %103, %105 : vector<2x512xf32>
      %cst_100 = arith.constant 0.000000e+00 : f32
      %107 = vector.broadcast %cst_100 : f32 to vector<2x512xf32>
      %108 = arith.maximumf %106, %107 : vector<2x512xf32>
      %c2_101 = arith.constant 2 : index
      %c0_102 = arith.constant 0 : index
      %109 = vector.load %arg7[%c2_101, %c0_102] : memref<4x512xf32, #tpu.memory_space<vmem>>, vector<1x512xf32>
      %110 = vector.broadcast %109 : vector<1x512xf32> to vector<2x512xf32>
      %111 = arith.mulf %108, %110 : vector<2x512xf32>
      %cst_103 = arith.constant dense<0.000000e+00> : vector<2xf32>
      %112 = vector.multi_reduction <add>, %111, %cst_103 [1] : vector<2x512xf32> to vector<2xf32>
      %113 = vector.shape_cast %112 : vector<2xf32> to vector<2x1xf32>
      %c3 = arith.constant 3 : index
      %c0_104 = arith.constant 0 : index
      %114 = vector.load %arg7[%c3, %c0_104] : memref<4x512xf32, #tpu.memory_space<vmem>>, vector<1x1xf32>
      %115 = vector.broadcast %114 : vector<1x1xf32> to vector<2x1xf32>
      %116 = arith.addf %113, %115 : vector<2x1xf32>
      %117 = math.tanh %116 : vector<2x1xf32>
      %c0_105 = arith.constant 0 : index
      %c0_106 = arith.constant 0 : index
      %118 = vector.load %arg8[%c0_105, %c0_106] : memref<2x1xf32, #tpu.memory_space<vmem>>, vector<2x1xf32>
      tpu.vector_store %arg8[%c0_105, %c0_106], %117 {strides = array<i32>} : memref<2x1xf32, #tpu.memory_space<vmem>>, vector<2x1xf32>,
    } else {
    }
    return
  }
  func.func @transform_0(%arg0: i32) -> (i32, i32) {
    %c0_i32 = arith.constant 0 : i32
    %c0_i32_0 = arith.constant 0 : i32
    return %arg0, %c0_i32 : i32, i32
  }
  func.func @transform_1(%arg0: i32) -> (i32, i32) {
    %c0_i32 = arith.constant 0 : i32
    %c0_i32_0 = arith.constant 0 : i32
    %c0_i32_1 = arith.constant 0 : i32
    return %c0_i32, %c0_i32_0 : i32, i32
  }
  func.func @transform_2(%arg0: i32) -> (i32, i32) {
    %c0_i32 = arith.constant 0 : i32
    %c0_i32_0 = arith.constant 0 : i32
    %c0_i32_1 = arith.constant 0 : i32
    return %c0_i32, %c0_i32_0 : i32, i32
  }
  func.func @transform_3(%arg0: i32) -> (i32, i32) {
    %c0_i32 = arith.constant 0 : i32
    %c0_i32_0 = arith.constant 0 : i32
    return %arg0, %c0_i32 : i32, i32
  }
  func.func @transform_4(%arg0: i32) -> (i32, i32) {
    %c0_i32 = arith.constant 0 : i32
    %c0_i32_0 = arith.constant 0 : i32
    %c0_i32_1 = arith.constant 0 : i32
    return %c0_i32, %c0_i32_0 : i32, i32
  }
  func.func @transform_5(%arg0: i32) -> (i32, i32) {
    %c0_i32 = arith.constant 0 : i32
    %c0_i32_0 = arith.constant 0 : i32
    %c0_i32_1 = arith.constant 0 : i32
    return %c0_i32, %c0_i32_0 : i32, i32
  }
  func.func @transform_6(%arg0: i32) -> (i32, i32) {
    %c0_i32 = arith.constant 0 : i32
    %c0_i32_0 = arith.constant 0 : i32
    %c0_i32_1 = arith.constant 0 : i32
    return %c0_i32, %c0_i32_0 : i32, i32
  }
  func.func @transform_7(%arg0: i32) -> (i32, i32) {
    %c0_i32 = arith.constant 0 : i32
    %c0_i32_0 = arith.constant 0 : i32
    %c0_i32_1 = arith.constant 0 : i32
    return %c0_i32, %c0_i32_0 : i32, i32
  }
}

</mosaic_0001>

<bundles_post_ra>
// kernel: chess_value_forward.1
= control target key start
LH: loop header
LB: loop body
LE: loop exit
PB: predicated region body
PF: predicated region fallthrough
CT: control target
= control target key end

     0   :  { %12 = vsyncpa [#allocation6], 0  ;;  %s14573_s0 = inlined_call_operand.vmem [shape: bf16[128,128], index: 0, kind: input, shape index: {}]   ;;  %s14574_s1 = inlined_call_operand.vmem [shape: bf16[128,64], index: 1, kind: input, shape index: {}]   ;;  %s14575_s2 = inlined_call_operand.hbm [shape: f32[2,64], index: 2, kind: input, shape index: {}]   ;;  %s14576_s3 = inlined_call_operand.hbm [shape: bf16[4096,1024], index: 3, kind: input, shape index: {}]   ;;  %s14577_s4 = inlined_call_operand.hbm [shape: f32[2,1024], index: 4, kind: input, shape index: {}]   ;;  %s14578_s5 = inlined_call_operand.hbm [shape: bf16[1024,512], index: 5, kind: input, shape index: {}]   ;;  %s14579_s6 = inlined_call_operand.hbm [shape: f32[4,512], index: 6, kind: input, shape index: {}]   ;;  %s14580_s7 = inlined_call_operand.vmem [shape: f32[2,1], index: 7, kind: output, shape index: {}]  }
   0x1   :  { %13 = vsyncpa [#allocation8], 0 }
   0x2   :  { %15 = vsyncpa [#allocation8 + $0x1], 0 }
   0x3   :  { %16 = vsyncpa [#allocation11], 0  ;;  %s12928_s24 = smov 0   ;;  %s12930_s25 = smov 0  }
   0x4   :  { %s12932_s26 = smov 0   ;;  %s12934_s27 = smov 0  }
   0x5 LB: > { %s12947_s28 = sadd.s32 4294967295, %s12874_s27   ;;  %p110_p0 = scmp.ne.s32.totalorder %s12866_s25, %s12862_s24  ;;  %s12874_s27 = sphi %s12934_s27, %s14601_s27   ;;  %s12870_s26 = sphi %s12932_s26, %s14600_s26   ;;  %s12866_s25 = sphi %s12930_s25, %s14599_s25   ;;  %s12862_s24 = sphi %s12928_s24, %s14598_s24  }
   0x6   : > { %p14581_p1 = scmp.eq.s32.totalorder %s12947_s28, 0  ;;  %p10691_p2 = scmp.ge.s32.totalorder %s12874_s27, 1 }
   0x7   : > { %p205_p3 = scmp.lt.s32.totalorder %s12874_s27, 3  ;;  %s12876_s8 = smov [#allocation9]  }
   0x8   : > { %p12956_p5 = por %p14581_p1, %p110_p0  ;;  %s232_s9 = sshll.u32 %s12876_s8, 4  ;;  %s233_s9 = int_to_ptr.vmem [resolvable:$true] %s232_s9 }
   0x9   : > { %p12960_p6 = pnand %p10691_p2, %p205_p3  ;;  %s12877_s10 = smov [#allocation10]  }
   0xa   : > { %s14584_s29 = scalar_select %p12956_p5, 1, 0 }
   0xb   : > { %s14585_s30 = scalar_select %p12960_p6, 1, 0 }
   0xc   : > { %p12216_p7 = pneg %p12960_p6  ;;  %s242_s11 = sshll.u32 %s12877_s10, 4  ;;  %s12972_s11 = int_to_ptr.vmem [resolvable:$true] %s242_s11 }
   0xd   : > { %s12878_s13 = smov [#allocation5]   ;;  %s12686_s17 = scalar_lea.hbm %s14577_s4, 256 }
   0xe   : > { %p12968_p8 = pnand %p12216_p7, %p14581_p1  ;;  %s12974_s14 = sshll.u32 %s12878_s13, 4  ;;  %s222_s14 = int_to_ptr.vmem [resolvable:$true] %s12974_s14 }
   0xf   : > { %p12687_p9 = scmp.ne.s32.totalorder %s14577_s4, %s12686_s17  ;;  %p12693_p13 = scmp.lt.u32.totalorder %s12686_s17, %s14577_s4 }
  0x10   : > { %p12984_p10 = pneg %p12968_p8 }
  0x12   : > { %p12689_p11 = pnand %p12984_p10, %p12687_p9 }
  0x14   : > { %p12690_p12 = pneg %p12689_p11 }
  0x16   : > { %p12695_p0 = pnand %p12693_p13, %p12690_p12 }
  0x18   : > { %12698 = shalt.err (!%p12695_p0)
}
  0x19   : > { %s12699_s23 = scalar_lea.vmem %s233_s9, 256  ;;  %p12707_p4 = scmp.lt.s32.totalorder %s233_s9, %s233_s9 }
  0x1a   : > { %p12700_p2 = scmp.ne.s32.totalorder %s233_s9, %s12699_s23  ;;  %p12708_p1 = scmp.lt.s32.totalorder %s12699_s23, %s12699_s23 }
  0x1c   : > { %p12702_p3 = pnand %p12700_p2, %p12984_p10  ;;  %p12709_p5 = por %p12708_p1, %p12707_p4 }
  0x1e   : > { %p12703_p7 = pneg %p12702_p3 }
  0x20   : > { %p12710_p6 = pnand %p12709_p5, %p12703_p7 }
  0x22   : > { %12713 = shalt.err (!%p12710_p6)
}
  0x23   : > { %12222 = dma.hbm_to_vmem [thread:$0]  (!%p12968_p8), %s14577_s4, 256, %s233_s9, [#allocation8]  }
  0x24   : > { %s12714_s15 = scalar_lea.hbm %s14578_s5, 32768 }
  0x25   : > { %p12715_p9 = scmp.ne.s32.totalorder %s14578_s5, %s12714_s15  ;;  %p12721_p4 = scmp.lt.u32.totalorder %s12714_s15, %s14578_s5 }
  0x27   : > { %p12717_p11 = pnand %p12715_p9, %p12984_p10 }
  0x29   : > { %p12718_p1 = pneg %p12717_p11 }
  0x2b   : > { %p12723_p5 = pnand %p12721_p4, %p12718_p1 }
  0x2d   : > { %12726 = shalt.err (!%p12723_p5)
}
  0x2e   : > { %s12727_s9 = scalar_lea.vmem %s12972_s11, 32768  ;;  %p12735_p0 = scmp.lt.s32.totalorder %s12972_s11, %s12972_s11 }
  0x2f   : > { %p12728_p6 = scmp.ne.s32.totalorder %s12972_s11, %s12727_s9  ;;  %p12736_p2 = scmp.lt.s32.totalorder %s12727_s9, %s12727_s9 }
  0x31   : > { %p12730_p12 = pnand %p12728_p6, %p12984_p10  ;;  %p12737_p3 = por %p12736_p2, %p12735_p0 }
  0x33   : > { %p12731_p13 = pneg %p12730_p12 }
  0x35   : > { %p12738_p7 = pnand %p12737_p3, %p12731_p13 }
  0x37   : > { %12741 = shalt.err (!%p12738_p7)
}
  0x38   : > { %s12879_s21 = smov 256   ;;  %s12880_s22 = smov 16  }
  0x39   : > { %12225 = dma.hbm_to_vmem [thread:$0]  (!%p12968_p8), %s14578_s5, 32768, %s12972_s11, [#allocation11], %s12879_s21, %s12879_s21, %s12880_s22  }
  0x3a   : > { %s12742_s13 = scalar_lea.hbm %s14575_s2, 32 }
  0x3b   : > { %p12743_p9 = scmp.ne.s32.totalorder %s14575_s2, %s12742_s13  ;;  %p12749_p4 = scmp.lt.u32.totalorder %s12742_s13, %s14575_s2 }
  0x3d   : > { %p12745_p11 = pnand %p12743_p9, %p12984_p10 }
  0x3f   : > { %p12746_p1 = pneg %p12745_p11 }
  0x41   : > { %p12751_p5 = pnand %p12749_p4, %p12746_p1 }
  0x43   : > { %12754 = shalt.err (!%p12751_p5)
}
  0x44   : > { %s12755_s19 = scalar_lea.vmem %s222_s14, 32  ;;  %p12763_p0 = scmp.lt.s32.totalorder %s222_s14, %s222_s14 }
  0x45   : > { %p12756_p6 = scmp.ne.s32.totalorder %s222_s14, %s12755_s19  ;;  %p12764_p2 = scmp.lt.s32.totalorder %s12755_s19, %s12755_s19 }
  0x47   : > { %p12758_p12 = pnand %p12756_p6, %p12984_p10  ;;  %p12765_p3 = por %p12764_p2, %p12763_p0 }
  0x49   : > { %p12759_p13 = pneg %p12758_p12 }
  0x4b   : > { %p12766_p7 = pnand %p12765_p3, %p12759_p13 }
  0x4d   : > { %12769 = shalt.err (!%p12766_p7)
}
  0x4e   : > { %12219 = dma.hbm_to_vmem [thread:$0]  (!%p12968_p8), %s14575_s2, 32, %s222_s14, [#allocation6]  }
  0x4f   : > { %s12881_s21 = smov [#allocation12]   ;;  %s12770_s8 = scalar_lea.hbm %s14579_s6, 256 }
  0x50   : > { %s256_s22 = sshll.u32 %s12881_s21, 4  ;;  %p12771_p9 = scmp.ne.s32.totalorder %s14579_s6, %s12770_s8  ;;  %s257_s22 = int_to_ptr.vmem [resolvable:$true] %s256_s22 }
  0x51   : > { %p12777_p4 = scmp.lt.u32.totalorder %s12770_s8, %s14579_s6 }
  0x52   : > { %p12773_p11 = pnand %p12771_p9, %p12984_p10 }
  0x54   : > { %p12774_p1 = pneg %p12773_p11 }
  0x56   : > { %p12779_p5 = pnand %p12777_p4, %p12774_p1 }
  0x58   : > { %12782 = shalt.err (!%p12779_p5)
}
  0x59   : > { %s12783_s14 = scalar_lea.vmem %s257_s22, 256  ;;  %p12791_p0 = scmp.lt.s32.totalorder %s257_s22, %s257_s22 }
  0x5a   : > { %p12784_p6 = scmp.ne.s32.totalorder %s257_s22, %s12783_s14  ;;  %p12792_p2 = scmp.lt.s32.totalorder %s12783_s14, %s12783_s14 }
  0x5c   : > { %p12786_p12 = pnand %p12784_p6, %p12984_p10  ;;  %p12793_p3 = por %p12792_p2, %p12791_p0 }
  0x5e   : > { %p12787_p13 = pneg %p12786_p12 }
  0x60   : > { %p12794_p7 = pnand %p12793_p3, %p12787_p13 }
  0x62   : > { %12797 = shalt.err (!%p12794_p7)
}
  0x63   : > { %12228 = dma.hbm_to_vmem [thread:$0]  (!%p12968_p8), %s14579_s6, 256, %s257_s22, [#allocation11]  }
  0x64   : > { %s13061_s20 = sadd.s32 1, %s12874_s27   ;;  %s97_s19 = sadd.s32 1, %s12870_s26 }
  0x65   : > { %s94_s12 = ssub.s32 %s12874_s27, %s13061_s20  ;;  %p104_p10 = scmp.ne.s32.totalorder %s12870_s26, %s12866_s25 }
  0x66   : > { %p95_p9 = scmp.eq.s32.totalorder %s94_s12, 0  ;;  %p105_p11 = scmp.eq.s32.totalorder %s12874_s27, 0 }
  0x67   : > { %p12237_p1 = scmp.lt.s32.totalorder %s12874_s27, 2  ;;  %s276_s11 = sand.u32 1, %s12874_s27  }
  0x68   : > { %s13072_s9 = scalar_select %p95_p9, %s12870_s26, %s97_s19  }
  0x69   : > { %p106_p4 = por %p105_p11, %p104_p10  ;;  %s278_s21 = sand.u32 1, %s12870_s26  }
  0x6a   : > { %s12025_s23 = sshll.u32 %s12874_s27, 17  ;;  %s10697_s24 = sshll.u32 %s278_s21, 13 }
  0x6b   : > { %s13079_s22 = scalar_lea.hbm %s14576_s3, %s12025_s23  ;;  %p13081_p8 = pnand %p12237_p1, %p106_p4 }
  0x6c   : > { %s280_s15 = scalar_lea.vmem [#allocation7], %s10697_s24  ;;  %s13087_s27 = scalar_lea.sflag [#allocation8], %s276_s11 }
  0x6d   : > { %s288_s16 = sshll.u32 %s280_s15, 4  ;;  %s12798_s14 = scalar_lea.hbm %s13079_s22, 131072  ;;  %s13085_s16 = int_to_ptr.vmem [resolvable:$true] %s288_s16 }
  0x6e   : > { %p12799_p5 = scmp.ne.s32.totalorder %s13079_s22, %s12798_s14  ;;  %p12800_p6 = pneg %p13081_p8 }
  0x6f   : > { %s12803_s19 = scalar_lea.hbm %s14576_s3, 262144  ;;  %p12804_p0 = scmp.lt.u32.totalorder %s13079_s22, %s14576_s3 }
  0x70   : > { %p12801_p12 = pnand %p12800_p6, %p12799_p5  ;;  %p12805_p2 = scmp.lt.u32.totalorder %s12803_s19, %s12798_s14 }
  0x71   : > { %p12807_p7 = scmp.lt.u32.totalorder %s12798_s14, %s13079_s22 }
  0x72   : > { %p12802_p13 = pneg %p12801_p12  ;;  %p12806_p3 = por %p12805_p2, %p12804_p0 }
  0x74   : > { %p12808_p10 = por %p12807_p7, %p12806_p3 }
  0x76   : > { %p12809_p9 = pnand %p12808_p10, %p12802_p13 }
  0x78   : > { %12812 = shalt.err (!%p12809_p9)
}
  0x79   : > { %s12813_s11 = scalar_lea.vmem %s13085_s16, 131072  ;;  %s12882_s23 = smov [#allocation7]  }
  0x7a   : > { %p12814_p11 = scmp.ne.s32.totalorder %s13085_s16, %s12813_s11  ;;  %s12818_s24 = sshll.u32 %s12882_s23, 4  ;;  %s12819_s24 = int_to_ptr.vmem [resolvable:$false] %s12818_s24 }
  0x7b   : > { %s12820_s8 = scalar_lea.vmem %s12819_s24, 262144  ;;  %p12821_p5 = scmp.lt.s32.totalorder %s13085_s16, %s12819_s24 }
  0x7c   : > { %p12816_p1 = pnand %p12814_p11, %p12800_p6  ;;  %p12822_p12 = scmp.lt.s32.totalorder %s12820_s8, %s12813_s11 }
  0x7e   : > { %p12817_p4 = pneg %p12816_p1  ;;  %p12823_p0 = por %p12822_p12, %p12821_p5 }
  0x80   : > { %p12824_p2 = pnand %p12823_p0, %p12817_p4 }
  0x82   : > { %12827 = shalt.err (!%p12824_p2)
}
  0x83   : > { %s12883_s10 = smov 512   ;;  %s12884_s15 = smov 32  }
  0x84   : > { %12232 = dma.hbm_to_vmem [thread:$0]  (!%p13081_p8), %s13079_s22, 131072, %s13085_s16, %s13087_s27, %s12883_s10, %s12883_s10, %s12884_s15  }
  0x85   : > { %p14589_p6 = scmp.ne.s32.totalorder %s14585_s30, 0 }
  0x86   : > { %p14590_p13 = scmp.eq.s32.totalorder (!%p14589_p6), %s12947_s28, 0 }
  0x87   : > { %300 = sbr.rel (%p14589_p6) target bundleno = 2336 (0x920), region = 48 }
  0x8e   : > { %12845 = dma.done.wait (%p14590_p13), [#allocation6], 32   ;;  %p14591_p3 = pmov %p14590_p13 }
  0x8f   : > { %s306_s14 = sand.u32 1, %s12947_s28   ;;  %s308_s17 = sand.u32 1, %s12866_s25  }
  0x90   : > { %12847 = vsyncadd (%p14591_p3), [#allocation6], 4294967264  ;;  %s10703_s18 = sshll.u32 %s308_s17, 13  ;;  %s307_s19 = scalar_lea.sflag [#allocation8], %s306_s14 }
  0x91   : > { %s13123_s12 = scalar_lea.vmem [#allocation7], %s10703_s18  ;;  %p14592_p7 = scmp.ne.s32.totalorder %s14584_s29, 0 }
  0x93   : > { %12849 = dma.done.wait (%p14592_p7), %s307_s19, 131072  }
  0x94   : > { %12851 = vsyncadd (%p14592_p7), %s307_s19, 4294836224  ;;  %p14593_p8 = pmov %p14591_p3 }
  0x95   : > { %p14594_p10 = pmov %p14591_p3 }
  0x96   : > { %12853 = dma.done.wait (%p14593_p8), [#allocation8], 256  }
  0x97   : > { %12855 = vsyncadd (%p14594_p10), [#allocation8], 4294967040  ;;  %p14595_p9 = pmov %p14591_p3 }
  0x98   : > { %p14596_p11 = pmov %p14591_p3 }
  0x99   : > { %12857 = dma.done.wait (%p14595_p9), [#allocation11], 33024  }
  0x9a   : > { %12859 = vsyncadd (%p14596_p11), [#allocation11], 4294934272  ;;  %s10707_s30 = sshll.u32 %s12947_s28, 3  ;;  %p14597_p4 = scmp.ne.s32.totalorder %s12947_s28, 0 }
  0x9b   : > { %p354_p1 = scmp.lt.s32.totalorder %s10707_s30, 15  ;;  %v12885_v0 = vmov (!%p14597_p4), 0.0  }
  0x9c   : > { %364 = sbr.rel (%p14597_p4) target bundleno = 163 (0xa3), region = 72  ;;  %365 = vst [vmem:[#allocation2] sm:$0xff] (!%p14597_p4), %v12885_v0  ;;  %366 = vst [vmem:[#allocation2 + $0x8] sm:$0xff] (!%p14597_p4), %v12885_v0 }
  0x9d   : > { %s14603_s30 = smov (!%p354_p1, %s10707_s30), 15 }
  0x9e   : > { %s10708_s22 = sshll.u32 %s14603_s30, 2 }
  0x9f   : > { %s13141_s16 = scalar_lea.vmem %s14573_s0, %s10708_s22 }
  0xa3 PF: > { %v12285_v1 = vld [vmem:[%s14574_s1] sm:$0xff]   ;;  %v12286_v2 = vld [vmem:[%s14574_s1 + $0x8] sm:$0xff]   ;;  %v12287_v3 = vld [vmem:[%s14574_s1 + $0x10] sm:$0xff]   ;;  %vm562_vm0 = vcmask 523264   ;;  %vm572_vm1 = vcmask 517120   ;;  %vm586_vm2 = vcmask 1041920  }
  0xa4   : > { %12038 = vmatprep.subr.bf16.mxu0 %v12285_v1  ;;  %v12288_v4 = vld [vmem:[%s14574_s1 + $0x18] sm:$0xff]   ;;  %v12293_v5 = vld [vmem:[%s13141_s16] sm:$0xff]   ;;  %v12290_v7 = vld [vmem:[%s14574_s1 + $0x28] sm:$0xff]   ;;  %p11764_p5 = scmp.ne.s32.totalorder %s12947_s28, 1 }
  0xa5   : > { %12039 = vmatpush3.bf16.msra.mxu0 %v12285_v1  ;;  %12054 = vmatprep.mubr.bf16.mxu0 %v12293_v5  ;;  %v12289_v6 = vld [vmem:[%s14574_s1 + $0x20] sm:$0xff]   ;;  %v12291_v8 = vld [vmem:[%s14574_s1 + $0x30] sm:$0xff]   ;;  %v12292_v9 = vld [vmem:[%s14574_s1 + $0x38] sm:$0xff]   ;;  %vm10580_vm3 = vcmask (!%p11764_p5), 1041408   ;;  %vm10597_vm4 = vcmask (!%p11764_p5), 1024  }
  0xa6   : > { %12040 = vmatprep.subr.bf16.mxu0 %v12286_v2  ;;  %v12294_v10 = vld [vmem:[%s13141_s16 + $0x8] sm:$0xff]   ;;  %v12295_v11 = vld [vmem:[%s13141_s16 + $0x10] sm:$0xff]   ;;  %v12296_v12 = vld [vmem:[%s13141_s16 + $0x18] sm:$0xff]   ;;  %s12886_s16 = smov 64  }
  0xa7   : > { %v923_v13 = vld [vmem:[%s13123_s12] sm:$0xff]  ;;  %v924_v15 = vld [vmem:[%s13123_s12 + $0x8] sm:$0xff] }
  0xa8   : > { %v927_v14 = vld [vmem:[%s13123_s12 + $0x20] sm:$0xff]  ;;  %v928_v16 = vld [vmem:[%s13123_s12 + $0x28] sm:$0xff] }
  0xa9   : > { %12041 = vmatpush3.bf16.msra.mxu0 %v12286_v2  ;;  %v10741_v17 = vcombine.high %v923_v13, %v927_v14  ;;  %v10742_v18 = vcombine.low %v924_v15, %v928_v16  ;;  %v10743_v19 = vcombine.high %v924_v15, %v928_v16  ;;  %v10740_v20 = vcombine.low %v923_v13, %v927_v14  ;;  %v931_v21 = vld [vmem:[%s13123_s12 + $0x40] sm:$0xff]  ;;  %v932_v23 = vld [vmem:[%s13123_s12 + $0x48] sm:$0xff] }
  0xaa   : > { %12042 = vmatprep.subr.bf16.mxu0 %v12287_v3  ;;  %v935_v22 = vld [vmem:[%s13123_s12 + $0x60] sm:$0xff]  ;;  %v936_v25 = vld [vmem:[%s13123_s12 + $0x68] sm:$0xff] }
  0xab   : > { %v10749_v24 = vcombine.high %v931_v21, %v935_v22  ;;  %v939_v26 = vld [vmem:[%s13123_s12 + $0x80] sm:$0xff]  ;;  %7067 = vmatprep.subr.bf16.mxu1 %v10741_v17  ;;  %v10751_v28 = vcombine.high %v932_v23, %v936_v25  ;;  %v940_v29 = vld [vmem:[%s13123_s12 + $0x88] sm:$0xff]  ;;  %v10750_v31 = vcombine.low %v932_v23, %v936_v25  ;;  %v10748_v32 = vcombine.low %v931_v21, %v935_v22 }
  0xac   : > { %v943_v27 = vld [vmem:[%s13123_s12 + $0xa0] sm:$0xff]  ;;  %v944_v30 = vld [vmem:[%s13123_s12 + $0xa8] sm:$0xff]  ;;  %7068 = vmatpush1.bf16.msra.mxu1 %v10740_v20 }
  0xad   : > { %12043 = vmatpush3.bf16.msra.mxu0 %v12287_v3  ;;  %7069 = vmatprep.subr.bf16.mxu1 %v10749_v24  ;;  %v10757_v33 = vcombine.high %v939_v26, %v943_v27  ;;  %v10759_v34 = vcombine.high %v940_v29, %v944_v30  ;;  %v947_v35 = vld [vmem:[%s13123_s12 + $0xc0] sm:$0xff]  ;;  %v948_v37 = vld [vmem:[%s13123_s12 + $0xc8] sm:$0xff]  ;;  %v10758_v39 = vcombine.low %v940_v29, %v944_v30 }
  0xae   : > { %12044 = vmatprep.subr.bf16.mxu0 %v12288_v4  ;;  %v951_v36 = vld [vmem:[%s13123_s12 + $0xe0] sm:$0xff]  ;;  %v952_v38 = vld [vmem:[%s13123_s12 + $0xe8] sm:$0xff]  ;;  %v10756_v40 = vcombine.low %v939_v26, %v943_v27 }
  0xaf   : > { %v10765_v41 = vcombine.high %v947_v35, %v951_v36  ;;  %v10767_v42 = vcombine.high %v948_v37, %v952_v38  ;;  %v955_v43 = vld [vmem:[%s13123_s12 + $0x100] sm:$0xff]  ;;  %v956_v45 = vld [vmem:[%s13123_s12 + $0x108] sm:$0xff]  ;;  %v10766_v47 = vcombine.low %v948_v37, %v952_v38  ;;  %v10764_v48 = vcombine.low %v947_v35, %v951_v36  ;;  %v13217_v37 = vld [vmem:[#allocation5] ss:$0 sm:$0xff] }
  0xb0   : > { %7070 = vmatpush1.bf16.msra.mxu1 %v10748_v32  ;;  %v959_v44 = vld [vmem:[%s13123_s12 + $0x120] sm:$0xff]  ;;  %v960_v46 = vld [vmem:[%s13123_s12 + $0x128] sm:$0xff] }
  0xb1   : > { %12045 = vmatpush3.bf16.msra.mxu0 %v12288_v4  ;;  %7071 = vmatprep.subr.bf16.mxu1 %v10757_v33  ;;  %v10773_v49 = vcombine.high %v955_v43, %v959_v44  ;;  %v10775_v50 = vcombine.high %v956_v45, %v960_v46  ;;  %v963_v51 = vld [vmem:[%s13123_s12 + $0x140] sm:$0xff]  ;;  %v964_v53 = vld [vmem:[%s13123_s12 + $0x148] sm:$0xff]  ;;  %v10774_v55 = vcombine.low %v956_v45, %v960_v46 }
  0xb2   : > { %12046 = vmatprep.subr.bf16.mxu0 %v12289_v6  ;;  %v967_v52 = vld [vmem:[%s13123_s12 + $0x160] sm:$0xff]  ;;  %v968_v54 = vld [vmem:[%s13123_s12 + $0x168] sm:$0xff]  ;;  %v10772_v56 = vcombine.low %v955_v43, %v959_v44 }
  0xb3   : > { %v10781_v57 = vcombine.high %v963_v51, %v967_v52  ;;  %v10783_v58 = vcombine.high %v964_v53, %v968_v54  ;;  %v971_v59 = vld [vmem:[%s13123_s12 + $0x180] sm:$0xff]  ;;  %v972_v61 = vld [vmem:[%s13123_s12 + $0x188] sm:$0xff]  ;;  %v10782_v63 = vcombine.low %v964_v53, %v968_v54  ;;  %v10780_v0 = vcombine.low %v963_v51, %v967_v52 }
  0xb4   : > { %7072 = vmatpush1.bf16.msra.mxu1 %v10756_v40  ;;  %v975_v60 = vld [vmem:[%s13123_s12 + $0x1a0] sm:$0xff]  ;;  %v976_v62 = vld [vmem:[%s13123_s12 + $0x1a8] sm:$0xff] }
  0xb5   : > { %12047 = vmatpush3.bf16.msra.mxu0 %v12289_v6  ;;  %7073 = vmatprep.subr.bf16.mxu1 %v10765_v41  ;;  %v10789_v1 = vcombine.high %v971_v59, %v975_v60  ;;  %v10791_v2 = vcombine.high %v972_v61, %v976_v62  ;;  %v979_v3 = vld [vmem:[%s13123_s12 + $0x1c0] sm:$0xff]  ;;  %v980_v5 = vld [vmem:[%s13123_s12 + $0x1c8] sm:$0xff] }
  0xb6   : > { %12048 = vmatprep.subr.bf16.mxu0 %v12290_v7  ;;  %v983_v4 = vld [vmem:[%s13123_s12 + $0x1e0] sm:$0xff]  ;;  %v984_v6 = vld [vmem:[%s13123_s12 + $0x1e8] sm:$0xff] }
  0xb7   : > { %v988_v13 = vld [vmem:[%s13123_s12 + $0x208] sm:$0xff]  ;;  %v10798_v15 = vcombine.low %v980_v5, %v984_v6  ;;  %v10796_v16 = vcombine.low %v979_v3, %v983_v4  ;;  %v999_v20 = vld [vmem:[%s13123_s12 + $0x260] sm:$0xff] }
  0xb8   : > { %7074 = vmatpush1.bf16.msra.mxu1 %v10764_v48  ;;  %v992_v14 = vld [vmem:[%s13123_s12 + $0x228] sm:$0xff]  ;;  %v1003_v27 = vld [vmem:[%s13123_s12 + $0x280] sm:$0xff] }
  0xb9   : > { %12049 = vmatpush3.bf16.msra.mxu0 %v12290_v7  ;;  %7075 = vmatprep.subr.bf16.mxu1 %v10773_v49  ;;  %v10790_v7 = vcombine.low %v972_v61, %v976_v62  ;;  %v996_v21 = vld [vmem:[%s13123_s12 + $0x248] sm:$0xff]  ;;  %v10806_v23 = vcombine.low %v988_v13, %v992_v14  ;;  %v1015_v48 = vld [vmem:[%s13123_s12 + $0x2e0] sm:$0xff] }
  0xba   : > { %12050 = vmatprep.subr.bf16.mxu0 %v12291_v8  ;;  %v1000_v22 = vld [vmem:[%s13123_s12 + $0x268] sm:$0xff]  ;;  %v1019_v62 = vld [vmem:[%s13123_s12 + $0x300] sm:$0xff] }
  0xbb   : > { %v10815_v26 = vcombine.high %v996_v21, %v1000_v22  ;;  %v1004_v29 = vld [vmem:[%s13123_s12 + $0x288] sm:$0xff] }
  0xbc   : > { %7076 = vmatpush1.bf16.msra.mxu1 %v10772_v56  ;;  %v1008_v30 = vld [vmem:[%s13123_s12 + $0x2a8] sm:$0xff] }
  0xbd   : > { %12051 = vmatpush3.bf16.msra.mxu0 %v12291_v8  ;;  %7077 = vmatprep.subr.bf16.mxu1 %v10781_v57  ;;  %v10788_v8 = vcombine.low %v971_v59, %v975_v60  ;;  %v10822_v35 = vcombine.low %v1004_v29, %v1008_v30  ;;  %v1012_v49 = vld [vmem:[%s13123_s12 + $0x2c8] sm:$0xff] }
  0xbe   : > { %12052 = vmatprep.subr.bf16.mxu0 %v12292_v9  ;;  %v1016_v53 = vld [vmem:[%s13123_s12 + $0x2e8] sm:$0xff] }
  0xbf   : > { %v10830_v57 = vcombine.low %v1012_v49, %v1016_v53 }
  0xc0   : > { %7078 = vmatpush1.bf16.msra.mxu1 %v10780_v0  ;;  %v1020_v0 = vld [vmem:[%s13123_s12 + $0x308] sm:$0xff] }
  0xc1   : > { %12053 = vmatpush3.bf16.msra.mxu0 %v12292_v9  ;;  %7079 = vmatprep.subr.bf16.mxu1 %v10789_v1  ;;  %v10797_v9 = vcombine.high %v979_v3, %v983_v4  ;;  %v1024_v3 = vld [vmem:[%s13123_s12 + $0x328] sm:$0xff] }
  0xc2   : > { %7395 = vmatprep.subr.bf16.mxu0 %v10743_v19  ;;  %v995_v19 = vld [vmem:[%s13123_s12 + $0x240] sm:$0xff] }
  0xc3   : > { %v10813_v25 = vcombine.high %v995_v19, %v999_v20  ;;  %v10812_v32 = vcombine.low %v995_v19, %v999_v20 }
  0xc4   : > { %12055 = vmatmul.mubr.bf16.vlgmr.msra.gmra.mrb[0].mxu0 %v12294_v10  ;;  %v10799_v10 = vcombine.high %v980_v5, %v984_v6  ;;  %7080 = vmatpush1.bf16.msra.mxu1 %v10788_v8  ;;  %v10838_v5 = vcombine.low %v1020_v0, %v1024_v3  ;;  %v10839_v6 = vcombine.high %v1020_v0, %v1024_v3  ;;  %v1031_v8 = vld [vmem:[%s13123_s12 + $0x360] sm:$0xff] }
  0xc5   : > { %12058 = vmatprep.mubr.bf16.mxu0 %v12295_v11  ;;  %7396 = vmatpush1.bf16.msra.mxu0 %v10742_v18  ;;  %v987_v11 = vld [vmem:[%s13123_s12 + $0x200] sm:$0xff]  ;;  %v10807_v18 = vcombine.high %v988_v13, %v992_v14 }
  0xc6   : > { %7397 = vmatprep.subr.bf16.mxu0 %v10751_v28  ;;  %7081 = vmatprep.subr.bf16.mxu1 %v10797_v9  ;;  %v1007_v28 = vld [vmem:[%s13123_s12 + $0x2a0] sm:$0xff]  ;;  %v1028_v9 = vld [vmem:[%s13123_s12 + $0x348] sm:$0xff] }
  0xc7   : > { %v10821_v33 = vcombine.high %v1003_v27, %v1007_v28  ;;  %v10820_v36 = vcombine.low %v1003_v27, %v1007_v28  ;;  %v1035_v27 = vld [vmem:[%s13123_s12 + $0x380] sm:$0xff] }
  0xc8   : > { %7082 = vmatpush1.bf16.msra.mxu1 %v10796_v16  ;;  %v1039_v28 = vld [vmem:[%s13123_s12 + $0x3a0] sm:$0xff] }
  0xc9   : > { %7398 = vmatpush1.bf16.msra.mxu0 %v10750_v31  ;;  %v10814_v31 = vcombine.low %v996_v21, %v1000_v22 }
  0xca   : > { %7399 = vmatprep.subr.bf16.mxu0 %v10759_v34  ;;  %v10823_v34 = vcombine.high %v1004_v29, %v1008_v30  ;;  %v10853_v29 = vcombine.high %v1035_v27, %v1039_v28  ;;  %v1036_v30 = vld [vmem:[%s13123_s12 + $0x388] sm:$0xff] }
  0xcc   : > { %12059 = vmatmul.mubr.bf16.gmra.mrb[4].mxu0 %v12296_v12  ;;  %v991_v12 = vld [vmem:[%s13123_s12 + $0x220] sm:$0xff] }
  0xcd   : > { %7400 = vmatpush1.bf16.msra.mxu0 %v10758_v39  ;;  %v10805_v17 = vcombine.high %v987_v11, %v991_v12  ;;  %v10804_v24 = vcombine.low %v987_v11, %v991_v12  ;;  %v13219_v39 = vld [vmem:[#allocation5 + $0x1] ss:$0 sm:$0xff]  ;;  %v1032_v11 = vld [vmem:[%s13123_s12 + $0x368] sm:$0xff] }
  0xce   : > { %7401 = vmatprep.subr.bf16.mxu0 %v10767_v42  ;;  %v10846_v13 = vcombine.low %v1028_v9, %v1032_v11  ;;  %v10847_v14 = vcombine.high %v1028_v9, %v1032_v11 }
  0xcf   : > { %7083 = vmatprep.subr.bf16.mxu1 %v10805_v17 }
  0xd0   : > { %7084 = vmatpush1.bf16.msra.mxu1 %v10804_v24 }
  0xd1   : > { %7402 = vmatpush1.bf16.msra.mxu0 %v10766_v47  ;;  %7085 = vmatprep.subr.bf16.mxu1 %v10813_v25  ;;  %v1011_v47 = vld [vmem:[%s13123_s12 + $0x2c0] sm:$0xff] }
  0xd2   : > { %7403 = vmatprep.subr.bf16.mxu0 %v10775_v50  ;;  %v10829_v52 = vcombine.high %v1011_v47, %v1015_v48  ;;  %v10828_v54 = vcombine.low %v1011_v47, %v1015_v48 }
  0xd4   : > { %7086 = vmatpush1.bf16.msra.mxu1 %v10812_v32  ;;  %v10852_v32 = vcombine.low %v1035_v27, %v1039_v28 }
  0xd5   : > { %7404 = vmatpush1.bf16.msra.mxu0 %v10774_v55  ;;  %7087 = vmatprep.subr.bf16.mxu1 %v10821_v33 }
  0xd6   : > { %7405 = vmatprep.subr.bf16.mxu0 %v10783_v58  ;;  %v10831_v58 = vcombine.high %v1012_v49, %v1016_v53  ;;  %v13275_v49 = vld [vmem:[%s13123_s12 + $0x408] sm:$0xff] }
  0xd8   : > { %7088 = vmatpush1.bf16.msra.mxu1 %v10820_v36  ;;  %v1043_v36 = vld [vmem:[%s13123_s12 + $0x3c0] sm:$0xff] }
  0xd9   : > { %7406 = vmatpush1.bf16.msra.mxu0 %v10782_v63  ;;  %7089 = vmatprep.subr.bf16.mxu1 %v10829_v52  ;;  %v1023_v63 = vld [vmem:[%s13123_s12 + $0x320] sm:$0xff] }
  0xda   : > { %7407 = vmatprep.subr.bf16.mxu0 %v10791_v2  ;;  %v10837_v2 = vcombine.high %v1019_v62, %v1023_v63  ;;  %v10836_v4 = vcombine.low %v1019_v62, %v1023_v63 }
  0xdc   : > { %7090 = vmatpush1.bf16.msra.mxu1 %v10828_v54 }
  0xdd   : > { %7408 = vmatpush1.bf16.msra.mxu0 %v10790_v7  ;;  %7091 = vmatprep.subr.bf16.mxu1 %v10837_v2  ;;  %v1027_v7 = vld [vmem:[%s13123_s12 + $0x340] sm:$0xff] }
  0xde   : > { %7409 = vmatprep.subr.bf16.mxu0 %v10799_v10  ;;  %v10845_v10 = vcombine.high %v1027_v7, %v1031_v8  ;;  %v10844_v12 = vcombine.low %v1027_v7, %v1031_v8 }
  0xe0   : > { %7092 = vmatpush1.bf16.msra.mxu1 %v10836_v4 }
  0xe1   : > { %7410 = vmatpush1.bf16.msra.mxu0 %v10798_v15  ;;  %7093 = vmatprep.subr.bf16.mxu1 %v10845_v10 }
  0xe2   : > { %7411 = vmatprep.subr.bf16.mxu0 %v10807_v18 }
  0xe4   : > { %7094 = vmatpush1.bf16.msra.mxu1 %v10844_v12  ;;  %v827_v12 = vlaneseq }
  0xe5   : > { %7412 = vmatpush1.bf16.msra.mxu0 %v10806_v23  ;;  %7095 = vmatprep.subr.bf16.mxu1 %v10853_v29 }
  0xe6   : > { %7413 = vmatprep.subr.bf16.mxu0 %v10815_v26 }
  0xe8   : > { %7096 = vmatpush1.bf16.msra.mxu1 %v10852_v32 }
  0xe9   : > { %7414 = vmatpush1.bf16.msra.mxu0 %v10814_v31  ;;  %v1040_v31 = vld [vmem:[%s13123_s12 + $0x3a8] sm:$0xff] }
  0xea   : > { %7415 = vmatprep.subr.bf16.mxu0 %v10823_v34  ;;  %v10854_v34 = vcombine.low %v1036_v30, %v1040_v31 }
  0xed   : > { %7416 = vmatpush1.bf16.msra.mxu0 %v10822_v35  ;;  %v10855_v35 = vcombine.high %v1036_v30, %v1040_v31 }
  0xee   : > { %7417 = vmatprep.subr.bf16.mxu0 %v10831_v58 }
  0xf1   : > { %7418 = vmatpush1.bf16.msra.mxu0 %v10830_v57 }
  0xf2   : > { %7419 = vmatprep.subr.bf16.mxu0 %v10839_v6 }
  0xf5   : > { %7420 = vmatpush1.bf16.msra.mxu0 %v10838_v5 }
  0xf6   : > { %7421 = vmatprep.subr.bf16.mxu0 %v10847_v14 }
  0xf9   : > { %7422 = vmatpush1.bf16.msra.mxu0 %v10846_v13 }
  0xfa   : > { %7423 = vmatprep.subr.bf16.mxu0 %v10855_v35  ;;  %v1063_v35 = vld [vmem:[%s13123_s12 + $0x460] sm:$0xff] }
  0xfd   : > { %7424 = vmatpush1.bf16.msra.mxu0 %v10854_v34 }
 0x197   : > { %v12056_v38 = vpop.f32.mrb[0].mxu0 }
 0x198   : > { %v535_v40 = vmul.f32 %v12056_v38, %v13217_v37  ;;  %v497_v41 = vpop.f32.mrb[1].mxu0  ;;  %v1047_v38 = vld [vmem:[%s13123_s12 + $0x3e0] sm:$0xff] }
 0x199   : > { %v533_v42 = vmul.f32 %v13217_v37, %v497_v41  ;;  %v12057_v43 = vpop.f32.mrb[2].mxu0  ;;  %v10861_v41 = vcombine.high %v1043_v36, %v1047_v38  ;;  %v10860_v47 = vcombine.low %v1043_v36, %v1047_v38  ;;  %v1060_v36 = vld [vmem:[%s13123_s12 + $0x448] sm:$0xff] }
 0x19a   : > { %v548_v44 = vadd.f32 %v13219_v39, %v535_v40  ;;  %v536_v45 = vmul.f32 %v12057_v43, %v13217_v37  ;;  %v500_v46 = vpop.f32.mrb[3].mxu0  ;;  %v1044_v40 = vld [vmem:[%s13123_s12 + $0x3c8] sm:$0xff]  ;;  %v13267_v43 = vld [vmem:[%s13123_s12 + $0x400] sm:$0xff] }
 0x19b   : > { %v546_v50 = vadd.f32 %v13219_v39, %v533_v42  ;;  %v534_v51 = vmul.f32 %v13217_v37, %v500_v46  ;;  %v1048_v42 = vld [vmem:[%s13123_s12 + $0x3e8] sm:$0xff]  ;;  %7097 = vmatprep.subr.bf16.mxu1 %v10861_v41 }
 0x19c   : > { %v556_v55 = vmax.f32 %v548_v44, 0.0  ;;  %v549_v56 = vadd.f32 %v13219_v39, %v536_v45  ;;  %v13270_v44 = vld [vmem:[%s13123_s12 + $0x420] sm:$0xff]  ;;  %v10863_v46 = vcombine.high %v1044_v40, %v1048_v42  ;;  %7098 = vmatpush1.bf16.msra.mxu1 %v10860_v47  ;;  %v1064_v38 = vld [vmem:[%s13123_s12 + $0x468] sm:$0xff] }
 0x19d   : > { %v554_v59 = vmax.f32 %v546_v50, 0.0  ;;  %v547_v60 = vadd.f32 %v13219_v39, %v534_v51  ;;  %v10868_v48 = vcombine.low %v13267_v43, %v13270_v44  ;;  %v13278_v50 = vld [vmem:[%s13123_s12 + $0x428] sm:$0xff]  ;;  %v10862_v51 = vcombine.low %v1044_v40, %v1048_v42  ;;  %v1067_v42 = vld [vmem:[%s13123_s12 + $0x480] sm:$0xff] }
 0x19e   : > { %565 = vst.msk [vmem:[#allocation4 + $0x10] sm:$0xff] %vm562_vm0, %v556_v55  ;;  %v557_v61 = vmax.f32 %v549_v56, 0.0  ;;  %v10870_v52 = vcombine.low %v13275_v49, %v13278_v50  ;;  %7425 = vmatprep.subr.bf16.mxu0 %v10863_v46  ;;  %v10869_v54 = vcombine.high %v13267_v43, %v13270_v44  ;;  %v10871_v55 = vcombine.high %v13275_v49, %v13278_v50  ;;  %v1068_v46 = vld [vmem:[%s13123_s12 + $0x488] sm:$0xff]  ;;  %v1079_v44 = vld [vmem:[%s13123_s12 + $0x4e0] sm:$0xff] }
 0x19f   : > { %563 = vst.msk [vmem:[#allocation4] sm:$0xff] %vm562_vm0, %v554_v59  ;;  %v555_v1 = vmax.f32 %v547_v60, 0.0  ;;  %7426 = vmatpush1.bf16.msra.mxu0 %v10862_v51  ;;  %v12060_v57 = vpop.f32.mrb[4].mxu0  ;;  %v1072_v47 = vld [vmem:[%s13123_s12 + $0x4a8] sm:$0xff] }
 0x1a0   : > { %566 = vst.msk [vmem:[#allocation4 + $0x18] sm:$0xff] %vm562_vm0, %v557_v61  ;;  %7108 = vmatprep.subr.bf16.mxu1 %v10869_v54  ;;  %7436 = vmatprep.subr.bf16.mxu0 %v10871_v55  ;;  %v539_v58 = vmul.f32 %v12060_v57, %v13217_v37  ;;  %v513_v59 = vpop.f32.mrb[5].mxu0  ;;  %v1080_v49 = vld [vmem:[%s13123_s12 + $0x4e8] sm:$0xff] }
 0x1a1   : > { %564 = vst.msk [vmem:[#allocation4 + $0x8] sm:$0xff] %vm562_vm0, %v555_v1  ;;  %v537_v60 = vmul.f32 %v13217_v37, %v513_v59  ;;  %v12061_v63 = vpop.f32.mrb[6].mxu0 }
 0x1a2   : > { %v552_v61 = vadd.f32 %v13219_v39, %v539_v58  ;;  %v540_v1 = vmul.f32 %v12061_v63, %v13217_v37  ;;  %v516_v2 = vpop.f32.mrb[7].mxu0  ;;  %v10879_v58 = vcombine.high %v1060_v36, %v1064_v38  ;;  %v10878_v63 = vcombine.low %v1060_v36, %v1064_v38 }
 0x1a3   : > { %v550_v62 = vadd.f32 %v13219_v39, %v537_v60  ;;  %v538_v4 = vmul.f32 %v13217_v37, %v516_v2  ;;  %v12887_v37 = vmov 1983009808   ;;  %v10887_v2 = vcombine.high %v1068_v46, %v1072_v47 }
 0x1a4   : > { %v560_v0 = vmax.f32 %v552_v61, 0.0  ;;  %v553_v5 = vadd.f32 %v13219_v39, %v540_v1  ;;  %v825_v11 = vunpack.c.l.s4 %v12887_v37 }
 0x1a5   : > { %v633_v15 = vld [vmem:[#allocation4 + $0x10] sm:$0x3]  ;;  %v648_v23 = vld [vmem:[#allocation4 + $0x14] sm:$0x3]  ;;  %v558_v3 = vmax.f32 %v550_v62, 0.0  ;;  %v551_v6 = vadd.f32 %v13219_v39, %v538_v4 }
 0x1a6   : > { %v10724_v16 = vld.sshfl [vmem:[#allocation4 + $0x2] sm:$0x3 pattern:$0x76325410]  ;;  %v571_v17 = vld [vmem:[#allocation4] sm:$0x3] }
 0x1a7   : > { %634 = vst.msk [vmem:[#allocation3 + $0x8] sm:$0x3] %vm572_vm1, %v633_v15  ;;  %583 = vrot.lane.b32.xlu0 %v10724_v16, %s12886_s16  ;;  %573 = vst.msk [vmem:[#allocation3] sm:$0x3] %vm572_vm1, %v571_v17  ;;  %v588_v18 = vld [vmem:[#allocation4 + $0x4] sm:$0x3]  ;;  %v826_v16 = vunpack.c.0.s8 %v825_v11 }
 0x1a8   : > { %v10726_v19 = vld.sshfl [vmem:[#allocation4 + $0xa] sm:$0x3 pattern:$0x76325410]  ;;  %v603_v20 = vld [vmem:[#allocation4 + $0x8] sm:$0x3] }
 0x1a9   : > { %589 = vst.msk [vmem:[#allocation3 + $0x2] sm:$0x3] %vm572_vm1, %v588_v18  ;;  %614 = vrot.lane.b32.xlu1 %v10726_v19, %s12886_s16  ;;  %604 = vst.msk [vmem:[#allocation3 + $0x4] sm:$0x3] %vm572_vm1, %v603_v20  ;;  %v618_v21 = vld [vmem:[#allocation4 + $0xc] sm:$0x3] }
 0x1aa   : > { %v10725_v22 = vld.sshfl [vmem:[#allocation4 + $0x6] sm:$0x3 pattern:$0x76325410]  ;;  %619 = vst.msk [vmem:[#allocation3 + $0x6] sm:$0x3] %vm572_vm1, %v618_v21 }
 0x1ab   : > { %599 = vrot.lane.b32.xlu0 %v10725_v22, %s12886_s16  ;;  %649 = vst.msk [vmem:[#allocation3 + $0xa] sm:$0x3] %vm572_vm1, %v648_v23  ;;  %v663_v24 = vld [vmem:[#allocation4 + $0x18] sm:$0x3]  ;;  %v678_v33 = vld [vmem:[#allocation4 + $0x1c] sm:$0x3] }
 0x1ac   : > { %v10727_v25 = vld.sshfl [vmem:[#allocation4 + $0xe] sm:$0x3 pattern:$0x76325410]  ;;  %664 = vst.msk [vmem:[#allocation3 + $0xc] sm:$0x3] %vm572_vm1, %v663_v24 }
 0x1ad   : > { %v10728_v26 = vld.sshfl [vmem:[#allocation4 + $0x12] sm:$0x3 pattern:$0x76325410]  ;;  %629 = vrot.lane.b32.xlu1 %v10727_v25, %s12886_s16  ;;  %679 = vst.msk [vmem:[#allocation3 + $0xe] sm:$0x3] %vm572_vm1, %v678_v33 }
 0x1ae   : > { %v10729_v45 = vld.sshfl [vmem:[#allocation4 + $0x16] sm:$0x3 pattern:$0x76325410]  ;;  %569 = vst.msk [vmem:[#allocation4 + $0x30] sm:$0xff] %vm562_vm0, %v560_v0  ;;  %567 = vst.msk [vmem:[#allocation4 + $0x20] sm:$0xff] %vm562_vm0, %v558_v3 }
 0x1af   : > { %644 = vrot.lane.b32.xlu0 %v10728_v26, %s12886_s16  ;;  %v10730_v53 = vld.sshfl [vmem:[#allocation4 + $0x1a] sm:$0x3 pattern:$0x76325410]  ;;  %v561_v7 = vmax.f32 %v553_v5, 0.0  ;;  %v559_v8 = vmax.f32 %v551_v6, 0.0 }
 0x1b0   : > { %v10731_v56 = vld.sshfl [vmem:[#allocation4 + $0x1e] sm:$0x3 pattern:$0x76325410]  ;;  %v13307_v17 = vshrl.u32 %v827_v12, 7  ;;  %v1059_v33 = vld [vmem:[%s13123_s12 + $0x440] sm:$0xff] }
 0x1b1   : > { %659 = vrot.lane.b32.xlu1 %v10729_v45, %s12886_s16  ;;  %570 = vst.msk [vmem:[#allocation4 + $0x38] sm:$0xff] %vm562_vm0, %v561_v7  ;;  %568 = vst.msk [vmem:[#allocation4 + $0x28] sm:$0xff] %vm562_vm0, %v559_v8  ;;  %v1071_v45 = vld [vmem:[%s13123_s12 + $0x4a0] sm:$0xff]  ;;  %v10877_v57 = vcombine.high %v1059_v33, %v1063_v35  ;;  %v10876_v62 = vcombine.low %v1059_v33, %v1063_v35  ;;  %v1084_v8 = vld [vmem:[%s13123_s12 + $0x508] sm:$0xff] }
 0x1b2   : > { %v13314_v22 = vsub.s32 %v826_v16, %v13307_v17  ;;  %v10885_v1 = vcombine.high %v1067_v42, %v1071_v45  ;;  %v1075_v3 = vld [vmem:[%s13123_s12 + $0x4c0] sm:$0xff]  ;;  %v10884_v50 = vcombine.low %v1067_v42, %v1071_v45  ;;  %v1108_v33 = vld [vmem:[%s13123_s12 + $0x5c8] sm:$0xff] }
 0x1b3   : > { %674 = vrot.lane.b32.xlu0 %v10730_v53, %s12886_s16  ;;  %v10893_v4 = vcombine.high %v1075_v3, %v1079_v44  ;;  %v1083_v6 = vld [vmem:[%s13123_s12 + $0x500] sm:$0xff] }
 0x1b4   : > { %v1087_v7 = vld [vmem:[%s13123_s12 + $0x520] sm:$0xff] }
 0x1b5   : > { %689 = vrot.lane.b32.xlu1 %v10731_v56, %s12886_s16  ;;  %v10733_v14 = vld.sshfl [vmem:[#allocation4 + $0x26] sm:$0x3 pattern:$0x76325410]  ;;  %v708_v53 = vld [vmem:[#allocation4 + $0x24] sm:$0x3]  ;;  %v10901_v11 = vcombine.high %v1083_v6, %v1087_v7  ;;  %v10900_v16 = vcombine.low %v1083_v6, %v1087_v7 }
 0x1b6   : > { %v10732_v39 = vld.sshfl [vmem:[#allocation4 + $0x22] sm:$0x3 pattern:$0x76325410]  ;;  %v693_v54 = vld [vmem:[#allocation4 + $0x20] sm:$0x3] }
 0x1b7   : > { %704 = vrot.lane.b32.xlu0 %v10732_v39, %s12886_s16  ;;  %v10737_v24 = vld.sshfl [vmem:[#allocation4 + $0x36] sm:$0x3 pattern:$0x76325410]  ;;  %709 = vst.msk [vmem:[#allocation3 + $0x12] sm:$0x3] %vm572_vm1, %v708_v53 }
 0x1b8   : > { %v10735_v19 = vld.sshfl [vmem:[#allocation4 + $0x2e] sm:$0x3 pattern:$0x76325410]  ;;  %v738_v55 = vld [vmem:[#allocation4 + $0x2c] sm:$0x3] }
 0x1b9   : > { %719 = vrot.lane.b32.xlu1 %v10733_v14, %s12886_s16  ;;  %v10734_v20 = vld.sshfl [vmem:[#allocation4 + $0x2a] sm:$0x3 pattern:$0x76325410]  ;;  %694 = vst.msk [vmem:[#allocation3 + $0x10] sm:$0x3] %vm572_vm1, %v693_v54 }
 0x1ba   : > { %v10736_v25 = vld.sshfl [vmem:[#allocation4 + $0x32] sm:$0x3 pattern:$0x76325410]  ;;  %739 = vst.msk [vmem:[#allocation3 + $0x16] sm:$0x3] %vm572_vm1, %v738_v55 }
 0x1bb   : > { %734 = vrot.lane.b32.xlu0 %v10734_v20, %s12886_s16  ;;  %v10739_v30 = vld.sshfl [vmem:[#allocation4 + $0x3e] sm:$0x3 pattern:$0x76325410]  ;;  %v723_v59 = vld [vmem:[#allocation4 + $0x28] sm:$0x3] }
 0x1bc   : > { %v10738_v34 = vld.sshfl [vmem:[#allocation4 + $0x3a] sm:$0x3 pattern:$0x76325410]  ;;  %v768_v60 = vld [vmem:[#allocation4 + $0x34] sm:$0x3] }
 0x1bd   : > { %749 = vrot.lane.b32.xlu1 %v10735_v19, %s12886_s16  ;;  %v753_v61 = vld [vmem:[#allocation4 + $0x30] sm:$0x3]  ;;  %724 = vst.msk [vmem:[#allocation3 + $0x14] sm:$0x3] %vm572_vm1, %v723_v59  ;;  %769 = vst.msk [vmem:[#allocation3 + $0x1a] sm:$0x3] %vm572_vm1, %v768_v60 }
 0x1be   : > { %754 = vst.msk [vmem:[#allocation3 + $0x18] sm:$0x3] %vm572_vm1, %v753_v61  ;;  %v798_v0 = vld [vmem:[#allocation4 + $0x3c] sm:$0x3]  ;;  %v783_v43 = vld [vmem:[#allocation4 + $0x38] sm:$0x3] }
 0x1bf   : > { %764 = vrot.lane.b32.xlu0 %v10736_v25, %s12886_s16  ;;  %799 = vst.msk [vmem:[#allocation3 + $0x1e] sm:$0x3] %vm572_vm1, %v798_v0  ;;  %784 = vst.msk [vmem:[#allocation3 + $0x1c] sm:$0x3] %vm572_vm1, %v783_v43  ;;  %v1095_v14 = vld [vmem:[%s13123_s12 + $0x560] sm:$0xff]  ;;  %v1092_v39 = vld [vmem:[%s13123_s12 + $0x548] sm:$0xff] }
 0x1c0   : > { %v1104_v25 = vld [vmem:[%s13123_s12 + $0x5a8] sm:$0xff]  ;;  %v1115_v42 = vld [vmem:[%s13123_s12 + $0x600] sm:$0xff] }
 0x1c1   : > { %779 = vrot.lane.b32.xlu1 %v10737_v24, %s12886_s16  ;;  %v1100_v24 = vld [vmem:[%s13123_s12 + $0x588] sm:$0xff]  ;;  %v1119_v45 = vld [vmem:[%s13123_s12 + $0x620] sm:$0xff] }
 0x1c2   : > { %v10918_v36 = vcombine.low %v1100_v24, %v1104_v25  ;;  %v10933_v55 = vcombine.high %v1115_v42, %v1119_v45  ;;  %v1127_v59 = vld [vmem:[%s13123_s12 + $0x660] sm:$0xff]  ;;  %v1124_v60 = vld [vmem:[%s13123_s12 + $0x648] sm:$0xff] }
 0x1c3   : > { %794 = vrot.lane.b32.xlu0 %v10738_v34, %s12886_s16  ;;  %v1112_v34 = vld [vmem:[%s13123_s12 + $0x5e8] sm:$0xff] }
 0x1c4   : > { %v10926_v54 = vcombine.low %v1108_v33, %v1112_v34  ;;  %v1128_v61 = vld [vmem:[%s13123_s12 + $0x668] sm:$0xff] }
 0x1c5   : > { %809 = vrot.lane.b32.xlu1 %v10739_v30, %s12886_s16  ;;  %v1107_v30 = vld [vmem:[%s13123_s12 + $0x5c0] sm:$0xff]  ;;  %v1132_v43 = vld [vmem:[%s13123_s12 + $0x688] sm:$0xff] }
 0x1c6   : > { %v1140_v6 = vld [vmem:[%s13123_s12 + $0x6c8] sm:$0xff] }
 0x1c7   : > { %v1144_v7 = vld [vmem:[%s13123_s12 + $0x6e8] sm:$0xff] }
 0x219   : > { %v584_v9 = vpop.permute.xlu0 %583 }
 0x21a   : > { %587 = vst.msk [vmem:[#allocation3] sm:$0x3] %vm586_vm2, %v584_v9  ;;  %v1088_v9 = vld [vmem:[%s13123_s12 + $0x528] sm:$0xff] }
 0x21b   : > { %v615_v10 = vpop.permute.xlu1 %614  ;;  %v10903_v12 = vcombine.high %v1084_v8, %v1088_v9 }
 0x21c   : > { %617 = vst.msk [vmem:[#allocation3 + $0x4] sm:$0x3] %vm586_vm2, %v615_v10  ;;  %v10892_v10 = vcombine.low %v1075_v3, %v1079_v44  ;;  %v1135_v3 = vld [vmem:[%s13123_s12 + $0x6a0] sm:$0xff]  ;;  %v1136_v44 = vld [vmem:[%s13123_s12 + $0x6a8] sm:$0xff] }
 0x21d   : > { %v600_v13 = vpop.permute.xlu0 %599 }
 0x21e   : > { %602 = vst.msk [vmem:[#allocation3 + $0x2] sm:$0x3] %vm586_vm2, %v600_v13  ;;  %v1091_v13 = vld [vmem:[%s13123_s12 + $0x540] sm:$0xff] }
 0x21f   : > { %v630_v15 = vpop.permute.xlu1 %629  ;;  %v10909_v19 = vcombine.high %v1091_v13, %v1095_v14 }
 0x220   : > { %632 = vst.msk [vmem:[#allocation3 + $0x6] sm:$0x3] %vm586_vm2, %v630_v15  ;;  %v1096_v15 = vld [vmem:[%s13123_s12 + $0x568] sm:$0xff] }
 0x221   : > { %v645_v18 = vpop.permute.xlu0 %644  ;;  %v10911_v20 = vcombine.high %v1092_v39, %v1096_v15 }
 0x222   : > { %647 = vst.msk [vmem:[#allocation3 + $0x8] sm:$0x3] %vm586_vm2, %v645_v18  ;;  %v10902_v18 = vcombine.low %v1084_v8, %v1088_v9  ;;  %v10950_v9 = vcombine.low %v1132_v43, %v1136_v44 }
 0x223   : > { %v660_v21 = vpop.permute.xlu1 %659 }
 0x224   : > { %662 = vst.msk [vmem:[#allocation3 + $0xa] sm:$0x3] %vm586_vm2, %v660_v21  ;;  %v1099_v21 = vld [vmem:[%s13123_s12 + $0x580] sm:$0xff] }
 0x225   : > { %v675_v23 = vpop.permute.xlu0 %674 }
 0x226   : > { %677 = vst.msk [vmem:[#allocation3 + $0xc] sm:$0x3] %vm586_vm2, %v675_v23  ;;  %v1103_v23 = vld [vmem:[%s13123_s12 + $0x5a0] sm:$0xff] }
 0x227   : > { %v690_v26 = vpop.permute.xlu1 %689  ;;  %v815_v27 = vld [vmem:[#allocation3] sm:$0xff]  ;;  %v10916_v35 = vcombine.low %v1099_v21, %v1103_v23 }
 0x228   : > { %692 = vst.msk [vmem:[#allocation3 + $0xe] sm:$0x3] %vm586_vm2, %v690_v26  ;;  %v830_v28 = vrot.slane %v815_v27, %v13314_v22  ;;  %v823_v29 = vcombine.high %v815_v27, %v815_v27  ;;  %v10908_v26 = vcombine.low %v1091_v13, %v1095_v14  ;;  %v10910_v27 = vcombine.low %v1092_v39, %v1096_v15  ;;  %v1148_v13 = vld [vmem:[%s13123_s12 + $0x708] sm:$0xff] }
 0x229   : > { %v1152_v14 = vld [vmem:[%s13123_s12 + $0x728] sm:$0xff]  ;;  %v10958_v15 = vcombine.low %v1140_v6, %v1144_v7 }
 0x22a   : > { %v838_v31 = vcombine.high %v830_v28, %v830_v28  ;;  %v13322_v32 = vrot.slane %v823_v29, %v13314_v22  ;;  %v13338_v51 = vpack.c.bf16 %v830_v28, %v830_v28  ;;  %v10917_v28 = vcombine.high %v1099_v21, %v1103_v23  ;;  %v1156_v21 = vld [vmem:[%s13123_s12 + $0x748] sm:$0xff] }
 0x22b   : > { %v10919_v29 = vcombine.high %v1100_v24, %v1104_v25  ;;  %v1160_v23 = vld [vmem:[%s13123_s12 + $0x768] sm:$0xff]  ;;  %v10966_v25 = vcombine.low %v1148_v13, %v1152_v14 }
 0x22c   : > { %v13330_v40 = vpack.c.bf16 %v838_v31, %v838_v31  ;;  %v839_v41 = vcombine.high %v13322_v32, %v13322_v32  ;;  %v1111_v31 = vld [vmem:[%s13123_s12 + $0x5e0] sm:$0xff] }
 0x22d   : > { %v10925_v38 = vcombine.high %v1107_v30, %v1111_v31  ;;  %v10924_v53 = vcombine.low %v1107_v30, %v1111_v31  ;;  %v1164_v30 = vld [vmem:[%s13123_s12 + $0x788] sm:$0xff] }
 0x22e   : > { %7099 = vmatprep.mubr.bf16.mxu1 %v13330_v40  ;;  %7427 = vmatprep.mubr.bf16.mxu0 %v13330_v40  ;;  %v13342_v56 = vpack.c.bf16 %v839_v41, %v839_v41  ;;  %v10927_v41 = vcombine.high %v1108_v33, %v1112_v34  ;;  %v1168_v31 = vld [vmem:[%s13123_s12 + $0x7a8] sm:$0xff]  ;;  %v10974_v34 = vcombine.low %v1156_v21, %v1160_v23 }
 0x22f   : > { %7100 = vmatmul.mubr.bf16.vlgmr.msra.gmra.mrb[0].mxu1 %v13338_v51  ;;  %7428 = vmatmul.mubr.bf16.vlgmr.msra.gmra.mrb[8].mxu0 %v13338_v51 }
 0x230   : > { %7109 = vmatpush1.bf16.msra.mxu1 %v10868_v48  ;;  %7437 = vmatpush1.bf16.msra.mxu0 %v10870_v52  ;;  %v1076_v48 = vld [vmem:[%s13123_s12 + $0x4c8] sm:$0xff]  ;;  %v10886_v52 = vcombine.low %v1068_v46, %v1072_v47 }
 0x231   : > { %7140 = vmatprep.mubr.bf16.mxu1 %v13342_v56  ;;  %7468 = vmatprep.mubr.bf16.mxu0 %v13342_v56  ;;  %v10895_v5 = vcombine.high %v1076_v48, %v1080_v49  ;;  %v10894_v37 = vcombine.low %v1076_v48, %v1080_v49  ;;  %v1116_v46 = vld [vmem:[%s13123_s12 + $0x608] sm:$0xff]  ;;  %v10942_v49 = vcombine.low %v1124_v60, %v1128_v61 }
 0x232   : > { %7110 = vmatprep.subr.bf16.mxu1 %v10877_v57  ;;  %7438 = vmatprep.subr.bf16.mxu0 %v10879_v58  ;;  %v1120_v47 = vld [vmem:[%s13123_s12 + $0x628] sm:$0xff]  ;;  %v1123_v58 = vld [vmem:[%s13123_s12 + $0x640] sm:$0xff] }
 0x233   : > { %v10935_v57 = vcombine.high %v1116_v46, %v1120_v47  ;;  %v10941_v0 = vcombine.high %v1123_v58, %v1127_v59  ;;  %v10940_v48 = vcombine.low %v1123_v58, %v1127_v59  ;;  %v1183_v58 = vld [vmem:[%s13123_s12 + $0x820] sm:$0xff]  ;;  %v1180_v59 = vld [vmem:[%s13123_s12 + $0x808] sm:$0xff] }
 0x234   : > { %7111 = vmatpush1.bf16.msra.mxu1 %v10876_v62  ;;  %7439 = vmatpush1.bf16.msra.mxu0 %v10878_v63  ;;  %v10932_v62 = vcombine.low %v1115_v42, %v1119_v45  ;;  %v10934_v63 = vcombine.low %v1116_v46, %v1120_v47  ;;  %v1172_v42 = vld [vmem:[%s13123_s12 + $0x7c8] sm:$0xff] }
 0x235   : > { %7112 = vmatprep.subr.bf16.mxu1 %v10885_v1  ;;  %7440 = vmatprep.subr.bf16.mxu0 %v10887_v2  ;;  %v10943_v1 = vcombine.high %v1124_v60, %v1128_v61  ;;  %v1131_v2 = vld [vmem:[%s13123_s12 + $0x680] sm:$0xff]  ;;  %v1176_v45 = vld [vmem:[%s13123_s12 + $0x7e8] sm:$0xff] }
 0x236   : > { %v10948_v8 = vcombine.low %v1131_v2, %v1135_v3  ;;  %v13414_v46 = vld [vmem:[#allocation3 + $0x8] sm:$0xff] }
 0x237   : > { %v1184_v60 = vld [vmem:[%s13123_s12 + $0x828] sm:$0xff]  ;;  %v13422_v61 = vrot.slane %v13414_v46, %v13314_v22 }
 0x238   : > { %7113 = vmatpush1.bf16.msra.mxu1 %v10884_v50  ;;  %7441 = vmatpush1.bf16.msra.mxu0 %v10886_v52  ;;  %v10949_v50 = vcombine.high %v1131_v2, %v1135_v3  ;;  %v10951_v52 = vcombine.high %v1132_v43, %v1136_v44  ;;  %v1187_v3 = vld [vmem:[%s13123_s12 + $0x840] sm:$0xff]  ;;  %v1188_v44 = vld [vmem:[%s13123_s12 + $0x848] sm:$0xff] }
 0x239   : > { %7114 = vmatprep.subr.bf16.mxu1 %v10893_v4  ;;  %7442 = vmatprep.subr.bf16.mxu0 %v10895_v5  ;;  %v1139_v4 = vld [vmem:[%s13123_s12 + $0x6c0] sm:$0xff]  ;;  %v855_v2 = vcombine.high %v13422_v61, %v13422_v61 }
 0x23a   : > { %v1143_v5 = vld [vmem:[%s13123_s12 + $0x6e0] sm:$0xff] }
 0x23b   : > { %v10956_v39 = vcombine.low %v1139_v4, %v1143_v5  ;;  %v1191_v43 = vld [vmem:[%s13123_s12 + $0x860] sm:$0xff] }
 0x23c   : > { %7115 = vmatpush1.bf16.msra.mxu1 %v10892_v10  ;;  %7443 = vmatpush1.bf16.msra.mxu0 %v10894_v37  ;;  %v10957_v10 = vcombine.high %v1139_v4, %v1143_v5  ;;  %v10959_v37 = vcombine.high %v1140_v6, %v1144_v7  ;;  %v13434_v4 = vpack.c.bf16 %v855_v2, %v855_v2  ;;  %v1195_v7 = vld [vmem:[%s13123_s12 + $0x880] sm:$0xff] }
 0x23d   : > { %7116 = vmatprep.subr.bf16.mxu1 %v10901_v11  ;;  %7444 = vmatprep.subr.bf16.mxu0 %v10903_v12  ;;  %v1147_v11 = vld [vmem:[%s13123_s12 + $0x700] sm:$0xff]  ;;  %v11005_v5 = vcombine.high %v1187_v3, %v1191_v43 }
 0x23e   : > { %v1151_v12 = vld [vmem:[%s13123_s12 + $0x720] sm:$0xff] }
 0x23f   : > { %v10964_v24 = vcombine.low %v1147_v11, %v1151_v12 }
 0x240   : > { %7117 = vmatpush1.bf16.msra.mxu1 %v10900_v16  ;;  %7445 = vmatpush1.bf16.msra.mxu0 %v10902_v18  ;;  %v10965_v16 = vcombine.high %v1147_v11, %v1151_v12  ;;  %v10967_v18 = vcombine.high %v1148_v13, %v1152_v14  ;;  %v1203_v13 = vld [vmem:[%s13123_s12 + $0x8c0] sm:$0xff] }
 0x241   : > { %7118 = vmatprep.subr.bf16.mxu1 %v10909_v19  ;;  %7446 = vmatprep.subr.bf16.mxu0 %v10911_v20  ;;  %v1155_v19 = vld [vmem:[%s13123_s12 + $0x740] sm:$0xff] }
 0x242   : > { %v1159_v20 = vld [vmem:[%s13123_s12 + $0x760] sm:$0xff] }
 0x243   : > { %v10972_v33 = vcombine.low %v1155_v19, %v1159_v20  ;;  %v1207_v14 = vld [vmem:[%s13123_s12 + $0x8e0] sm:$0xff] }
 0x244   : > { %7119 = vmatpush1.bf16.msra.mxu1 %v10908_v26  ;;  %7447 = vmatpush1.bf16.msra.mxu0 %v10910_v27  ;;  %v10973_v26 = vcombine.high %v1155_v19, %v1159_v20  ;;  %v10975_v27 = vcombine.high %v1156_v21, %v1160_v23  ;;  %v11021_v19 = vcombine.high %v1203_v13, %v1207_v14  ;;  %v1211_v21 = vld [vmem:[%s13123_s12 + $0x900] sm:$0xff] }
 0x245   : > { %7120 = vmatprep.subr.bf16.mxu1 %v10917_v28  ;;  %7448 = vmatprep.subr.bf16.mxu0 %v10919_v29  ;;  %v1163_v28 = vld [vmem:[%s13123_s12 + $0x780] sm:$0xff] }
 0x246   : > { %v1167_v29 = vld [vmem:[%s13123_s12 + $0x7a0] sm:$0xff] }
 0x247   : > { %v10980_v47 = vcombine.low %v1163_v28, %v1167_v29  ;;  %v1215_v23 = vld [vmem:[%s13123_s12 + $0x920] sm:$0xff] }
 0x248   : > { %7121 = vmatpush1.bf16.msra.mxu1 %v10916_v35  ;;  %7449 = vmatpush1.bf16.msra.mxu0 %v10918_v36  ;;  %v10981_v35 = vcombine.high %v1163_v28, %v1167_v29  ;;  %v10983_v36 = vcombine.high %v1164_v30, %v1168_v31  ;;  %v11029_v28 = vcombine.high %v1211_v21, %v1215_v23 }
 0x249   : > { %7122 = vmatprep.subr.bf16.mxu1 %v10925_v38  ;;  %7450 = vmatprep.subr.bf16.mxu0 %v10927_v41  ;;  %v1171_v38 = vld [vmem:[%s13123_s12 + $0x7c0] sm:$0xff] }
 0x24a   : > { %v1175_v41 = vld [vmem:[%s13123_s12 + $0x7e0] sm:$0xff] }
 0x24c   : > { %7123 = vmatpush1.bf16.msra.mxu1 %v10924_v53  ;;  %7451 = vmatpush1.bf16.msra.mxu0 %v10926_v54  ;;  %v10982_v53 = vcombine.low %v1164_v30, %v1168_v31  ;;  %v10989_v54 = vcombine.high %v1171_v38, %v1175_v41  ;;  %v1219_v30 = vld [vmem:[%s13123_s12 + $0x940] sm:$0xff] }
 0x24d   : > { %7124 = vmatprep.subr.bf16.mxu1 %v10933_v55  ;;  %7452 = vmatprep.subr.bf16.mxu0 %v10935_v57  ;;  %v10991_v55 = vcombine.high %v1172_v42, %v1176_v45  ;;  %v1179_v57 = vld [vmem:[%s13123_s12 + $0x800] sm:$0xff] }
 0x24e   : > { %v1223_v31 = vld [vmem:[%s13123_s12 + $0x960] sm:$0xff] }
 0x250   : > { %7125 = vmatpush1.bf16.msra.mxu1 %v10932_v62  ;;  %7453 = vmatpush1.bf16.msra.mxu0 %v10934_v63  ;;  %v10988_v62 = vcombine.low %v1171_v38, %v1175_v41  ;;  %v10990_v63 = vcombine.low %v1172_v42, %v1176_v45  ;;  %v11037_v38 = vcombine.high %v1219_v30, %v1223_v31  ;;  %v1227_v42 = vld [vmem:[%s13123_s12 + $0x980] sm:$0xff] }
 0x251   : > { %7126 = vmatprep.subr.bf16.mxu1 %v10941_v0  ;;  %7454 = vmatprep.subr.bf16.mxu0 %v10943_v1  ;;  %v10997_v0 = vcombine.high %v1179_v57, %v1183_v58  ;;  %v10999_v1 = vcombine.high %v1180_v59, %v1184_v60  ;;  %v1231_v45 = vld [vmem:[%s13123_s12 + $0x9a0] sm:$0xff] }
 0x254   : > { %7127 = vmatpush1.bf16.msra.mxu1 %v10940_v48  ;;  %7455 = vmatpush1.bf16.msra.mxu0 %v10942_v49  ;;  %v1192_v48 = vld [vmem:[%s13123_s12 + $0x868] sm:$0xff]  ;;  %v10996_v49 = vcombine.low %v1179_v57, %v1183_v58  ;;  %v11045_v57 = vcombine.high %v1227_v42, %v1231_v45 }
 0x255   : > { %7128 = vmatprep.subr.bf16.mxu1 %v10949_v50  ;;  %7456 = vmatprep.subr.bf16.mxu0 %v10951_v52  ;;  %v13432_v50 = vpack.c.bf16 %v13322_v32, %v13322_v32  ;;  %v10998_v52 = vcombine.low %v1180_v59, %v1184_v60  ;;  %v11007_v6 = vcombine.high %v1188_v44, %v1192_v48  ;;  %v1200_v32 = vld [vmem:[%s13123_s12 + $0x8a8] sm:$0xff]  ;;  %v1235_v59 = vld [vmem:[%s13123_s12 + $0x9c0] sm:$0xff] }
 0x256   : > { %v1239_v60 = vld [vmem:[%s13123_s12 + $0x9e0] sm:$0xff] }
 0x257   : > { %v11053_v2 = vcombine.high %v1235_v59, %v1239_v60 }
 0x258   : > { %7129 = vmatpush1.bf16.msra.mxu1 %v10948_v8  ;;  %7457 = vmatpush1.bf16.msra.mxu0 %v10950_v9  ;;  %v1199_v8 = vld [vmem:[%s13123_s12 + $0x8a0] sm:$0xff]  ;;  %v1196_v9 = vld [vmem:[%s13123_s12 + $0x888] sm:$0xff] }
 0x259   : > { %7130 = vmatprep.subr.bf16.mxu1 %v10957_v10  ;;  %7458 = vmatprep.subr.bf16.mxu0 %v10959_v37  ;;  %v11004_v10 = vcombine.low %v1187_v3, %v1191_v43  ;;  %v11006_v37 = vcombine.low %v1188_v44, %v1192_v48  ;;  %v11013_v11 = vcombine.high %v1195_v7, %v1199_v8  ;;  %v1243_v43 = vld [vmem:[%s13123_s12 + $0xa00] sm:$0xff]  ;;  %v1244_v48 = vld [vmem:[%s13123_s12 + $0xa08] sm:$0xff] }
 0x25a   : > { %v11015_v12 = vcombine.high %v1196_v9, %v1200_v32  ;;  %v1247_v44 = vld [vmem:[%s13123_s12 + $0xa20] sm:$0xff] }
 0x25c   : > { %7131 = vmatpush1.bf16.msra.mxu1 %v10956_v39  ;;  %7459 = vmatpush1.bf16.msra.mxu0 %v10958_v15  ;;  %v1204_v39 = vld [vmem:[%s13123_s12 + $0x8c8] sm:$0xff] }
 0x25d   : > { %7132 = vmatprep.subr.bf16.mxu1 %v10965_v16  ;;  %7460 = vmatprep.subr.bf16.mxu0 %v10967_v18  ;;  %v1208_v15 = vld [vmem:[%s13123_s12 + $0x8e8] sm:$0xff]  ;;  %v11012_v16 = vcombine.low %v1195_v7, %v1199_v8  ;;  %v11014_v18 = vcombine.low %v1196_v9, %v1200_v32  ;;  %v1251_v8 = vld [vmem:[%s13123_s12 + $0xa40] sm:$0xff] }
 0x25e   : > { %v11023_v20 = vcombine.high %v1204_v39, %v1208_v15  ;;  %v1255_v9 = vld [vmem:[%s13123_s12 + $0xa60] sm:$0xff]  ;;  %v1252_v32 = vld [vmem:[%s13123_s12 + $0xa48] sm:$0xff] }
 0x260   : > { %7133 = vmatpush1.bf16.msra.mxu1 %v10964_v24  ;;  %7461 = vmatpush1.bf16.msra.mxu0 %v10966_v25  ;;  %v1212_v24 = vld [vmem:[%s13123_s12 + $0x908] sm:$0xff] }
 0x261   : > { %7134 = vmatprep.subr.bf16.mxu1 %v10973_v26  ;;  %7462 = vmatprep.subr.bf16.mxu0 %v10975_v27  ;;  %v1216_v25 = vld [vmem:[%s13123_s12 + $0x928] sm:$0xff]  ;;  %v11020_v26 = vcombine.low %v1203_v13, %v1207_v14  ;;  %v11022_v27 = vcombine.low %v1204_v39, %v1208_v15  ;;  %v1259_v14 = vld [vmem:[%s13123_s12 + $0xa80] sm:$0xff] }
 0x262   : > { %v11031_v29 = vcombine.high %v1212_v24, %v1216_v25  ;;  %v1263_v39 = vld [vmem:[%s13123_s12 + $0xaa0] sm:$0xff]  ;;  %v1260_v15 = vld [vmem:[%s13123_s12 + $0xa88] sm:$0xff] }
 0x264   : > { %7135 = vmatpush1.bf16.msra.mxu1 %v10972_v33  ;;  %7463 = vmatpush1.bf16.msra.mxu0 %v10974_v34  ;;  %v1220_v33 = vld [vmem:[%s13123_s12 + $0x948] sm:$0xff] }
 0x265   : > { %7136 = vmatprep.subr.bf16.mxu1 %v10981_v35  ;;  %7464 = vmatprep.subr.bf16.mxu0 %v10983_v36  ;;  %v1224_v34 = vld [vmem:[%s13123_s12 + $0x968] sm:$0xff]  ;;  %v11028_v35 = vcombine.low %v1211_v21, %v1215_v23  ;;  %v11030_v36 = vcombine.low %v1212_v24, %v1216_v25  ;;  %v11077_v21 = vcombine.high %v1259_v14, %v1263_v39  ;;  %v705_v23 = vpop.permute.xlu0 %704  ;;  %v1267_v25 = vld [vmem:[%s13123_s12 + $0xac0] sm:$0xff] }
 0x266   : > { %v11039_v41 = vcombine.high %v1220_v33, %v1224_v34  ;;  %707 = vst.msk [vmem:[#allocation3 + $0x10] sm:$0x3] %vm586_vm2, %v705_v23 }
 0x268   : > { %7137 = vmatpush1.bf16.msra.mxu1 %v10980_v47  ;;  %7465 = vmatpush1.bf16.msra.mxu0 %v10982_v53  ;;  %v1228_v47 = vld [vmem:[%s13123_s12 + $0x988] sm:$0xff] }
 0x269   : > { %7138 = vmatprep.subr.bf16.mxu1 %v10989_v54  ;;  %7466 = vmatprep.subr.bf16.mxu0 %v10991_v55  ;;  %v1232_v53 = vld [vmem:[%s13123_s12 + $0x9a8] sm:$0xff]  ;;  %v11036_v54 = vcombine.low %v1219_v30, %v1223_v31  ;;  %v11038_v55 = vcombine.low %v1220_v33, %v1224_v34  ;;  %v735_v34 = vpop.permute.xlu0 %734 }
 0x26a   : > { %v11047_v58 = vcombine.high %v1228_v47, %v1232_v53  ;;  %737 = vst.msk [vmem:[#allocation3 + $0x14] sm:$0x3] %vm586_vm2, %v735_v34 }
 0x26c   : > { %7139 = vmatpush1.bf16.msra.mxu1 %v10988_v62  ;;  %7467 = vmatpush1.bf16.msra.mxu0 %v10990_v63  ;;  %v1236_v62 = vld [vmem:[%s13123_s12 + $0x9c8] sm:$0xff] }
 0x26d   : > { %7149 = vmatprep.subr.bf16.mxu1 %v10997_v0  ;;  %7477 = vmatprep.subr.bf16.mxu0 %v10999_v1  ;;  %v1240_v63 = vld [vmem:[%s13123_s12 + $0x9e8] sm:$0xff]  ;;  %v11044_v0 = vcombine.low %v1227_v42, %v1231_v45  ;;  %v11046_v1 = vcombine.low %v1228_v47, %v1232_v53 }
 0x26e   : > { %v11055_v3 = vcombine.high %v1236_v62, %v1240_v63  ;;  %v1280_v42 = vld [vmem:[%s13123_s12 + $0xb28] sm:$0xff] }
 0x26f   : > { %7141 = vmatmul.mubr.bf16.vlgmr.msra.gmra.mrb[0].mxu1 %v13432_v50  ;;  %7469 = vmatmul.mubr.bf16.vlgmr.msra.gmra.mrb[8].mxu0 %v13432_v50 }
 0x270   : > { %7150 = vmatpush1.bf16.msra.mxu1 %v10996_v49  ;;  %7181 = vmatprep.mubr.bf16.mxu1 %v13434_v4  ;;  %v1248_v49 = vld [vmem:[%s13123_s12 + $0xa28] sm:$0xff] }
 0x271   : > { %7478 = vmatpush1.bf16.msra.mxu0 %v10998_v52  ;;  %7509 = vmatprep.mubr.bf16.mxu0 %v13434_v4  ;;  %v11052_v52 = vcombine.low %v1235_v59, %v1239_v60  ;;  %v11063_v7 = vcombine.high %v1244_v48, %v1248_v49  ;;  %v1287_v59 = vld [vmem:[%s13123_s12 + $0xb60] sm:$0xff]  ;;  %v1284_v60 = vld [vmem:[%s13123_s12 + $0xb48] sm:$0xff] }
 0x272   : > { %7151 = vmatprep.subr.bf16.mxu1 %v11005_v5  ;;  %7479 = vmatprep.subr.bf16.mxu0 %v11007_v6  ;;  %v11054_v5 = vcombine.low %v1236_v62, %v1240_v63  ;;  %v11061_v6 = vcombine.high %v1243_v43, %v1247_v44  ;;  %v1288_v62 = vld [vmem:[%s13123_s12 + $0xb68] sm:$0xff] }
 0x274   : > { %7152 = vmatpush1.bf16.msra.mxu1 %v11004_v10  ;;  %v1256_v10 = vld [vmem:[%s13123_s12 + $0xa68] sm:$0xff] }
 0x275   : > { %7480 = vmatpush1.bf16.msra.mxu0 %v11006_v37  ;;  %7153 = vmatprep.subr.bf16.mxu1 %v11013_v11  ;;  %v11060_v37 = vcombine.low %v1243_v43, %v1247_v44  ;;  %v11062_v11 = vcombine.low %v1244_v48, %v1248_v49  ;;  %v11071_v13 = vcombine.high %v1252_v32, %v1256_v10  ;;  %v1291_v44 = vld [vmem:[%s13123_s12 + $0xb80] sm:$0xff]  ;;  %v1292_v49 = vld [vmem:[%s13123_s12 + $0xb88] sm:$0xff] }
 0x276   : > { %7481 = vmatprep.subr.bf16.mxu0 %v11015_v12  ;;  %v11069_v12 = vcombine.high %v1251_v8, %v1255_v9  ;;  %v11103_v43 = vcombine.high %v1284_v60, %v1288_v62  ;;  %v1295_v48 = vld [vmem:[%s13123_s12 + $0xba0] sm:$0xff] }
 0x278   : > { %7154 = vmatpush1.bf16.msra.mxu1 %v11012_v16  ;;  %v1264_v16 = vld [vmem:[%s13123_s12 + $0xaa8] sm:$0xff] }
 0x279   : > { %7482 = vmatpush1.bf16.msra.mxu0 %v11014_v18  ;;  %7155 = vmatprep.subr.bf16.mxu1 %v11021_v19  ;;  %v11068_v18 = vcombine.low %v1251_v8, %v1255_v9  ;;  %v720_v19 = vpop.permute.xlu1 %719  ;;  %v11079_v24 = vcombine.high %v1260_v15, %v1264_v16  ;;  %v11078_v31 = vcombine.low %v1260_v15, %v1264_v16  ;;  %v1299_v9 = vld [vmem:[%s13123_s12 + $0xbc0] sm:$0xff] }
 0x27a   : > { %7483 = vmatprep.subr.bf16.mxu0 %v11023_v20  ;;  %v11070_v20 = vcombine.low %v1252_v32, %v1256_v10  ;;  %722 = vst.msk [vmem:[#allocation3 + $0x12] sm:$0x3] %vm586_vm2, %v720_v19  ;;  %v1303_v32 = vld [vmem:[%s13123_s12 + $0xbe0] sm:$0xff]  ;;  %v1300_v10 = vld [vmem:[%s13123_s12 + $0xbc8] sm:$0xff] }
 0x27b   : > { %v1307_v15 = vld [vmem:[%s13123_s12 + $0xc00] sm:$0xff]  ;;  %v1312_v19 = vld [vmem:[%s13123_s12 + $0xc28] sm:$0xff] }
 0x27c   : > { %7156 = vmatpush1.bf16.msra.mxu1 %v11020_v26  ;;  %v1271_v26 = vld [vmem:[%s13123_s12 + $0xae0] sm:$0xff] }
 0x27d   : > { %7484 = vmatpush1.bf16.msra.mxu0 %v11022_v27  ;;  %7157 = vmatprep.subr.bf16.mxu1 %v11029_v28  ;;  %v1268_v27 = vld [vmem:[%s13123_s12 + $0xac8] sm:$0xff]  ;;  %v750_v30 = vpop.permute.xlu1 %749  ;;  %v11085_v33 = vcombine.high %v1267_v25, %v1271_v26  ;;  %v11084_v45 = vcombine.low %v1267_v25, %v1271_v26  ;;  %v1311_v16 = vld [vmem:[%s13123_s12 + $0xc20] sm:$0xff] }
 0x27e   : > { %7485 = vmatprep.subr.bf16.mxu0 %v11031_v29  ;;  %v1272_v28 = vld [vmem:[%s13123_s12 + $0xae8] sm:$0xff]  ;;  %v11076_v29 = vcombine.low %v1259_v14, %v1263_v39  ;;  %752 = vst.msk [vmem:[#allocation3 + $0x16] sm:$0x3] %vm586_vm2, %v750_v30  ;;  %v11117_v14 = vcombine.high %v1299_v9, %v1303_v32  ;;  %v11125_v23 = vcombine.high %v1307_v15, %v1311_v16  ;;  %v1315_v26 = vld [vmem:[%s13123_s12 + $0xc40] sm:$0xff] }
 0x27f   : > { %v11086_v53 = vcombine.low %v1268_v27, %v1272_v28  ;;  %v1320_v30 = vld [vmem:[%s13123_s12 + $0xc68] sm:$0xff] }
 0x280   : > { %7158 = vmatpush1.bf16.msra.mxu1 %v11028_v35  ;;  %v11087_v35 = vcombine.high %v1268_v27, %v1272_v28  ;;  %v1319_v27 = vld [vmem:[%s13123_s12 + $0xc60] sm:$0xff]  ;;  %v11124_v28 = vcombine.low %v1307_v15, %v1311_v16 }
 0x281   : > { %7486 = vmatpush1.bf16.msra.mxu0 %v11030_v36  ;;  %7159 = vmatprep.subr.bf16.mxu1 %v11037_v38  ;;  %v1275_v36 = vld [vmem:[%s13123_s12 + $0xb00] sm:$0xff]  ;;  %v780_v47 = vpop.permute.xlu1 %779  ;;  %v11133_v34 = vcombine.high %v1315_v26, %v1319_v27 }
 0x282   : > { %7487 = vmatprep.subr.bf16.mxu0 %v11039_v41  ;;  %v1279_v38 = vld [vmem:[%s13123_s12 + $0xb20] sm:$0xff]  ;;  %v1276_v41 = vld [vmem:[%s13123_s12 + $0xb08] sm:$0xff]  ;;  %782 = vst.msk [vmem:[#allocation3 + $0x1a] sm:$0x3] %vm586_vm2, %v780_v47 }
 0x283   : > { %v11092_v63 = vcombine.low %v1275_v36, %v1279_v38 }
 0x284   : > { %7160 = vmatpush1.bf16.msra.mxu1 %v11036_v54  ;;  %v11093_v54 = vcombine.high %v1275_v36, %v1279_v38  ;;  %v1327_v36 = vld [vmem:[%s13123_s12 + $0xca0] sm:$0xff] }
 0x285   : > { %7488 = vmatpush1.bf16.msra.mxu0 %v11038_v55  ;;  %7161 = vmatprep.subr.bf16.mxu1 %v11045_v57  ;;  %v765_v55 = vpop.permute.xlu0 %764  ;;  %v11095_v57 = vcombine.high %v1276_v41, %v1280_v42 }
 0x286   : > { %7489 = vmatprep.subr.bf16.mxu0 %v11047_v58  ;;  %v1283_v58 = vld [vmem:[%s13123_s12 + $0xb40] sm:$0xff]  ;;  %767 = vst.msk [vmem:[#allocation3 + $0x18] sm:$0x3] %vm586_vm2, %v765_v55 }
 0x287   : > { %v1331_v55 = vld [vmem:[%s13123_s12 + $0xcc0] sm:$0xff] }
 0x288   : > { %7162 = vmatpush1.bf16.msra.mxu1 %v11044_v0  ;;  %v810_v0 = vpop.permute.xlu1 %809 }
 0x289   : > { %7490 = vmatpush1.bf16.msra.mxu0 %v11046_v1  ;;  %7163 = vmatprep.subr.bf16.mxu1 %v11053_v2  ;;  %v11094_v1 = vcombine.low %v1276_v41, %v1280_v42  ;;  %v11101_v2 = vcombine.high %v1283_v58, %v1287_v59  ;;  %812 = vst.msk [vmem:[#allocation3 + $0x1e] sm:$0x3] %vm586_vm2, %v810_v0  ;;  %v1324_v42 = vld [vmem:[%s13123_s12 + $0xc88] sm:$0xff] }
 0x28a   : > { %7491 = vmatprep.subr.bf16.mxu0 %v11055_v3  ;;  %v795_v3 = vpop.permute.xlu0 %794 }
 0x28b   : > { %797 = vst.msk [vmem:[#allocation3 + $0x1c] sm:$0x3] %vm586_vm2, %v795_v3  ;;  %v1340_v3 = vld [vmem:[%s13123_s12 + $0xd08] sm:$0xff] }
 0x28c   : > { %7164 = vmatpush1.bf16.msra.mxu1 %v11052_v52  ;;  %v1296_v52 = vld [vmem:[%s13123_s12 + $0xba8] sm:$0xff] }
 0x28d   : > { %7492 = vmatpush1.bf16.msra.mxu0 %v11054_v5  ;;  %7165 = vmatprep.subr.bf16.mxu1 %v11061_v6  ;;  %v11100_v5 = vcombine.low %v1283_v58, %v1287_v59  ;;  %v11102_v6 = vcombine.low %v1284_v60, %v1288_v62  ;;  %v11111_v8 = vcombine.high %v1292_v49, %v1296_v52  ;;  %v1332_v58 = vld [vmem:[%s13123_s12 + $0xcc8] sm:$0xff] }
 0x28e   : > { %7493 = vmatprep.subr.bf16.mxu0 %v11063_v7  ;;  %v11109_v7 = vcombine.high %v1291_v44, %v1295_v48  ;;  %v1336_v59 = vld [vmem:[%s13123_s12 + $0xce8] sm:$0xff] }
 0x28f   : > { %v11151_v0 = vcombine.high %v1332_v58, %v1336_v59 }
 0x290   : > { %7166 = vmatpush1.bf16.msra.mxu1 %v11060_v37  ;;  %v1304_v37 = vld [vmem:[%s13123_s12 + $0xbe8] sm:$0xff] }
 0x291   : > { %7494 = vmatpush1.bf16.msra.mxu0 %v11062_v11  ;;  %7167 = vmatprep.subr.bf16.mxu1 %v11069_v12  ;;  %v840_v11 = vcombine.high %v13414_v46, %v13414_v46  ;;  %v11108_v12 = vcombine.low %v1291_v44, %v1295_v48  ;;  %v11119_v39 = vcombine.high %v1300_v10, %v1304_v37 }
 0x292   : > { %7495 = vmatprep.subr.bf16.mxu0 %v11071_v13  ;;  %v11110_v13 = vcombine.low %v1292_v49, %v1296_v52  ;;  %v11116_v46 = vcombine.low %v1299_v9, %v1303_v32  ;;  %v11150_v48 = vcombine.low %v1332_v58, %v1336_v59  ;;  %v1387_v58 = vld [vmem:[%s13123_s12 + $0xe80] sm:$0xff] }
 0x293   : > { %v1391_v59 = vld [vmem:[%s13123_s12 + $0xea0] sm:$0xff] }
 0x294   : > { %7168 = vmatpush1.bf16.msra.mxu1 %v11068_v18  ;;  %v1308_v18 = vld [vmem:[%s13123_s12 + $0xc08] sm:$0xff] }
 0x295   : > { %7496 = vmatpush1.bf16.msra.mxu0 %v11070_v20  ;;  %7169 = vmatprep.subr.bf16.mxu1 %v11077_v21  ;;  %v13511_v20 = vrot.slane %v840_v11, %v13314_v22  ;;  %v11118_v21 = vcombine.low %v1300_v10, %v1304_v37  ;;  %v1355_v11 = vld [vmem:[%s13123_s12 + $0xd80] sm:$0xff] }
 0x296   : > { %7497 = vmatprep.subr.bf16.mxu0 %v11079_v24  ;;  %v11127_v24 = vcombine.high %v1308_v18, %v1312_v19 }
 0x297   : > { %v856_v25 = vcombine.high %v13511_v20, %v13511_v20 }
 0x298   : > { %7170 = vmatpush1.bf16.msra.mxu1 %v11076_v29  ;;  %v1316_v29 = vld [vmem:[%s13123_s12 + $0xc48] sm:$0xff] }
 0x299   : > { %7498 = vmatpush1.bf16.msra.mxu0 %v11078_v31  ;;  %7171 = vmatprep.subr.bf16.mxu1 %v11085_v33  ;;  %v13521_v31 = vpack.c.bf16 %v13422_v61, %v13422_v61  ;;  %v11126_v33 = vcombine.low %v1308_v18, %v1312_v19  ;;  %v13526_v38 = vpack.c.bf16 %v856_v25, %v856_v25  ;;  %v1363_v19 = vld [vmem:[%s13123_s12 + $0xdc0] sm:$0xff] }
 0x29a   : > { %7499 = vmatprep.subr.bf16.mxu0 %v11087_v35  ;;  %v1323_v35 = vld [vmem:[%s13123_s12 + $0xc80] sm:$0xff]  ;;  %v11135_v41 = vcombine.high %v1316_v29, %v1320_v30  ;;  %v11132_v61 = vcombine.low %v1315_v26, %v1319_v27  ;;  %v11134_v47 = vcombine.low %v1316_v29, %v1320_v30  ;;  %v1372_v30 = vld [vmem:[%s13123_s12 + $0xe08] sm:$0xff] }
 0x29b   : > { %v11140_v60 = vcombine.low %v1323_v35, %v1327_v36  ;;  %v1375_v29 = vld [vmem:[%s13123_s12 + $0xe20] sm:$0xff] }
 0x29c   : > { %7172 = vmatpush1.bf16.msra.mxu1 %v11084_v45  ;;  %v1328_v45 = vld [vmem:[%s13123_s12 + $0xca8] sm:$0xff] }
 0x29d   : > { %7500 = vmatpush1.bf16.msra.mxu0 %v11086_v53  ;;  %7173 = vmatprep.subr.bf16.mxu1 %v11093_v54  ;;  %v11141_v53 = vcombine.high %v1323_v35, %v1327_v36  ;;  %v11143_v54 = vcombine.high %v1324_v42, %v1328_v45  ;;  %v11142_v62 = vcombine.low %v1324_v42, %v1328_v45  ;;  %v1379_v42 = vld [vmem:[%s13123_s12 + $0xe40] sm:$0xff] }
 0x29e   : > { %7501 = vmatprep.subr.bf16.mxu0 %v11095_v57  ;;  %v1335_v57 = vld [vmem:[%s13123_s12 + $0xce0] sm:$0xff] }
 0x29f   : > { %v11148_v44 = vcombine.low %v1331_v55, %v1335_v57  ;;  %v1383_v45 = vld [vmem:[%s13123_s12 + $0xe60] sm:$0xff] }
 0x2a0   : > { %7174 = vmatpush1.bf16.msra.mxu1 %v11092_v63  ;;  %v11149_v63 = vcombine.high %v1331_v55, %v1335_v57  ;;  %v11197_v55 = vcombine.high %v1379_v42, %v1383_v45 }
 0x2a1   : > { %7502 = vmatpush1.bf16.msra.mxu0 %v11094_v1  ;;  %7175 = vmatprep.subr.bf16.mxu1 %v11101_v2  ;;  %v1339_v1 = vld [vmem:[%s13123_s12 + $0xd00] sm:$0xff] }
 0x2a2   : > { %7503 = vmatprep.subr.bf16.mxu0 %v11103_v43  ;;  %v1343_v2 = vld [vmem:[%s13123_s12 + $0xd20] sm:$0xff]  ;;  %v1344_v43 = vld [vmem:[%s13123_s12 + $0xd28] sm:$0xff] }
 0x2a3   : > { %v11157_v49 = vcombine.high %v1339_v1, %v1343_v2  ;;  %v11159_v52 = vcombine.high %v1340_v3, %v1344_v43  ;;  %v11156_v9 = vcombine.low %v1339_v1, %v1343_v2  ;;  %v11158_v32 = vcombine.low %v1340_v3, %v1344_v43  ;;  %v1395_v3 = vld [vmem:[%s13123_s12 + $0xec0] sm:$0xff] }
 0x2a4   : > { %7176 = vmatpush1.bf16.msra.mxu1 %v11100_v5  ;;  %v1347_v5 = vld [vmem:[%s13123_s12 + $0xd40] sm:$0xff]  ;;  %v11205_v1 = vcombine.high %v1387_v58, %v1391_v59 }
 0x2a5   : > { %7504 = vmatpush1.bf16.msra.mxu0 %v11102_v6  ;;  %7177 = vmatprep.subr.bf16.mxu1 %v11109_v7  ;;  %v1351_v6 = vld [vmem:[%s13123_s12 + $0xd60] sm:$0xff]  ;;  %v1348_v7 = vld [vmem:[%s13123_s12 + $0xd48] sm:$0xff] }
 0x2a6   : > { %7505 = vmatprep.subr.bf16.mxu0 %v11111_v8  ;;  %v1352_v8 = vld [vmem:[%s13123_s12 + $0xd68] sm:$0xff]  ;;  %v11165_v10 = vcombine.high %v1347_v5, %v1351_v6  ;;  %v1399_v43 = vld [vmem:[%s13123_s12 + $0xee0] sm:$0xff] }
 0x2a7   : > { %v11167_v37 = vcombine.high %v1348_v7, %v1352_v8  ;;  %v11166_v15 = vcombine.low %v1348_v7, %v1352_v8  ;;  %v1403_v7 = vld [vmem:[%s13123_s12 + $0xf00] sm:$0xff] }
 0x2a8   : > { %7178 = vmatpush1.bf16.msra.mxu1 %v11108_v12  ;;  %v1359_v12 = vld [vmem:[%s13123_s12 + $0xda0] sm:$0xff] }
 0x2a9   : > { %7506 = vmatpush1.bf16.msra.mxu0 %v11110_v13  ;;  %7179 = vmatprep.subr.bf16.mxu1 %v11117_v14  ;;  %v1356_v13 = vld [vmem:[%s13123_s12 + $0xd88] sm:$0xff]  ;;  %v11173_v16 = vcombine.high %v1355_v11, %v1359_v12  ;;  %v1407_v8 = vld [vmem:[%s13123_s12 + $0xf20] sm:$0xff] }
 0x2aa   : > { %7507 = vmatprep.subr.bf16.mxu0 %v11119_v39  ;;  %v1360_v14 = vld [vmem:[%s13123_s12 + $0xda8] sm:$0xff]  ;;  %v11164_v39 = vcombine.low %v1347_v5, %v1351_v6  ;;  %v11213_v5 = vcombine.high %v1395_v3, %v1399_v43 }
 0x2ab   : > { %v11175_v18 = vcombine.high %v1356_v13, %v1360_v14  ;;  %v11174_v25 = vcombine.low %v1356_v13, %v1360_v14  ;;  %v1411_v13 = vld [vmem:[%s13123_s12 + $0xf40] sm:$0xff] }
 0x2ac   : > { %7180 = vmatpush1.bf16.msra.mxu1 %v11116_v46  ;;  %v1367_v46 = vld [vmem:[%s13123_s12 + $0xde0] sm:$0xff] }
 0x2ad   : > { %7508 = vmatpush1.bf16.msra.mxu0 %v11118_v21  ;;  %7190 = vmatprep.subr.bf16.mxu1 %v11125_v23  ;;  %v1364_v21 = vld [vmem:[%s13123_s12 + $0xdc8] sm:$0xff]  ;;  %v11181_v26 = vcombine.high %v1363_v19, %v1367_v46  ;;  %v1415_v14 = vld [vmem:[%s13123_s12 + $0xf60] sm:$0xff] }
 0x2ae   : > { %7518 = vmatprep.subr.bf16.mxu0 %v11127_v24  ;;  %v1368_v23 = vld [vmem:[%s13123_s12 + $0xde8] sm:$0xff]  ;;  %v11172_v24 = vcombine.low %v1355_v11, %v1359_v12  ;;  %v11221_v11 = vcombine.high %v1403_v7, %v1407_v8 }
 0x2af   : > { %7182 = vmatmul.mubr.bf16.vlgmr.msra.gmra.mrb[0].mxu1 %v13521_v31  ;;  %v11183_v27 = vcombine.high %v1364_v21, %v1368_v23  ;;  %v11182_v35 = vcombine.low %v1364_v21, %v1368_v23  ;;  %v1419_v21 = vld [vmem:[%s13123_s12 + $0xf80] sm:$0xff] }
 0x2b0   : > { %7510 = vmatmul.mubr.bf16.vlgmr.msra.gmra.mrb[8].mxu0 %v13521_v31  ;;  %7191 = vmatpush1.bf16.msra.mxu1 %v11124_v28  ;;  %v1371_v28 = vld [vmem:[%s13123_s12 + $0xe00] sm:$0xff] }
 0x2b1   : > { %7222 = vmatprep.mubr.bf16.mxu1 %v13526_v38  ;;  %7519 = vmatpush1.bf16.msra.mxu0 %v11126_v33  ;;  %v1376_v33 = vld [vmem:[%s13123_s12 + $0xe28] sm:$0xff]  ;;  %v11189_v36 = vcombine.high %v1371_v28, %v1375_v29  ;;  %v1423_v23 = vld [vmem:[%s13123_s12 + $0xfa0] sm:$0xff] }
 0x2b2   : > { %7550 = vmatprep.mubr.bf16.mxu0 %v13526_v38  ;;  %7192 = vmatprep.subr.bf16.mxu1 %v11133_v34  ;;  %v11180_v34 = vcombine.low %v1363_v19, %v1367_v46  ;;  %v11229_v19 = vcombine.high %v1411_v13, %v1415_v14 }
 0x2b3   : > { %7520 = vmatprep.subr.bf16.mxu0 %v11135_v41  ;;  %v11191_v41 = vcombine.high %v1372_v30, %v1376_v33 }
 0x2b4   : > { %7193 = vmatpush1.bf16.msra.mxu1 %v11132_v61  ;;  %v1380_v61 = vld [vmem:[%s13123_s12 + $0xe48] sm:$0xff] }
 0x2b5   : > { %7521 = vmatpush1.bf16.msra.mxu0 %v11134_v47  ;;  %7194 = vmatprep.subr.bf16.mxu1 %v11141_v53  ;;  %v1384_v47 = vld [vmem:[%s13123_s12 + $0xe68] sm:$0xff]  ;;  %v11188_v53 = vcombine.low %v1371_v28, %v1375_v29  ;;  %v11237_v28 = vcombine.high %v1419_v21, %v1423_v23 }
 0x2b6   : > { %7522 = vmatprep.subr.bf16.mxu0 %v11143_v54  ;;  %v11190_v54 = vcombine.low %v1372_v30, %v1376_v33  ;;  %v11199_v57 = vcombine.high %v1380_v61, %v1384_v47  ;;  %v1427_v30 = vld [vmem:[%s13123_s12 + $0xfc0] sm:$0xff] }
 0x2b7   : > { %v1431_v33 = vld [vmem:[%s13123_s12 + $0xfe0] sm:$0xff] }
 0x2b8   : > { %7195 = vmatpush1.bf16.msra.mxu1 %v11140_v60  ;;  %v1388_v60 = vld [vmem:[%s13123_s12 + $0xe88] sm:$0xff] }
 0x2b9   : > { %7523 = vmatpush1.bf16.msra.mxu0 %v11142_v62  ;;  %7196 = vmatprep.subr.bf16.mxu1 %v11149_v63  ;;  %v1392_v62 = vld [vmem:[%s13123_s12 + $0xea8] sm:$0xff]  ;;  %v11196_v63 = vcombine.low %v1379_v42, %v1383_v45  ;;  %v11245_v45 = vcombine.high %v1427_v30, %v1431_v33 }
 0x2ba   : > { %7524 = vmatprep.subr.bf16.mxu0 %v11151_v0  ;;  %v11198_v0 = vcombine.low %v1380_v61, %v1384_v47  ;;  %v11207_v2 = vcombine.high %v1388_v60, %v1392_v62  ;;  %v1435_v47 = vld [vmem:[%s13123_s12 + $0x1000] sm:$0xff] }
 0x2bc   : > { %7197 = vmatpush1.bf16.msra.mxu1 %v11148_v44  ;;  %v1396_v44 = vld [vmem:[%s13123_s12 + $0xec8] sm:$0xff] }
 0x2bd   : > { %7525 = vmatpush1.bf16.msra.mxu0 %v11150_v48  ;;  %7198 = vmatprep.subr.bf16.mxu1 %v11157_v49  ;;  %v1400_v48 = vld [vmem:[%s13123_s12 + $0xee8] sm:$0xff]  ;;  %v11204_v49 = vcombine.low %v1387_v58, %v1391_v59  ;;  %v11244_v58 = vcombine.low %v1427_v30, %v1431_v33 }
 0x2be   : > { %7526 = vmatprep.subr.bf16.mxu0 %v11159_v52  ;;  %v11206_v52 = vcombine.low %v1388_v60, %v1392_v62  ;;  %v11215_v6 = vcombine.high %v1396_v44, %v1400_v48  ;;  %v1476_v30 = vld [vmem:[%s13123_s12 + $0x1148] sm:$0xff] }
 0x2bf   : > { %v1480_v33 = vld [vmem:[%s13123_s12 + $0x1168] sm:$0xff] }
 0x2c0   : > { %7199 = vmatpush1.bf16.msra.mxu1 %v11156_v9  ;;  %v1404_v9 = vld [vmem:[%s13123_s12 + $0xf08] sm:$0xff] }
 0x2c1   : > { %7527 = vmatpush1.bf16.msra.mxu0 %v11158_v32  ;;  %7200 = vmatprep.subr.bf16.mxu1 %v11165_v10  ;;  %v1408_v32 = vld [vmem:[%s13123_s12 + $0xf28] sm:$0xff]  ;;  %v11212_v10 = vcombine.low %v1395_v3, %v1399_v43 }
 0x2c2   : > { %7528 = vmatprep.subr.bf16.mxu0 %v11167_v37  ;;  %v11214_v37 = vcombine.low %v1396_v44, %v1400_v48  ;;  %v11223_v12 = vcombine.high %v1404_v9, %v1408_v32  ;;  %v1448_v3 = vld [vmem:[%s13123_s12 + $0x1068] sm:$0xff]  ;;  %v13603_v44 = vpack.c.bf16 %v13511_v20, %v13511_v20 }
 0x2c4   : > { %7201 = vmatpush1.bf16.msra.mxu1 %v11164_v39  ;;  %v1412_v39 = vld [vmem:[%s13123_s12 + $0xf48] sm:$0xff] }
 0x2c5   : > { %7529 = vmatpush1.bf16.msra.mxu0 %v11166_v15  ;;  %7202 = vmatprep.subr.bf16.mxu1 %v11173_v16  ;;  %v1416_v15 = vld [vmem:[%s13123_s12 + $0xf68] sm:$0xff]  ;;  %v11220_v16 = vcombine.low %v1403_v7, %v1407_v8 }
 0x2c6   : > { %7530 = vmatprep.subr.bf16.mxu0 %v11175_v18  ;;  %v11222_v18 = vcombine.low %v1404_v9, %v1408_v32  ;;  %v11231_v46 = vcombine.high %v1412_v39, %v1416_v15  ;;  %v1452_v8 = vld [vmem:[%s13123_s12 + $0x1088] sm:$0xff] }
 0x2c7   : > { %v1456_v9 = vld [vmem:[%s13123_s12 + $0x10a8] sm:$0xff] }
 0x2c8   : > { %7203 = vmatpush1.bf16.msra.mxu1 %v11172_v24  ;;  %v1420_v24 = vld [vmem:[%s13123_s12 + $0xf88] sm:$0xff] }
 0x2c9   : > { %7531 = vmatpush1.bf16.msra.mxu0 %v11174_v25  ;;  %7204 = vmatprep.subr.bf16.mxu1 %v11181_v26  ;;  %v1424_v25 = vld [vmem:[%s13123_s12 + $0xfa8] sm:$0xff]  ;;  %v11228_v26 = vcombine.low %v1411_v13, %v1415_v14 }
 0x2ca   : > { %7532 = vmatprep.subr.bf16.mxu0 %v11183_v27  ;;  %v11230_v27 = vcombine.low %v1412_v39, %v1416_v15  ;;  %v11239_v29 = vcombine.high %v1420_v24, %v1424_v25  ;;  %v11238_v42 = vcombine.low %v1420_v24, %v1424_v25  ;;  %v1460_v13 = vld [vmem:[%s13123_s12 + $0x10c8] sm:$0xff]  ;;  %v11270_v15 = vcombine.low %v1452_v8, %v1456_v9 }
 0x2cb   : > { %v1464_v14 = vld [vmem:[%s13123_s12 + $0x10e8] sm:$0xff] }
 0x2cc   : > { %7205 = vmatpush1.bf16.msra.mxu1 %v11180_v34  ;;  %v1428_v34 = vld [vmem:[%s13123_s12 + $0xfc8] sm:$0xff]  ;;  %v11278_v25 = vcombine.low %v1460_v13, %v1464_v14 }
 0x2cd   : > { %7533 = vmatpush1.bf16.msra.mxu0 %v11182_v35  ;;  %7206 = vmatprep.subr.bf16.mxu1 %v11189_v36  ;;  %v1432_v35 = vld [vmem:[%s13123_s12 + $0xfe8] sm:$0xff] }
 0x2ce   : > { %7534 = vmatprep.subr.bf16.mxu0 %v11191_v41  ;;  %v13585_v36 = vld [vmem:[#allocation3 + $0x10] sm:$0xff]  ;;  %v11236_v41 = vcombine.low %v1419_v21, %v1423_v23  ;;  %v11247_v61 = vcombine.high %v1428_v34, %v1432_v35  ;;  %v11246_v59 = vcombine.low %v1428_v34, %v1432_v35 }
 0x2cf   : > { %v1468_v21 = vld [vmem:[%s13123_s12 + $0x1108] sm:$0xff] }
 0x2d0   : > { %7207 = vmatpush1.bf16.msra.mxu1 %v11188_v53  ;;  %v1439_v53 = vld [vmem:[%s13123_s12 + $0x1020] sm:$0xff]  ;;  %v1472_v23 = vld [vmem:[%s13123_s12 + $0x1128] sm:$0xff] }
 0x2d1   : > { %7535 = vmatpush1.bf16.msra.mxu0 %v11190_v54  ;;  %7208 = vmatprep.subr.bf16.mxu1 %v11197_v55  ;;  %v13591_v54 = vrot.slane %v13585_v36, %v13314_v22  ;;  %v1436_v55 = vld [vmem:[%s13123_s12 + $0x1008] sm:$0xff]  ;;  %v11253_v60 = vcombine.high %v1435_v47, %v1439_v53  ;;  %v11252_v43 = vcombine.low %v1435_v47, %v1439_v53 }
 0x2d2   : > { %7536 = vmatprep.subr.bf16.mxu0 %v11199_v57  ;;  %v1440_v57 = vld [vmem:[%s13123_s12 + $0x1028] sm:$0xff]  ;;  %v11286_v35 = vcombine.low %v1468_v21, %v1472_v23 }
 0x2d3   : > { %v11255_v62 = vcombine.high %v1436_v55, %v1440_v57  ;;  %v11254_v48 = vcombine.low %v1436_v55, %v1440_v57  ;;  %v1484_v47 = vld [vmem:[%s13123_s12 + $0x1188] sm:$0xff]  ;;  %v11294_v57 = vcombine.low %v1476_v30, %v1480_v33 }
 0x2d4   : > { %7209 = vmatpush1.bf16.msra.mxu1 %v11196_v63  ;;  %v1443_v63 = vld [vmem:[%s13123_s12 + $0x1040] sm:$0xff]  ;;  %v1488_v53 = vld [vmem:[%s13123_s12 + $0x11a8] sm:$0xff] }
 0x2d5   : > { %7537 = vmatpush1.bf16.msra.mxu0 %v11198_v0  ;;  %7210 = vmatprep.subr.bf16.mxu1 %v11205_v1  ;;  %v1447_v0 = vld [vmem:[%s13123_s12 + $0x1060] sm:$0xff]  ;;  %v872_v1 = vcombine.high %v13591_v54, %v13591_v54 }
 0x2d6   : > { %7538 = vmatprep.subr.bf16.mxu0 %v11207_v2  ;;  %v1444_v2 = vld [vmem:[%s13123_s12 + $0x1048] sm:$0xff]  ;;  %v11260_v20 = vcombine.low %v1443_v63, %v1447_v0 }
 0x2d7   : > { %v13607_v7 = vpack.c.bf16 %v872_v1, %v872_v1  ;;  %v11262_v32 = vcombine.low %v1444_v2, %v1448_v3 }
 0x2d8   : > { %7211 = vmatpush1.bf16.msra.mxu1 %v11204_v49  ;;  %v11261_v49 = vcombine.high %v1443_v63, %v1447_v0  ;;  %v1492_v63 = vld [vmem:[%s13123_s12 + $0x11c8] sm:$0xff] }
 0x2d9   : > { %7539 = vmatpush1.bf16.msra.mxu0 %v11206_v52  ;;  %7212 = vmatprep.subr.bf16.mxu1 %v11213_v5  ;;  %v11263_v52 = vcombine.high %v1444_v2, %v1448_v3  ;;  %v1451_v5 = vld [vmem:[%s13123_s12 + $0x1080] sm:$0xff]  ;;  %v1496_v0 = vld [vmem:[%s13123_s12 + $0x11e8] sm:$0xff]  ;;  %v11302_v2 = vcombine.low %v1484_v47, %v1488_v53 }
 0x2da   : > { %7540 = vmatprep.subr.bf16.mxu0 %v11215_v6  ;;  %v1455_v6 = vld [vmem:[%s13123_s12 + $0x10a0] sm:$0xff] }
 0x2db   : > { %v11268_v39 = vcombine.low %v1451_v5, %v1455_v6 }
 0x2dc   : > { %7213 = vmatpush1.bf16.msra.mxu1 %v11212_v10  ;;  %v11269_v10 = vcombine.high %v1451_v5, %v1455_v6  ;;  %v1504_v5 = vld [vmem:[%s13123_s12 + $0x1228] sm:$0xff] }
 0x2dd   : > { %7541 = vmatpush1.bf16.msra.mxu0 %v11214_v37  ;;  %7214 = vmatprep.subr.bf16.mxu1 %v11221_v11  ;;  %v11271_v37 = vcombine.high %v1452_v8, %v1456_v9  ;;  %v1459_v11 = vld [vmem:[%s13123_s12 + $0x10c0] sm:$0xff]  ;;  %v11310_v8 = vcombine.low %v1492_v63, %v1496_v0 }
 0x2de   : > { %7542 = vmatprep.subr.bf16.mxu0 %v11223_v12  ;;  %v1463_v12 = vld [vmem:[%s13123_s12 + $0x10e0] sm:$0xff] }
 0x2df   : > { %v11276_v24 = vcombine.low %v1459_v11, %v1463_v12 }
 0x2e0   : > { %7215 = vmatpush1.bf16.msra.mxu1 %v11220_v16  ;;  %v11277_v16 = vcombine.high %v1459_v11, %v1463_v12  ;;  %v1512_v11 = vld [vmem:[%s13123_s12 + $0x1268] sm:$0xff] }
 0x2e1   : > { %7543 = vmatpush1.bf16.msra.mxu0 %v11222_v18  ;;  %7216 = vmatprep.subr.bf16.mxu1 %v11229_v19  ;;  %v11279_v18 = vcombine.high %v1460_v13, %v1464_v14  ;;  %v1467_v19 = vld [vmem:[%s13123_s12 + $0x1100] sm:$0xff] }
 0x2e2   : > { %7544 = vmatprep.subr.bf16.mxu0 %v11231_v46  ;;  %v1471_v46 = vld [vmem:[%s13123_s12 + $0x1120] sm:$0xff] }
 0x2e3   : > { %v11284_v34 = vcombine.low %v1467_v19, %v1471_v46 }
 0x2e4   : > { %7217 = vmatpush1.bf16.msra.mxu1 %v11228_v26  ;;  %v11285_v26 = vcombine.high %v1467_v19, %v1471_v46  ;;  %v1520_v19 = vld [vmem:[%s13123_s12 + $0x12a8] sm:$0xff] }
 0x2e5   : > { %7545 = vmatpush1.bf16.msra.mxu0 %v11230_v27  ;;  %7218 = vmatprep.subr.bf16.mxu1 %v11237_v28  ;;  %v11287_v27 = vcombine.high %v1468_v21, %v1472_v23  ;;  %v1475_v28 = vld [vmem:[%s13123_s12 + $0x1140] sm:$0xff] }
 0x2e6   : > { %7546 = vmatprep.subr.bf16.mxu0 %v11239_v29  ;;  %v1479_v29 = vld [vmem:[%s13123_s12 + $0x1160] sm:$0xff] }
 0x2e7   : > { %v11292_v55 = vcombine.low %v1475_v28, %v1479_v29 }
 0x2e8   : > { %7219 = vmatpush1.bf16.msra.mxu1 %v11236_v41  ;;  %v11293_v41 = vcombine.high %v1475_v28, %v1479_v29  ;;  %v1528_v28 = vld [vmem:[%s13123_s12 + $0x12e8] sm:$0xff] }
 0x2e9   : > { %7547 = vmatpush1.bf16.msra.mxu0 %v11238_v42  ;;  %7220 = vmatprep.subr.bf16.mxu1 %v11245_v45  ;;  %v11295_v42 = vcombine.high %v1476_v30, %v1480_v33  ;;  %v1483_v45 = vld [vmem:[%s13123_s12 + $0x1180] sm:$0xff] }
 0x2ea   : > { %7548 = vmatprep.subr.bf16.mxu0 %v11247_v61  ;;  %v1487_v61 = vld [vmem:[%s13123_s12 + $0x11a0] sm:$0xff] }
 0x2eb   : > { %v11300_v1 = vcombine.low %v1483_v45, %v1487_v61 }
 0x2ec   : > { %7221 = vmatpush1.bf16.msra.mxu1 %v11244_v58  ;;  %v11301_v58 = vcombine.high %v1483_v45, %v1487_v61  ;;  %v1536_v45 = vld [vmem:[%s13123_s12 + $0x1328] sm:$0xff] }
 0x2ed   : > { %7549 = vmatpush1.bf16.msra.mxu0 %v11246_v59  ;;  %7231 = vmatprep.subr.bf16.mxu1 %v11253_v60  ;;  %v11303_v59 = vcombine.high %v1484_v47, %v1488_v53  ;;  %v1491_v60 = vld [vmem:[%s13123_s12 + $0x11c0] sm:$0xff] }
 0x2ee   : > { %7559 = vmatprep.subr.bf16.mxu0 %v11255_v62  ;;  %v1495_v62 = vld [vmem:[%s13123_s12 + $0x11e0] sm:$0xff] }
 0x2ef   : > { %7223 = vmatmul.mubr.bf16.vlgmr.msra.gmra.mrb[0].mxu1 %v13603_v44  ;;  %v11309_v3 = vcombine.high %v1491_v60, %v1495_v62  ;;  %v11308_v6 = vcombine.low %v1491_v60, %v1495_v62  ;;  %v1544_v60 = vld [vmem:[%s13123_s12 + $0x1368] sm:$0xff] }
 0x2f0   : > { %7551 = vmatmul.mubr.bf16.vlgmr.msra.gmra.mrb[8].mxu0 %v13603_v44  ;;  %7232 = vmatpush1.bf16.msra.mxu1 %v11252_v43  ;;  %v11311_v43 = vcombine.high %v1492_v63, %v1496_v0 }
 0x2f1   : > { %7560 = vmatpush1.bf16.msra.mxu0 %v11254_v48  ;;  %7233 = vmatprep.subr.bf16.mxu1 %v11261_v49  ;;  %v1499_v48 = vld [vmem:[%s13123_s12 + $0x1200] sm:$0xff] }
 0x2f2   : > { %7561 = vmatprep.subr.bf16.mxu0 %v11263_v52  ;;  %7263 = vmatprep.mubr.bf16.mxu1 %v13607_v7  ;;  %v1503_v49 = vld [vmem:[%s13123_s12 + $0x1220] sm:$0xff]  ;;  %v1500_v52 = vld [vmem:[%s13123_s12 + $0x1208] sm:$0xff] }
 0x2f3   : > { %7591 = vmatprep.mubr.bf16.mxu0 %v13607_v7  ;;  %v11317_v9 = vcombine.high %v1499_v48, %v1503_v49  ;;  %v11316_v12 = vcombine.low %v1499_v48, %v1503_v49  ;;  %v11318_v13 = vcombine.low %v1500_v52, %v1504_v5  ;;  %v1552_v48 = vld [vmem:[%s13123_s12 + $0x13a8] sm:$0xff] }
 0x2f4   : > { %7234 = vmatpush1.bf16.msra.mxu1 %v11260_v20  ;;  %v11319_v20 = vcombine.high %v1500_v52, %v1504_v5 }
 0x2f5   : > { %7562 = vmatpush1.bf16.msra.mxu0 %v11262_v32  ;;  %7235 = vmatprep.subr.bf16.mxu1 %v11269_v10  ;;  %v1507_v32 = vld [vmem:[%s13123_s12 + $0x1240] sm:$0xff] }
 0x2f6   : > { %7563 = vmatprep.subr.bf16.mxu0 %v11271_v37  ;;  %v1511_v10 = vld [vmem:[%s13123_s12 + $0x1260] sm:$0xff]  ;;  %v1508_v37 = vld [vmem:[%s13123_s12 + $0x1248] sm:$0xff] }
 0x2f7   : > { %v11325_v14 = vcombine.high %v1507_v32, %v1511_v10  ;;  %v11324_v46 = vcombine.low %v1507_v32, %v1511_v10  ;;  %v11326_v21 = vcombine.low %v1508_v37, %v1512_v11  ;;  %v1560_v32 = vld [vmem:[%s13123_s12 + $0x13e8] sm:$0xff]  ;;  %v857_v10 = vcombine.high %v13585_v36, %v13585_v36 }
 0x2f8   : > { %7236 = vmatpush1.bf16.msra.mxu1 %v11268_v39  ;;  %v11327_v39 = vcombine.high %v1508_v37, %v1512_v11 }
 0x2f9   : > { %7564 = vmatpush1.bf16.msra.mxu0 %v11270_v15  ;;  %7237 = vmatprep.subr.bf16.mxu1 %v11277_v16  ;;  %v1515_v15 = vld [vmem:[%s13123_s12 + $0x1280] sm:$0xff] }
 0x2fa   : > { %7565 = vmatprep.subr.bf16.mxu0 %v11279_v18  ;;  %v1519_v16 = vld [vmem:[%s13123_s12 + $0x12a0] sm:$0xff]  ;;  %v1516_v18 = vld [vmem:[%s13123_s12 + $0x1288] sm:$0xff] }
 0x2fb   : > { %v11333_v23 = vcombine.high %v1515_v15, %v1519_v16  ;;  %v11332_v29 = vcombine.low %v1515_v15, %v1519_v16  ;;  %v11334_v30 = vcombine.low %v1516_v18, %v1520_v19  ;;  %v1564_v15 = vld [vmem:[%s13123_s12 + $0x1408] sm:$0xff] }
 0x2fc   : > { %7238 = vmatpush1.bf16.msra.mxu1 %v11276_v24  ;;  %v11335_v24 = vcombine.high %v1516_v18, %v1520_v19  ;;  %v1568_v16 = vld [vmem:[%s13123_s12 + $0x1428] sm:$0xff]  ;;  %v13674_v18 = vrot.slane %v857_v10, %v13314_v22 }
 0x2fd   : > { %7566 = vmatpush1.bf16.msra.mxu0 %v11278_v25  ;;  %7239 = vmatprep.subr.bf16.mxu1 %v11285_v26  ;;  %v1523_v25 = vld [vmem:[%s13123_s12 + $0x12c0] sm:$0xff] }
 0x2fe   : > { %7567 = vmatprep.subr.bf16.mxu0 %v11287_v27  ;;  %v1527_v26 = vld [vmem:[%s13123_s12 + $0x12e0] sm:$0xff]  ;;  %v1524_v27 = vld [vmem:[%s13123_s12 + $0x12c8] sm:$0xff] }
 0x2ff   : > { %v11341_v33 = vcombine.high %v1523_v25, %v1527_v26  ;;  %v11340_v61 = vcombine.low %v1523_v25, %v1527_v26  ;;  %v11342_v47 = vcombine.low %v1524_v27, %v1528_v28  ;;  %v1575_v25 = vld [vmem:[%s13123_s12 + $0x1460] sm:$0xff] }
 0x300   : > { %7240 = vmatpush1.bf16.msra.mxu1 %v11284_v34  ;;  %v11343_v34 = vcombine.high %v1524_v27, %v1528_v28  ;;  %v1572_v27 = vld [vmem:[%s13123_s12 + $0x1448] sm:$0xff] }
 0x301   : > { %7568 = vmatpush1.bf16.msra.mxu0 %v11286_v35  ;;  %7241 = vmatprep.subr.bf16.mxu1 %v11293_v41  ;;  %v1531_v35 = vld [vmem:[%s13123_s12 + $0x1300] sm:$0xff]  ;;  %v1576_v28 = vld [vmem:[%s13123_s12 + $0x1468] sm:$0xff] }
 0x302   : > { %7569 = vmatprep.subr.bf16.mxu0 %v11295_v42  ;;  %v1535_v41 = vld [vmem:[%s13123_s12 + $0x1320] sm:$0xff]  ;;  %v1532_v42 = vld [vmem:[%s13123_s12 + $0x1308] sm:$0xff] }
 0x303   : > { %v11349_v53 = vcombine.high %v1531_v35, %v1535_v41  ;;  %v11348_v62 = vcombine.low %v1531_v35, %v1535_v41  ;;  %v11350_v63 = vcombine.low %v1532_v42, %v1536_v45  ;;  %v1583_v35 = vld [vmem:[%s13123_s12 + $0x14a0] sm:$0xff] }
 0x304   : > { %7242 = vmatpush1.bf16.msra.mxu1 %v11292_v55  ;;  %v11351_v55 = vcombine.high %v1532_v42, %v1536_v45  ;;  %v11391_v42 = vcombine.high %v1572_v27, %v1576_v28  ;;  %v1580_v45 = vld [vmem:[%s13123_s12 + $0x1488] sm:$0xff] }
 0x305   : > { %7570 = vmatpush1.bf16.msra.mxu0 %v11294_v57  ;;  %7243 = vmatprep.subr.bf16.mxu1 %v11301_v58  ;;  %v1539_v57 = vld [vmem:[%s13123_s12 + $0x1340] sm:$0xff] }
 0x306   : > { %7571 = vmatprep.subr.bf16.mxu0 %v11303_v59  ;;  %v1543_v58 = vld [vmem:[%s13123_s12 + $0x1360] sm:$0xff]  ;;  %v1540_v59 = vld [vmem:[%s13123_s12 + $0x1348] sm:$0xff] }
 0x307   : > { %v11357_v0 = vcombine.high %v1539_v57, %v1543_v58  ;;  %v11356_v49 = vcombine.low %v1539_v57, %v1543_v58  ;;  %v11358_v52 = vcombine.low %v1540_v59, %v1544_v60  ;;  %v1587_v57 = vld [vmem:[%s13123_s12 + $0x14c0] sm:$0xff] }
 0x308   : > { %7244 = vmatpush1.bf16.msra.mxu1 %v11300_v1  ;;  %v11359_v1 = vcombine.high %v1540_v59, %v1544_v60  ;;  %v1591_v58 = vld [vmem:[%s13123_s12 + $0x14e0] sm:$0xff]  ;;  %v1588_v59 = vld [vmem:[%s13123_s12 + $0x14c8] sm:$0xff] }
 0x309   : > { %7572 = vmatpush1.bf16.msra.mxu0 %v11302_v2  ;;  %7245 = vmatprep.subr.bf16.mxu1 %v11309_v3  ;;  %v1547_v2 = vld [vmem:[%s13123_s12 + $0x1380] sm:$0xff]  ;;  %v1592_v60 = vld [vmem:[%s13123_s12 + $0x14e8] sm:$0xff] }
 0x30a   : > { %7573 = vmatprep.subr.bf16.mxu0 %v11311_v43  ;;  %v1551_v3 = vld [vmem:[%s13123_s12 + $0x13a0] sm:$0xff]  ;;  %v1548_v43 = vld [vmem:[%s13123_s12 + $0x1388] sm:$0xff] }
 0x30b   : > { %v11365_v5 = vcombine.high %v1547_v2, %v1551_v3  ;;  %v11364_v37 = vcombine.low %v1547_v2, %v1551_v3  ;;  %v11366_v11 = vcombine.low %v1548_v43, %v1552_v48  ;;  %v1595_v2 = vld [vmem:[%s13123_s12 + $0x1500] sm:$0xff] }
 0x30c   : > { %7246 = vmatpush1.bf16.msra.mxu1 %v11308_v6  ;;  %v11367_v6 = vcombine.high %v1548_v43, %v1552_v48  ;;  %v1599_v3 = vld [vmem:[%s13123_s12 + $0x1520] sm:$0xff]  ;;  %v1596_v43 = vld [vmem:[%s13123_s12 + $0x1508] sm:$0xff] }
 0x30d   : > { %7574 = vmatpush1.bf16.msra.mxu0 %v11310_v8  ;;  %7247 = vmatprep.subr.bf16.mxu1 %v11317_v9  ;;  %v1555_v8 = vld [vmem:[%s13123_s12 + $0x13c0] sm:$0xff]  ;;  %v1600_v48 = vld [vmem:[%s13123_s12 + $0x1528] sm:$0xff]  ;;  %v11412_v10 = vcombine.low %v1595_v2, %v1599_v3 }
 0x30e   : > { %7575 = vmatprep.subr.bf16.mxu0 %v11319_v20  ;;  %v1559_v9 = vld [vmem:[%s13123_s12 + $0x13e0] sm:$0xff]  ;;  %v1556_v20 = vld [vmem:[%s13123_s12 + $0x13c8] sm:$0xff] }
 0x30f   : > { %v11372_v36 = vcombine.low %v1555_v8, %v1559_v9  ;;  %v11374_v19 = vcombine.low %v1556_v20, %v1560_v32 }
 0x310   : > { %7248 = vmatpush1.bf16.msra.mxu1 %v11316_v12  ;;  %v11373_v12 = vcombine.high %v1555_v8, %v1559_v9  ;;  %v1603_v8 = vld [vmem:[%s13123_s12 + $0x1540] sm:$0xff] }
 0x311   : > { %7576 = vmatpush1.bf16.msra.mxu0 %v11318_v13  ;;  %7249 = vmatprep.subr.bf16.mxu1 %v11325_v14  ;;  %v11375_v13 = vcombine.high %v1556_v20, %v1560_v32  ;;  %v1563_v14 = vld [vmem:[%s13123_s12 + $0x1400] sm:$0xff]  ;;  %v1604_v20 = vld [vmem:[%s13123_s12 + $0x1548] sm:$0xff] }
 0x312   : > { %7577 = vmatprep.subr.bf16.mxu0 %v11327_v39  ;;  %v1567_v39 = vld [vmem:[%s13123_s12 + $0x1420] sm:$0xff]  ;;  %v1608_v32 = vld [vmem:[%s13123_s12 + $0x1568] sm:$0xff] }
 0x313   : > { %v11380_v26 = vcombine.low %v1563_v14, %v1567_v39  ;;  %v1607_v9 = vld [vmem:[%s13123_s12 + $0x1560] sm:$0xff] }
 0x314   : > { %7250 = vmatpush1.bf16.msra.mxu1 %v11324_v46  ;;  %v11381_v46 = vcombine.high %v1563_v14, %v1567_v39  ;;  %v1615_v14 = vld [vmem:[%s13123_s12 + $0x15a0] sm:$0xff]  ;;  %v1612_v39 = vld [vmem:[%s13123_s12 + $0x1588] sm:$0xff] }
 0x315   : > { %7578 = vmatpush1.bf16.msra.mxu0 %v11326_v21  ;;  %7251 = vmatprep.subr.bf16.mxu1 %v11333_v23  ;;  %v11383_v21 = vcombine.high %v1564_v15, %v1568_v16  ;;  %v873_v23 = vcombine.high %v13674_v18, %v13674_v18 }
 0x316   : > { %7579 = vmatprep.subr.bf16.mxu0 %v11335_v24  ;;  %v1571_v24 = vld [vmem:[%s13123_s12 + $0x1440] sm:$0xff] }
 0x317   : > { %v13689_v41 = vpack.c.bf16 %v873_v23, %v873_v23  ;;  %v1623_v23 = vld [vmem:[%s13123_s12 + $0x15e0] sm:$0xff] }
 0x318   : > { %7252 = vmatpush1.bf16.msra.mxu1 %v11332_v29  ;;  %v13684_v29 = vpack.c.bf16 %v13591_v54, %v13591_v54  ;;  %v11388_v54 = vcombine.low %v1571_v24, %v1575_v25 }
 0x319   : > { %7580 = vmatpush1.bf16.msra.mxu0 %v11334_v30  ;;  %7253 = vmatprep.subr.bf16.mxu1 %v11341_v33  ;;  %v11382_v30 = vcombine.low %v1564_v15, %v1568_v16  ;;  %v11389_v33 = vcombine.high %v1571_v24, %v1575_v25  ;;  %v1616_v15 = vld [vmem:[%s13123_s12 + $0x15a8] sm:$0xff]  ;;  %v11420_v16 = vcombine.low %v1603_v8, %v1607_v9 }
 0x31a   : > { %7581 = vmatprep.subr.bf16.mxu0 %v11343_v34  ;;  %v1579_v34 = vld [vmem:[%s13123_s12 + $0x1480] sm:$0xff]  ;;  %v1620_v24 = vld [vmem:[%s13123_s12 + $0x15c8] sm:$0xff] }
 0x31b   : > { %v1624_v25 = vld [vmem:[%s13123_s12 + $0x15e8] sm:$0xff] }
 0x31c   : > { %7254 = vmatpush1.bf16.msra.mxu1 %v11340_v61  ;;  %v1584_v61 = vld [vmem:[%s13123_s12 + $0x14a8] sm:$0xff] }
 0x31d   : > { %7582 = vmatpush1.bf16.msra.mxu0 %v11342_v47  ;;  %7255 = vmatprep.subr.bf16.mxu1 %v11349_v53  ;;  %v11390_v47 = vcombine.low %v1572_v27, %v1576_v28  ;;  %v11397_v53 = vcombine.high %v1579_v34, %v1583_v35  ;;  %v11430_v27 = vcombine.low %v1612_v39, %v1616_v15 }
 0x31e   : > { %7583 = vmatprep.subr.bf16.mxu0 %v11351_v55  ;;  %v11399_v55 = vcombine.high %v1580_v45, %v1584_v61 }
 0x320   : > { %7256 = vmatpush1.bf16.msra.mxu1 %v11348_v62  ;;  %v11396_v62 = vcombine.low %v1579_v34, %v1583_v35  ;;  %v1631_v34 = vld [vmem:[%s13123_s12 + $0x1620] sm:$0xff]  ;;  %v1628_v35 = vld [vmem:[%s13123_s12 + $0x1608] sm:$0xff] }
 0x321   : > { %7584 = vmatpush1.bf16.msra.mxu0 %v11350_v63  ;;  %7257 = vmatprep.subr.bf16.mxu1 %v11357_v0  ;;  %v11398_v63 = vcombine.low %v1580_v45, %v1584_v61  ;;  %v11405_v0 = vcombine.high %v1587_v57, %v1591_v58  ;;  %v11438_v61 = vcombine.low %v1620_v24, %v1624_v25 }
 0x322   : > { %7585 = vmatprep.subr.bf16.mxu0 %v11359_v1  ;;  %v11407_v1 = vcombine.high %v1588_v59, %v1592_v60 }
 0x324   : > { %7258 = vmatpush1.bf16.msra.mxu1 %v11356_v49  ;;  %v11404_v49 = vcombine.low %v1587_v57, %v1591_v58  ;;  %v1636_v57 = vld [vmem:[%s13123_s12 + $0x1648] sm:$0xff] }
 0x325   : > { %7586 = vmatpush1.bf16.msra.mxu0 %v11358_v52  ;;  %7259 = vmatprep.subr.bf16.mxu1 %v11365_v5  ;;  %v11406_v52 = vcombine.low %v1588_v59, %v1592_v60  ;;  %v11413_v5 = vcombine.high %v1595_v2, %v1599_v3  ;;  %v1640_v58 = vld [vmem:[%s13123_s12 + $0x1668] sm:$0xff] }
 0x326   : > { %7587 = vmatprep.subr.bf16.mxu0 %v11367_v6  ;;  %v11415_v6 = vcombine.high %v1596_v43, %v1600_v48  ;;  %v1644_v2 = vld [vmem:[%s13123_s12 + $0x1688] sm:$0xff] }
 0x327   : > { %v1648_v3 = vld [vmem:[%s13123_s12 + $0x16a8] sm:$0xff] }
 0x328   : > { %7260 = vmatpush1.bf16.msra.mxu1 %v11364_v37  ;;  %v11414_v37 = vcombine.low %v1596_v43, %v1600_v48  ;;  %v11454_v48 = vcombine.low %v1636_v57, %v1640_v58 }
 0x329   : > { %7588 = vmatpush1.bf16.msra.mxu0 %v11366_v11  ;;  %7261 = vmatprep.subr.bf16.mxu1 %v11373_v12  ;;  %v11421_v11 = vcombine.high %v1603_v8, %v1607_v9  ;;  %v11423_v12 = vcombine.high %v1604_v20, %v1608_v32  ;;  %v1652_v8 = vld [vmem:[%s13123_s12 + $0x16c8] sm:$0xff] }
 0x32a   : > { %7589 = vmatprep.subr.bf16.mxu0 %v11375_v13  ;;  %v1611_v13 = vld [vmem:[%s13123_s12 + $0x1580] sm:$0xff]  ;;  %v1656_v9 = vld [vmem:[%s13123_s12 + $0x16e8] sm:$0xff] }
 0x32c   : > { %7262 = vmatpush1.bf16.msra.mxu1 %v11372_v36  ;;  %v11422_v36 = vcombine.low %v1604_v20, %v1608_v32  ;;  %v11462_v32 = vcombine.low %v1644_v2, %v1648_v3 }
 0x32d   : > { %7590 = vmatpush1.bf16.msra.mxu0 %v11374_v19  ;;  %7272 = vmatprep.subr.bf16.mxu1 %v11381_v46  ;;  %v11429_v19 = vcombine.high %v1611_v13, %v1615_v14  ;;  %v11431_v46 = vcombine.high %v1612_v39, %v1616_v15  ;;  %v11470_v15 = vcombine.low %v1652_v8, %v1656_v9 }
 0x32e   : > { %7600 = vmatprep.subr.bf16.mxu0 %v11383_v21  ;;  %v1619_v21 = vld [vmem:[%s13123_s12 + $0x15c0] sm:$0xff] }
 0x32f   : > { %7264 = vmatmul.mubr.bf16.vlgmr.msra.gmra.mrb[0].mxu1 %v13684_v29  ;;  %v11437_v28 = vcombine.high %v1619_v21, %v1623_v23  ;;  %v11436_v45 = vcombine.low %v1619_v21, %v1623_v23  ;;  %v1668_v21 = vld [vmem:[%s13123_s12 + $0x1748] sm:$0xff] }
 0x330   : > { %7592 = vmatmul.mubr.bf16.vlgmr.msra.gmra.mrb[8].mxu0 %v13684_v29  ;;  %7273 = vmatpush1.bf16.msra.mxu1 %v11380_v26  ;;  %v11428_v26 = vcombine.low %v1611_v13, %v1615_v14  ;;  %v1660_v13 = vld [vmem:[%s13123_s12 + $0x1708] sm:$0xff] }
 0x331   : > { %7304 = vmatprep.mubr.bf16.mxu1 %v13689_v41  ;;  %7601 = vmatpush1.bf16.msra.mxu0 %v11382_v30  ;;  %v11439_v30 = vcombine.high %v1620_v24, %v1624_v25  ;;  %v1664_v14 = vld [vmem:[%s13123_s12 + $0x1728] sm:$0xff] }
 0x332   : > { %7632 = vmatprep.mubr.bf16.mxu0 %v13689_v41  ;;  %7274 = vmatprep.subr.bf16.mxu1 %v11389_v33  ;;  %v1627_v33 = vld [vmem:[%s13123_s12 + $0x1600] sm:$0xff]  ;;  %v1672_v23 = vld [vmem:[%s13123_s12 + $0x1768] sm:$0xff]  ;;  %v11478_v25 = vcombine.low %v1660_v13, %v1664_v14 }
 0x333   : > { %7602 = vmatprep.subr.bf16.mxu0 %v11391_v42  ;;  %v1632_v42 = vld [vmem:[%s13123_s12 + $0x1628] sm:$0xff]  ;;  %v11444_v59 = vcombine.low %v1627_v33, %v1631_v34 }
 0x334   : > { %7275 = vmatpush1.bf16.msra.mxu1 %v11388_v54  ;;  %v11445_v54 = vcombine.high %v1627_v33, %v1631_v34  ;;  %v11446_v60 = vcombine.low %v1628_v35, %v1632_v42  ;;  %v1676_v33 = vld [vmem:[%s13123_s12 + $0x1788] sm:$0xff] }
 0x335   : > { %7603 = vmatpush1.bf16.msra.mxu0 %v11390_v47  ;;  %7276 = vmatprep.subr.bf16.mxu1 %v11397_v53  ;;  %v11447_v47 = vcombine.high %v1628_v35, %v1632_v42  ;;  %v1635_v53 = vld [vmem:[%s13123_s12 + $0x1640] sm:$0xff]  ;;  %v1680_v34 = vld [vmem:[%s13123_s12 + $0x17a8] sm:$0xff]  ;;  %v11486_v42 = vcombine.low %v1668_v21, %v1672_v23 }
 0x336   : > { %7604 = vmatprep.subr.bf16.mxu0 %v11399_v55  ;;  %v1639_v55 = vld [vmem:[%s13123_s12 + $0x1660] sm:$0xff] }
 0x337   : > { %v11452_v43 = vcombine.low %v1635_v53, %v1639_v55 }
 0x338   : > { %7277 = vmatpush1.bf16.msra.mxu1 %v11396_v62  ;;  %v11453_v62 = vcombine.high %v1635_v53, %v1639_v55  ;;  %v1684_v53 = vld [vmem:[%s13123_s12 + $0x17c8] sm:$0xff] }
 0x339   : > { %7605 = vmatpush1.bf16.msra.mxu0 %v11398_v63  ;;  %7278 = vmatprep.subr.bf16.mxu1 %v11405_v0  ;;  %v11455_v63 = vcombine.high %v1636_v57, %v1640_v58  ;;  %v1643_v0 = vld [vmem:[%s13123_s12 + $0x1680] sm:$0xff]  ;;  %v1688_v55 = vld [vmem:[%s13123_s12 + $0x17e8] sm:$0xff]  ;;  %v13748_v58 = vld [vmem:[#allocation3 + $0x18] sm:$0xff] }
 0x33a   : > { %7606 = vmatprep.subr.bf16.mxu0 %v11407_v1  ;;  %v1647_v1 = vld [vmem:[%s13123_s12 + $0x16a0] sm:$0xff] }
 0x33b   : > { %v11460_v20 = vcombine.low %v1643_v0, %v1647_v1 }
 0x33c   : > { %7279 = vmatpush1.bf16.msra.mxu1 %v11404_v49  ;;  %v11461_v49 = vcombine.high %v1643_v0, %v1647_v1  ;;  %v1695_v0 = vld [vmem:[%s13123_s12 + $0x1820] sm:$0xff]  ;;  %v1692_v1 = vld [vmem:[%s13123_s12 + $0x1808] sm:$0xff] }
 0x33d   : > { %7607 = vmatpush1.bf16.msra.mxu0 %v11406_v52  ;;  %7280 = vmatprep.subr.bf16.mxu1 %v11413_v5  ;;  %v11463_v52 = vcombine.high %v1644_v2, %v1648_v3  ;;  %v1651_v5 = vld [vmem:[%s13123_s12 + $0x16c0] sm:$0xff]  ;;  %v1696_v2 = vld [vmem:[%s13123_s12 + $0x1828] sm:$0xff]  ;;  %v13756_v3 = vrot.slane %v13748_v58, %v13314_v22 }
 0x33e   : > { %7608 = vmatprep.subr.bf16.mxu0 %v11415_v6  ;;  %v1655_v6 = vld [vmem:[%s13123_s12 + $0x16e0] sm:$0xff] }
 0x33f   : > { %v11468_v39 = vcombine.low %v1651_v5, %v1655_v6 }
 0x340   : > { %7281 = vmatpush1.bf16.msra.mxu1 %v11412_v10  ;;  %v11469_v10 = vcombine.high %v1651_v5, %v1655_v6  ;;  %v889_v5 = vcombine.high %v13756_v3, %v13756_v3  ;;  %v1699_v6 = vld [vmem:[%s13123_s12 + $0x1840] sm:$0xff] }
 0x341   : > { %7609 = vmatpush1.bf16.msra.mxu0 %v11414_v37  ;;  %7282 = vmatprep.subr.bf16.mxu1 %v11421_v11  ;;  %v11471_v37 = vcombine.high %v1652_v8, %v1656_v9  ;;  %v1659_v11 = vld [vmem:[%s13123_s12 + $0x1700] sm:$0xff] }
 0x342   : > { %7610 = vmatprep.subr.bf16.mxu0 %v11423_v12  ;;  %v1663_v12 = vld [vmem:[%s13123_s12 + $0x1720] sm:$0xff] }
 0x343   : > { %v11476_v24 = vcombine.low %v1659_v11, %v1663_v12  ;;  %v1703_v8 = vld [vmem:[%s13123_s12 + $0x1860] sm:$0xff] }
 0x344   : > { %7283 = vmatpush1.bf16.msra.mxu1 %v11420_v16  ;;  %v11477_v16 = vcombine.high %v1659_v11, %v1663_v12  ;;  %v11517_v11 = vcombine.high %v1699_v6, %v1703_v8  ;;  %v1707_v12 = vld [vmem:[%s13123_s12 + $0x1880] sm:$0xff] }
 0x345   : > { %7611 = vmatpush1.bf16.msra.mxu0 %v11422_v36  ;;  %7284 = vmatprep.subr.bf16.mxu1 %v11429_v19  ;;  %v11479_v36 = vcombine.high %v1660_v13, %v1664_v14  ;;  %v1667_v19 = vld [vmem:[%s13123_s12 + $0x1740] sm:$0xff]  ;;  %v13771_v14 = vpack.c.bf16 %v889_v5, %v889_v5 }
 0x346   : > { %7612 = vmatprep.subr.bf16.mxu0 %v11431_v46  ;;  %v1671_v46 = vld [vmem:[%s13123_s12 + $0x1760] sm:$0xff] }
 0x347   : > { %v11484_v35 = vcombine.low %v1667_v19, %v1671_v46  ;;  %v1711_v13 = vld [vmem:[%s13123_s12 + $0x18a0] sm:$0xff] }
 0x348   : > { %7285 = vmatpush1.bf16.msra.mxu1 %v11428_v26  ;;  %v11485_v26 = vcombine.high %v1667_v19, %v1671_v46  ;;  %v11525_v19 = vcombine.high %v1707_v12, %v1711_v13 }
 0x349   : > { %7613 = vmatpush1.bf16.msra.mxu0 %v11430_v27  ;;  %7286 = vmatprep.subr.bf16.mxu1 %v11437_v28  ;;  %v11487_v27 = vcombine.high %v1668_v21, %v1672_v23  ;;  %v1675_v28 = vld [vmem:[%s13123_s12 + $0x1780] sm:$0xff] }
 0x34a   : > { %7614 = vmatprep.subr.bf16.mxu0 %v11439_v30  ;;  %v1679_v30 = vld [vmem:[%s13123_s12 + $0x17a0] sm:$0xff] }
 0x34b   : > { %v11492_v57 = vcombine.low %v1675_v28, %v1679_v30  ;;  %v1715_v21 = vld [vmem:[%s13123_s12 + $0x18c0] sm:$0xff] }
 0x34c   : > { %7287 = vmatpush1.bf16.msra.mxu1 %v11436_v45  ;;  %v11493_v45 = vcombine.high %v1675_v28, %v1679_v30  ;;  %v1719_v23 = vld [vmem:[%s13123_s12 + $0x18e0] sm:$0xff] }
 0x34d   : > { %7615 = vmatpush1.bf16.msra.mxu0 %v11438_v61  ;;  %7288 = vmatprep.subr.bf16.mxu1 %v11445_v54  ;;  %v11495_v61 = vcombine.high %v1676_v33, %v1680_v34  ;;  %v1683_v54 = vld [vmem:[%s13123_s12 + $0x17c0] sm:$0xff]  ;;  %v11533_v28 = vcombine.high %v1715_v21, %v1719_v23 }
 0x34e   : > { %7616 = vmatprep.subr.bf16.mxu0 %v11447_v47  ;;  %v1687_v47 = vld [vmem:[%s13123_s12 + $0x17e0] sm:$0xff] }
 0x350   : > { %7289 = vmatpush1.bf16.msra.mxu1 %v11444_v59  ;;  %v11494_v59 = vcombine.low %v1676_v33, %v1680_v34  ;;  %v1723_v33 = vld [vmem:[%s13123_s12 + $0x1900] sm:$0xff] }
 0x351   : > { %7617 = vmatpush1.bf16.msra.mxu0 %v11446_v60  ;;  %7290 = vmatprep.subr.bf16.mxu1 %v11453_v62  ;;  %v11501_v60 = vcombine.high %v1683_v54, %v1687_v47  ;;  %v11503_v62 = vcombine.high %v1684_v53, %v1688_v55  ;;  %v1727_v34 = vld [vmem:[%s13123_s12 + $0x1920] sm:$0xff] }
 0x352   : > { %7618 = vmatprep.subr.bf16.mxu0 %v11455_v63  ;;  %v1691_v63 = vld [vmem:[%s13123_s12 + $0x1800] sm:$0xff] }
 0x353   : > { %v11508_v9 = vcombine.low %v1691_v63, %v1695_v0 }
 0x354   : > { %7291 = vmatpush1.bf16.msra.mxu1 %v11452_v43  ;;  %v11500_v43 = vcombine.low %v1683_v54, %v1687_v47  ;;  %v11541_v54 = vcombine.high %v1723_v33, %v1727_v34 }
 0x355   : > { %7619 = vmatpush1.bf16.msra.mxu0 %v11454_v48  ;;  %7292 = vmatprep.subr.bf16.mxu1 %v11461_v49  ;;  %v11502_v48 = vcombine.low %v1684_v53, %v1688_v55  ;;  %v11509_v49 = vcombine.high %v1691_v63, %v1695_v0  ;;  %v1731_v53 = vld [vmem:[%s13123_s12 + $0x1940] sm:$0xff] }
 0x356   : > { %7620 = vmatprep.subr.bf16.mxu0 %v11463_v52  ;;  %v11511_v52 = vcombine.high %v1692_v1, %v1696_v2  ;;  %v1735_v55 = vld [vmem:[%s13123_s12 + $0x1960] sm:$0xff] }
 0x357   : > { %v11549_v63 = vcombine.high %v1731_v53, %v1735_v55 }
 0x358   : > { %7293 = vmatpush1.bf16.msra.mxu1 %v11460_v20  ;;  %v1700_v20 = vld [vmem:[%s13123_s12 + $0x1848] sm:$0xff] }
 0x359   : > { %7621 = vmatpush1.bf16.msra.mxu0 %v11462_v32  ;;  %7294 = vmatprep.subr.bf16.mxu1 %v11469_v10  ;;  %v1704_v32 = vld [vmem:[%s13123_s12 + $0x1868] sm:$0xff]  ;;  %v13766_v10 = vpack.c.bf16 %v13674_v18, %v13674_v18  ;;  %v11516_v18 = vcombine.low %v1699_v6, %v1703_v8  ;;  %v1747_v8 = vld [vmem:[%s13123_s12 + $0x19c0] sm:$0xff] }
 0x35a   : > { %7622 = vmatprep.subr.bf16.mxu0 %v11471_v37  ;;  %v11510_v37 = vcombine.low %v1692_v1, %v1696_v2  ;;  %v1739_v1 = vld [vmem:[%s13123_s12 + $0x1980] sm:$0xff] }
 0x35b   : > { %v1743_v2 = vld [vmem:[%s13123_s12 + $0x19a0] sm:$0xff] }
 0x35c   : > { %7295 = vmatpush1.bf16.msra.mxu1 %v11468_v39  ;;  %v11519_v39 = vcombine.high %v1700_v20, %v1704_v32  ;;  %v11557_v5 = vcombine.high %v1739_v1, %v1743_v2 }
 0x35d   : > { %7623 = vmatpush1.bf16.msra.mxu0 %v11470_v15  ;;  %7296 = vmatprep.subr.bf16.mxu1 %v11477_v16  ;;  %v1708_v15 = vld [vmem:[%s13123_s12 + $0x1888] sm:$0xff] }
 0x35e   : > { %7624 = vmatprep.subr.bf16.mxu0 %v11479_v36  ;;  %v1712_v16 = vld [vmem:[%s13123_s12 + $0x18a8] sm:$0xff]  ;;  %v11518_v36 = vcombine.low %v1700_v20, %v1704_v32 }
 0x35f   : > { %v11527_v46 = vcombine.high %v1708_v15, %v1712_v16  ;;  %v1748_v20 = vld [vmem:[%s13123_s12 + $0x19c8] sm:$0xff] }
 0x360   : > { %7297 = vmatpush1.bf16.msra.mxu1 %v11476_v24  ;;  %v1716_v24 = vld [vmem:[%s13123_s12 + $0x18c8] sm:$0xff] }
 0x361   : > { %7625 = vmatpush1.bf16.msra.mxu0 %v11478_v25  ;;  %7298 = vmatprep.subr.bf16.mxu1 %v11485_v26  ;;  %v1720_v25 = vld [vmem:[%s13123_s12 + $0x18e8] sm:$0xff]  ;;  %v11524_v26 = vcombine.low %v1707_v12, %v1711_v13 }
 0x362   : > { %7626 = vmatprep.subr.bf16.mxu0 %v11487_v27  ;;  %v11526_v27 = vcombine.low %v1708_v15, %v1712_v16  ;;  %v11535_v30 = vcombine.high %v1716_v24, %v1720_v25  ;;  %v1752_v32 = vld [vmem:[%s13123_s12 + $0x19e8] sm:$0xff]  ;;  %v1759_v15 = vld [vmem:[%s13123_s12 + $0x1a20] sm:$0xff] }
 0x363   : > { %v11567_v13 = vcombine.high %v1748_v20, %v1752_v32  ;;  %v1756_v16 = vld [vmem:[%s13123_s12 + $0x1a08] sm:$0xff] }
 0x364   : > { %7299 = vmatpush1.bf16.msra.mxu1 %v11484_v35  ;;  %v1724_v35 = vld [vmem:[%s13123_s12 + $0x1908] sm:$0xff] }
 0x365   : > { %7627 = vmatpush1.bf16.msra.mxu0 %v11486_v42  ;;  %7300 = vmatprep.subr.bf16.mxu1 %v11493_v45  ;;  %v1728_v42 = vld [vmem:[%s13123_s12 + $0x1928] sm:$0xff]  ;;  %v11532_v45 = vcombine.low %v1715_v21, %v1719_v23  ;;  %v1763_v23 = vld [vmem:[%s13123_s12 + $0x1a40] sm:$0xff] }
 0x366   : > { %7628 = vmatprep.subr.bf16.mxu0 %v11495_v61  ;;  %v11534_v61 = vcombine.low %v1716_v24, %v1720_v25  ;;  %v11543_v47 = vcombine.high %v1724_v35, %v1728_v42  ;;  %v1767_v24 = vld [vmem:[%s13123_s12 + $0x1a60] sm:$0xff]  ;;  %v1764_v25 = vld [vmem:[%s13123_s12 + $0x1a48] sm:$0xff] }
 0x368   : > { %7301 = vmatpush1.bf16.msra.mxu1 %v11492_v57  ;;  %v1732_v57 = vld [vmem:[%s13123_s12 + $0x1948] sm:$0xff] }
 0x369   : > { %7629 = vmatpush1.bf16.msra.mxu0 %v11494_v59  ;;  %7302 = vmatprep.subr.bf16.mxu1 %v11501_v60  ;;  %v1736_v59 = vld [vmem:[%s13123_s12 + $0x1968] sm:$0xff]  ;;  %v11540_v60 = vcombine.low %v1723_v33, %v1727_v34  ;;  %v1771_v34 = vld [vmem:[%s13123_s12 + $0x1a80] sm:$0xff] }
 0x36a   : > { %7630 = vmatprep.subr.bf16.mxu0 %v11503_v62  ;;  %v11542_v62 = vcombine.low %v1724_v35, %v1728_v42  ;;  %v11551_v0 = vcombine.high %v1732_v57, %v1736_v59  ;;  %v1775_v35 = vld [vmem:[%s13123_s12 + $0x1aa0] sm:$0xff]  ;;  %v1772_v42 = vld [vmem:[%s13123_s12 + $0x1a88] sm:$0xff] }
 0x36c   : > { %7303 = vmatpush1.bf16.msra.mxu1 %v11500_v43  ;;  %v1740_v43 = vld [vmem:[%s13123_s12 + $0x1988] sm:$0xff] }
 0x36d   : > { %7631 = vmatpush1.bf16.msra.mxu0 %v11502_v48  ;;  %7313 = vmatprep.subr.bf16.mxu1 %v11509_v49  ;;  %v1744_v48 = vld [vmem:[%s13123_s12 + $0x19a8] sm:$0xff]  ;;  %v11548_v49 = vcombine.low %v1731_v53, %v1735_v55  ;;  %v1779_v55 = vld [vmem:[%s13123_s12 + $0x1ac0] sm:$0xff] }
 0x36e   : > { %7641 = vmatprep.subr.bf16.mxu0 %v11511_v52  ;;  %v11550_v52 = vcombine.low %v1732_v57, %v1736_v59  ;;  %v11559_v6 = vcombine.high %v1740_v43, %v1744_v48  ;;  %v1783_v57 = vld [vmem:[%s13123_s12 + $0x1ae0] sm:$0xff]  ;;  %v1780_v59 = vld [vmem:[%s13123_s12 + $0x1ac8] sm:$0xff] }
 0x36f   : > { %7305 = vmatmul.mubr.bf16.vlgmr.msra.gmra.mrb[0].mxu1 %v13766_v10 }
 0x370   : > { %7633 = vmatmul.mubr.bf16.vlgmr.msra.gmra.mrb[8].mxu0 %v13766_v10  ;;  %7314 = vmatpush1.bf16.msra.mxu1 %v11508_v9  ;;  %v1751_v9 = vld [vmem:[%s13123_s12 + $0x19e0] sm:$0xff] }
 0x371   : > { %7345 = vmatprep.mubr.bf16.mxu1 %v13771_v14  ;;  %7642 = vmatpush1.bf16.msra.mxu0 %v11510_v37  ;;  %v11556_v37 = vcombine.low %v1739_v1, %v1743_v2  ;;  %v11565_v12 = vcombine.high %v1747_v8, %v1751_v9  ;;  %v1787_v2 = vld [vmem:[%s13123_s12 + $0x1b00] sm:$0xff] }
 0x372   : > { %7673 = vmatprep.mubr.bf16.mxu0 %v13771_v14  ;;  %7315 = vmatprep.subr.bf16.mxu1 %v11517_v11  ;;  %v11558_v11 = vcombine.low %v1740_v43, %v1744_v48  ;;  %v1791_v43 = vld [vmem:[%s13123_s12 + $0x1b20] sm:$0xff]  ;;  %v1788_v48 = vld [vmem:[%s13123_s12 + $0x1b08] sm:$0xff] }
 0x373   : > { %7643 = vmatprep.subr.bf16.mxu0 %v11519_v39  ;;  %v1755_v39 = vld [vmem:[%s13123_s12 + $0x1a00] sm:$0xff] }
 0x374   : > { %7316 = vmatpush1.bf16.msra.mxu1 %v11516_v18  ;;  %v1760_v18 = vld [vmem:[%s13123_s12 + $0x1a28] sm:$0xff] }
 0x375   : > { %7644 = vmatpush1.bf16.msra.mxu0 %v11518_v36  ;;  %7317 = vmatprep.subr.bf16.mxu1 %v11525_v19  ;;  %v11564_v36 = vcombine.low %v1747_v8, %v1751_v9  ;;  %v11566_v19 = vcombine.low %v1748_v20, %v1752_v32  ;;  %v11575_v21 = vcombine.high %v1756_v16, %v1760_v18  ;;  %v1795_v9 = vld [vmem:[%s13123_s12 + $0x1b40] sm:$0xff]  ;;  %v1796_v32 = vld [vmem:[%s13123_s12 + $0x1b48] sm:$0xff] }
 0x376   : > { %7645 = vmatprep.subr.bf16.mxu0 %v11527_v46  ;;  %v11573_v46 = vcombine.high %v1755_v39, %v1759_v15  ;;  %v1799_v20 = vld [vmem:[%s13123_s12 + $0x1b60] sm:$0xff] }
 0x378   : > { %7318 = vmatpush1.bf16.msra.mxu1 %v11524_v26  ;;  %v1768_v26 = vld [vmem:[%s13123_s12 + $0x1a68] sm:$0xff] }
 0x379   : > { %7646 = vmatpush1.bf16.msra.mxu0 %v11526_v27  ;;  %7319 = vmatprep.subr.bf16.mxu1 %v11533_v28  ;;  %v11572_v27 = vcombine.low %v1755_v39, %v1759_v15  ;;  %v11574_v28 = vcombine.low %v1756_v16, %v1760_v18  ;;  %v11583_v33 = vcombine.high %v1764_v25, %v1768_v26  ;;  %v1803_v15 = vld [vmem:[%s13123_s12 + $0x1b80] sm:$0xff]  ;;  %v1804_v18 = vld [vmem:[%s13123_s12 + $0x1b88] sm:$0xff] }
 0x37a   : > { %7647 = vmatprep.subr.bf16.mxu0 %v11535_v30  ;;  %v11581_v30 = vcombine.high %v1763_v23, %v1767_v24  ;;  %v1807_v16 = vld [vmem:[%s13123_s12 + $0x1ba0] sm:$0xff] }
 0x37c   : > { %7320 = vmatpush1.bf16.msra.mxu1 %v11532_v45  ;;  %v1776_v45 = vld [vmem:[%s13123_s12 + $0x1aa8] sm:$0xff] }
 0x37d   : > { %7648 = vmatpush1.bf16.msra.mxu0 %v11534_v61  ;;  %7321 = vmatprep.subr.bf16.mxu1 %v11541_v54  ;;  %v11580_v61 = vcombine.low %v1763_v23, %v1767_v24  ;;  %v11582_v54 = vcombine.low %v1764_v25, %v1768_v26  ;;  %v11591_v53 = vcombine.high %v1772_v42, %v1776_v45  ;;  %v1811_v24 = vld [vmem:[%s13123_s12 + $0x1bc0] sm:$0xff]  ;;  %v1812_v26 = vld [vmem:[%s13123_s12 + $0x1bc8] sm:$0xff] }
 0x37e   : > { %7649 = vmatprep.subr.bf16.mxu0 %v11543_v47  ;;  %v11589_v47 = vcombine.high %v1771_v34, %v1775_v35  ;;  %v1815_v25 = vld [vmem:[%s13123_s12 + $0x1be0] sm:$0xff] }
 0x380   : > { %7322 = vmatpush1.bf16.msra.mxu1 %v11540_v60  ;;  %v1784_v60 = vld [vmem:[%s13123_s12 + $0x1ae8] sm:$0xff] }
 0x381   : > { %7650 = vmatpush1.bf16.msra.mxu0 %v11542_v62  ;;  %7323 = vmatprep.subr.bf16.mxu1 %v11549_v63  ;;  %v11588_v62 = vcombine.low %v1771_v34, %v1775_v35  ;;  %v11590_v63 = vcombine.low %v1772_v42, %v1776_v45  ;;  %v11599_v1 = vcombine.high %v1780_v59, %v1784_v60  ;;  %v1819_v42 = vld [vmem:[%s13123_s12 + $0x1c00] sm:$0xff] }
 0x382   : > { %7651 = vmatprep.subr.bf16.mxu0 %v11551_v0  ;;  %v11597_v0 = vcombine.high %v1779_v55, %v1783_v57  ;;  %v11629_v34 = vcombine.high %v1811_v24, %v1815_v25  ;;  %v1823_v45 = vld [vmem:[%s13123_s12 + $0x1c20] sm:$0xff] }
 0x384   : > { %7324 = vmatpush1.bf16.msra.mxu1 %v11548_v49  ;;  %v1792_v49 = vld [vmem:[%s13123_s12 + $0x1b28] sm:$0xff] }
 0x385   : > { %7652 = vmatpush1.bf16.msra.mxu0 %v11550_v52  ;;  %7325 = vmatprep.subr.bf16.mxu1 %v11557_v5  ;;  %v11596_v52 = vcombine.low %v1779_v55, %v1783_v57  ;;  %v11598_v5 = vcombine.low %v1780_v59, %v1784_v60  ;;  %v11607_v8 = vcombine.high %v1788_v48, %v1792_v49  ;;  %v1827_v60 = vld [vmem:[%s13123_s12 + $0x1c40] sm:$0xff] }
 0x386   : > { %7653 = vmatprep.subr.bf16.mxu0 %v11559_v6  ;;  %v11605_v6 = vcombine.high %v1787_v2, %v1791_v43  ;;  %v11637_v55 = vcombine.high %v1819_v42, %v1823_v45 }
 0x388   : > { %7326 = vmatpush1.bf16.msra.mxu1 %v11556_v37  ;;  %v1800_v37 = vld [vmem:[%s13123_s12 + $0x1b68] sm:$0xff] }
 0x389   : > { %7654 = vmatpush1.bf16.msra.mxu0 %v11558_v11  ;;  %7327 = vmatprep.subr.bf16.mxu1 %v11565_v12  ;;  %v11604_v11 = vcombine.low %v1787_v2, %v1791_v43  ;;  %v11606_v12 = vcombine.low %v1788_v48, %v1792_v49  ;;  %v11615_v39 = vcombine.high %v1796_v32, %v1800_v37  ;;  %v1835_v49 = vld [vmem:[%s13123_s12 + $0x1c80] sm:$0xff] }
 0x38a   : > { %7655 = vmatprep.subr.bf16.mxu0 %v11567_v13  ;;  %v11613_v13 = vcombine.high %v1795_v9, %v1799_v20  ;;  %v13847_v2 = vpack.c.bf16 %v13756_v3, %v13756_v3 }
 0x38c   : > { %7328 = vmatpush1.bf16.msra.mxu1 %v11564_v36  ;;  %v1808_v36 = vld [vmem:[%s13123_s12 + $0x1ba8] sm:$0xff] }
 0x38d   : > { %7656 = vmatpush1.bf16.msra.mxu0 %v11566_v19  ;;  %7329 = vmatprep.subr.bf16.mxu1 %v11573_v46  ;;  %v11612_v19 = vcombine.low %v1795_v9, %v1799_v20  ;;  %v11614_v46 = vcombine.low %v1796_v32, %v1800_v37  ;;  %v11623_v23 = vcombine.high %v1804_v18, %v1808_v36  ;;  %v1840_v9 = vld [vmem:[%s13123_s12 + $0x1ca8] sm:$0xff] }
 0x38e   : > { %7657 = vmatprep.subr.bf16.mxu0 %v11575_v21  ;;  %v11621_v21 = vcombine.high %v1803_v15, %v1807_v16 }
 0x390   : > { %7330 = vmatpush1.bf16.msra.mxu1 %v11572_v27  ;;  %v1816_v27 = vld [vmem:[%s13123_s12 + $0x1be8] sm:$0xff] }
 0x391   : > { %7658 = vmatpush1.bf16.msra.mxu0 %v11574_v28  ;;  %7331 = vmatprep.subr.bf16.mxu1 %v11581_v30  ;;  %v874_v28 = vcombine.high %v13748_v58, %v13748_v58  ;;  %v11620_v30 = vcombine.low %v1803_v15, %v1807_v16  ;;  %v11631_v35 = vcombine.high %v1812_v26, %v1816_v27 }
 0x392   : > { %7659 = vmatprep.subr.bf16.mxu0 %v11583_v33  ;;  %v11622_v33 = vcombine.low %v1804_v18, %v1808_v36  ;;  %v11628_v58 = vcombine.low %v1811_v24, %v1815_v25 }
 0x394   : > { %7332 = vmatpush1.bf16.msra.mxu1 %v11580_v61  ;;  %v1820_v61 = vld [vmem:[%s13123_s12 + $0x1c08] sm:$0xff] }
 0x395   : > { %7660 = vmatpush1.bf16.msra.mxu0 %v11582_v54  ;;  %7333 = vmatprep.subr.bf16.mxu1 %v11589_v47  ;;  %v1824_v54 = vld [vmem:[%s13123_s12 + $0x1c28] sm:$0xff]  ;;  %v13837_v47 = vrot.slane %v874_v28, %v13314_v22  ;;  %v1859_v28 = vld [vmem:[%s13123_s12 + $0x1d40] sm:$0xff] }
 0x396   : > { %7661 = vmatprep.subr.bf16.mxu0 %v11591_v53  ;;  %v11630_v53 = vcombine.low %v1812_v26, %v1816_v27  ;;  %v11639_v57 = vcombine.high %v1820_v61, %v1824_v54  ;;  %v11638_v43 = vcombine.low %v1820_v61, %v1824_v54  ;;  %v1867_v54 = vld [vmem:[%s13123_s12 + $0x1d80] sm:$0xff] }
 0x397   : > { %v890_v59 = vcombine.high %v13837_v47, %v13837_v47 }
 0x398   : > { %7334 = vmatpush1.bf16.msra.mxu1 %v11588_v62  ;;  %v1831_v62 = vld [vmem:[%s13123_s12 + $0x1c60] sm:$0xff] }
 0x399   : > { %7662 = vmatpush1.bf16.msra.mxu0 %v11590_v63  ;;  %7335 = vmatprep.subr.bf16.mxu1 %v11597_v0  ;;  %v11636_v63 = vcombine.low %v1819_v42, %v1823_v45  ;;  %v1828_v0 = vld [vmem:[%s13123_s12 + $0x1c48] sm:$0xff]  ;;  %v11645_v48 = vcombine.high %v1827_v60, %v1831_v62  ;;  %v11644_v3 = vcombine.low %v1827_v60, %v1831_v62 }
 0x39a   : > { %7663 = vmatprep.subr.bf16.mxu0 %v11599_v1  ;;  %v1832_v1 = vld [vmem:[%s13123_s12 + $0x1c68] sm:$0xff] }
 0x39b   : > { %v11646_v20 = vcombine.low %v1828_v0, %v1832_v1 }
 0x39c   : > { %7336 = vmatpush1.bf16.msra.mxu1 %v11596_v52  ;;  %v1839_v52 = vld [vmem:[%s13123_s12 + $0x1ca0] sm:$0xff] }
 0x39d   : > { %7664 = vmatpush1.bf16.msra.mxu0 %v11598_v5  ;;  %7337 = vmatprep.subr.bf16.mxu1 %v11605_v6  ;;  %v13852_v5 = vpack.c.bf16 %v890_v59, %v890_v59  ;;  %v11647_v6 = vcombine.high %v1828_v0, %v1832_v1  ;;  %v11653_v32 = vcombine.high %v1835_v49, %v1839_v52  ;;  %v1879_v0 = vld [vmem:[%s13123_s12 + $0x1de0] sm:$0xff]  ;;  %v1876_v1 = vld [vmem:[%s13123_s12 + $0x1dc8] sm:$0xff] }
 0x39e   : > { %7665 = vmatprep.subr.bf16.mxu0 %v11607_v8  ;;  %v1836_v8 = vld [vmem:[%s13123_s12 + $0x1c88] sm:$0xff]  ;;  %v11652_v15 = vcombine.low %v1835_v49, %v1839_v52 }
 0x39f   : > { %v11655_v37 = vcombine.high %v1836_v8, %v1840_v9  ;;  %v11654_v16 = vcombine.low %v1836_v8, %v1840_v9  ;;  %v1883_v8 = vld [vmem:[%s13123_s12 + $0x1e00] sm:$0xff] }
 0x3a0   : > { %7338 = vmatpush1.bf16.msra.mxu1 %v11604_v11  ;;  %v1843_v11 = vld [vmem:[%s13123_s12 + $0x1cc0] sm:$0xff] }
 0x3a1   : > { %7666 = vmatpush1.bf16.msra.mxu0 %v11606_v12  ;;  %7339 = vmatprep.subr.bf16.mxu1 %v11613_v13  ;;  %v1847_v12 = vld [vmem:[%s13123_s12 + $0x1ce0] sm:$0xff]  ;;  %v1844_v13 = vld [vmem:[%s13123_s12 + $0x1cc8] sm:$0xff] }
 0x3a2   : > { %7667 = vmatprep.subr.bf16.mxu0 %v11615_v39  ;;  %v1848_v39 = vld [vmem:[%s13123_s12 + $0x1ce8] sm:$0xff]  ;;  %v11661_v18 = vcombine.high %v1843_v11, %v1847_v12  ;;  %v11660_v24 = vcombine.low %v1843_v11, %v1847_v12  ;;  %v1887_v9 = vld [vmem:[%s13123_s12 + $0x1e20] sm:$0xff] }
 0x3a3   : > { %v11663_v36 = vcombine.high %v1844_v13, %v1848_v39  ;;  %v11662_v25 = vcombine.low %v1844_v13, %v1848_v39  ;;  %v11701_v11 = vcombine.high %v1883_v8, %v1887_v9  ;;  %v1891_v13 = vld [vmem:[%s13123_s12 + $0x1e40] sm:$0xff] }
 0x3a4   : > { %7340 = vmatpush1.bf16.msra.mxu1 %v11612_v19  ;;  %v1851_v19 = vld [vmem:[%s13123_s12 + $0x1d00] sm:$0xff] }
 0x3a5   : > { %7668 = vmatpush1.bf16.msra.mxu0 %v11614_v46  ;;  %7341 = vmatprep.subr.bf16.mxu1 %v11621_v21  ;;  %v1855_v46 = vld [vmem:[%s13123_s12 + $0x1d20] sm:$0xff]  ;;  %v1852_v21 = vld [vmem:[%s13123_s12 + $0x1d08] sm:$0xff] }
 0x3a6   : > { %7669 = vmatprep.subr.bf16.mxu0 %v11623_v23  ;;  %v1856_v23 = vld [vmem:[%s13123_s12 + $0x1d28] sm:$0xff]  ;;  %v11669_v26 = vcombine.high %v1851_v19, %v1855_v46  ;;  %v1895_v39 = vld [vmem:[%s13123_s12 + $0x1e60] sm:$0xff] }
 0x3a7   : > { %v11671_v27 = vcombine.high %v1852_v21, %v1856_v23  ;;  %v11670_v42 = vcombine.low %v1852_v21, %v1856_v23  ;;  %v1899_v21 = vld [vmem:[%s13123_s12 + $0x1e80] sm:$0xff] }
 0x3a8   : > { %7342 = vmatpush1.bf16.msra.mxu1 %v11620_v30  ;;  %v1863_v30 = vld [vmem:[%s13123_s12 + $0x1d60] sm:$0xff] }
 0x3a9   : > { %7670 = vmatpush1.bf16.msra.mxu0 %v11622_v33  ;;  %7343 = vmatprep.subr.bf16.mxu1 %v11629_v34  ;;  %v1860_v33 = vld [vmem:[%s13123_s12 + $0x1d48] sm:$0xff]  ;;  %v11677_v45 = vcombine.high %v1859_v28, %v1863_v30  ;;  %v1903_v23 = vld [vmem:[%s13123_s12 + $0x1ea0] sm:$0xff] }
 0x3aa   : > { %7671 = vmatprep.subr.bf16.mxu0 %v11631_v35  ;;  %v1864_v34 = vld [vmem:[%s13123_s12 + $0x1d68] sm:$0xff]  ;;  %v11668_v35 = vcombine.low %v1851_v19, %v1855_v46  ;;  %v11709_v19 = vcombine.high %v1891_v13, %v1895_v39 }
 0x3ab   : > { %v11679_v61 = vcombine.high %v1860_v33, %v1864_v34  ;;  %v11678_v59 = vcombine.low %v1860_v33, %v1864_v34  ;;  %v1907_v33 = vld [vmem:[%s13123_s12 + $0x1ec0] sm:$0xff] }
 0x3ac   : > { %7344 = vmatpush1.bf16.msra.mxu1 %v11628_v58  ;;  %v1871_v58 = vld [vmem:[%s13123_s12 + $0x1da0] sm:$0xff] }
 0x3ad   : > { %7672 = vmatpush1.bf16.msra.mxu0 %v11630_v53  ;;  %7354 = vmatprep.subr.bf16.mxu1 %v11637_v55  ;;  %v1868_v53 = vld [vmem:[%s13123_s12 + $0x1d88] sm:$0xff]  ;;  %v11685_v60 = vcombine.high %v1867_v54, %v1871_v58  ;;  %v1911_v34 = vld [vmem:[%s13123_s12 + $0x1ee0] sm:$0xff] }
 0x3ae   : > { %7682 = vmatprep.subr.bf16.mxu0 %v11639_v57  ;;  %v1872_v55 = vld [vmem:[%s13123_s12 + $0x1da8] sm:$0xff]  ;;  %v11676_v57 = vcombine.low %v1859_v28, %v1863_v30  ;;  %v11717_v28 = vcombine.high %v1899_v21, %v1903_v23 }
 0x3af   : > { %7346 = vmatmul.mubr.bf16.vlgmr.msra.gmra.mrb[0].mxu1 %v13847_v2  ;;  %v11687_v62 = vcombine.high %v1868_v53, %v1872_v55  ;;  %v11686_v49 = vcombine.low %v1868_v53, %v1872_v55  ;;  %v1915_v53 = vld [vmem:[%s13123_s12 + $0x1f00] sm:$0xff] }
 0x3b0   : > { %7674 = vmatmul.mubr.bf16.vlgmr.msra.gmra.mrb[8].mxu0 %v13847_v2  ;;  %7355 = vmatpush1.bf16.msra.mxu1 %v11636_v63  ;;  %v1875_v63 = vld [vmem:[%s13123_s12 + $0x1dc0] sm:$0xff] }
 0x3b1   : > { %7386 = vmatprep.mubr.bf16.mxu1 %v13852_v5  ;;  %7683 = vmatpush1.bf16.msra.mxu0 %v11638_v43  ;;  %v1880_v43 = vld [vmem:[%s13123_s12 + $0x1de8] sm:$0xff]  ;;  %v11693_v52 = vcombine.high %v1875_v63, %v1879_v0  ;;  %v1919_v55 = vld [vmem:[%s13123_s12 + $0x1f20] sm:$0xff] }
 0x3b2   : > { %7714 = vmatprep.mubr.bf16.mxu0 %v13852_v5  ;;  %7356 = vmatprep.subr.bf16.mxu1 %v11645_v48  ;;  %v11684_v48 = vcombine.low %v1867_v54, %v1871_v58  ;;  %v11725_v54 = vcombine.high %v1907_v33, %v1911_v34 }
 0x3b3   : > { %7684 = vmatprep.subr.bf16.mxu0 %v11647_v6  ;;  %v11695_v6 = vcombine.high %v1876_v1, %v1880_v43 }
 0x3b4   : > { %7357 = vmatpush1.bf16.msra.mxu1 %v11644_v3  ;;  %v1884_v3 = vld [vmem:[%s13123_s12 + $0x1e08] sm:$0xff] }
 0x3b5   : > { %7685 = vmatpush1.bf16.msra.mxu0 %v11646_v20  ;;  %7358 = vmatprep.subr.bf16.mxu1 %v11653_v32  ;;  %v1888_v20 = vld [vmem:[%s13123_s12 + $0x1e28] sm:$0xff]  ;;  %v11692_v32 = vcombine.low %v1875_v63, %v1879_v0  ;;  %v11733_v63 = vcombine.high %v1915_v53, %v1919_v55 }
 0x3b6   : > { %7686 = vmatprep.subr.bf16.mxu0 %v11655_v37  ;;  %v11694_v37 = vcombine.low %v1876_v1, %v1880_v43  ;;  %v11703_v12 = vcombine.high %v1884_v3, %v1888_v20  ;;  %v1923_v1 = vld [vmem:[%s13123_s12 + $0x1f40] sm:$0xff] }
 0x3b7   : > { %v1927_v43 = vld [vmem:[%s13123_s12 + $0x1f60] sm:$0xff] }
 0x3b8   : > { %7359 = vmatpush1.bf16.msra.mxu1 %v11652_v15  ;;  %v1892_v15 = vld [vmem:[%s13123_s12 + $0x1e48] sm:$0xff] }
 0x3b9   : > { %7687 = vmatpush1.bf16.msra.mxu0 %v11654_v16  ;;  %7360 = vmatprep.subr.bf16.mxu1 %v11661_v18  ;;  %v1896_v16 = vld [vmem:[%s13123_s12 + $0x1e68] sm:$0xff]  ;;  %v11700_v18 = vcombine.low %v1883_v8, %v1887_v9  ;;  %v11741_v8 = vcombine.high %v1923_v1, %v1927_v43 }
 0x3ba   : > { %7688 = vmatprep.subr.bf16.mxu0 %v11663_v36  ;;  %v11702_v36 = vcombine.low %v1884_v3, %v1888_v20  ;;  %v11711_v46 = vcombine.high %v1892_v15, %v1896_v16  ;;  %v1931_v3 = vld [vmem:[%s13123_s12 + $0x1f80] sm:$0xff] }
 0x3bb   : > { %v1935_v20 = vld [vmem:[%s13123_s12 + $0x1fa0] sm:$0xff] }
 0x3bc   : > { %7361 = vmatpush1.bf16.msra.mxu1 %v11660_v24  ;;  %v1900_v24 = vld [vmem:[%s13123_s12 + $0x1e88] sm:$0xff] }
 0x3bd   : > { %7689 = vmatpush1.bf16.msra.mxu0 %v11662_v25  ;;  %7362 = vmatprep.subr.bf16.mxu1 %v11669_v26  ;;  %v1904_v25 = vld [vmem:[%s13123_s12 + $0x1ea8] sm:$0xff]  ;;  %v11708_v26 = vcombine.low %v1891_v13, %v1895_v39  ;;  %v11749_v13 = vcombine.high %v1931_v3, %v1935_v20 }
 0x3be   : > { %7690 = vmatprep.subr.bf16.mxu0 %v11671_v27  ;;  %v11710_v27 = vcombine.low %v1892_v15, %v1896_v16  ;;  %v11719_v30 = vcombine.high %v1900_v24, %v1904_v25  ;;  %v1939_v15 = vld [vmem:[%s13123_s12 + $0x1fc0] sm:$0xff] }
 0x3bf   : > { %v1943_v16 = vld [vmem:[%s13123_s12 + $0x1fe0] sm:$0xff] }
 0x3c0   : > { %7363 = vmatpush1.bf16.msra.mxu1 %v11668_v35  ;;  %v1908_v35 = vld [vmem:[%s13123_s12 + $0x1ec8] sm:$0xff] }
 0x3c1   : > { %7691 = vmatpush1.bf16.msra.mxu0 %v11670_v42  ;;  %7364 = vmatprep.subr.bf16.mxu1 %v11677_v45  ;;  %v1912_v42 = vld [vmem:[%s13123_s12 + $0x1ee8] sm:$0xff]  ;;  %v11716_v45 = vcombine.low %v1899_v21, %v1903_v23  ;;  %v11757_v21 = vcombine.high %v1939_v15, %v1943_v16 }
 0x3c2   : > { %7692 = vmatprep.subr.bf16.mxu0 %v11679_v61  ;;  %v11718_v61 = vcombine.low %v1900_v24, %v1904_v25  ;;  %v11727_v58 = vcombine.high %v1908_v35, %v1912_v42  ;;  %v925_v24 = vld [vmem:[%s13123_s12 + $0x10] sm:$0xff] }
 0x3c3   : > { %v929_v25 = vld [vmem:[%s13123_s12 + $0x30] sm:$0xff] }
 0x3c4   : > { %7365 = vmatpush1.bf16.msra.mxu1 %v11676_v57  ;;  %v1916_v57 = vld [vmem:[%s13123_s12 + $0x1f08] sm:$0xff] }
 0x3c5   : > { %7693 = vmatpush1.bf16.msra.mxu0 %v11678_v59  ;;  %7366 = vmatprep.subr.bf16.mxu1 %v11685_v60  ;;  %v1920_v59 = vld [vmem:[%s13123_s12 + $0x1f28] sm:$0xff]  ;;  %v11724_v60 = vcombine.low %v1907_v33, %v1911_v34  ;;  %v10745_v33 = vcombine.high %v925_v24, %v929_v25 }
 0x3c6   : > { %7694 = vmatprep.subr.bf16.mxu0 %v11687_v62  ;;  %v11726_v62 = vcombine.low %v1908_v35, %v1912_v42  ;;  %v11735_v0 = vcombine.high %v1916_v57, %v1920_v59  ;;  %v933_v35 = vld [vmem:[%s13123_s12 + $0x50] sm:$0xff] }
 0x3c7   : > { %v937_v42 = vld [vmem:[%s13123_s12 + $0x70] sm:$0xff] }
 0x3c8   : > { %7367 = vmatpush1.bf16.msra.mxu1 %v11684_v48  ;;  %v1924_v48 = vld [vmem:[%s13123_s12 + $0x1f48] sm:$0xff] }
 0x3c9   : > { %7695 = vmatpush1.bf16.msra.mxu0 %v11686_v49  ;;  %7368 = vmatprep.subr.bf16.mxu1 %v11693_v52  ;;  %v1928_v49 = vld [vmem:[%s13123_s12 + $0x1f68] sm:$0xff]  ;;  %v11732_v52 = vcombine.low %v1915_v53, %v1919_v55  ;;  %v10753_v55 = vcombine.high %v933_v35, %v937_v42 }
 0x3ca   : > { %7696 = vmatprep.subr.bf16.mxu0 %v11695_v6  ;;  %v11734_v6 = vcombine.low %v1916_v57, %v1920_v59  ;;  %v11743_v9 = vcombine.high %v1924_v48, %v1928_v49  ;;  %v941_v57 = vld [vmem:[%s13123_s12 + $0x90] sm:$0xff] }
 0x3cb   : > { %v945_v59 = vld [vmem:[%s13123_s12 + $0xb0] sm:$0xff] }
 0x3cc   : > { %7369 = vmatpush1.bf16.msra.mxu1 %v11692_v32  ;;  %v1932_v32 = vld [vmem:[%s13123_s12 + $0x1f88] sm:$0xff] }
 0x3cd   : > { %7697 = vmatpush1.bf16.msra.mxu0 %v11694_v37  ;;  %7370 = vmatprep.subr.bf16.mxu1 %v11701_v11  ;;  %v1936_v37 = vld [vmem:[%s13123_s12 + $0x1fa8] sm:$0xff]  ;;  %v11740_v11 = vcombine.low %v1923_v1, %v1927_v43  ;;  %v10761_v1 = vcombine.high %v941_v57, %v945_v59 }
 0x3ce   : > { %7698 = vmatprep.subr.bf16.mxu0 %v11703_v12  ;;  %v11742_v12 = vcombine.low %v1924_v48, %v1928_v49  ;;  %v11751_v39 = vcombine.high %v1932_v32, %v1936_v37  ;;  %v949_v48 = vld [vmem:[%s13123_s12 + $0xd0] sm:$0xff] }
 0x3cf   : > { %v953_v49 = vld [vmem:[%s13123_s12 + $0xf0] sm:$0xff] }
 0x3d0   : > { %7371 = vmatpush1.bf16.msra.mxu1 %v11700_v18  ;;  %v1940_v18 = vld [vmem:[%s13123_s12 + $0x1fc8] sm:$0xff] }
 0x3d1   : > { %7699 = vmatpush1.bf16.msra.mxu0 %v11702_v36  ;;  %7372 = vmatprep.subr.bf16.mxu1 %v11709_v19  ;;  %v1944_v36 = vld [vmem:[%s13123_s12 + $0x1fe8] sm:$0xff]  ;;  %v11748_v19 = vcombine.low %v1931_v3, %v1935_v20  ;;  %v10769_v3 = vcombine.high %v949_v48, %v953_v49  ;;  %v957_v20 = vld [vmem:[%s13123_s12 + $0x110] sm:$0xff] }
 0x3d2   : > { %7700 = vmatprep.subr.bf16.mxu0 %v11711_v46  ;;  %v11750_v46 = vcombine.low %v1932_v32, %v1936_v37  ;;  %v11759_v23 = vcombine.high %v1940_v18, %v1944_v36  ;;  %v961_v32 = vld [vmem:[%s13123_s12 + $0x130] sm:$0xff]  ;;  %v958_v37 = vld [vmem:[%s13123_s12 + $0x118] sm:$0xff] }
 0x3d4   : > { %7373 = vmatpush1.bf16.msra.mxu1 %v11708_v26  ;;  %v926_v26 = vld [vmem:[%s13123_s12 + $0x18] sm:$0xff] }
 0x3d5   : > { %7701 = vmatpush1.bf16.msra.mxu0 %v11710_v27  ;;  %7374 = vmatprep.subr.bf16.mxu1 %v11717_v28  ;;  %v930_v27 = vld [vmem:[%s13123_s12 + $0x38] sm:$0xff]  ;;  %v11756_v28 = vcombine.low %v1939_v15, %v1943_v16  ;;  %v965_v16 = vld [vmem:[%s13123_s12 + $0x150] sm:$0xff] }
 0x3d6   : > { %7702 = vmatprep.subr.bf16.mxu0 %v11719_v30  ;;  %v11758_v30 = vcombine.low %v1940_v18, %v1944_v36  ;;  %v10747_v34 = vcombine.high %v926_v26, %v930_v27  ;;  %v10746_v53 = vcombine.low %v926_v26, %v930_v27  ;;  %v969_v18 = vld [vmem:[%s13123_s12 + $0x170] sm:$0xff]  ;;  %v966_v36 = vld [vmem:[%s13123_s12 + $0x158] sm:$0xff] }
 0x3d7   : > { %v977_v26 = vld [vmem:[%s13123_s12 + $0x1b0] sm:$0xff]  ;;  %v974_v27 = vld [vmem:[%s13123_s12 + $0x198] sm:$0xff] }
 0x3d8   : > { %7375 = vmatpush1.bf16.msra.mxu1 %v11716_v45  ;;  %v10744_v45 = vcombine.low %v925_v24, %v929_v25  ;;  %v973_v25 = vld [vmem:[%s13123_s12 + $0x190] sm:$0xff] }
 0x3d9   : > { %7703 = vmatpush1.bf16.msra.mxu0 %v11718_v61  ;;  %7376 = vmatprep.subr.bf16.mxu1 %v11725_v54  ;;  %v934_v61 = vld [vmem:[%s13123_s12 + $0x58] sm:$0xff] }
 0x3da   : > { %7704 = vmatprep.subr.bf16.mxu0 %v11727_v58  ;;  %v938_v54 = vld [vmem:[%s13123_s12 + $0x78] sm:$0xff]  ;;  %v13921_v58 = vpack.c.bf16 %v13837_v47, %v13837_v47  ;;  %v10752_v47 = vcombine.low %v933_v35, %v937_v42  ;;  %v981_v42 = vld [vmem:[%s13123_s12 + $0x1d0] sm:$0xff] }
 0x3dc   : > { %7377 = vmatpush1.bf16.msra.mxu1 %v11724_v60  ;;  %v10755_v60 = vcombine.high %v934_v61, %v938_v54 }
 0x3dd   : > { %7705 = vmatpush1.bf16.msra.mxu0 %v11726_v62  ;;  %7378 = vmatprep.subr.bf16.mxu1 %v11733_v63  ;;  %v942_v62 = vld [vmem:[%s13123_s12 + $0x98] sm:$0xff] }
 0x3de   : > { %7706 = vmatprep.subr.bf16.mxu0 %v11735_v0  ;;  %v946_v63 = vld [vmem:[%s13123_s12 + $0xb8] sm:$0xff]  ;;  %v10754_v0 = vcombine.low %v934_v61, %v938_v54 }
 0x3df   : > { %v10763_v43 = vcombine.high %v942_v62, %v946_v63  ;;  %v982_v61 = vld [vmem:[%s13123_s12 + $0x1d8] sm:$0xff] }
 0x3e0   : > { %7379 = vmatpush1.bf16.msra.mxu1 %v11732_v52  ;;  %v950_v52 = vld [vmem:[%s13123_s12 + $0xd8] sm:$0xff] }
 0x3e1   : > { %7707 = vmatpush1.bf16.msra.mxu0 %v11734_v6  ;;  %7380 = vmatprep.subr.bf16.mxu1 %v11741_v8  ;;  %v954_v6 = vld [vmem:[%s13123_s12 + $0xf8] sm:$0xff]  ;;  %v10760_v8 = vcombine.low %v941_v57, %v945_v59 }
 0x3e2   : > { %7708 = vmatprep.subr.bf16.mxu0 %v11743_v9  ;;  %v10762_v9 = vcombine.low %v942_v62, %v946_v63  ;;  %v986_v54 = vld [vmem:[%s13123_s12 + $0x1f8] sm:$0xff]  ;;  %v993_v62 = vld [vmem:[%s13123_s12 + $0x230] sm:$0xff] }
 0x3e3   : > { %v10803_v59 = vcombine.high %v982_v61, %v986_v54  ;;  %v990_v63 = vld [vmem:[%s13123_s12 + $0x218] sm:$0xff] }
 0x3e4   : > { %7381 = vmatpush1.bf16.msra.mxu1 %v11740_v11  ;;  %v962_v11 = vld [vmem:[%s13123_s12 + $0x138] sm:$0xff] }
 0x3e5   : > { %7709 = vmatpush1.bf16.msra.mxu0 %v11742_v12  ;;  %7382 = vmatprep.subr.bf16.mxu1 %v11749_v13  ;;  %v10768_v12 = vcombine.low %v949_v48, %v953_v49  ;;  %v10770_v13 = vcombine.low %v950_v52, %v954_v6  ;;  %v10779_v15 = vcombine.high %v958_v37, %v962_v11  ;;  %v997_v49 = vld [vmem:[%s13123_s12 + $0x250] sm:$0xff] }
 0x3e6   : > { %7710 = vmatprep.subr.bf16.mxu0 %v11751_v39  ;;  %v10777_v39 = vcombine.high %v957_v20, %v961_v32 }
 0x3e8   : > { %7383 = vmatpush1.bf16.msra.mxu1 %v11748_v19  ;;  %v970_v19 = vld [vmem:[%s13123_s12 + $0x178] sm:$0xff] }
 0x3e9   : > { %7711 = vmatpush1.bf16.msra.mxu0 %v11750_v46  ;;  %7384 = vmatprep.subr.bf16.mxu1 %v11757_v21  ;;  %v10776_v46 = vcombine.low %v957_v20, %v961_v32  ;;  %v10778_v21 = vcombine.low %v958_v37, %v962_v11  ;;  %v10787_v24 = vcombine.high %v966_v36, %v970_v19  ;;  %v1005_v32 = vld [vmem:[%s13123_s12 + $0x290] sm:$0xff]  ;;  %v1006_v11 = vld [vmem:[%s13123_s12 + $0x298] sm:$0xff] }
 0x3ea   : > { %7712 = vmatprep.subr.bf16.mxu0 %v11759_v23  ;;  %v10785_v23 = vcombine.high %v965_v16, %v969_v18  ;;  %v1009_v37 = vld [vmem:[%s13123_s12 + $0x2b0] sm:$0xff] }
 0x3ec   : > { %7385 = vmatpush1.bf16.msra.mxu1 %v11756_v28  ;;  %v978_v28 = vld [vmem:[%s13123_s12 + $0x1b8] sm:$0xff] }
 0x3ed   : > { %7713 = vmatpush1.bf16.msra.mxu0 %v11758_v30  ;;  %7723 = vmatprep.subr.bf16.mxu1 %v10745_v33  ;;  %v10784_v30 = vcombine.low %v965_v16, %v969_v18  ;;  %v10786_v33 = vcombine.low %v966_v36, %v970_v19  ;;  %v10795_v35 = vcombine.high %v974_v27, %v978_v28  ;;  %v1013_v18 = vld [vmem:[%s13123_s12 + $0x2d0] sm:$0xff]  ;;  %v1014_v19 = vld [vmem:[%s13123_s12 + $0x2d8] sm:$0xff] }
 0x3ee   : > { %8051 = vmatprep.subr.bf16.mxu0 %v10747_v34  ;;  %v10793_v34 = vcombine.high %v973_v25, %v977_v26  ;;  %v1017_v36 = vld [vmem:[%s13123_s12 + $0x2f0] sm:$0xff] }
 0x3ef   : > { %7387 = vmatmul.mubr.bf16.vlgmr.msra.gmra.mrb[0].mxu1 %v13921_v58 }
 0x3f0   : > { %7715 = vmatmul.mubr.bf16.vlgmr.msra.gmra.mrb[8].mxu0 %v13921_v58  ;;  %7724 = vmatpush1.bf16.msra.mxu1 %v10744_v45  ;;  %v985_v45 = vld [vmem:[%s13123_s12 + $0x1f0] sm:$0xff] }
 0x3f1   : > { %7755 = vmatprep.mubr.bf16.mxu1 %v13330_v40  ;;  %8052 = vmatpush1.bf16.msra.mxu0 %v10746_v53  ;;  %v10792_v53 = vcombine.low %v973_v25, %v977_v26  ;;  %v10801_v57 = vcombine.high %v981_v42, %v985_v45  ;;  %v1021_v26 = vld [vmem:[%s13123_s12 + $0x310] sm:$0xff] }
 0x3f2   : > { %8083 = vmatprep.mubr.bf16.mxu0 %v13330_v40  ;;  %7725 = vmatprep.subr.bf16.mxu1 %v10753_v55  ;;  %v10771_v40 = vcombine.high %v950_v52, %v954_v6  ;;  %v10794_v55 = vcombine.low %v974_v27, %v978_v28  ;;  %v1001_v52 = vld [vmem:[%s13123_s12 + $0x270] sm:$0xff]  ;;  %v998_v6 = vld [vmem:[%s13123_s12 + $0x258] sm:$0xff] }
 0x3f3   : > { %8053 = vmatprep.subr.bf16.mxu0 %v10755_v60  ;;  %v989_v60 = vld [vmem:[%s13123_s12 + $0x210] sm:$0xff]  ;;  %v1022_v28 = vld [vmem:[%s13123_s12 + $0x318] sm:$0xff] }
 0x3f4   : > { %7726 = vmatpush1.bf16.msra.mxu1 %v10752_v47  ;;  %v994_v47 = vld [vmem:[%s13123_s12 + $0x238] sm:$0xff]  ;;  %v1025_v27 = vld [vmem:[%s13123_s12 + $0x330] sm:$0xff] }
 0x3f5   : > { %8054 = vmatpush1.bf16.msra.mxu0 %v10754_v0  ;;  %7727 = vmatprep.subr.bf16.mxu1 %v10761_v1  ;;  %v10800_v0 = vcombine.low %v981_v42, %v985_v45  ;;  %v10802_v1 = vcombine.low %v982_v61, %v986_v54  ;;  %v10811_v48 = vcombine.high %v990_v63, %v994_v47  ;;  %v1029_v45 = vld [vmem:[%s13123_s12 + $0x350] sm:$0xff]  ;;  %v1030_v54 = vld [vmem:[%s13123_s12 + $0x358] sm:$0xff] }
 0x3f6   : > { %8055 = vmatprep.subr.bf16.mxu0 %v10763_v43  ;;  %v10809_v43 = vcombine.high %v989_v60, %v993_v62  ;;  %v1033_v61 = vld [vmem:[%s13123_s12 + $0x370] sm:$0xff] }
 0x3f8   : > { %7728 = vmatpush1.bf16.msra.mxu1 %v10760_v8  ;;  %v1002_v8 = vld [vmem:[%s13123_s12 + $0x278] sm:$0xff] }
 0x3f9   : > { %8056 = vmatpush1.bf16.msra.mxu0 %v10762_v9  ;;  %7729 = vmatprep.subr.bf16.mxu1 %v10769_v3  ;;  %v10808_v9 = vcombine.low %v989_v60, %v993_v62  ;;  %v10810_v3 = vcombine.low %v990_v63, %v994_v47  ;;  %v10819_v20 = vcombine.high %v998_v6, %v1002_v8  ;;  %v1037_v62 = vld [vmem:[%s13123_s12 + $0x390] sm:$0xff]  ;;  %v1038_v47 = vld [vmem:[%s13123_s12 + $0x398] sm:$0xff] }
 0x3fa   : > { %8057 = vmatprep.subr.bf16.mxu0 %v10771_v40  ;;  %v10817_v40 = vcombine.high %v997_v49, %v1001_v52  ;;  %v1041_v63 = vld [vmem:[%s13123_s12 + $0x3b0] sm:$0xff] }
 0x3fc   : > { %7730 = vmatpush1.bf16.msra.mxu1 %v10768_v12  ;;  %v1010_v12 = vld [vmem:[%s13123_s12 + $0x2b8] sm:$0xff] }
 0x3fd   : > { %8058 = vmatpush1.bf16.msra.mxu0 %v10770_v13  ;;  %7731 = vmatprep.subr.bf16.mxu1 %v10777_v39  ;;  %v10816_v13 = vcombine.low %v997_v49, %v1001_v52  ;;  %v10818_v39 = vcombine.low %v998_v6, %v1002_v8  ;;  %v10827_v16 = vcombine.high %v1006_v11, %v1010_v12  ;;  %v1045_v52 = vld [vmem:[%s13123_s12 + $0x3d0] sm:$0xff]  ;;  %v1046_v8 = vld [vmem:[%s13123_s12 + $0x3d8] sm:$0xff] }
 0x3fe   : > { %8059 = vmatprep.subr.bf16.mxu0 %v10779_v15  ;;  %v10825_v15 = vcombine.high %v1005_v32, %v1009_v37  ;;  %v1049_v6 = vld [vmem:[%s13123_s12 + $0x3f0] sm:$0xff] }
 0x400   : > { %7732 = vmatpush1.bf16.msra.mxu1 %v10776_v46  ;;  %v1018_v46 = vld [vmem:[%s13123_s12 + $0x2f8] sm:$0xff] }
 0x401   : > { %8060 = vmatpush1.bf16.msra.mxu0 %v10778_v21  ;;  %7733 = vmatprep.subr.bf16.mxu1 %v10785_v23  ;;  %v10824_v21 = vcombine.low %v1005_v32, %v1009_v37  ;;  %v10826_v23 = vcombine.low %v1006_v11, %v1010_v12  ;;  %v10835_v25 = vcombine.high %v1014_v19, %v1018_v46  ;;  %v1053_v37 = vld [vmem:[%s13123_s12 + $0x410] sm:$0xff]  ;;  %v1054_v12 = vld [vmem:[%s13123_s12 + $0x418] sm:$0xff] }
 0x402   : > { %8061 = vmatprep.subr.bf16.mxu0 %v10787_v24  ;;  %v10833_v24 = vcombine.high %v1013_v18, %v1017_v36  ;;  %v1057_v11 = vld [vmem:[%s13123_s12 + $0x430] sm:$0xff] }
 0x404   : > { %7734 = vmatpush1.bf16.msra.mxu1 %v10784_v30  ;;  %v1026_v30 = vld [vmem:[%s13123_s12 + $0x338] sm:$0xff] }
 0x405   : > { %8062 = vmatpush1.bf16.msra.mxu0 %v10786_v33  ;;  %7735 = vmatprep.subr.bf16.mxu1 %v10793_v34  ;;  %v10832_v33 = vcombine.low %v1013_v18, %v1017_v36  ;;  %v10834_v34 = vcombine.low %v1014_v19, %v1018_v46  ;;  %v10843_v42 = vcombine.high %v1022_v28, %v1026_v30  ;;  %v1061_v36 = vld [vmem:[%s13123_s12 + $0x450] sm:$0xff] }
 0x406   : > { %8063 = vmatprep.subr.bf16.mxu0 %v10795_v35  ;;  %v10841_v35 = vcombine.high %v1021_v26, %v1025_v27  ;;  %v1065_v19 = vld [vmem:[%s13123_s12 + $0x470] sm:$0xff]  ;;  %v10872_v46 = vcombine.low %v1053_v37, %v1057_v11 }
 0x408   : > { %7736 = vmatpush1.bf16.msra.mxu1 %v10792_v53  ;;  %v1034_v53 = vld [vmem:[%s13123_s12 + $0x378] sm:$0xff] }
 0x409   : > { %8064 = vmatpush1.bf16.msra.mxu0 %v10794_v55  ;;  %7737 = vmatprep.subr.bf16.mxu1 %v10801_v57  ;;  %v10840_v55 = vcombine.low %v1021_v26, %v1025_v27  ;;  %v10842_v57 = vcombine.low %v1022_v28, %v1026_v30  ;;  %v10851_v60 = vcombine.high %v1030_v54, %v1034_v53  ;;  %v1069_v26 = vld [vmem:[%s13123_s12 + $0x490] sm:$0xff]  ;;  %v1070_v30 = vld [vmem:[%s13123_s12 + $0x498] sm:$0xff] }
 0x40a   : > { %8065 = vmatprep.subr.bf16.mxu0 %v10803_v59  ;;  %v10849_v59 = vcombine.high %v1029_v45, %v1033_v61  ;;  %v1073_v27 = vld [vmem:[%s13123_s12 + $0x4b0] sm:$0xff] }
 0x40c   : > { %7738 = vmatpush1.bf16.msra.mxu1 %v10800_v0  ;;  %v1042_v0 = vld [vmem:[%s13123_s12 + $0x3b8] sm:$0xff] }
 0x40d   : > { %8066 = vmatpush1.bf16.msra.mxu0 %v10802_v1  ;;  %7739 = vmatprep.subr.bf16.mxu1 %v10809_v43  ;;  %v10848_v1 = vcombine.low %v1029_v45, %v1033_v61  ;;  %v10850_v43 = vcombine.low %v1030_v54, %v1034_v53  ;;  %v10859_v49 = vcombine.high %v1038_v47, %v1042_v0  ;;  %v1077_v61 = vld [vmem:[%s13123_s12 + $0x4d0] sm:$0xff]  ;;  %v1078_v53 = vld [vmem:[%s13123_s12 + $0x4d8] sm:$0xff] }
 0x40e   : > { %8067 = vmatprep.subr.bf16.mxu0 %v10811_v48  ;;  %v10857_v48 = vcombine.high %v1037_v62, %v1041_v63  ;;  %v1081_v54 = vld [vmem:[%s13123_s12 + $0x4f0] sm:$0xff] }
 0x410   : > { %7740 = vmatpush1.bf16.msra.mxu1 %v10808_v9  ;;  %v1050_v9 = vld [vmem:[%s13123_s12 + $0x3f8] sm:$0xff] }
 0x411   : > { %8068 = vmatpush1.bf16.msra.mxu0 %v10810_v3  ;;  %7741 = vmatprep.subr.bf16.mxu1 %v10817_v40  ;;  %v10856_v3 = vcombine.low %v1037_v62, %v1041_v63  ;;  %v10858_v40 = vcombine.low %v1038_v47, %v1042_v0  ;;  %v10867_v32 = vcombine.high %v1046_v8, %v1050_v9  ;;  %v1089_v62 = vld [vmem:[%s13123_s12 + $0x530] sm:$0xff]  ;;  %v1086_v63 = vld [vmem:[%s13123_s12 + $0x518] sm:$0xff] }
 0x412   : > { %8069 = vmatprep.subr.bf16.mxu0 %v10819_v20  ;;  %v10865_v20 = vcombine.high %v1045_v52, %v1049_v6  ;;  %v1090_v47 = vld [vmem:[%s13123_s12 + $0x538] sm:$0xff]  ;;  %v10896_v0 = vcombine.low %v1077_v61, %v1081_v54 }
 0x414   : > { %7742 = vmatpush1.bf16.msra.mxu1 %v10816_v13  ;;  %v1058_v13 = vld [vmem:[%s13123_s12 + $0x438] sm:$0xff] }
 0x415   : > { %8070 = vmatpush1.bf16.msra.mxu0 %v10818_v39  ;;  %7743 = vmatprep.subr.bf16.mxu1 %v10825_v15  ;;  %v10864_v39 = vcombine.low %v1045_v52, %v1049_v6  ;;  %v10866_v15 = vcombine.low %v1046_v8, %v1050_v9  ;;  %v10875_v18 = vcombine.high %v1054_v12, %v1058_v13  ;;  %v1097_v52 = vld [vmem:[%s13123_s12 + $0x570] sm:$0xff]  ;;  %v1094_v6 = vld [vmem:[%s13123_s12 + $0x558] sm:$0xff] }
 0x416   : > { %8071 = vmatprep.subr.bf16.mxu0 %v10827_v16  ;;  %v10873_v16 = vcombine.high %v1053_v37, %v1057_v11  ;;  %v1098_v8 = vld [vmem:[%s13123_s12 + $0x578] sm:$0xff]  ;;  %v1105_v37 = vld [vmem:[%s13123_s12 + $0x5b0] sm:$0xff] }
 0x417   : > { %v1102_v11 = vld [vmem:[%s13123_s12 + $0x598] sm:$0xff] }
 0x418   : > { %7744 = vmatpush1.bf16.msra.mxu1 %v10824_v21  ;;  %v1062_v21 = vld [vmem:[%s13123_s12 + $0x458] sm:$0xff] }
 0x419   : > { %8072 = vmatpush1.bf16.msra.mxu0 %v10826_v23  ;;  %7745 = vmatprep.subr.bf16.mxu1 %v10833_v24  ;;  %v1066_v23 = vld [vmem:[%s13123_s12 + $0x478] sm:$0xff]  ;;  %v10874_v24 = vcombine.low %v1054_v12, %v1058_v13 }
 0x41a   : > { %8073 = vmatprep.subr.bf16.mxu0 %v10835_v25  ;;  %v10881_v25 = vcombine.high %v1061_v36, %v1065_v19  ;;  %v10883_v28 = vcombine.high %v1062_v21, %v1066_v23  ;;  %v1106_v12 = vld [vmem:[%s13123_s12 + $0x5b8] sm:$0xff] }
 0x41c   : > { %7746 = vmatpush1.bf16.msra.mxu1 %v10832_v33  ;;  %v1074_v33 = vld [vmem:[%s13123_s12 + $0x4b8] sm:$0xff] }
 0x41d   : > { %8074 = vmatpush1.bf16.msra.mxu0 %v10834_v34  ;;  %7747 = vmatprep.subr.bf16.mxu1 %v10841_v35  ;;  %v10880_v34 = vcombine.low %v1061_v36, %v1065_v19  ;;  %v10882_v35 = vcombine.low %v1062_v21, %v1066_v23  ;;  %v10891_v45 = vcombine.high %v1070_v30, %v1074_v33  ;;  %v1113_v36 = vld [vmem:[%s13123_s12 + $0x5f0] sm:$0xff]  ;;  %v1110_v19 = vld [vmem:[%s13123_s12 + $0x5d8] sm:$0xff] }
 0x41e   : > { %8075 = vmatprep.subr.bf16.mxu0 %v10843_v42  ;;  %v10889_v42 = vcombine.high %v1069_v26, %v1073_v27  ;;  %v10922_v23 = vcombine.low %v1102_v11, %v1106_v12 }
 0x420   : > { %7748 = vmatpush1.bf16.msra.mxu1 %v10840_v55  ;;  %v10888_v55 = vcombine.low %v1069_v26, %v1073_v27  ;;  %v1117_v26 = vld [vmem:[%s13123_s12 + $0x610] sm:$0xff] }
 0x421   : > { %8076 = vmatpush1.bf16.msra.mxu0 %v10842_v57  ;;  %7749 = vmatprep.subr.bf16.mxu1 %v10849_v59  ;;  %v10890_v57 = vcombine.low %v1070_v30, %v1074_v33  ;;  %v10897_v59 = vcombine.high %v1077_v61, %v1081_v54  ;;  %v1121_v27 = vld [vmem:[%s13123_s12 + $0x630] sm:$0xff]  ;;  %v1122_v30 = vld [vmem:[%s13123_s12 + $0x638] sm:$0xff] }
 0x422   : > { %8077 = vmatprep.subr.bf16.mxu0 %v10851_v60  ;;  %v1085_v60 = vld [vmem:[%s13123_s12 + $0x510] sm:$0xff]  ;;  %v1126_v54 = vld [vmem:[%s13123_s12 + $0x658] sm:$0xff] }
 0x423   : > { %v10904_v9 = vcombine.low %v1085_v60, %v1089_v62  ;;  %v1129_v61 = vld [vmem:[%s13123_s12 + $0x670] sm:$0xff] }
 0x424   : > { %7750 = vmatpush1.bf16.msra.mxu1 %v10848_v1 }
 0x425   : > { %8078 = vmatpush1.bf16.msra.mxu0 %v10850_v43  ;;  %7751 = vmatprep.subr.bf16.mxu1 %v10857_v48  ;;  %v10905_v43 = vcombine.high %v1085_v60, %v1089_v62  ;;  %v10907_v48 = vcombine.high %v1086_v63, %v1090_v47  ;;  %v1137_v60 = vld [vmem:[%s13123_s12 + $0x6b0] sm:$0xff]  ;;  %v1134_v62 = vld [vmem:[%s13123_s12 + $0x698] sm:$0xff] }
 0x426   : > { %8079 = vmatprep.subr.bf16.mxu0 %v10859_v49  ;;  %v1093_v49 = vld [vmem:[%s13123_s12 + $0x550] sm:$0xff] }
 0x427   : > { %v10912_v13 = vcombine.low %v1093_v49, %v1097_v52 }
 0x428   : > { %7752 = vmatpush1.bf16.msra.mxu1 %v10856_v3  ;;  %v10906_v3 = vcombine.low %v1086_v63, %v1090_v47  ;;  %v1138_v63 = vld [vmem:[%s13123_s12 + $0x6b8] sm:$0xff] }
 0x429   : > { %8080 = vmatpush1.bf16.msra.mxu0 %v10858_v40  ;;  %7753 = vmatprep.subr.bf16.mxu1 %v10865_v20  ;;  %v10913_v40 = vcombine.high %v1093_v49, %v1097_v52  ;;  %v10915_v20 = vcombine.high %v1094_v6, %v1098_v8  ;;  %v1145_v49 = vld [vmem:[%s13123_s12 + $0x6f0] sm:$0xff]  ;;  %v1142_v52 = vld [vmem:[%s13123_s12 + $0x6d8] sm:$0xff] }
 0x42a   : > { %8081 = vmatprep.subr.bf16.mxu0 %v10867_v32  ;;  %v1101_v32 = vld [vmem:[%s13123_s12 + $0x590] sm:$0xff] }
 0x42b   : > { %v10920_v21 = vcombine.low %v1101_v32, %v1105_v37 }
 0x42c   : > { %7754 = vmatpush1.bf16.msra.mxu1 %v10864_v39  ;;  %v10914_v39 = vcombine.low %v1094_v6, %v1098_v8  ;;  %v1146_v6 = vld [vmem:[%s13123_s12 + $0x6f8] sm:$0xff] }
 0x42d   : > { %8082 = vmatpush1.bf16.msra.mxu0 %v10866_v15  ;;  %7764 = vmatprep.subr.bf16.mxu1 %v10873_v16  ;;  %v10921_v15 = vcombine.high %v1101_v32, %v1105_v37  ;;  %v10923_v16 = vcombine.high %v1102_v11, %v1106_v12  ;;  %v1153_v32 = vld [vmem:[%s13123_s12 + $0x730] sm:$0xff]  ;;  %v1150_v37 = vld [vmem:[%s13123_s12 + $0x718] sm:$0xff] }
 0x42e   : > { %8092 = vmatprep.subr.bf16.mxu0 %v10875_v18  ;;  %v1109_v18 = vld [vmem:[%s13123_s12 + $0x5d0] sm:$0xff]  ;;  %v1154_v11 = vld [vmem:[%s13123_s12 + $0x738] sm:$0xff] }
 0x42f   : > { %7756 = vmatmul.mubr.bf16.vlgmr.msra.gmra.mrb[4].mxu1 %v13338_v51  ;;  %v10928_v33 = vcombine.low %v1109_v18, %v1113_v36 }
 0x430   : > { %8084 = vmatmul.mubr.bf16.vlgmr.msra.gmra.mrb[12].mxu0 %v13338_v51  ;;  %7765 = vmatpush1.bf16.msra.mxu1 %v10872_v46  ;;  %v1082_v51 = vld [vmem:[%s13123_s12 + $0x4f8] sm:$0xff] }
 0x431   : > { %7796 = vmatprep.mubr.bf16.mxu1 %v13342_v56  ;;  %8093 = vmatpush1.bf16.msra.mxu0 %v10874_v24  ;;  %v10898_v1 = vcombine.low %v1078_v53, %v1082_v51  ;;  %v1114_v46 = vld [vmem:[%s13123_s12 + $0x5f8] sm:$0xff]  ;;  %v10929_v24 = vcombine.high %v1109_v18, %v1113_v36  ;;  %v1161_v18 = vld [vmem:[%s13123_s12 + $0x770] sm:$0xff] }
 0x432   : > { %8124 = vmatprep.mubr.bf16.mxu0 %v13342_v56  ;;  %7766 = vmatprep.subr.bf16.mxu1 %v10881_v25  ;;  %v10899_v56 = vcombine.high %v1078_v53, %v1082_v51  ;;  %v10931_v25 = vcombine.high %v1110_v19, %v1114_v46  ;;  %v1130_v53 = vld [vmem:[%s13123_s12 + $0x678] sm:$0xff]  ;;  %v10936_v51 = vcombine.low %v1117_v26, %v1121_v27 }
 0x433   : > { %8094 = vmatprep.subr.bf16.mxu0 %v10883_v28  ;;  %v1118_v28 = vld [vmem:[%s13123_s12 + $0x618] sm:$0xff] }
 0x434   : > { %7767 = vmatpush1.bf16.msra.mxu1 %v10880_v34  ;;  %v10930_v34 = vcombine.low %v1110_v19, %v1114_v46  ;;  %v1158_v36 = vld [vmem:[%s13123_s12 + $0x758] sm:$0xff] }
 0x435   : > { %8095 = vmatpush1.bf16.msra.mxu0 %v10882_v35  ;;  %7768 = vmatprep.subr.bf16.mxu1 %v10889_v42  ;;  %v10937_v35 = vcombine.high %v1117_v26, %v1121_v27  ;;  %v10939_v42 = vcombine.high %v1118_v28, %v1122_v30  ;;  %v1162_v19 = vld [vmem:[%s13123_s12 + $0x778] sm:$0xff]  ;;  %v1169_v26 = vld [vmem:[%s13123_s12 + $0x7b0] sm:$0xff] }
 0x436   : > { %8096 = vmatprep.subr.bf16.mxu0 %v10891_v45  ;;  %v1125_v45 = vld [vmem:[%s13123_s12 + $0x650] sm:$0xff]  ;;  %v1166_v27 = vld [vmem:[%s13123_s12 + $0x798] sm:$0xff] }
 0x437   : > { %v10944_v47 = vcombine.low %v1125_v45, %v1129_v61 }
 0x438   : > { %7769 = vmatpush1.bf16.msra.mxu1 %v10888_v55  ;;  %v10938_v55 = vcombine.low %v1118_v28, %v1122_v30  ;;  %v1170_v28 = vld [vmem:[%s13123_s12 + $0x7b8] sm:$0xff] }
 0x439   : > { %8097 = vmatpush1.bf16.msra.mxu0 %v10890_v57  ;;  %7770 = vmatprep.subr.bf16.mxu1 %v10897_v59  ;;  %v10945_v57 = vcombine.high %v1125_v45, %v1129_v61  ;;  %v10947_v59 = vcombine.high %v1126_v54, %v1130_v53  ;;  %v1177_v45 = vld [vmem:[%s13123_s12 + $0x7f0] sm:$0xff]  ;;  %v1174_v61 = vld [vmem:[%s13123_s12 + $0x7d8] sm:$0xff] }
 0x43a   : > { %8098 = vmatprep.subr.bf16.mxu0 %v10899_v56  ;;  %v1133_v56 = vld [vmem:[%s13123_s12 + $0x690] sm:$0xff] }
 0x43b   : > { %v10952_v8 = vcombine.low %v1133_v56, %v1137_v60 }
 0x43c   : > { %7771 = vmatpush1.bf16.msra.mxu1 %v10896_v0  ;;  %v10946_v0 = vcombine.low %v1126_v54, %v1130_v53  ;;  %v1178_v54 = vld [vmem:[%s13123_s12 + $0x7f8] sm:$0xff] }
 0x43d   : > { %8099 = vmatpush1.bf16.msra.mxu0 %v10898_v1  ;;  %7772 = vmatprep.subr.bf16.mxu1 %v10905_v43  ;;  %v10953_v1 = vcombine.high %v1133_v56, %v1137_v60  ;;  %v10955_v43 = vcombine.high %v1134_v62, %v1138_v63  ;;  %v1185_v56 = vld [vmem:[%s13123_s12 + $0x830] sm:$0xff]  ;;  %v1182_v60 = vld [vmem:[%s13123_s12 + $0x818] sm:$0xff] }
 0x43e   : > { %8100 = vmatprep.subr.bf16.mxu0 %v10907_v48  ;;  %v1141_v48 = vld [vmem:[%s13123_s12 + $0x6d0] sm:$0xff] }
 0x43f   : > { %v10960_v12 = vcombine.low %v1141_v48, %v1145_v49 }
 0x440   : > { %7773 = vmatpush1.bf16.msra.mxu1 %v10904_v9  ;;  %v10954_v9 = vcombine.low %v1134_v62, %v1138_v63  ;;  %v1186_v62 = vld [vmem:[%s13123_s12 + $0x838] sm:$0xff] }
 0x441   : > { %8101 = vmatpush1.bf16.msra.mxu0 %v10906_v3  ;;  %7774 = vmatprep.subr.bf16.mxu1 %v10913_v40  ;;  %v10961_v3 = vcombine.high %v1141_v48, %v1145_v49  ;;  %v10963_v40 = vcombine.high %v1142_v52, %v1146_v6  ;;  %v1193_v48 = vld [vmem:[%s13123_s12 + $0x870] sm:$0xff] }
 0x442   : > { %8102 = vmatprep.subr.bf16.mxu0 %v10915_v20  ;;  %v1149_v20 = vld [vmem:[%s13123_s12 + $0x710] sm:$0xff] }
 0x443   : > { %v10968_v46 = vcombine.low %v1149_v20, %v1153_v32 }
 0x444   : > { %7775 = vmatpush1.bf16.msra.mxu1 %v10912_v13  ;;  %v10962_v13 = vcombine.low %v1142_v52, %v1146_v6  ;;  %v1190_v52 = vld [vmem:[%s13123_s12 + $0x858] sm:$0xff] }
 0x445   : > { %8103 = vmatpush1.bf16.msra.mxu0 %v10914_v39  ;;  %7776 = vmatprep.subr.bf16.mxu1 %v10921_v15  ;;  %v10969_v39 = vcombine.high %v1149_v20, %v1153_v32  ;;  %v10971_v15 = vcombine.high %v1150_v37, %v1154_v11  ;;  %v1194_v6 = vld [vmem:[%s13123_s12 + $0x878] sm:$0xff] }
 0x446   : > { %8104 = vmatprep.subr.bf16.mxu0 %v10923_v16  ;;  %v1157_v16 = vld [vmem:[%s13123_s12 + $0x750] sm:$0xff]  ;;  %v11011_v20 = vcombine.high %v1190_v52, %v1194_v6  ;;  %v1198_v32 = vld [vmem:[%s13123_s12 + $0x898] sm:$0xff] }
 0x447   : > { %v10976_v30 = vcombine.low %v1157_v16, %v1161_v18 }
 0x448   : > { %7777 = vmatpush1.bf16.msra.mxu1 %v10920_v21  ;;  %v10970_v21 = vcombine.low %v1150_v37, %v1154_v11  ;;  %v1202_v37 = vld [vmem:[%s13123_s12 + $0x8b8] sm:$0xff] }
 0x449   : > { %8105 = vmatpush1.bf16.msra.mxu0 %v10922_v23  ;;  %7778 = vmatprep.subr.bf16.mxu1 %v10929_v24  ;;  %v10977_v23 = vcombine.high %v1157_v16, %v1161_v18  ;;  %v10979_v24 = vcombine.high %v1158_v36, %v1162_v19  ;;  %v1209_v16 = vld [vmem:[%s13123_s12 + $0x8f0] sm:$0xff]  ;;  %v1206_v18 = vld [vmem:[%s13123_s12 + $0x8d8] sm:$0xff] }
 0x44a   : > { %8106 = vmatprep.subr.bf16.mxu0 %v10931_v25  ;;  %v1165_v25 = vld [vmem:[%s13123_s12 + $0x790] sm:$0xff] }
 0x44b   : > { %v10984_v53 = vcombine.low %v1165_v25, %v1169_v26 }
 0x44c   : > { %7779 = vmatpush1.bf16.msra.mxu1 %v10928_v33  ;;  %v10978_v33 = vcombine.low %v1158_v36, %v1162_v19  ;;  %v11018_v19 = vcombine.low %v1198_v32, %v1202_v37 }
 0x44d   : > { %8107 = vmatpush1.bf16.msra.mxu0 %v10930_v34  ;;  %7780 = vmatprep.subr.bf16.mxu1 %v10937_v35  ;;  %v10985_v34 = vcombine.high %v1165_v25, %v1169_v26  ;;  %v10987_v35 = vcombine.high %v1166_v27, %v1170_v28  ;;  %v1218_v25 = vld [vmem:[%s13123_s12 + $0x938] sm:$0xff] }
 0x44e   : > { %8108 = vmatprep.subr.bf16.mxu0 %v10939_v42  ;;  %v1173_v42 = vld [vmem:[%s13123_s12 + $0x7d0] sm:$0xff] }
 0x44f   : > { %v10992_v63 = vcombine.low %v1173_v42, %v1177_v45 }
 0x450   : > { %7781 = vmatpush1.bf16.msra.mxu1 %v10936_v51  ;;  %v10986_v51 = vcombine.low %v1166_v27, %v1170_v28 }
 0x451   : > { %8109 = vmatpush1.bf16.msra.mxu0 %v10938_v55  ;;  %7782 = vmatprep.subr.bf16.mxu1 %v10945_v57  ;;  %v10993_v55 = vcombine.high %v1173_v42, %v1177_v45  ;;  %v10995_v57 = vcombine.high %v1174_v61, %v1178_v54  ;;  %v1226_v42 = vld [vmem:[%s13123_s12 + $0x978] sm:$0xff] }
 0x452   : > { %8110 = vmatprep.subr.bf16.mxu0 %v10947_v59  ;;  %v1181_v59 = vld [vmem:[%s13123_s12 + $0x810] sm:$0xff] }
 0x453   : > { %v11000_v49 = vcombine.low %v1181_v59, %v1185_v56 }
 0x454   : > { %7783 = vmatpush1.bf16.msra.mxu1 %v10944_v47  ;;  %v10994_v47 = vcombine.low %v1174_v61, %v1178_v54 }
 0x455   : > { %8111 = vmatpush1.bf16.msra.mxu0 %v10946_v0  ;;  %7784 = vmatprep.subr.bf16.mxu1 %v10953_v1  ;;  %v11001_v0 = vcombine.high %v1181_v59, %v1185_v56  ;;  %v11003_v1 = vcombine.high %v1182_v60, %v1186_v62  ;;  %v1234_v59 = vld [vmem:[%s13123_s12 + $0x9b8] sm:$0xff] }
 0x456   : > { %8112 = vmatprep.subr.bf16.mxu0 %v10955_v43  ;;  %v1189_v43 = vld [vmem:[%s13123_s12 + $0x850] sm:$0xff] }
 0x457   : > { %v11008_v11 = vcombine.low %v1189_v43, %v1193_v48 }
 0x458   : > { %7785 = vmatpush1.bf16.msra.mxu1 %v10952_v8  ;;  %v11002_v8 = vcombine.low %v1182_v60, %v1186_v62 }
 0x459   : > { %8113 = vmatpush1.bf16.msra.mxu0 %v10954_v9  ;;  %7786 = vmatprep.subr.bf16.mxu1 %v10961_v3  ;;  %v11009_v9 = vcombine.high %v1189_v43, %v1193_v48  ;;  %v1197_v3 = vld [vmem:[%s13123_s12 + $0x890] sm:$0xff]  ;;  %v1242_v43 = vld [vmem:[%s13123_s12 + $0x9f8] sm:$0xff] }
 0x45a   : > { %8114 = vmatprep.subr.bf16.mxu0 %v10963_v40  ;;  %v1201_v40 = vld [vmem:[%s13123_s12 + $0x8b0] sm:$0xff] }
 0x45b   : > { %v11016_v36 = vcombine.low %v1197_v3, %v1201_v40 }
 0x45c   : > { %7787 = vmatpush1.bf16.msra.mxu1 %v10960_v12  ;;  %v11010_v12 = vcombine.low %v1190_v52, %v1194_v6 }
 0x45d   : > { %8115 = vmatpush1.bf16.msra.mxu0 %v10962_v13  ;;  %7788 = vmatprep.subr.bf16.mxu1 %v10969_v39  ;;  %v11017_v13 = vcombine.high %v1197_v3, %v1201_v40  ;;  %v11019_v39 = vcombine.high %v1198_v32, %v1202_v37  ;;  %v1246_v3 = vld [vmem:[%s13123_s12 + $0xa18] sm:$0xff] }
 0x45e   : > { %8116 = vmatprep.subr.bf16.mxu0 %v10971_v15  ;;  %v1205_v15 = vld [vmem:[%s13123_s12 + $0x8d0] sm:$0xff]  ;;  %v1250_v40 = vld [vmem:[%s13123_s12 + $0xa38] sm:$0xff] }
 0x45f   : > { %v11024_v26 = vcombine.low %v1205_v15, %v1209_v16 }
 0x460   : > { %7789 = vmatpush1.bf16.msra.mxu1 %v10968_v46  ;;  %v11025_v46 = vcombine.high %v1205_v15, %v1209_v16  ;;  %v1258_v15 = vld [vmem:[%s13123_s12 + $0xa78] sm:$0xff] }
 0x461   : > { %8117 = vmatpush1.bf16.msra.mxu0 %v10970_v21  ;;  %7790 = vmatprep.subr.bf16.mxu1 %v10977_v23  ;;  %v1213_v21 = vld [vmem:[%s13123_s12 + $0x910] sm:$0xff] }
 0x462   : > { %8118 = vmatprep.subr.bf16.mxu0 %v10979_v24  ;;  %v1217_v23 = vld [vmem:[%s13123_s12 + $0x930] sm:$0xff]  ;;  %v1214_v24 = vld [vmem:[%s13123_s12 + $0x918] sm:$0xff] }
 0x463   : > { %v11033_v28 = vcombine.high %v1213_v21, %v1217_v23  ;;  %v11032_v45 = vcombine.low %v1213_v21, %v1217_v23  ;;  %v11034_v61 = vcombine.low %v1214_v24, %v1218_v25  ;;  %v1266_v21 = vld [vmem:[%s13123_s12 + $0xab8] sm:$0xff] }
 0x464   : > { %7791 = vmatpush1.bf16.msra.mxu1 %v10976_v30  ;;  %v11035_v30 = vcombine.high %v1214_v24, %v1218_v25 }
 0x465   : > { %8119 = vmatpush1.bf16.msra.mxu0 %v10978_v33  ;;  %7792 = vmatprep.subr.bf16.mxu1 %v10985_v34  ;;  %v1221_v33 = vld [vmem:[%s13123_s12 + $0x950] sm:$0xff] }
 0x466   : > { %8120 = vmatprep.subr.bf16.mxu0 %v10987_v35  ;;  %v1225_v34 = vld [vmem:[%s13123_s12 + $0x970] sm:$0xff]  ;;  %v1222_v35 = vld [vmem:[%s13123_s12 + $0x958] sm:$0xff] }
 0x467   : > { %v11041_v54 = vcombine.high %v1221_v33, %v1225_v34  ;;  %v11040_v56 = vcombine.low %v1221_v33, %v1225_v34  ;;  %v11042_v60 = vcombine.low %v1222_v35, %v1226_v42  ;;  %v1274_v33 = vld [vmem:[%s13123_s12 + $0xaf8] sm:$0xff] }
 0x468   : > { %7793 = vmatpush1.bf16.msra.mxu1 %v10984_v53  ;;  %v11043_v53 = vcombine.high %v1222_v35, %v1226_v42 }
 0x469   : > { %8121 = vmatpush1.bf16.msra.mxu0 %v10986_v51  ;;  %7794 = vmatprep.subr.bf16.mxu1 %v10993_v55  ;;  %v1229_v51 = vld [vmem:[%s13123_s12 + $0x990] sm:$0xff] }
 0x46a   : > { %8122 = vmatprep.subr.bf16.mxu0 %v10995_v57  ;;  %v1233_v55 = vld [vmem:[%s13123_s12 + $0x9b0] sm:$0xff]  ;;  %v1230_v57 = vld [vmem:[%s13123_s12 + $0x998] sm:$0xff] }
 0x46b   : > { %v11049_v62 = vcombine.high %v1229_v51, %v1233_v55  ;;  %v11048_v48 = vcombine.low %v1229_v51, %v1233_v55  ;;  %v1282_v51 = vld [vmem:[%s13123_s12 + $0xb38] sm:$0xff] }
 0x46c   : > { %7795 = vmatpush1.bf16.msra.mxu1 %v10992_v63  ;;  %v11051_v63 = vcombine.high %v1230_v57, %v1234_v59 }
 0x46d   : > { %8123 = vmatpush1.bf16.msra.mxu0 %v10994_v47  ;;  %7805 = vmatprep.subr.bf16.mxu1 %v11001_v0  ;;  %v1237_v47 = vld [vmem:[%s13123_s12 + $0x9d0] sm:$0xff] }
 0x46e   : > { %8133 = vmatprep.subr.bf16.mxu0 %v11003_v1  ;;  %v1241_v0 = vld [vmem:[%s13123_s12 + $0x9f0] sm:$0xff]  ;;  %v1238_v1 = vld [vmem:[%s13123_s12 + $0x9d8] sm:$0xff] }
 0x46f   : > { %7797 = vmatmul.mubr.bf16.vlgmr.msra.gmra.mrb[4].mxu1 %v13432_v50  ;;  %v11057_v52 = vcombine.high %v1237_v47, %v1241_v0  ;;  %v11059_v6 = vcombine.high %v1238_v1, %v1242_v43  ;;  %v11058_v32 = vcombine.low %v1238_v1, %v1242_v43 }
 0x470   : > { %8125 = vmatmul.mubr.bf16.vlgmr.msra.gmra.mrb[12].mxu0 %v13432_v50  ;;  %7806 = vmatpush1.bf16.msra.mxu1 %v11000_v49  ;;  %v1210_v50 = vld [vmem:[%s13123_s12 + $0x8f8] sm:$0xff]  ;;  %v11050_v49 = vcombine.low %v1230_v57, %v1234_v59 }
 0x471   : > { %7837 = vmatprep.mubr.bf16.mxu1 %v13434_v4  ;;  %8134 = vmatpush1.bf16.msra.mxu0 %v11002_v8  ;;  %v11026_v27 = vcombine.low %v1206_v18, %v1210_v50  ;;  %v1245_v8 = vld [vmem:[%s13123_s12 + $0xa10] sm:$0xff] }
 0x472   : > { %8165 = vmatprep.mubr.bf16.mxu0 %v13434_v4  ;;  %7807 = vmatprep.subr.bf16.mxu1 %v11009_v9  ;;  %v11027_v4 = vcombine.high %v1206_v18, %v1210_v50  ;;  %v1249_v9 = vld [vmem:[%s13123_s12 + $0xa30] sm:$0xff]  ;;  %v11066_v18 = vcombine.low %v1246_v3, %v1250_v40 }
 0x473   : > { %8135 = vmatprep.subr.bf16.mxu0 %v11011_v20  ;;  %v11056_v20 = vcombine.low %v1237_v47, %v1241_v0  ;;  %v11065_v37 = vcombine.high %v1245_v8, %v1249_v9  ;;  %v11064_v16 = vcombine.low %v1245_v8, %v1249_v9  ;;  %v1290_v47 = vld [vmem:[%s13123_s12 + $0xb78] sm:$0xff] }
 0x474   : > { %7808 = vmatpush1.bf16.msra.mxu1 %v11008_v11  ;;  %v11067_v11 = vcombine.high %v1246_v3, %v1250_v40  ;;  %v1298_v8 = vld [vmem:[%s13123_s12 + $0xbb8] sm:$0xff] }
 0x475   : > { %8136 = vmatpush1.bf16.msra.mxu0 %v11010_v12  ;;  %7809 = vmatprep.subr.bf16.mxu1 %v11017_v13  ;;  %v1253_v12 = vld [vmem:[%s13123_s12 + $0xa50] sm:$0xff] }
 0x476   : > { %8137 = vmatprep.subr.bf16.mxu0 %v11019_v39  ;;  %v1257_v13 = vld [vmem:[%s13123_s12 + $0xa70] sm:$0xff]  ;;  %v1254_v39 = vld [vmem:[%s13123_s12 + $0xa58] sm:$0xff] }
 0x477   : > { %v11073_v50 = vcombine.high %v1253_v12, %v1257_v13  ;;  %v11072_v23 = vcombine.low %v1253_v12, %v1257_v13  ;;  %v11074_v24 = vcombine.low %v1254_v39, %v1258_v15  ;;  %v1306_v12 = vld [vmem:[%s13123_s12 + $0xbf8] sm:$0xff] }
 0x478   : > { %7810 = vmatpush1.bf16.msra.mxu1 %v11016_v36  ;;  %v11075_v36 = vcombine.high %v1254_v39, %v1258_v15 }
 0x479   : > { %8138 = vmatpush1.bf16.msra.mxu0 %v11018_v19  ;;  %7811 = vmatprep.subr.bf16.mxu1 %v11025_v46  ;;  %v1261_v19 = vld [vmem:[%s13123_s12 + $0xa90] sm:$0xff] }
 0x47a   : > { %8139 = vmatprep.subr.bf16.mxu0 %v11027_v4  ;;  %v1265_v46 = vld [vmem:[%s13123_s12 + $0xab0] sm:$0xff]  ;;  %v1262_v4 = vld [vmem:[%s13123_s12 + $0xa98] sm:$0xff] }
 0x47b   : > { %v11081_v25 = vcombine.high %v1261_v19, %v1265_v46  ;;  %v11080_v34 = vcombine.low %v1261_v19, %v1265_v46  ;;  %v11082_v35 = vcombine.low %v1262_v4, %v1266_v21  ;;  %v1314_v19 = vld [vmem:[%s13123_s12 + $0xc38] sm:$0xff] }
 0x47c   : > { %7812 = vmatpush1.bf16.msra.mxu1 %v11024_v26  ;;  %v11083_v26 = vcombine.high %v1262_v4, %v1266_v21 }
 0x47d   : > { %8140 = vmatpush1.bf16.msra.mxu0 %v11026_v27  ;;  %7813 = vmatprep.subr.bf16.mxu1 %v11033_v28  ;;  %v1269_v27 = vld [vmem:[%s13123_s12 + $0xad0] sm:$0xff] }
 0x47e   : > { %8141 = vmatprep.subr.bf16.mxu0 %v11035_v30  ;;  %v1273_v28 = vld [vmem:[%s13123_s12 + $0xaf0] sm:$0xff]  ;;  %v1270_v30 = vld [vmem:[%s13123_s12 + $0xad8] sm:$0xff] }
 0x47f   : > { %v11089_v42 = vcombine.high %v1269_v27, %v1273_v28  ;;  %v11088_v55 = vcombine.low %v1269_v27, %v1273_v28  ;;  %v11090_v57 = vcombine.low %v1270_v30, %v1274_v33  ;;  %v1318_v27 = vld [vmem:[%s13123_s12 + $0xc58] sm:$0xff] }
 0x480   : > { %7814 = vmatpush1.bf16.msra.mxu1 %v11032_v45  ;;  %v11091_v45 = vcombine.high %v1270_v30, %v1274_v33  ;;  %v1322_v28 = vld [vmem:[%s13123_s12 + $0xc78] sm:$0xff] }
 0x481   : > { %8142 = vmatpush1.bf16.msra.mxu0 %v11034_v61  ;;  %7815 = vmatprep.subr.bf16.mxu1 %v11041_v54  ;;  %v1277_v61 = vld [vmem:[%s13123_s12 + $0xb10] sm:$0xff] }
 0x482   : > { %8143 = vmatprep.subr.bf16.mxu0 %v11043_v53  ;;  %v1281_v54 = vld [vmem:[%s13123_s12 + $0xb30] sm:$0xff]  ;;  %v1278_v53 = vld [vmem:[%s13123_s12 + $0xb18] sm:$0xff] }
 0x483   : > { %v11097_v59 = vcombine.high %v1277_v61, %v1281_v54  ;;  %v11096_v0 = vcombine.low %v1277_v61, %v1281_v54  ;;  %v11098_v1 = vcombine.low %v1278_v53, %v1282_v51  ;;  %v1330_v61 = vld [vmem:[%s13123_s12 + $0xcb8] sm:$0xff] }
 0x484   : > { %7816 = vmatpush1.bf16.msra.mxu1 %v11040_v56  ;;  %v11099_v56 = vcombine.high %v1278_v53, %v1282_v51  ;;  %v11138_v53 = vcombine.low %v1318_v27, %v1322_v28 }
 0x485   : > { %8144 = vmatpush1.bf16.msra.mxu0 %v11042_v60  ;;  %7817 = vmatprep.subr.bf16.mxu1 %v11049_v62  ;;  %v1285_v60 = vld [vmem:[%s13123_s12 + $0xb50] sm:$0xff] }
 0x486   : > { %8145 = vmatprep.subr.bf16.mxu0 %v11051_v63  ;;  %v1289_v62 = vld [vmem:[%s13123_s12 + $0xb70] sm:$0xff]  ;;  %v1286_v63 = vld [vmem:[%s13123_s12 + $0xb58] sm:$0xff] }
 0x487   : > { %v11105_v43 = vcombine.high %v1285_v60, %v1289_v62  ;;  %v11104_v9 = vcombine.low %v1285_v60, %v1289_v62  ;;  %v11106_v3 = vcombine.low %v1286_v63, %v1290_v47 }
 0x488   : > { %7818 = vmatpush1.bf16.msra.mxu1 %v11048_v48  ;;  %v11107_v48 = vcombine.high %v1286_v63, %v1290_v47  ;;  %v1341_v47 = vld [vmem:[%s13123_s12 + $0xd10] sm:$0xff] }
 0x489   : > { %8146 = vmatpush1.bf16.msra.mxu0 %v11050_v49  ;;  %7819 = vmatprep.subr.bf16.mxu1 %v11057_v52  ;;  %v1293_v49 = vld [vmem:[%s13123_s12 + $0xb90] sm:$0xff] }
 0x48a   : > { %8147 = vmatprep.subr.bf16.mxu0 %v11059_v6  ;;  %v1297_v52 = vld [vmem:[%s13123_s12 + $0xbb0] sm:$0xff]  ;;  %v1294_v6 = vld [vmem:[%s13123_s12 + $0xb98] sm:$0xff] }
 0x48b   : > { %v11113_v40 = vcombine.high %v1293_v49, %v1297_v52  ;;  %v11112_v13 = vcombine.low %v1293_v49, %v1297_v52  ;;  %v11114_v39 = vcombine.low %v1294_v6, %v1298_v8 }
 0x48c   : > { %7820 = vmatpush1.bf16.msra.mxu1 %v11056_v20  ;;  %v11115_v20 = vcombine.high %v1294_v6, %v1298_v8  ;;  %v1349_v8 = vld [vmem:[%s13123_s12 + $0xd50] sm:$0xff] }
 0x48d   : > { %8148 = vmatpush1.bf16.msra.mxu0 %v11058_v32  ;;  %7821 = vmatprep.subr.bf16.mxu1 %v11065_v37  ;;  %v1301_v32 = vld [vmem:[%s13123_s12 + $0xbd0] sm:$0xff] }
 0x48e   : > { %8149 = vmatprep.subr.bf16.mxu0 %v11067_v11  ;;  %v1305_v37 = vld [vmem:[%s13123_s12 + $0xbf0] sm:$0xff]  ;;  %v1302_v11 = vld [vmem:[%s13123_s12 + $0xbd8] sm:$0xff] }
 0x48f   : > { %v11121_v15 = vcombine.high %v1301_v32, %v1305_v37  ;;  %v11120_v46 = vcombine.low %v1301_v32, %v1305_v37  ;;  %v11122_v4 = vcombine.low %v1302_v11, %v1306_v12 }
 0x490   : > { %7822 = vmatpush1.bf16.msra.mxu1 %v11064_v16  ;;  %v11123_v16 = vcombine.high %v1302_v11, %v1306_v12  ;;  %v1357_v12 = vld [vmem:[%s13123_s12 + $0xd90] sm:$0xff] }
 0x491   : > { %8150 = vmatpush1.bf16.msra.mxu0 %v11066_v18  ;;  %7823 = vmatprep.subr.bf16.mxu1 %v11073_v50  ;;  %v1309_v18 = vld [vmem:[%s13123_s12 + $0xc10] sm:$0xff] }
 0x492   : > { %8151 = vmatprep.subr.bf16.mxu0 %v11075_v36  ;;  %v1313_v50 = vld [vmem:[%s13123_s12 + $0xc30] sm:$0xff]  ;;  %v1310_v36 = vld [vmem:[%s13123_s12 + $0xc18] sm:$0xff] }
 0x493   : > { %v11129_v21 = vcombine.high %v1309_v18, %v1313_v50  ;;  %v11130_v30 = vcombine.low %v1310_v36, %v1314_v19 }
 0x494   : > { %7824 = vmatpush1.bf16.msra.mxu1 %v11072_v23  ;;  %v11131_v23 = vcombine.high %v1310_v36, %v1314_v19 }
 0x495   : > { %8152 = vmatpush1.bf16.msra.mxu0 %v11074_v24  ;;  %7825 = vmatprep.subr.bf16.mxu1 %v11081_v25  ;;  %v1317_v24 = vld [vmem:[%s13123_s12 + $0xc50] sm:$0xff] }
 0x496   : > { %8153 = vmatprep.subr.bf16.mxu0 %v11083_v26  ;;  %v1321_v25 = vld [vmem:[%s13123_s12 + $0xc70] sm:$0xff]  ;;  %v11128_v26 = vcombine.low %v1309_v18, %v1313_v50 }
 0x497   : > { %v11137_v33 = vcombine.high %v1317_v24, %v1321_v25  ;;  %v11136_v54 = vcombine.low %v1317_v24, %v1321_v25  ;;  %v1366_v24 = vld [vmem:[%s13123_s12 + $0xdd8] sm:$0xff] }
 0x498   : > { %7826 = vmatpush1.bf16.msra.mxu1 %v11080_v34  ;;  %v1325_v34 = vld [vmem:[%s13123_s12 + $0xc90] sm:$0xff]  ;;  %v1370_v25 = vld [vmem:[%s13123_s12 + $0xdf8] sm:$0xff] }
 0x499   : > { %8154 = vmatpush1.bf16.msra.mxu0 %v11082_v35  ;;  %7827 = vmatprep.subr.bf16.mxu1 %v11089_v42  ;;  %v1329_v35 = vld [vmem:[%s13123_s12 + $0xcb0] sm:$0xff]  ;;  %v11139_v42 = vcombine.high %v1318_v27, %v1322_v28 }
 0x49a   : > { %8155 = vmatprep.subr.bf16.mxu0 %v11091_v45  ;;  %v1326_v45 = vld [vmem:[%s13123_s12 + $0xc98] sm:$0xff]  ;;  %v11145_v51 = vcombine.high %v1325_v34, %v1329_v35  ;;  %v11144_v60 = vcombine.low %v1325_v34, %v1329_v35 }
 0x49b   : > { %v11146_v62 = vcombine.low %v1326_v45, %v1330_v61 }
 0x49c   : > { %7828 = vmatpush1.bf16.msra.mxu1 %v11088_v55  ;;  %v11147_v55 = vcombine.high %v1326_v45, %v1330_v61 }
 0x49d   : > { %8156 = vmatpush1.bf16.msra.mxu0 %v11090_v57  ;;  %7829 = vmatprep.subr.bf16.mxu1 %v11097_v59  ;;  %v1333_v57 = vld [vmem:[%s13123_s12 + $0xcd0] sm:$0xff] }
 0x49e   : > { %8157 = vmatprep.subr.bf16.mxu0 %v11099_v56  ;;  %v1337_v59 = vld [vmem:[%s13123_s12 + $0xcf0] sm:$0xff]  ;;  %v1334_v56 = vld [vmem:[%s13123_s12 + $0xcd8] sm:$0xff] }
 0x49f   : > { %v11153_v63 = vcombine.high %v1333_v57, %v1337_v59 }
 0x4a0   : > { %7830 = vmatpush1.bf16.msra.mxu1 %v11096_v0  ;;  %v1345_v0 = vld [vmem:[%s13123_s12 + $0xd30] sm:$0xff] }
 0x4a1   : > { %8158 = vmatpush1.bf16.msra.mxu0 %v11098_v1  ;;  %7831 = vmatprep.subr.bf16.mxu1 %v11105_v43  ;;  %v1342_v1 = vld [vmem:[%s13123_s12 + $0xd18] sm:$0xff]  ;;  %v11161_v52 = vcombine.high %v1341_v47, %v1345_v0 }
 0x4a2   : > { %8159 = vmatprep.subr.bf16.mxu0 %v11107_v48  ;;  %v1346_v43 = vld [vmem:[%s13123_s12 + $0xd38] sm:$0xff]  ;;  %v11152_v48 = vcombine.low %v1333_v57, %v1337_v59 }
 0x4a3   : > { %v11163_v6 = vcombine.high %v1342_v1, %v1346_v43  ;;  %v11162_v32 = vcombine.low %v1342_v1, %v1346_v43  ;;  %v1374_v59 = vld [vmem:[%s13123_s12 + $0xe18] sm:$0xff]  ;;  %v1385_v1 = vld [vmem:[%s13123_s12 + $0xe70] sm:$0xff] }
 0x4a4   : > { %7832 = vmatpush1.bf16.msra.mxu1 %v11104_v9  ;;  %v1353_v9 = vld [vmem:[%s13123_s12 + $0xd70] sm:$0xff] }
 0x4a5   : > { %8160 = vmatpush1.bf16.msra.mxu0 %v11106_v3  ;;  %7833 = vmatprep.subr.bf16.mxu1 %v11113_v40  ;;  %v1350_v3 = vld [vmem:[%s13123_s12 + $0xd58] sm:$0xff]  ;;  %v11169_v37 = vcombine.high %v1349_v8, %v1353_v9 }
 0x4a6   : > { %8161 = vmatprep.subr.bf16.mxu0 %v11115_v20  ;;  %v1354_v40 = vld [vmem:[%s13123_s12 + $0xd78] sm:$0xff]  ;;  %v11160_v20 = vcombine.low %v1341_v47, %v1345_v0  ;;  %v1381_v0 = vld [vmem:[%s13123_s12 + $0xe50] sm:$0xff] }
 0x4a7   : > { %v11171_v11 = vcombine.high %v1350_v3, %v1354_v40  ;;  %v11170_v18 = vcombine.low %v1350_v3, %v1354_v40  ;;  %v1389_v3 = vld [vmem:[%s13123_s12 + $0xe90] sm:$0xff] }
 0x4a8   : > { %7834 = vmatpush1.bf16.msra.mxu1 %v11112_v13  ;;  %v1361_v13 = vld [vmem:[%s13123_s12 + $0xdb0] sm:$0xff] }
 0x4a9   : > { %8162 = vmatpush1.bf16.msra.mxu0 %v11114_v39  ;;  %7835 = vmatprep.subr.bf16.mxu1 %v11121_v15  ;;  %v1358_v39 = vld [vmem:[%s13123_s12 + $0xd98] sm:$0xff]  ;;  %v11177_v50 = vcombine.high %v1357_v12, %v1361_v13  ;;  %v1393_v40 = vld [vmem:[%s13123_s12 + $0xeb0] sm:$0xff] }
 0x4aa   : > { %8163 = vmatprep.subr.bf16.mxu0 %v11123_v16  ;;  %v1362_v15 = vld [vmem:[%s13123_s12 + $0xdb8] sm:$0xff]  ;;  %v11168_v16 = vcombine.low %v1349_v8, %v1353_v9  ;;  %v11201_v8 = vcombine.high %v1381_v0, %v1385_v1 }
 0x4ab   : > { %v11179_v19 = vcombine.high %v1358_v39, %v1362_v15 }
 0x4ac   : > { %7836 = vmatpush1.bf16.msra.mxu1 %v11120_v46  ;;  %v1365_v46 = vld [vmem:[%s13123_s12 + $0xdd0] sm:$0xff] }
 0x4ad   : > { %8164 = vmatpush1.bf16.msra.mxu0 %v11122_v4  ;;  %7846 = vmatprep.subr.bf16.mxu1 %v11129_v21  ;;  %v1369_v4 = vld [vmem:[%s13123_s12 + $0xdf0] sm:$0xff] }
 0x4ae   : > { %8174 = vmatprep.subr.bf16.mxu0 %v11131_v23  ;;  %v11185_v45 = vcombine.high %v1365_v46, %v1369_v4 }
 0x4af   : > { %7838 = vmatmul.mubr.bf16.vlgmr.msra.gmra.mrb[4].mxu1 %v13521_v31 }
 0x4b0   : > { %8166 = vmatmul.mubr.bf16.vlgmr.msra.gmra.mrb[12].mxu0 %v13521_v31  ;;  %7847 = vmatpush1.bf16.msra.mxu1 %v11128_v26  ;;  %v1338_v31 = vld [vmem:[%s13123_s12 + $0xcf8] sm:$0xff] }
 0x4b1   : > { %7878 = vmatprep.mubr.bf16.mxu1 %v13526_v38  ;;  %8175 = vmatpush1.bf16.msra.mxu0 %v11130_v30  ;;  %v11154_v49 = vcombine.low %v1334_v56, %v1338_v31  ;;  %v11176_v30 = vcombine.low %v1357_v12, %v1361_v13  ;;  %v11209_v12 = vcombine.high %v1389_v3, %v1393_v40 }
 0x4b2   : > { %8206 = vmatprep.mubr.bf16.mxu0 %v13526_v38  ;;  %7848 = vmatprep.subr.bf16.mxu1 %v11137_v33  ;;  %v11155_v38 = vcombine.high %v1334_v56, %v1338_v31  ;;  %v1378_v56 = vld [vmem:[%s13123_s12 + $0xe38] sm:$0xff]  ;;  %v813_v31 = vld [vmem:[#allocation2] sm:$0xff] }
 0x4b3   : > { %8176 = vmatprep.subr.bf16.mxu0 %v11139_v42  ;;  %v11178_v42 = vcombine.low %v1358_v39, %v1362_v15  ;;  %v11195_v47 = vcombine.high %v1374_v59, %v1378_v56  ;;  %v1397_v39 = vld [vmem:[%s13123_s12 + $0xed0] sm:$0xff] }
 0x4b4   : > { %7849 = vmatpush1.bf16.msra.mxu1 %v11136_v54  ;;  %v1401_v15 = vld [vmem:[%s13123_s12 + $0xef0] sm:$0xff] }
 0x4b5   : > { %8177 = vmatpush1.bf16.msra.mxu0 %v11138_v53  ;;  %7850 = vmatprep.subr.bf16.mxu1 %v11145_v51  ;;  %v11187_v53 = vcombine.high %v1366_v24, %v1370_v25  ;;  %v1373_v51 = vld [vmem:[%s13123_s12 + $0xe10] sm:$0xff] }
 0x4b6   : > { %8178 = vmatprep.subr.bf16.mxu0 %v11147_v55  ;;  %v1377_v55 = vld [vmem:[%s13123_s12 + $0xe30] sm:$0xff] }
 0x4b8   : > { %7851 = vmatpush1.bf16.msra.mxu1 %v11144_v60  ;;  %v11184_v60 = vcombine.low %v1365_v46, %v1369_v4  ;;  %v1405_v4 = vld [vmem:[%s13123_s12 + $0xf10] sm:$0xff] }
 0x4b9   : > { %8179 = vmatpush1.bf16.msra.mxu0 %v11146_v62  ;;  %7852 = vmatprep.subr.bf16.mxu1 %v11153_v63  ;;  %v11186_v63 = vcombine.low %v1366_v24, %v1370_v25  ;;  %v1410_v24 = vld [vmem:[%s13123_s12 + $0xf38] sm:$0xff]  ;;  %v11216_v25 = vcombine.low %v1397_v39, %v1401_v15 }
 0x4ba   : > { %8180 = vmatprep.subr.bf16.mxu0 %v11155_v38  ;;  %v11193_v38 = vcombine.high %v1373_v51, %v1377_v55 }
 0x4bc   : > { %7853 = vmatpush1.bf16.msra.mxu1 %v11152_v48  ;;  %v1382_v48 = vld [vmem:[%s13123_s12 + $0xe58] sm:$0xff] }
 0x4bd   : > { %8181 = vmatpush1.bf16.msra.mxu0 %v11154_v49  ;;  %7854 = vmatprep.subr.bf16.mxu1 %v11161_v52  ;;  %v1386_v49 = vld [vmem:[%s13123_s12 + $0xe78] sm:$0xff]  ;;  %v11192_v52 = vcombine.low %v1373_v51, %v1377_v55  ;;  %v1425_v51 = vld [vmem:[%s13123_s12 + $0xfb0] sm:$0xff] }
 0x4be   : > { %8182 = vmatprep.subr.bf16.mxu0 %v11163_v6  ;;  %v11194_v6 = vcombine.low %v1374_v59, %v1378_v56  ;;  %v11203_v9 = vcombine.high %v1382_v48, %v1386_v49  ;;  %v1422_v55 = vld [vmem:[%s13123_s12 + $0xf98] sm:$0xff] }
 0x4c0   : > { %7855 = vmatpush1.bf16.msra.mxu1 %v11160_v20  ;;  %v1390_v20 = vld [vmem:[%s13123_s12 + $0xe98] sm:$0xff] }
 0x4c1   : > { %8183 = vmatpush1.bf16.msra.mxu0 %v11162_v32  ;;  %7856 = vmatprep.subr.bf16.mxu1 %v11169_v37  ;;  %v1394_v32 = vld [vmem:[%s13123_s12 + $0xeb8] sm:$0xff]  ;;  %v11200_v37 = vcombine.low %v1381_v0, %v1385_v1 }
 0x4c2   : > { %v7388_v36 = vpop.f32.mrb[0].mxu1  ;;  %8184 = vmatprep.subr.bf16.mxu0 %v11171_v11  ;;  %v11202_v11 = vcombine.low %v1382_v48, %v1386_v49  ;;  %v11211_v13 = vcombine.high %v1390_v20, %v1394_v32  ;;  %v1437_v49 = vld [vmem:[%s13123_s12 + $0x1010] sm:$0xff] }
 0x4c3   : > { %v7716_v21 = vpop.f32.mrb[8].mxu0  ;;  %v7390_v23 = vpop.f32.mrb[1].mxu1 }
 0x4c4   : > { %v8387_v26 = vcombine.low %v7388_v36, %v7390_v23  ;;  %v7718_v27 = vpop.f32.mrb[9].mxu0  ;;  %v7392_v28 = vpop.f32.mrb[2].mxu1  ;;  %7857 = vmatpush1.bf16.msra.mxu1 %v11168_v16  ;;  %v1398_v16 = vld [vmem:[%s13123_s12 + $0xed8] sm:$0xff]  ;;  %v11210_v36 = vcombine.low %v1390_v20, %v1394_v32  ;;  %v1445_v32 = vld [vmem:[%s13123_s12 + $0x1050] sm:$0xff] }
 0x4c5   : > { %v8388_v33 = vcombine.low %v7716_v21, %v7718_v27  ;;  %v7720_v34 = vpop.f32.mrb[10].mxu0  ;;  %8185 = vmatpush1.bf16.msra.mxu0 %v11170_v18  ;;  %v7393_v35 = vpop.f32.mrb[3].mxu1  ;;  %7858 = vmatprep.subr.bf16.mxu1 %v11177_v50  ;;  %v1402_v18 = vld [vmem:[%s13123_s12 + $0xef8] sm:$0xff]  ;;  %v11208_v50 = vcombine.low %v1389_v3, %v1393_v40  ;;  %v1409_v21 = vld [vmem:[%s13123_s12 + $0xf30] sm:$0xff] }
 0x4c6   : > { %v8395_v61 = vrot.slane %v8387_v26, %v13314_v22  ;;  %v7721_v54 = vpop.f32.mrb[11].mxu0  ;;  %8186 = vmatprep.subr.bf16.mxu0 %v11179_v19  ;;  %v11217_v19 = vcombine.high %v1397_v39, %v1401_v15  ;;  %v11219_v46 = vcombine.high %v1398_v16, %v1402_v18  ;;  %v1406_v23 = vld [vmem:[%s13123_s12 + $0xf18] sm:$0xff]  ;;  %v11218_v26 = vcombine.low %v1398_v16, %v1402_v18  ;;  %v1453_v16 = vld [vmem:[%s13123_s12 + $0x1090] sm:$0xff] }
 0x4c7   : > { %v8402_v57 = vrot.slane %v8388_v33, %v13314_v22  ;;  %v11225_v27 = vcombine.high %v1405_v4, %v1409_v21  ;;  %v11227_v28 = vcombine.high %v1406_v23, %v1410_v24  ;;  %v1417_v33 = vld [vmem:[%s13123_s12 + $0xf70] sm:$0xff]  ;;  %v1414_v34 = vld [vmem:[%s13123_s12 + $0xf58] sm:$0xff] }
 0x4c8   : > { %7859 = vmatpush1.bf16.msra.mxu1 %v11176_v30  ;;  %v1413_v30 = vld [vmem:[%s13123_s12 + $0xf50] sm:$0xff]  ;;  %v1418_v35 = vld [vmem:[%s13123_s12 + $0xf78] sm:$0xff] }
 0x4c9   : > { %v8403_v62 = vcombine.low %v8395_v61, %v8402_v57  ;;  %8187 = vmatpush1.bf16.msra.mxu0 %v11178_v42  ;;  %7860 = vmatprep.subr.bf16.mxu1 %v11185_v45  ;;  %v11224_v42 = vcombine.low %v1405_v4, %v1409_v21  ;;  %v11226_v45 = vcombine.low %v1406_v23, %v1410_v24  ;;  %v1426_v57 = vld [vmem:[%s13123_s12 + $0xfb8] sm:$0xff]  ;;  %v1457_v18 = vld [vmem:[%s13123_s12 + $0x10b0] sm:$0xff] }
 0x4ca   : > { %8188 = vmatprep.subr.bf16.mxu0 %v11187_v53  ;;  %v11233_v61 = vcombine.high %v1413_v30, %v1417_v33  ;;  %v11235_v54 = vcombine.high %v1414_v34, %v1418_v35  ;;  %v1421_v53 = vld [vmem:[%s13123_s12 + $0xf90] sm:$0xff]  ;;  %v11232_v59 = vcombine.low %v1413_v30, %v1417_v33  ;;  %v11234_v56 = vcombine.low %v1414_v34, %v1418_v35  ;;  %v1470_v35 = vld [vmem:[%s13123_s12 + $0x1118] sm:$0xff] }
 0x4cb   : > { %v8423_v43 = vadd.f32 %v8403_v62, %v813_v31  ;;  %v11241_v31 = vcombine.high %v1421_v53, %v1425_v51  ;;  %v1429_v62 = vld [vmem:[%s13123_s12 + $0xfd0] sm:$0xff]  ;;  %v11240_v0 = vcombine.low %v1421_v53, %v1425_v51  ;;  %v11242_v1 = vcombine.low %v1422_v55, %v1426_v57 }
 0x4cc   : > { %7861 = vmatpush1.bf16.msra.mxu1 %v11184_v60  ;;  %v11243_v60 = vcombine.high %v1422_v55, %v1426_v57  ;;  %v11273_v21 = vcombine.high %v1453_v16, %v1457_v18  ;;  %v1461_v24 = vld [vmem:[%s13123_s12 + $0x10d0] sm:$0xff]  ;;  %v1478_v57 = vld [vmem:[%s13123_s12 + $0x1158] sm:$0xff] }
 0x4cd   : > { %8425 = vst [vmem:[#allocation2] sm:$0xff] %v8423_v43  ;;  %8189 = vmatpush1.bf16.msra.mxu0 %v11186_v63  ;;  %7862 = vmatprep.subr.bf16.mxu1 %v11193_v38  ;;  %v1433_v63 = vld [vmem:[%s13123_s12 + $0xff0] sm:$0xff]  ;;  %v1430_v38 = vld [vmem:[%s13123_s12 + $0xfd8] sm:$0xff] }
 0x4ce   : > { %8190 = vmatprep.subr.bf16.mxu0 %v11195_v47  ;;  %v1434_v47 = vld [vmem:[%s13123_s12 + $0xff8] sm:$0xff]  ;;  %v11249_v43 = vcombine.high %v1429_v62, %v1433_v63  ;;  %v1469_v33 = vld [vmem:[%s13123_s12 + $0x1110] sm:$0xff] }
 0x4cf   : > { %v11251_v48 = vcombine.high %v1430_v38, %v1434_v47  ;;  %v11250_v3 = vcombine.low %v1430_v38, %v1434_v47  ;;  %v1473_v34 = vld [vmem:[%s13123_s12 + $0x1130] sm:$0xff]  ;;  %v1486_v47 = vld [vmem:[%s13123_s12 + $0x1198] sm:$0xff] }
 0x4d0   : > { %7863 = vmatpush1.bf16.msra.mxu1 %v11192_v52  ;;  %v1441_v52 = vld [vmem:[%s13123_s12 + $0x1030] sm:$0xff] }
 0x4d1   : > { %8191 = vmatpush1.bf16.msra.mxu0 %v11194_v6  ;;  %7864 = vmatprep.subr.bf16.mxu1 %v11201_v8  ;;  %v1438_v6 = vld [vmem:[%s13123_s12 + $0x1018] sm:$0xff]  ;;  %v11257_v40 = vcombine.high %v1437_v49, %v1441_v52  ;;  %v1477_v51 = vld [vmem:[%s13123_s12 + $0x1150] sm:$0xff] }
 0x4d2   : > { %8192 = vmatprep.subr.bf16.mxu0 %v11203_v9  ;;  %v1442_v8 = vld [vmem:[%s13123_s12 + $0x1038] sm:$0xff]  ;;  %v11248_v9 = vcombine.low %v1429_v62, %v1433_v63  ;;  %v1481_v55 = vld [vmem:[%s13123_s12 + $0x1170] sm:$0xff] }
 0x4d3   : > { %v11259_v20 = vcombine.high %v1438_v6, %v1442_v8  ;;  %v11258_v39 = vcombine.low %v1438_v6, %v1442_v8  ;;  %v1485_v63 = vld [vmem:[%s13123_s12 + $0x1190] sm:$0xff]  ;;  %v1494_v8 = vld [vmem:[%s13123_s12 + $0x11d8] sm:$0xff] }
 0x4d4   : > { %7865 = vmatpush1.bf16.msra.mxu1 %v11200_v37  ;;  %v1449_v37 = vld [vmem:[%s13123_s12 + $0x1070] sm:$0xff] }
 0x4d5   : > { %8193 = vmatpush1.bf16.msra.mxu0 %v11202_v11  ;;  %7866 = vmatprep.subr.bf16.mxu1 %v11209_v12  ;;  %v11256_v11 = vcombine.low %v1437_v49, %v1441_v52  ;;  %v1446_v12 = vld [vmem:[%s13123_s12 + $0x1058] sm:$0xff]  ;;  %v11265_v15 = vcombine.high %v1445_v32, %v1449_v37  ;;  %v1489_v38 = vld [vmem:[%s13123_s12 + $0x11b0] sm:$0xff] }
 0x4d6   : > { %8194 = vmatprep.subr.bf16.mxu0 %v11211_v13  ;;  %v1450_v13 = vld [vmem:[%s13123_s12 + $0x1078] sm:$0xff]  ;;  %v1493_v52 = vld [vmem:[%s13123_s12 + $0x11d0] sm:$0xff] }
 0x4d7   : > { %v11266_v4 = vcombine.low %v1446_v12, %v1450_v13  ;;  %v1497_v6 = vld [vmem:[%s13123_s12 + $0x11f0] sm:$0xff] }
 0x4d8   : > { %7867 = vmatpush1.bf16.msra.mxu1 %v11208_v50  ;;  %v11267_v50 = vcombine.high %v1446_v12, %v1450_v13  ;;  %v1502_v12 = vld [vmem:[%s13123_s12 + $0x1218] sm:$0xff] }
 0x4d9   : > { %8195 = vmatpush1.bf16.msra.mxu0 %v11210_v36  ;;  %7868 = vmatprep.subr.bf16.mxu1 %v11217_v19  ;;  %v1454_v36 = vld [vmem:[%s13123_s12 + $0x1098] sm:$0xff] }
 0x4da   : > { %8196 = vmatprep.subr.bf16.mxu0 %v11219_v46  ;;  %v1458_v19 = vld [vmem:[%s13123_s12 + $0x10b8] sm:$0xff]  ;;  %v11264_v46 = vcombine.low %v1445_v32, %v1449_v37  ;;  %v1501_v37 = vld [vmem:[%s13123_s12 + $0x1210] sm:$0xff] }
 0x4db   : > { %v11275_v23 = vcombine.high %v1454_v36, %v1458_v19  ;;  %v1506_v13 = vld [vmem:[%s13123_s12 + $0x1238] sm:$0xff] }
 0x4dc   : > { %7869 = vmatpush1.bf16.msra.mxu1 %v11216_v25  ;;  %v1465_v25 = vld [vmem:[%s13123_s12 + $0x10f0] sm:$0xff] }
 0x4dd   : > { %8197 = vmatpush1.bf16.msra.mxu0 %v11218_v26  ;;  %7870 = vmatprep.subr.bf16.mxu1 %v11225_v27  ;;  %v1462_v26 = vld [vmem:[%s13123_s12 + $0x10d8] sm:$0xff]  ;;  %v11272_v27 = vcombine.low %v1453_v16, %v1457_v18  ;;  %v11281_v30 = vcombine.high %v1461_v24, %v1465_v25  ;;  %v11323_v18 = vcombine.high %v1502_v12, %v1506_v13 }
 0x4de   : > { %8198 = vmatprep.subr.bf16.mxu0 %v11227_v28  ;;  %v11274_v28 = vcombine.low %v1454_v36, %v1458_v19  ;;  %v1513_v36 = vld [vmem:[%s13123_s12 + $0x1270] sm:$0xff]  ;;  %v1510_v19 = vld [vmem:[%s13123_s12 + $0x1258] sm:$0xff] }
 0x4e0   : > { %7871 = vmatpush1.bf16.msra.mxu1 %v11224_v42  ;;  %v1474_v42 = vld [vmem:[%s13123_s12 + $0x1138] sm:$0xff] }
 0x4e1   : > { %8199 = vmatpush1.bf16.msra.mxu0 %v11226_v45  ;;  %7872 = vmatprep.subr.bf16.mxu1 %v11233_v61  ;;  %v11280_v45 = vcombine.low %v1461_v24, %v1465_v25  ;;  %v11291_v53 = vcombine.high %v1470_v35, %v1474_v42  ;;  %v1517_v25 = vld [vmem:[%s13123_s12 + $0x1290] sm:$0xff] }
 0x4e2   : > { %8200 = vmatprep.subr.bf16.mxu0 %v11235_v54  ;;  %v11289_v54 = vcombine.high %v1469_v33, %v1473_v34 }
 0x4e4   : > { %7873 = vmatpush1.bf16.msra.mxu1 %v11232_v59  ;;  %v1482_v59 = vld [vmem:[%s13123_s12 + $0x1178] sm:$0xff] }
 0x4e5   : > { %8201 = vmatpush1.bf16.msra.mxu0 %v11234_v56  ;;  %7874 = vmatprep.subr.bf16.mxu1 %v11241_v31  ;;  %v11288_v56 = vcombine.low %v1469_v33, %v1473_v34  ;;  %v11290_v31 = vcombine.low %v1470_v35, %v1474_v42  ;;  %v11299_v62 = vcombine.high %v1478_v57, %v1482_v59  ;;  %v1525_v34 = vld [vmem:[%s13123_s12 + $0x12d0] sm:$0xff]  ;;  %v1526_v42 = vld [vmem:[%s13123_s12 + $0x12d8] sm:$0xff] }
 0x4e6   : > { %8202 = vmatprep.subr.bf16.mxu0 %v11243_v60  ;;  %v11297_v60 = vcombine.high %v1477_v51, %v1481_v55  ;;  %v1529_v35 = vld [vmem:[%s13123_s12 + $0x12f0] sm:$0xff] }
 0x4e8   : > { %7875 = vmatpush1.bf16.msra.mxu1 %v11240_v0  ;;  %v1490_v0 = vld [vmem:[%s13123_s12 + $0x11b8] sm:$0xff] }
 0x4e9   : > { %8203 = vmatpush1.bf16.msra.mxu0 %v11242_v1  ;;  %7876 = vmatprep.subr.bf16.mxu1 %v11249_v43  ;;  %v11296_v1 = vcombine.low %v1477_v51, %v1481_v55  ;;  %v11298_v43 = vcombine.low %v1478_v57, %v1482_v59  ;;  %v11307_v49 = vcombine.high %v1486_v47, %v1490_v0  ;;  %v1533_v55 = vld [vmem:[%s13123_s12 + $0x1310] sm:$0xff]  ;;  %v1534_v59 = vld [vmem:[%s13123_s12 + $0x1318] sm:$0xff] }
 0x4ea   : > { %8204 = vmatprep.subr.bf16.mxu0 %v11251_v48  ;;  %v11305_v48 = vcombine.high %v1485_v63, %v1489_v38  ;;  %v1537_v57 = vld [vmem:[%s13123_s12 + $0x1330] sm:$0xff] }
 0x4ec   : > { %7877 = vmatpush1.bf16.msra.mxu1 %v11248_v9  ;;  %v1498_v9 = vld [vmem:[%s13123_s12 + $0x11f8] sm:$0xff] }
 0x4ed   : > { %8205 = vmatpush1.bf16.msra.mxu0 %v11250_v3  ;;  %7887 = vmatprep.subr.bf16.mxu1 %v11257_v40  ;;  %v11304_v3 = vcombine.low %v1485_v63, %v1489_v38  ;;  %v11306_v40 = vcombine.low %v1486_v47, %v1490_v0  ;;  %v11315_v32 = vcombine.high %v1494_v8, %v1498_v9  ;;  %v1541_v38 = vld [vmem:[%s13123_s12 + $0x1350] sm:$0xff]  ;;  %v1542_v0 = vld [vmem:[%s13123_s12 + $0x1358] sm:$0xff] }
 0x4ee   : > { %8215 = vmatprep.subr.bf16.mxu0 %v11259_v20  ;;  %v11313_v20 = vcombine.high %v1493_v52, %v1497_v6  ;;  %v1545_v47 = vld [vmem:[%s13123_s12 + $0x1370] sm:$0xff] }
 0x4ef   : > { %7879 = vmatmul.mubr.bf16.vlgmr.msra.gmra.mrb[4].mxu1 %v13603_v44 }
 0x4f0   : > { %8207 = vmatmul.mubr.bf16.vlgmr.msra.gmra.mrb[12].mxu0 %v13603_v44  ;;  %7888 = vmatpush1.bf16.msra.mxu1 %v11256_v11  ;;  %v1466_v44 = vld [vmem:[%s13123_s12 + $0x10f8] sm:$0xff]  ;;  %v1505_v11 = vld [vmem:[%s13123_s12 + $0x1230] sm:$0xff] }
 0x4f1   : > { %7919 = vmatprep.mubr.bf16.mxu1 %v13607_v7  ;;  %8216 = vmatpush1.bf16.msra.mxu0 %v11258_v39  ;;  %v11282_v61 = vcombine.low %v1462_v26, %v1466_v44  ;;  %v11312_v39 = vcombine.low %v1493_v52, %v1497_v6  ;;  %v11321_v16 = vcombine.high %v1501_v37, %v1505_v11  ;;  %v1549_v6 = vld [vmem:[%s13123_s12 + $0x1390] sm:$0xff] }
 0x4f2   : > { %8247 = vmatprep.mubr.bf16.mxu0 %v13607_v7  ;;  %7889 = vmatprep.subr.bf16.mxu1 %v11265_v15  ;;  %v11283_v7 = vcombine.high %v1462_v26, %v1466_v44  ;;  %v11314_v15 = vcombine.low %v1494_v8, %v1498_v9  ;;  %v1521_v26 = vld [vmem:[%s13123_s12 + $0x12b0] sm:$0xff]  ;;  %v1518_v44 = vld [vmem:[%s13123_s12 + $0x1298] sm:$0xff] }
 0x4f3   : > { %8217 = vmatprep.subr.bf16.mxu0 %v11267_v50  ;;  %v1509_v50 = vld [vmem:[%s13123_s12 + $0x1250] sm:$0xff]  ;;  %v1550_v9 = vld [vmem:[%s13123_s12 + $0x1398] sm:$0xff] }
 0x4f4   : > { %7890 = vmatpush1.bf16.msra.mxu1 %v11264_v46  ;;  %v1514_v46 = vld [vmem:[%s13123_s12 + $0x1278] sm:$0xff]  ;;  %v1553_v8 = vld [vmem:[%s13123_s12 + $0x13b0] sm:$0xff] }
 0x4f5   : > { %8218 = vmatpush1.bf16.msra.mxu0 %v11266_v4  ;;  %7891 = vmatprep.subr.bf16.mxu1 %v11273_v21  ;;  %v11320_v4 = vcombine.low %v1501_v37, %v1505_v11  ;;  %v11322_v21 = vcombine.low %v1502_v12, %v1506_v13  ;;  %v11331_v24 = vcombine.high %v1510_v19, %v1514_v46  ;;  %v1557_v11 = vld [vmem:[%s13123_s12 + $0x13d0] sm:$0xff]  ;;  %v1558_v13 = vld [vmem:[%s13123_s12 + $0x13d8] sm:$0xff] }
 0x4f6   : > { %8219 = vmatprep.subr.bf16.mxu0 %v11275_v23  ;;  %v11329_v23 = vcombine.high %v1509_v50, %v1513_v36  ;;  %v1561_v12 = vld [vmem:[%s13123_s12 + $0x13f0] sm:$0xff] }
 0x4f8   : > { %7892 = vmatpush1.bf16.msra.mxu1 %v11272_v27  ;;  %v1522_v27 = vld [vmem:[%s13123_s12 + $0x12b8] sm:$0xff] }
 0x4f9   : > { %8220 = vmatpush1.bf16.msra.mxu0 %v11274_v28  ;;  %7893 = vmatprep.subr.bf16.mxu1 %v11281_v30  ;;  %v11328_v28 = vcombine.low %v1509_v50, %v1513_v36  ;;  %v11330_v30 = vcombine.low %v1510_v19, %v1514_v46  ;;  %v11339_v33 = vcombine.high %v1518_v44, %v1522_v27  ;;  %v1565_v36 = vld [vmem:[%s13123_s12 + $0x1410] sm:$0xff]  ;;  %v1566_v46 = vld [vmem:[%s13123_s12 + $0x1418] sm:$0xff] }
 0x4fa   : > { %8221 = vmatprep.subr.bf16.mxu0 %v11283_v7  ;;  %v11337_v7 = vcombine.high %v1517_v25, %v1521_v26  ;;  %v1569_v19 = vld [vmem:[%s13123_s12 + $0x1430] sm:$0xff] }
 0x4fc   : > { %7894 = vmatpush1.bf16.msra.mxu1 %v11280_v45  ;;  %v1530_v45 = vld [vmem:[%s13123_s12 + $0x12f8] sm:$0xff] }
 0x4fd   : > { %8222 = vmatpush1.bf16.msra.mxu0 %v11282_v61  ;;  %7895 = vmatprep.subr.bf16.mxu1 %v11289_v54  ;;  %v11336_v61 = vcombine.low %v1517_v25, %v1521_v26  ;;  %v11338_v54 = vcombine.low %v1518_v44, %v1522_v27  ;;  %v11347_v51 = vcombine.high %v1526_v42, %v1530_v45  ;;  %v1573_v26 = vld [vmem:[%s13123_s12 + $0x1450] sm:$0xff] }
 0x4fe   : > { %8223 = vmatprep.subr.bf16.mxu0 %v11291_v53  ;;  %v11345_v53 = vcombine.high %v1525_v34, %v1529_v35  ;;  %v1577_v44 = vld [vmem:[%s13123_s12 + $0x1470] sm:$0xff]  ;;  %v11384_v27 = vcombine.low %v1565_v36, %v1569_v19 }
 0x500   : > { %7896 = vmatpush1.bf16.msra.mxu1 %v11288_v56  ;;  %v1538_v56 = vld [vmem:[%s13123_s12 + $0x1338] sm:$0xff] }
 0x501   : > { %8224 = vmatpush1.bf16.msra.mxu0 %v11290_v31  ;;  %7897 = vmatprep.subr.bf16.mxu1 %v11297_v60  ;;  %v11344_v31 = vcombine.low %v1525_v34, %v1529_v35  ;;  %v11346_v60 = vcombine.low %v1526_v42, %v1530_v45  ;;  %v11355_v63 = vcombine.high %v1534_v59, %v1538_v56  ;;  %v1581_v34 = vld [vmem:[%s13123_s12 + $0x1490] sm:$0xff]  ;;  %v1582_v45 = vld [vmem:[%s13123_s12 + $0x1498] sm:$0xff] }
 0x502   : > { %8225 = vmatprep.subr.bf16.mxu0 %v11299_v62  ;;  %v11353_v62 = vcombine.high %v1533_v55, %v1537_v57  ;;  %v1585_v35 = vld [vmem:[%s13123_s12 + $0x14b0] sm:$0xff] }
 0x504   : > { %7898 = vmatpush1.bf16.msra.mxu1 %v11296_v1  ;;  %v1546_v1 = vld [vmem:[%s13123_s12 + $0x1378] sm:$0xff] }
 0x505   : > { %8226 = vmatpush1.bf16.msra.mxu0 %v11298_v43  ;;  %7899 = vmatprep.subr.bf16.mxu1 %v11305_v48  ;;  %v11352_v43 = vcombine.low %v1533_v55, %v1537_v57  ;;  %v11354_v48 = vcombine.low %v1534_v59, %v1538_v56  ;;  %v11363_v52 = vcombine.high %v1542_v0, %v1546_v1  ;;  %v1589_v57 = vld [vmem:[%s13123_s12 + $0x14d0] sm:$0xff]  ;;  %v1590_v56 = vld [vmem:[%s13123_s12 + $0x14d8] sm:$0xff] }
 0x506   : > { %8227 = vmatprep.subr.bf16.mxu0 %v11307_v49  ;;  %v11361_v49 = vcombine.high %v1541_v38, %v1545_v47  ;;  %v1593_v59 = vld [vmem:[%s13123_s12 + $0x14f0] sm:$0xff] }
 0x508   : > { %7900 = vmatpush1.bf16.msra.mxu1 %v11304_v3  ;;  %v1554_v3 = vld [vmem:[%s13123_s12 + $0x13b8] sm:$0xff] }
 0x509   : > { %8228 = vmatpush1.bf16.msra.mxu0 %v11306_v40  ;;  %7901 = vmatprep.subr.bf16.mxu1 %v11313_v20  ;;  %v11360_v40 = vcombine.low %v1541_v38, %v1545_v47  ;;  %v11362_v20 = vcombine.low %v1542_v0, %v1546_v1  ;;  %v11371_v37 = vcombine.high %v1550_v9, %v1554_v3  ;;  %v1601_v38 = vld [vmem:[%s13123_s12 + $0x1530] sm:$0xff]  ;;  %v1598_v47 = vld [vmem:[%s13123_s12 + $0x1518] sm:$0xff] }
 0x50a   : > { %8229 = vmatprep.subr.bf16.mxu0 %v11315_v32  ;;  %v11369_v32 = vcombine.high %v1549_v6, %v1553_v8  ;;  %v1602_v0 = vld [vmem:[%s13123_s12 + $0x1538] sm:$0xff]  ;;  %v11408_v1 = vcombine.low %v1589_v57, %v1593_v59 }
 0x50c   : > { %7902 = vmatpush1.bf16.msra.mxu1 %v11312_v39  ;;  %v1562_v39 = vld [vmem:[%s13123_s12 + $0x13f8] sm:$0xff] }
 0x50d   : > { %8230 = vmatpush1.bf16.msra.mxu0 %v11314_v15  ;;  %7903 = vmatprep.subr.bf16.mxu1 %v11321_v16  ;;  %v11368_v15 = vcombine.low %v1549_v6, %v1553_v8  ;;  %v11370_v16 = vcombine.low %v1550_v9, %v1554_v3  ;;  %v11379_v50 = vcombine.high %v1558_v13, %v1562_v39  ;;  %v1609_v6 = vld [vmem:[%s13123_s12 + $0x1570] sm:$0xff]  ;;  %v1606_v8 = vld [vmem:[%s13123_s12 + $0x1558] sm:$0xff] }
 0x50e   : > { %8231 = vmatprep.subr.bf16.mxu0 %v11323_v18  ;;  %v11377_v18 = vcombine.high %v1557_v11, %v1561_v12  ;;  %v1610_v9 = vld [vmem:[%s13123_s12 + $0x1578] sm:$0xff] }
 0x510   : > { %7904 = vmatpush1.bf16.msra.mxu1 %v11320_v4  ;;  %v1570_v4 = vld [vmem:[%s13123_s12 + $0x1438] sm:$0xff] }
 0x511   : > { %8232 = vmatpush1.bf16.msra.mxu0 %v11322_v21  ;;  %7905 = vmatprep.subr.bf16.mxu1 %v11329_v23  ;;  %v11376_v21 = vcombine.low %v1557_v11, %v1561_v12  ;;  %v11378_v23 = vcombine.low %v1558_v13, %v1562_v39  ;;  %v11387_v25 = vcombine.high %v1566_v46, %v1570_v4  ;;  %v1617_v11 = vld [vmem:[%s13123_s12 + $0x15b0] sm:$0xff]  ;;  %v1614_v12 = vld [vmem:[%s13123_s12 + $0x1598] sm:$0xff] }
 0x512   : > { %8233 = vmatprep.subr.bf16.mxu0 %v11331_v24  ;;  %v11385_v24 = vcombine.high %v1565_v36, %v1569_v19  ;;  %v1618_v13 = vld [vmem:[%s13123_s12 + $0x15b8] sm:$0xff]  ;;  %v1625_v36 = vld [vmem:[%s13123_s12 + $0x15f0] sm:$0xff] }
 0x513   : > { %v1622_v19 = vld [vmem:[%s13123_s12 + $0x15d8] sm:$0xff] }
 0x514   : > { %7906 = vmatpush1.bf16.msra.mxu1 %v11328_v28  ;;  %v1574_v28 = vld [vmem:[%s13123_s12 + $0x1458] sm:$0xff] }
 0x515   : > { %8234 = vmatpush1.bf16.msra.mxu0 %v11330_v30  ;;  %7907 = vmatprep.subr.bf16.mxu1 %v11337_v7  ;;  %v1578_v30 = vld [vmem:[%s13123_s12 + $0x1478] sm:$0xff]  ;;  %v11386_v7 = vcombine.low %v1566_v46, %v1570_v4 }
 0x516   : > { %8235 = vmatprep.subr.bf16.mxu0 %v11339_v33  ;;  %v11393_v33 = vcombine.high %v1573_v26, %v1577_v44  ;;  %v11395_v42 = vcombine.high %v1574_v28, %v1578_v30  ;;  %v1626_v46 = vld [vmem:[%s13123_s12 + $0x15f8] sm:$0xff] }
 0x518   : > { %7908 = vmatpush1.bf16.msra.mxu1 %v11336_v61  ;;  %v1586_v61 = vld [vmem:[%s13123_s12 + $0x14b8] sm:$0xff] }
 0x519   : > { %8236 = vmatpush1.bf16.msra.mxu0 %v11338_v54  ;;  %7909 = vmatprep.subr.bf16.mxu1 %v11345_v53  ;;  %v11392_v54 = vcombine.low %v1573_v26, %v1577_v44  ;;  %v11394_v53 = vcombine.low %v1574_v28, %v1578_v30  ;;  %v11403_v55 = vcombine.high %v1582_v45, %v1586_v61  ;;  %v1633_v26 = vld [vmem:[%s13123_s12 + $0x1630] sm:$0xff]  ;;  %v1630_v44 = vld [vmem:[%s13123_s12 + $0x1618] sm:$0xff] }
 0x51a   : > { %8237 = vmatprep.subr.bf16.mxu0 %v11347_v51  ;;  %v11401_v51 = vcombine.high %v1581_v34, %v1585_v35  ;;  %v11442_v30 = vcombine.low %v1622_v19, %v1626_v46 }
 0x51c   : > { %7910 = vmatpush1.bf16.msra.mxu1 %v11344_v31  ;;  %v11400_v31 = vcombine.low %v1581_v34, %v1585_v35  ;;  %v1637_v34 = vld [vmem:[%s13123_s12 + $0x1650] sm:$0xff] }
 0x51d   : > { %8238 = vmatpush1.bf16.msra.mxu0 %v11346_v60  ;;  %7911 = vmatprep.subr.bf16.mxu1 %v11353_v62  ;;  %v11402_v60 = vcombine.low %v1582_v45, %v1586_v61  ;;  %v11409_v62 = vcombine.high %v1589_v57, %v1593_v59  ;;  %v1641_v35 = vld [vmem:[%s13123_s12 + $0x1670] sm:$0xff]  ;;  %v1642_v45 = vld [vmem:[%s13123_s12 + $0x1678] sm:$0xff] }
 0x51e   : > { %8239 = vmatprep.subr.bf16.mxu0 %v11355_v63  ;;  %v1597_v63 = vld [vmem:[%s13123_s12 + $0x1510] sm:$0xff]  ;;  %v1646_v59 = vld [vmem:[%s13123_s12 + $0x1698] sm:$0xff] }
 0x51f   : > { %v11416_v3 = vcombine.low %v1597_v63, %v1601_v38  ;;  %v1649_v57 = vld [vmem:[%s13123_s12 + $0x16b0] sm:$0xff] }
 0x520   : > { %7912 = vmatpush1.bf16.msra.mxu1 %v11352_v43 }
 0x521   : > { %8240 = vmatpush1.bf16.msra.mxu0 %v11354_v48  ;;  %7913 = vmatprep.subr.bf16.mxu1 %v11361_v49  ;;  %v11417_v48 = vcombine.high %v1597_v63, %v1601_v38  ;;  %v11419_v49 = vcombine.high %v1598_v47, %v1602_v0  ;;  %v1657_v63 = vld [vmem:[%s13123_s12 + $0x16f0] sm:$0xff]  ;;  %v1654_v38 = vld [vmem:[%s13123_s12 + $0x16d8] sm:$0xff] }
 0x522   : > { %8241 = vmatprep.subr.bf16.mxu0 %v11363_v52  ;;  %v1605_v52 = vld [vmem:[%s13123_s12 + $0x1550] sm:$0xff] }
 0x523   : > { %v11424_v39 = vcombine.low %v1605_v52, %v1609_v6 }
 0x524   : > { %7914 = vmatpush1.bf16.msra.mxu1 %v11360_v40  ;;  %v11418_v40 = vcombine.low %v1598_v47, %v1602_v0  ;;  %v1658_v47 = vld [vmem:[%s13123_s12 + $0x16f8] sm:$0xff] }
 0x525   : > { %8242 = vmatpush1.bf16.msra.mxu0 %v11362_v20  ;;  %7915 = vmatprep.subr.bf16.mxu1 %v11369_v32  ;;  %v11425_v20 = vcombine.high %v1605_v52, %v1609_v6  ;;  %v11427_v32 = vcombine.high %v1606_v8, %v1610_v9  ;;  %v1665_v52 = vld [vmem:[%s13123_s12 + $0x1730] sm:$0xff]  ;;  %v1662_v6 = vld [vmem:[%s13123_s12 + $0x1718] sm:$0xff] }
 0x526   : > { %8243 = vmatprep.subr.bf16.mxu0 %v11371_v37  ;;  %v1613_v37 = vld [vmem:[%s13123_s12 + $0x1590] sm:$0xff] }
 0x527   : > { %v11432_v4 = vcombine.low %v1613_v37, %v1617_v11 }
 0x528   : > { %7916 = vmatpush1.bf16.msra.mxu1 %v11368_v15  ;;  %v11426_v15 = vcombine.low %v1606_v8, %v1610_v9  ;;  %v1666_v8 = vld [vmem:[%s13123_s12 + $0x1738] sm:$0xff] }
 0x529   : > { %8244 = vmatpush1.bf16.msra.mxu0 %v11370_v16  ;;  %7917 = vmatprep.subr.bf16.mxu1 %v11377_v18  ;;  %v11433_v16 = vcombine.high %v1613_v37, %v1617_v11  ;;  %v11435_v18 = vcombine.high %v1614_v12, %v1618_v13  ;;  %v1673_v37 = vld [vmem:[%s13123_s12 + $0x1770] sm:$0xff]  ;;  %v1670_v11 = vld [vmem:[%s13123_s12 + $0x1758] sm:$0xff] }
 0x52a   : > { %8245 = vmatprep.subr.bf16.mxu0 %v11379_v50  ;;  %v1621_v50 = vld [vmem:[%s13123_s12 + $0x15d0] sm:$0xff] }
 0x52b   : > { %v11440_v28 = vcombine.low %v1621_v50, %v1625_v36 }
 0x52c   : > { %7918 = vmatpush1.bf16.msra.mxu1 %v11376_v21  ;;  %v11434_v21 = vcombine.low %v1614_v12, %v1618_v13  ;;  %v1674_v12 = vld [vmem:[%s13123_s12 + $0x1778] sm:$0xff] }
 0x52d   : > { %8246 = vmatpush1.bf16.msra.mxu0 %v11378_v23  ;;  %7928 = vmatprep.subr.bf16.mxu1 %v11385_v24  ;;  %v11441_v23 = vcombine.high %v1621_v50, %v1625_v36  ;;  %v11443_v24 = vcombine.high %v1622_v19, %v1626_v46  ;;  %v1681_v50 = vld [vmem:[%s13123_s12 + $0x17b0] sm:$0xff]  ;;  %v1678_v36 = vld [vmem:[%s13123_s12 + $0x1798] sm:$0xff] }
 0x52e   : > { %8256 = vmatprep.subr.bf16.mxu0 %v11387_v25  ;;  %v1629_v25 = vld [vmem:[%s13123_s12 + $0x1610] sm:$0xff]  ;;  %v1682_v19 = vld [vmem:[%s13123_s12 + $0x17b8] sm:$0xff] }
 0x52f   : > { %7920 = vmatmul.mubr.bf16.vlgmr.msra.gmra.mrb[4].mxu1 %v13684_v29  ;;  %v11448_v61 = vcombine.low %v1629_v25, %v1633_v26 }
 0x530   : > { %8248 = vmatmul.mubr.bf16.vlgmr.msra.gmra.mrb[12].mxu0 %v13684_v29  ;;  %7929 = vmatpush1.bf16.msra.mxu1 %v11384_v27  ;;  %v1594_v29 = vld [vmem:[%s13123_s12 + $0x14f8] sm:$0xff] }
 0x531   : > { %7960 = vmatprep.mubr.bf16.mxu1 %v13689_v41  ;;  %8257 = vmatpush1.bf16.msra.mxu0 %v11386_v7  ;;  %v11410_v43 = vcombine.low %v1590_v56, %v1594_v29  ;;  %v1634_v27 = vld [vmem:[%s13123_s12 + $0x1638] sm:$0xff]  ;;  %v11449_v7 = vcombine.high %v1629_v25, %v1633_v26  ;;  %v1689_v25 = vld [vmem:[%s13123_s12 + $0x17f0] sm:$0xff] }
 0x532   : > { %8288 = vmatprep.mubr.bf16.mxu0 %v13689_v41  ;;  %7930 = vmatprep.subr.bf16.mxu1 %v11393_v33  ;;  %v11411_v41 = vcombine.high %v1590_v56, %v1594_v29  ;;  %v11451_v33 = vcombine.high %v1630_v44, %v1634_v27  ;;  %v1650_v56 = vld [vmem:[%s13123_s12 + $0x16b8] sm:$0xff]  ;;  %v11456_v29 = vcombine.low %v1637_v34, %v1641_v35 }
 0x533   : > { %8258 = vmatprep.subr.bf16.mxu0 %v11395_v42  ;;  %v1638_v42 = vld [vmem:[%s13123_s12 + $0x1658] sm:$0xff] }
 0x534   : > { %7931 = vmatpush1.bf16.msra.mxu1 %v11392_v54  ;;  %v11450_v54 = vcombine.low %v1630_v44, %v1634_v27  ;;  %v1686_v26 = vld [vmem:[%s13123_s12 + $0x17d8] sm:$0xff] }
 0x535   : > { %8259 = vmatpush1.bf16.msra.mxu0 %v11394_v53  ;;  %7932 = vmatprep.subr.bf16.mxu1 %v11401_v51  ;;  %v11457_v53 = vcombine.high %v1637_v34, %v1641_v35  ;;  %v11459_v51 = vcombine.high %v1638_v42, %v1642_v45  ;;  %v1690_v44 = vld [vmem:[%s13123_s12 + $0x17f8] sm:$0xff]  ;;  %v1697_v34 = vld [vmem:[%s13123_s12 + $0x1830] sm:$0xff] }
 0x536   : > { %8260 = vmatprep.subr.bf16.mxu0 %v11403_v55  ;;  %v1645_v55 = vld [vmem:[%s13123_s12 + $0x1690] sm:$0xff]  ;;  %v1694_v35 = vld [vmem:[%s13123_s12 + $0x1818] sm:$0xff] }
 0x537   : > { %v11464_v0 = vcombine.low %v1645_v55, %v1649_v57 }
 0x538   : > { %7933 = vmatpush1.bf16.msra.mxu1 %v11400_v31  ;;  %v11458_v31 = vcombine.low %v1638_v42, %v1642_v45  ;;  %v1698_v42 = vld [vmem:[%s13123_s12 + $0x1838] sm:$0xff] }
 0x539   : > { %8261 = vmatpush1.bf16.msra.mxu0 %v11402_v60  ;;  %7934 = vmatprep.subr.bf16.mxu1 %v11409_v62  ;;  %v11465_v60 = vcombine.high %v1645_v55, %v1649_v57  ;;  %v11467_v62 = vcombine.high %v1646_v59, %v1650_v56  ;;  %v1705_v55 = vld [vmem:[%s13123_s12 + $0x1870] sm:$0xff] }
 0x53a   : > { %8262 = vmatprep.subr.bf16.mxu0 %v11411_v41  ;;  %v1653_v41 = vld [vmem:[%s13123_s12 + $0x16d0] sm:$0xff] }
 0x53b   : > { %v11472_v9 = vcombine.low %v1653_v41, %v1657_v63 }
 0x53c   : > { %7935 = vmatpush1.bf16.msra.mxu1 %v11408_v1  ;;  %v11466_v1 = vcombine.low %v1646_v59, %v1650_v56  ;;  %v1702_v59 = vld [vmem:[%s13123_s12 + $0x1858] sm:$0xff] }
 0x53d   : > { %8263 = vmatpush1.bf16.msra.mxu0 %v11410_v43  ;;  %7936 = vmatprep.subr.bf16.mxu1 %v11417_v48  ;;  %v11473_v43 = vcombine.high %v1653_v41, %v1657_v63  ;;  %v11475_v48 = vcombine.high %v1654_v38, %v1658_v47  ;;  %v1706_v56 = vld [vmem:[%s13123_s12 + $0x1878] sm:$0xff] }
 0x53e   : > { %8264 = vmatprep.subr.bf16.mxu0 %v11419_v49  ;;  %v1661_v49 = vld [vmem:[%s13123_s12 + $0x1710] sm:$0xff]  ;;  %v11523_v41 = vcombine.high %v1702_v59, %v1706_v56  ;;  %v1710_v63 = vld [vmem:[%s13123_s12 + $0x1898] sm:$0xff] }
 0x53f   : > { %v11480_v13 = vcombine.low %v1661_v49, %v1665_v52 }
 0x540   : > { %7937 = vmatpush1.bf16.msra.mxu1 %v11416_v3  ;;  %v11474_v3 = vcombine.low %v1654_v38, %v1658_v47  ;;  %v1714_v38 = vld [vmem:[%s13123_s12 + $0x18b8] sm:$0xff] }
 0x541   : > { %8265 = vmatpush1.bf16.msra.mxu0 %v11418_v40  ;;  %7938 = vmatprep.subr.bf16.mxu1 %v11425_v20  ;;  %v11481_v40 = vcombine.high %v1661_v49, %v1665_v52  ;;  %v11483_v20 = vcombine.high %v1662_v6, %v1666_v8  ;;  %v1721_v49 = vld [vmem:[%s13123_s12 + $0x18f0] sm:$0xff]  ;;  %v1718_v52 = vld [vmem:[%s13123_s12 + $0x18d8] sm:$0xff] }
 0x542   : > { %8266 = vmatprep.subr.bf16.mxu0 %v11427_v32  ;;  %v1669_v32 = vld [vmem:[%s13123_s12 + $0x1750] sm:$0xff] }
 0x543   : > { %v11488_v46 = vcombine.low %v1669_v32, %v1673_v37 }
 0x544   : > { %7939 = vmatpush1.bf16.msra.mxu1 %v11424_v39  ;;  %v11482_v39 = vcombine.low %v1662_v6, %v1666_v8  ;;  %v11530_v8 = vcombine.low %v1710_v63, %v1714_v38 }
 0x545   : > { %8267 = vmatpush1.bf16.msra.mxu0 %v11426_v15  ;;  %7940 = vmatprep.subr.bf16.mxu1 %v11433_v16  ;;  %v11489_v15 = vcombine.high %v1669_v32, %v1673_v37  ;;  %v11491_v16 = vcombine.high %v1670_v11, %v1674_v12  ;;  %v1730_v32 = vld [vmem:[%s13123_s12 + $0x1938] sm:$0xff] }
 0x546   : > { %8268 = vmatprep.subr.bf16.mxu0 %v11435_v18  ;;  %v1677_v18 = vld [vmem:[%s13123_s12 + $0x1790] sm:$0xff] }
 0x547   : > { %v11496_v27 = vcombine.low %v1677_v18, %v1681_v50 }
 0x548   : > { %7941 = vmatpush1.bf16.msra.mxu1 %v11432_v4  ;;  %v11490_v4 = vcombine.low %v1670_v11, %v1674_v12 }
 0x549   : > { %8269 = vmatpush1.bf16.msra.mxu0 %v11434_v21  ;;  %7942 = vmatprep.subr.bf16.mxu1 %v11441_v23  ;;  %v11497_v21 = vcombine.high %v1677_v18, %v1681_v50  ;;  %v11499_v23 = vcombine.high %v1678_v36, %v1682_v19  ;;  %v1738_v18 = vld [vmem:[%s13123_s12 + $0x1978] sm:$0xff] }
 0x54a   : > { %8270 = vmatprep.subr.bf16.mxu0 %v11443_v24  ;;  %v1685_v24 = vld [vmem:[%s13123_s12 + $0x17d0] sm:$0xff] }
 0x54b   : > { %v11504_v45 = vcombine.low %v1685_v24, %v1689_v25 }
 0x54c   : > { %7943 = vmatpush1.bf16.msra.mxu1 %v11440_v28  ;;  %v11498_v28 = vcombine.low %v1678_v36, %v1682_v19 }
 0x54d   : > { %8271 = vmatpush1.bf16.msra.mxu0 %v11442_v30  ;;  %7944 = vmatprep.subr.bf16.mxu1 %v11449_v7  ;;  %v11505_v30 = vcombine.high %v1685_v24, %v1689_v25  ;;  %v11507_v7 = vcombine.high %v1686_v26, %v1690_v44  ;;  %v1746_v24 = vld [vmem:[%s13123_s12 + $0x19b8] sm:$0xff] }
 0x54e   : > { %8272 = vmatprep.subr.bf16.mxu0 %v11451_v33  ;;  %v1693_v33 = vld [vmem:[%s13123_s12 + $0x1810] sm:$0xff] }
 0x54f   : > { %v11512_v57 = vcombine.low %v1693_v33, %v1697_v34 }
 0x550   : > { %7945 = vmatpush1.bf16.msra.mxu1 %v11448_v61  ;;  %v11506_v61 = vcombine.low %v1686_v26, %v1690_v44 }
 0x551   : > { %8273 = vmatpush1.bf16.msra.mxu0 %v11450_v54  ;;  %7946 = vmatprep.subr.bf16.mxu1 %v11457_v53  ;;  %v11513_v54 = vcombine.high %v1693_v33, %v1697_v34  ;;  %v11515_v53 = vcombine.high %v1694_v35, %v1698_v42  ;;  %v1754_v33 = vld [vmem:[%s13123_s12 + $0x19f8] sm:$0xff] }
 0x552   : > { %8274 = vmatprep.subr.bf16.mxu0 %v11459_v51  ;;  %v1701_v51 = vld [vmem:[%s13123_s12 + $0x1850] sm:$0xff] }
 0x553   : > { %v11520_v47 = vcombine.low %v1701_v51, %v1705_v55 }
 0x554   : > { %7947 = vmatpush1.bf16.msra.mxu1 %v11456_v29  ;;  %v11514_v29 = vcombine.low %v1694_v35, %v1698_v42 }
 0x555   : > { %8275 = vmatpush1.bf16.msra.mxu0 %v11458_v31  ;;  %7948 = vmatprep.subr.bf16.mxu1 %v11465_v60  ;;  %v11521_v31 = vcombine.high %v1701_v51, %v1705_v55  ;;  %v1709_v60 = vld [vmem:[%s13123_s12 + $0x1890] sm:$0xff]  ;;  %v1762_v51 = vld [vmem:[%s13123_s12 + $0x1a38] sm:$0xff] }
 0x556   : > { %8276 = vmatprep.subr.bf16.mxu0 %v11467_v62  ;;  %v1713_v62 = vld [vmem:[%s13123_s12 + $0x18b0] sm:$0xff] }
 0x557   : > { %v11528_v6 = vcombine.low %v1709_v60, %v1713_v62 }
 0x558   : > { %7949 = vmatpush1.bf16.msra.mxu1 %v11464_v0  ;;  %v11522_v0 = vcombine.low %v1702_v59, %v1706_v56 }
 0x559   : > { %8277 = vmatpush1.bf16.msra.mxu0 %v11466_v1  ;;  %7950 = vmatprep.subr.bf16.mxu1 %v11473_v43  ;;  %v11529_v1 = vcombine.high %v1709_v60, %v1713_v62  ;;  %v11531_v43 = vcombine.high %v1710_v63, %v1714_v38  ;;  %v1766_v60 = vld [vmem:[%s13123_s12 + $0x1a58] sm:$0xff] }
 0x55a   : > { %8278 = vmatprep.subr.bf16.mxu0 %v11475_v48  ;;  %v1717_v48 = vld [vmem:[%s13123_s12 + $0x18d0] sm:$0xff]  ;;  %v1770_v62 = vld [vmem:[%s13123_s12 + $0x1a78] sm:$0xff] }
 0x55b   : > { %v11536_v37 = vcombine.low %v1717_v48, %v1721_v49 }
 0x55c   : > { %7951 = vmatpush1.bf16.msra.mxu1 %v11472_v9  ;;  %v11537_v9 = vcombine.high %v1717_v48, %v1721_v49  ;;  %v1778_v48 = vld [vmem:[%s13123_s12 + $0x1ab8] sm:$0xff] }
 0x55d   : > { %8279 = vmatpush1.bf16.msra.mxu0 %v11474_v3  ;;  %7952 = vmatprep.subr.bf16.mxu1 %v11481_v40  ;;  %v1725_v3 = vld [vmem:[%s13123_s12 + $0x1910] sm:$0xff] }
 0x55e   : > { %8280 = vmatprep.subr.bf16.mxu0 %v11483_v20  ;;  %v1729_v40 = vld [vmem:[%s13123_s12 + $0x1930] sm:$0xff]  ;;  %v1726_v20 = vld [vmem:[%s13123_s12 + $0x1918] sm:$0xff] }
 0x55f   : > { %v11545_v12 = vcombine.high %v1725_v3, %v1729_v40  ;;  %v11544_v50 = vcombine.low %v1725_v3, %v1729_v40  ;;  %v11546_v36 = vcombine.low %v1726_v20, %v1730_v32  ;;  %v1786_v3 = vld [vmem:[%s13123_s12 + $0x1af8] sm:$0xff] }
 0x560   : > { %7953 = vmatpush1.bf16.msra.mxu1 %v11480_v13  ;;  %v11547_v13 = vcombine.high %v1726_v20, %v1730_v32 }
 0x561   : > { %8281 = vmatpush1.bf16.msra.mxu0 %v11482_v39  ;;  %7954 = vmatprep.subr.bf16.mxu1 %v11489_v15  ;;  %v1733_v39 = vld [vmem:[%s13123_s12 + $0x1950] sm:$0xff] }
 0x562   : > { %8282 = vmatprep.subr.bf16.mxu0 %v11491_v16  ;;  %v1737_v15 = vld [vmem:[%s13123_s12 + $0x1970] sm:$0xff]  ;;  %v1734_v16 = vld [vmem:[%s13123_s12 + $0x1958] sm:$0xff] }
 0x563   : > { %v11553_v19 = vcombine.high %v1733_v39, %v1737_v15  ;;  %v11552_v25 = vcombine.low %v1733_v39, %v1737_v15  ;;  %v11554_v26 = vcombine.low %v1734_v16, %v1738_v18  ;;  %v1794_v39 = vld [vmem:[%s13123_s12 + $0x1b38] sm:$0xff] }
 0x564   : > { %7955 = vmatpush1.bf16.msra.mxu1 %v11488_v46  ;;  %v11555_v46 = vcombine.high %v1734_v16, %v1738_v18 }
 0x565   : > { %8283 = vmatpush1.bf16.msra.mxu0 %v11490_v4  ;;  %7956 = vmatprep.subr.bf16.mxu1 %v11497_v21  ;;  %v1741_v4 = vld [vmem:[%s13123_s12 + $0x1990] sm:$0xff] }
 0x566   : > { %8284 = vmatprep.subr.bf16.mxu0 %v11499_v23  ;;  %v1745_v21 = vld [vmem:[%s13123_s12 + $0x19b0] sm:$0xff]  ;;  %v1742_v23 = vld [vmem:[%s13123_s12 + $0x1998] sm:$0xff] }
 0x567   : > { %v11561_v44 = vcombine.high %v1741_v4, %v1745_v21  ;;  %v11560_v34 = vcombine.low %v1741_v4, %v1745_v21  ;;  %v11562_v35 = vcombine.low %v1742_v23, %v1746_v24  ;;  %v1802_v4 = vld [vmem:[%s13123_s12 + $0x1b78] sm:$0xff] }
 0x568   : > { %7957 = vmatpush1.bf16.msra.mxu1 %v11496_v27  ;;  %v11563_v27 = vcombine.high %v1742_v23, %v1746_v24 }
 0x569   : > { %8285 = vmatpush1.bf16.msra.mxu0 %v11498_v28  ;;  %7958 = vmatprep.subr.bf16.mxu1 %v11505_v30  ;;  %v1749_v28 = vld [vmem:[%s13123_s12 + $0x19d0] sm:$0xff] }
 0x56a   : > { %8286 = vmatprep.subr.bf16.mxu0 %v11507_v7  ;;  %v1753_v30 = vld [vmem:[%s13123_s12 + $0x19f0] sm:$0xff]  ;;  %v1750_v7 = vld [vmem:[%s13123_s12 + $0x19d8] sm:$0xff] }
 0x56b   : > { %v11569_v42 = vcombine.high %v1749_v28, %v1753_v30  ;;  %v11568_v55 = vcombine.low %v1749_v28, %v1753_v30  ;;  %v1810_v28 = vld [vmem:[%s13123_s12 + $0x1bb8] sm:$0xff] }
 0x56c   : > { %7959 = vmatpush1.bf16.msra.mxu1 %v11504_v45  ;;  %v11571_v45 = vcombine.high %v1750_v7, %v1754_v33 }
 0x56d   : > { %8287 = vmatpush1.bf16.msra.mxu0 %v11506_v61  ;;  %7969 = vmatprep.subr.bf16.mxu1 %v11513_v54  ;;  %v1757_v61 = vld [vmem:[%s13123_s12 + $0x1a10] sm:$0xff] }
 0x56e   : > { %8297 = vmatprep.subr.bf16.mxu0 %v11515_v53  ;;  %v1761_v54 = vld [vmem:[%s13123_s12 + $0x1a30] sm:$0xff]  ;;  %v1758_v53 = vld [vmem:[%s13123_s12 + $0x1a18] sm:$0xff] }
 0x56f   : > { %7961 = vmatmul.mubr.bf16.vlgmr.msra.gmra.mrb[4].mxu1 %v13766_v10  ;;  %v11577_v59 = vcombine.high %v1757_v61, %v1761_v54  ;;  %v11579_v56 = vcombine.high %v1758_v53, %v1762_v51  ;;  %v11578_v63 = vcombine.low %v1758_v53, %v1762_v51 }
 0x570   : > { %8289 = vmatmul.mubr.bf16.vlgmr.msra.gmra.mrb[12].mxu0 %v13766_v10  ;;  %7970 = vmatpush1.bf16.msra.mxu1 %v11512_v57  ;;  %v1722_v10 = vld [vmem:[%s13123_s12 + $0x18f8] sm:$0xff]  ;;  %v11570_v57 = vcombine.low %v1750_v7, %v1754_v33 }
 0x571   : > { %8001 = vmatprep.mubr.bf16.mxu1 %v13771_v14  ;;  %8298 = vmatpush1.bf16.msra.mxu0 %v11514_v29  ;;  %v11538_v11 = vcombine.low %v1718_v52, %v1722_v10  ;;  %v1765_v29 = vld [vmem:[%s13123_s12 + $0x1a50] sm:$0xff] }
 0x572   : > { %8329 = vmatprep.mubr.bf16.mxu0 %v13771_v14  ;;  %7971 = vmatprep.subr.bf16.mxu1 %v11521_v31  ;;  %v11539_v14 = vcombine.high %v1718_v52, %v1722_v10  ;;  %v1769_v31 = vld [vmem:[%s13123_s12 + $0x1a70] sm:$0xff]  ;;  %v11586_v52 = vcombine.low %v1766_v60, %v1770_v62 }
 0x573   : > { %8299 = vmatprep.subr.bf16.mxu0 %v11523_v41  ;;  %v11576_v41 = vcombine.low %v1757_v61, %v1761_v54  ;;  %v11585_v38 = vcombine.high %v1765_v29, %v1769_v31  ;;  %v11584_v49 = vcombine.low %v1765_v29, %v1769_v31  ;;  %v1818_v61 = vld [vmem:[%s13123_s12 + $0x1bf8] sm:$0xff] }
 0x574   : > { %7972 = vmatpush1.bf16.msra.mxu1 %v11520_v47  ;;  %v11587_v47 = vcombine.high %v1766_v60, %v1770_v62  ;;  %v1826_v29 = vld [vmem:[%s13123_s12 + $0x1c38] sm:$0xff] }
 0x575   : > { %8300 = vmatpush1.bf16.msra.mxu0 %v11522_v0  ;;  %7973 = vmatprep.subr.bf16.mxu1 %v11529_v1  ;;  %v1773_v0 = vld [vmem:[%s13123_s12 + $0x1a90] sm:$0xff] }
 0x576   : > { %8301 = vmatprep.subr.bf16.mxu0 %v11531_v43  ;;  %v1777_v1 = vld [vmem:[%s13123_s12 + $0x1ab0] sm:$0xff]  ;;  %v1774_v43 = vld [vmem:[%s13123_s12 + $0x1a98] sm:$0xff] }
 0x577   : > { %v11593_v10 = vcombine.high %v1773_v0, %v1777_v1  ;;  %v11592_v40 = vcombine.low %v1773_v0, %v1777_v1  ;;  %v11594_v20 = vcombine.low %v1774_v43, %v1778_v48  ;;  %v1830_v0 = vld [vmem:[%s13123_s12 + $0x1c58] sm:$0xff] }
 0x578   : > { %7974 = vmatpush1.bf16.msra.mxu1 %v11528_v6  ;;  %v11595_v6 = vcombine.high %v1774_v43, %v1778_v48  ;;  %v1834_v1 = vld [vmem:[%s13123_s12 + $0x1c78] sm:$0xff] }
 0x579   : > { %8302 = vmatpush1.bf16.msra.mxu0 %v11530_v8  ;;  %7975 = vmatprep.subr.bf16.mxu1 %v11537_v9  ;;  %v1781_v8 = vld [vmem:[%s13123_s12 + $0x1ad0] sm:$0xff] }
 0x57a   : > { %8303 = vmatprep.subr.bf16.mxu0 %v11539_v14  ;;  %v1785_v9 = vld [vmem:[%s13123_s12 + $0x1af0] sm:$0xff]  ;;  %v1782_v14 = vld [vmem:[%s13123_s12 + $0x1ad8] sm:$0xff] }
 0x57b   : > { %v11601_v32 = vcombine.high %v1781_v8, %v1785_v9  ;;  %v11600_v15 = vcombine.low %v1781_v8, %v1785_v9  ;;  %v11602_v16 = vcombine.low %v1782_v14, %v1786_v3  ;;  %v1842_v8 = vld [vmem:[%s13123_s12 + $0x1cb8] sm:$0xff] }
 0x57c   : > { %7976 = vmatpush1.bf16.msra.mxu1 %v11536_v37  ;;  %v11603_v37 = vcombine.high %v1782_v14, %v1786_v3  ;;  %v11650_v14 = vcombine.low %v1830_v0, %v1834_v1 }
 0x57d   : > { %8304 = vmatpush1.bf16.msra.mxu0 %v11538_v11  ;;  %7977 = vmatprep.subr.bf16.mxu1 %v11545_v12  ;;  %v1789_v11 = vld [vmem:[%s13123_s12 + $0x1b10] sm:$0xff] }
 0x57e   : > { %8305 = vmatprep.subr.bf16.mxu0 %v11547_v13  ;;  %v1793_v12 = vld [vmem:[%s13123_s12 + $0x1b30] sm:$0xff]  ;;  %v1790_v13 = vld [vmem:[%s13123_s12 + $0x1b18] sm:$0xff] }
 0x57f   : > { %v11609_v18 = vcombine.high %v1789_v11, %v1793_v12  ;;  %v11608_v21 = vcombine.low %v1789_v11, %v1793_v12  ;;  %v11610_v23 = vcombine.low %v1790_v13, %v1794_v39 }
 0x580   : > { %7978 = vmatpush1.bf16.msra.mxu1 %v11544_v50  ;;  %v11611_v50 = vcombine.high %v1790_v13, %v1794_v39  ;;  %v1853_v39 = vld [vmem:[%s13123_s12 + $0x1d10] sm:$0xff] }
 0x581   : > { %8306 = vmatpush1.bf16.msra.mxu0 %v11546_v36  ;;  %7979 = vmatprep.subr.bf16.mxu1 %v11553_v19  ;;  %v1797_v36 = vld [vmem:[%s13123_s12 + $0x1b50] sm:$0xff] }
 0x582   : > { %8307 = vmatprep.subr.bf16.mxu0 %v11555_v46  ;;  %v1801_v19 = vld [vmem:[%s13123_s12 + $0x1b70] sm:$0xff]  ;;  %v1798_v46 = vld [vmem:[%s13123_s12 + $0x1b58] sm:$0xff] }
 0x583   : > { %v11617_v24 = vcombine.high %v1797_v36, %v1801_v19  ;;  %v11616_v30 = vcombine.low %v1797_v36, %v1801_v19  ;;  %v11618_v7 = vcombine.low %v1798_v46, %v1802_v4 }
 0x584   : > { %7980 = vmatpush1.bf16.msra.mxu1 %v11552_v25  ;;  %v11619_v25 = vcombine.high %v1798_v46, %v1802_v4  ;;  %v1861_v4 = vld [vmem:[%s13123_s12 + $0x1d50] sm:$0xff] }
 0x585   : > { %8308 = vmatpush1.bf16.msra.mxu0 %v11554_v26  ;;  %7981 = vmatprep.subr.bf16.mxu1 %v11561_v44  ;;  %v1805_v26 = vld [vmem:[%s13123_s12 + $0x1b90] sm:$0xff] }
 0x586   : > { %8309 = vmatprep.subr.bf16.mxu0 %v11563_v27  ;;  %v1809_v44 = vld [vmem:[%s13123_s12 + $0x1bb0] sm:$0xff]  ;;  %v1806_v27 = vld [vmem:[%s13123_s12 + $0x1b98] sm:$0xff] }
 0x587   : > { %v11625_v33 = vcombine.high %v1805_v26, %v1809_v44  ;;  %v11624_v54 = vcombine.low %v1805_v26, %v1809_v44  ;;  %v11626_v53 = vcombine.low %v1806_v27, %v1810_v28 }
 0x588   : > { %7982 = vmatpush1.bf16.msra.mxu1 %v11560_v34  ;;  %v11627_v34 = vcombine.high %v1806_v27, %v1810_v28  ;;  %v1869_v28 = vld [vmem:[%s13123_s12 + $0x1d90] sm:$0xff] }
 0x589   : > { %8310 = vmatpush1.bf16.msra.mxu0 %v11562_v35  ;;  %7983 = vmatprep.subr.bf16.mxu1 %v11569_v42  ;;  %v1813_v35 = vld [vmem:[%s13123_s12 + $0x1bd0] sm:$0xff] }
 0x58a   : > { %8311 = vmatprep.subr.bf16.mxu0 %v11571_v45  ;;  %v1817_v42 = vld [vmem:[%s13123_s12 + $0x1bf0] sm:$0xff]  ;;  %v1814_v45 = vld [vmem:[%s13123_s12 + $0x1bd8] sm:$0xff] }
 0x58b   : > { %v11633_v51 = vcombine.high %v1813_v35, %v1817_v42  ;;  %v11632_v31 = vcombine.low %v1813_v35, %v1817_v42  ;;  %v11634_v60 = vcombine.low %v1814_v45, %v1818_v61 }
 0x58c   : > { %7984 = vmatpush1.bf16.msra.mxu1 %v11568_v55  ;;  %v11635_v55 = vcombine.high %v1814_v45, %v1818_v61  ;;  %v1877_v61 = vld [vmem:[%s13123_s12 + $0x1dd0] sm:$0xff] }
 0x58d   : > { %8312 = vmatpush1.bf16.msra.mxu0 %v11570_v57  ;;  %7985 = vmatprep.subr.bf16.mxu1 %v11577_v59  ;;  %v1821_v57 = vld [vmem:[%s13123_s12 + $0x1c10] sm:$0xff] }
 0x58e   : > { %8313 = vmatprep.subr.bf16.mxu0 %v11579_v56  ;;  %v1825_v59 = vld [vmem:[%s13123_s12 + $0x1c30] sm:$0xff]  ;;  %v1822_v56 = vld [vmem:[%s13123_s12 + $0x1c18] sm:$0xff] }
 0x58f   : > { %v11641_v62 = vcombine.high %v1821_v57, %v1825_v59  ;;  %v11642_v43 = vcombine.low %v1822_v56, %v1826_v29 }
 0x590   : > { %7986 = vmatpush1.bf16.msra.mxu1 %v11576_v41  ;;  %v11643_v41 = vcombine.high %v1822_v56, %v1826_v29  ;;  %v1885_v29 = vld [vmem:[%s13123_s12 + $0x1e10] sm:$0xff] }
 0x591   : > { %8314 = vmatpush1.bf16.msra.mxu0 %v11578_v63  ;;  %7987 = vmatprep.subr.bf16.mxu1 %v11585_v38  ;;  %v1829_v63 = vld [vmem:[%s13123_s12 + $0x1c50] sm:$0xff] }
 0x592   : > { %8315 = vmatprep.subr.bf16.mxu0 %v11587_v47  ;;  %v1833_v38 = vld [vmem:[%s13123_s12 + $0x1c70] sm:$0xff]  ;;  %v11640_v47 = vcombine.low %v1821_v57, %v1825_v59 }
 0x593   : > { %v11649_v48 = vcombine.high %v1829_v63, %v1833_v38  ;;  %v11648_v9 = vcombine.low %v1829_v63, %v1833_v38 }
 0x594   : > { %7988 = vmatpush1.bf16.msra.mxu1 %v11584_v49  ;;  %v1837_v49 = vld [vmem:[%s13123_s12 + $0x1c90] sm:$0xff] }
 0x595   : > { %8316 = vmatpush1.bf16.msra.mxu0 %v11586_v52  ;;  %7989 = vmatprep.subr.bf16.mxu1 %v11593_v10  ;;  %v1841_v52 = vld [vmem:[%s13123_s12 + $0x1cb0] sm:$0xff]  ;;  %v11651_v10 = vcombine.high %v1830_v0, %v1834_v1 }
 0x596   : > { %8317 = vmatprep.subr.bf16.mxu0 %v11595_v6  ;;  %v1838_v6 = vld [vmem:[%s13123_s12 + $0x1c98] sm:$0xff]  ;;  %v11657_v3 = vcombine.high %v1837_v49, %v1841_v52  ;;  %v11656_v11 = vcombine.low %v1837_v49, %v1841_v52  ;;  %v1893_v0 = vld [vmem:[%s13123_s12 + $0x1e50] sm:$0xff] }
 0x597   : > { %v11658_v12 = vcombine.low %v1838_v6, %v1842_v8  ;;  %v1897_v1 = vld [vmem:[%s13123_s12 + $0x1e70] sm:$0xff] }
 0x598   : > { %7990 = vmatpush1.bf16.msra.mxu1 %v11592_v40  ;;  %v11659_v40 = vcombine.high %v1838_v6, %v1842_v8  ;;  %v1901_v8 = vld [vmem:[%s13123_s12 + $0x1e90] sm:$0xff] }
 0x599   : > { %8318 = vmatpush1.bf16.msra.mxu0 %v11594_v20  ;;  %7991 = vmatprep.subr.bf16.mxu1 %v11601_v32  ;;  %v1845_v20 = vld [vmem:[%s13123_s12 + $0x1cd0] sm:$0xff] }
 0x59a   : > { %8319 = vmatprep.subr.bf16.mxu0 %v11603_v37  ;;  %v1849_v32 = vld [vmem:[%s13123_s12 + $0x1cf0] sm:$0xff]  ;;  %v1846_v37 = vld [vmem:[%s13123_s12 + $0x1cd8] sm:$0xff] }
 0x59b   : > { %v11665_v13 = vcombine.high %v1845_v20, %v1849_v32 }
 0x59c   : > { %7992 = vmatpush1.bf16.msra.mxu1 %v11600_v15  ;;  %v1857_v15 = vld [vmem:[%s13123_s12 + $0x1d30] sm:$0xff] }
 0x59d   : > { %8320 = vmatpush1.bf16.msra.mxu0 %v11602_v16  ;;  %7993 = vmatprep.subr.bf16.mxu1 %v11609_v18  ;;  %v1854_v16 = vld [vmem:[%s13123_s12 + $0x1d18] sm:$0xff]  ;;  %v11673_v19 = vcombine.high %v1853_v39, %v1857_v15 }
 0x59e   : > { %8321 = vmatprep.subr.bf16.mxu0 %v11611_v50  ;;  %v1858_v18 = vld [vmem:[%s13123_s12 + $0x1d38] sm:$0xff]  ;;  %v11664_v50 = vcombine.low %v1845_v20, %v1849_v32 }
 0x59f   : > { %v11675_v46 = vcombine.high %v1854_v16, %v1858_v18  ;;  %v11674_v26 = vcombine.low %v1854_v16, %v1858_v18  ;;  %v1917_v18 = vld [vmem:[%s13123_s12 + $0x1f10] sm:$0xff] }
 0x5a0   : > { %7994 = vmatpush1.bf16.msra.mxu1 %v11608_v21  ;;  %v1865_v21 = vld [vmem:[%s13123_s12 + $0x1d70] sm:$0xff] }
 0x5a1   : > { %8322 = vmatpush1.bf16.msra.mxu0 %v11610_v23  ;;  %7995 = vmatprep.subr.bf16.mxu1 %v11617_v24  ;;  %v1862_v23 = vld [vmem:[%s13123_s12 + $0x1d58] sm:$0xff]  ;;  %v11681_v44 = vcombine.high %v1861_v4, %v1865_v21 }
 0x5a2   : > { %8323 = vmatprep.subr.bf16.mxu0 %v11619_v25  ;;  %v1866_v24 = vld [vmem:[%s13123_s12 + $0x1d78] sm:$0xff]  ;;  %v11672_v25 = vcombine.low %v1853_v39, %v1857_v15 }
 0x5a3   : > { %v11683_v27 = vcombine.high %v1862_v23, %v1866_v24  ;;  %v11682_v35 = vcombine.low %v1862_v23, %v1866_v24  ;;  %v1925_v24 = vld [vmem:[%s13123_s12 + $0x1f50] sm:$0xff] }
 0x5a4   : > { %7996 = vmatpush1.bf16.msra.mxu1 %v11616_v30  ;;  %v1873_v30 = vld [vmem:[%s13123_s12 + $0x1db0] sm:$0xff] }
 0x5a5   : > { %8324 = vmatpush1.bf16.msra.mxu0 %v11618_v7  ;;  %7997 = vmatprep.subr.bf16.mxu1 %v11625_v33  ;;  %v1870_v7 = vld [vmem:[%s13123_s12 + $0x1d98] sm:$0xff]  ;;  %v11689_v42 = vcombine.high %v1869_v28, %v1873_v30 }
 0x5a6   : > { %8325 = vmatprep.subr.bf16.mxu0 %v11627_v34  ;;  %v1874_v33 = vld [vmem:[%s13123_s12 + $0x1db8] sm:$0xff]  ;;  %v11680_v34 = vcombine.low %v1861_v4, %v1865_v21 }
 0x5a7   : > { %v11691_v45 = vcombine.high %v1870_v7, %v1874_v33  ;;  %v11690_v57 = vcombine.low %v1870_v7, %v1874_v33  ;;  %v1933_v33 = vld [vmem:[%s13123_s12 + $0x1f90] sm:$0xff] }
 0x5a8   : > { %7998 = vmatpush1.bf16.msra.mxu1 %v11624_v54  ;;  %v1881_v54 = vld [vmem:[%s13123_s12 + $0x1df0] sm:$0xff] }
 0x5a9   : > { %8326 = vmatpush1.bf16.msra.mxu0 %v11626_v53  ;;  %7999 = vmatprep.subr.bf16.mxu1 %v11633_v51  ;;  %v1878_v53 = vld [vmem:[%s13123_s12 + $0x1dd8] sm:$0xff]  ;;  %v11697_v59 = vcombine.high %v1877_v61, %v1881_v54 }
 0x5aa   : > { %8327 = vmatprep.subr.bf16.mxu0 %v11635_v55  ;;  %v1882_v51 = vld [vmem:[%s13123_s12 + $0x1df8] sm:$0xff]  ;;  %v11688_v55 = vcombine.low %v1869_v28, %v1873_v30 }
 0x5ab   : > { %v11699_v56 = vcombine.high %v1878_v53, %v1882_v51  ;;  %v11698_v63 = vcombine.low %v1878_v53, %v1882_v51  ;;  %v1941_v51 = vld [vmem:[%s13123_s12 + $0x1fd0] sm:$0xff] }
 0x5ac   : > { %8000 = vmatpush1.bf16.msra.mxu1 %v11632_v31  ;;  %v1889_v31 = vld [vmem:[%s13123_s12 + $0x1e30] sm:$0xff] }
 0x5ad   : > { %8328 = vmatpush1.bf16.msra.mxu0 %v11634_v60  ;;  %8010 = vmatprep.subr.bf16.mxu1 %v11641_v62  ;;  %v1886_v60 = vld [vmem:[%s13123_s12 + $0x1e18] sm:$0xff]  ;;  %v11705_v38 = vcombine.high %v1885_v29, %v1889_v31  ;;  %v11704_v49 = vcombine.low %v1885_v29, %v1889_v31 }
 0x5ae   : > { %8338 = vmatprep.subr.bf16.mxu0 %v11643_v41  ;;  %v1890_v62 = vld [vmem:[%s13123_s12 + $0x1e38] sm:$0xff]  ;;  %v11696_v41 = vcombine.low %v1877_v61, %v1881_v54 }
 0x5af   : > { %8002 = vmatmul.mubr.bf16.vlgmr.msra.gmra.mrb[4].mxu1 %v13847_v2  ;;  %v11706_v52 = vcombine.low %v1886_v60, %v1890_v62 }
 0x5b0   : > { %8330 = vmatmul.mubr.bf16.vlgmr.msra.gmra.mrb[12].mxu0 %v13847_v2  ;;  %8011 = vmatpush1.bf16.msra.mxu1 %v11640_v47  ;;  %v1850_v2 = vld [vmem:[%s13123_s12 + $0x1cf8] sm:$0xff]  ;;  %v11707_v47 = vcombine.high %v1886_v60, %v1890_v62 }
 0x5b1   : > { %8042 = vmatprep.mubr.bf16.mxu1 %v13852_v5  ;;  %8339 = vmatpush1.bf16.msra.mxu0 %v11642_v43  ;;  %v11666_v36 = vcombine.low %v1846_v37, %v1850_v2  ;;  %v1894_v43 = vld [vmem:[%s13123_s12 + $0x1e58] sm:$0xff] }
 0x5b2   : > { %8370 = vmatprep.mubr.bf16.mxu0 %v13852_v5  ;;  %8012 = vmatprep.subr.bf16.mxu1 %v11649_v48  ;;  %v11667_v5 = vcombine.high %v1846_v37, %v1850_v2  ;;  %v1898_v48 = vld [vmem:[%s13123_s12 + $0x1e78] sm:$0xff]  ;;  %v1909_v2 = vld [vmem:[%s13123_s12 + $0x1ed0] sm:$0xff] }
 0x5b3   : > { %8340 = vmatprep.subr.bf16.mxu0 %v11651_v10  ;;  %v11713_v10 = vcombine.high %v1893_v0, %v1897_v1  ;;  %v11715_v6 = vcombine.high %v1894_v43, %v1898_v48  ;;  %v11714_v20 = vcombine.low %v1894_v43, %v1898_v48 }
 0x5b4   : > { %8013 = vmatpush1.bf16.msra.mxu1 %v11648_v9  ;;  %v1905_v9 = vld [vmem:[%s13123_s12 + $0x1eb0] sm:$0xff] }
 0x5b5   : > { %8341 = vmatpush1.bf16.msra.mxu0 %v11650_v14  ;;  %8014 = vmatprep.subr.bf16.mxu1 %v11657_v3  ;;  %v1902_v14 = vld [vmem:[%s13123_s12 + $0x1e98] sm:$0xff]  ;;  %v11721_v32 = vcombine.high %v1901_v8, %v1905_v9 }
 0x5b6   : > { %8342 = vmatprep.subr.bf16.mxu0 %v11659_v40  ;;  %v1906_v3 = vld [vmem:[%s13123_s12 + $0x1eb8] sm:$0xff]  ;;  %v11712_v40 = vcombine.low %v1893_v0, %v1897_v1 }
 0x5b7   : > { %v11723_v37 = vcombine.high %v1902_v14, %v1906_v3  ;;  %v11722_v39 = vcombine.low %v1902_v14, %v1906_v3 }
 0x5b8   : > { %8015 = vmatpush1.bf16.msra.mxu1 %v11656_v11  ;;  %v1913_v11 = vld [vmem:[%s13123_s12 + $0x1ef0] sm:$0xff] }
 0x5b9   : > { %8343 = vmatpush1.bf16.msra.mxu0 %v11658_v12  ;;  %8016 = vmatprep.subr.bf16.mxu1 %v11665_v13  ;;  %v1910_v12 = vld [vmem:[%s13123_s12 + $0x1ed8] sm:$0xff]  ;;  %v11729_v15 = vcombine.high %v1909_v2, %v1913_v11 }
 0x5ba   : > { %8344 = vmatprep.subr.bf16.mxu0 %v11667_v5  ;;  %v1914_v13 = vld [vmem:[%s13123_s12 + $0x1ef8] sm:$0xff]  ;;  %v11720_v5 = vcombine.low %v1901_v8, %v1905_v9 }
 0x5bb   : > { %v11731_v16 = vcombine.high %v1910_v12, %v1914_v13  ;;  %v11730_v4 = vcombine.low %v1910_v12, %v1914_v13  ;;  %v814_v9 = vld [vmem:[#allocation2 + $0x8] sm:$0xff] }
 0x5bc   : > { %8017 = vmatpush1.bf16.msra.mxu1 %v11664_v50  ;;  %v1921_v50 = vld [vmem:[%s13123_s12 + $0x1f30] sm:$0xff]  ;;  %v12311_v12 = vld [vmem:[#allocation10 + $0x28] ss:$16 sps:$4 sm:$0xff] (!%p11764_p5)  }
 0x5bd   : > { %8345 = vmatpush1.bf16.msra.mxu0 %v11666_v36  ;;  %8018 = vmatprep.subr.bf16.mxu1 %v11673_v19  ;;  %v1918_v36 = vld [vmem:[%s13123_s12 + $0x1f18] sm:$0xff]  ;;  %v11737_v21 = vcombine.high %v1917_v18, %v1921_v50  ;;  %v12312_v13 = vld [vmem:[#allocation10 + $0x44] ss:$16 sps:$4 sm:$0xff] (!%p11764_p5)  }
 0x5be   : > { %8346 = vmatprep.subr.bf16.mxu0 %v11675_v46  ;;  %v1922_v19 = vld [vmem:[%s13123_s12 + $0x1f38] sm:$0xff]  ;;  %v11728_v46 = vcombine.low %v1909_v2, %v1913_v11  ;;  %v12310_v11 = vld [vmem:[#allocation10 + $0x20] ss:$16 sps:$4 sm:$0xff] (!%p11764_p5)  }
 0x5bf   : > { %v11739_v23 = vcombine.high %v1918_v36, %v1922_v19  ;;  %v11738_v28 = vcombine.low %v1918_v36, %v1922_v19  ;;  %v12308_v2 = vld [vmem:[#allocation10 + $0x2c] ss:$16 sps:$4 sm:$0xff] (!%p11764_p5)   ;;  %v12323_v36 = vld [vmem:[#allocation10 + $0x68] ss:$16 sps:$4 sm:$0xff] (!%p11764_p5)   ;;  %v12324_v19 = vld [vmem:[#allocation10 + $0x84] ss:$16 sps:$4 sm:$0xff] (!%p11764_p5)  }
 0x5c0   : > { %8019 = vmatpush1.bf16.msra.mxu1 %v11672_v25  ;;  %v1929_v25 = vld [vmem:[%s13123_s12 + $0x1f70] sm:$0xff] }
 0x5c1   : > { %8347 = vmatpush1.bf16.msra.mxu0 %v11674_v26  ;;  %8020 = vmatprep.subr.bf16.mxu1 %v11681_v44  ;;  %v1926_v26 = vld [vmem:[%s13123_s12 + $0x1f58] sm:$0xff]  ;;  %v11745_v30 = vcombine.high %v1925_v24, %v1929_v25 }
 0x5c2   : > { %8348 = vmatprep.subr.bf16.mxu0 %v11683_v27  ;;  %v1930_v44 = vld [vmem:[%s13123_s12 + $0x1f78] sm:$0xff]  ;;  %v11736_v27 = vcombine.low %v1917_v18, %v1921_v50  ;;  %v12322_v50 = vld [vmem:[#allocation10 + $0x60] ss:$16 sps:$4 sm:$0xff] (!%p11764_p5)  }
 0x5c3   : > { %v11747_v7 = vcombine.high %v1926_v26, %v1930_v44  ;;  %v11746_v61 = vcombine.low %v1926_v26, %v1930_v44  ;;  %v12320_v18 = vld [vmem:[#allocation10 + $0x6c] ss:$16 sps:$4 sm:$0xff] (!%p11764_p5)   ;;  %v12335_v26 = vld [vmem:[#allocation10 + $0xa8] ss:$16 sps:$4 sm:$0xff] (!%p11764_p5)   ;;  %v12336_v44 = vld [vmem:[#allocation10 + $0xc4] ss:$16 sps:$4 sm:$0xff] (!%p11764_p5)  }
 0x5c4   : > { %8021 = vmatpush1.bf16.msra.mxu1 %v11680_v34  ;;  %v1937_v34 = vld [vmem:[%s13123_s12 + $0x1fb0] sm:$0xff] }
 0x5c5   : > { %8349 = vmatpush1.bf16.msra.mxu0 %v11682_v35  ;;  %8022 = vmatprep.subr.bf16.mxu1 %v11689_v42  ;;  %v1934_v35 = vld [vmem:[%s13123_s12 + $0x1f98] sm:$0xff]  ;;  %v11753_v54 = vcombine.high %v1933_v33, %v1937_v34 }
 0x5c6   : > { %8350 = vmatprep.subr.bf16.mxu0 %v11691_v45  ;;  %v1938_v42 = vld [vmem:[%s13123_s12 + $0x1fb8] sm:$0xff]  ;;  %v11744_v45 = vcombine.low %v1925_v24, %v1929_v25  ;;  %v12334_v25 = vld [vmem:[#allocation10 + $0xa0] ss:$16 sps:$4 sm:$0xff] (!%p11764_p5)  }
 0x5c7   : > { %v11755_v53 = vcombine.high %v1934_v35, %v1938_v42  ;;  %v11754_v29 = vcombine.low %v1934_v35, %v1938_v42  ;;  %v12332_v24 = vld [vmem:[#allocation10 + $0xac] ss:$16 sps:$4 sm:$0xff] (!%p11764_p5)   ;;  %v12347_v35 = vld [vmem:[#allocation10 + $0xe8] ss:$16 sps:$4 sm:$0xff] (!%p11764_p5)   ;;  %v12348_v42 = vld [vmem:[#allocation10 + $0x104] ss:$16 sps:$4 sm:$0xff] (!%p11764_p5)  }
 0x5c8   : > { %8023 = vmatpush1.bf16.msra.mxu1 %v11688_v55  ;;  %v1945_v55 = vld [vmem:[%s13123_s12 + $0x1ff0] sm:$0xff] }
 0x5c9   : > { %8351 = vmatpush1.bf16.msra.mxu0 %v11690_v57  ;;  %8024 = vmatprep.subr.bf16.mxu1 %v11697_v59  ;;  %v1942_v57 = vld [vmem:[%s13123_s12 + $0x1fd8] sm:$0xff]  ;;  %v11761_v31 = vcombine.high %v1941_v51, %v1945_v55  ;;  %v11760_v62 = vcombine.low %v1941_v51, %v1945_v55  ;;  %v12358_v55 = vld [vmem:[#allocation10 + $0x120] ss:$16 sps:$4 sm:$0xff] (!%p11764_p5)  }
 0x5ca   : > { %8352 = vmatprep.subr.bf16.mxu0 %v11699_v56  ;;  %v1946_v59 = vld [vmem:[%s13123_s12 + $0x1ff8] sm:$0xff]  ;;  %v11752_v56 = vcombine.low %v1933_v33, %v1937_v34  ;;  %v12346_v34 = vld [vmem:[#allocation10 + $0xe0] ss:$16 sps:$4 sm:$0xff] (!%p11764_p5)  }
 0x5cb   : > { %v11763_v60 = vcombine.high %v1942_v57, %v1946_v59  ;;  %v12344_v33 = vld [vmem:[#allocation10 + $0xec] ss:$16 sps:$4 sm:$0xff] (!%p11764_p5)  }
 0x5cc   : > { %8025 = vmatpush1.bf16.msra.mxu1 %v11696_v41  ;;  %v11762_v41 = vcombine.low %v1942_v57, %v1946_v59  ;;  %v12356_v51 = vld [vmem:[#allocation10 + $0x12c] ss:$16 sps:$4 sm:$0xff] (!%p11764_p5)   ;;  %v12359_v57 = vld [vmem:[#allocation10 + $0x128] ss:$16 sps:$4 sm:$0xff] (!%p11764_p5)   ;;  %v12360_v59 = vld [vmem:[#allocation10 + $0x144] ss:$16 sps:$4 sm:$0xff] (!%p11764_p5)  }
 0x5cd   : > { %8353 = vmatpush1.bf16.msra.mxu0 %v11698_v63  ;;  %8026 = vmatprep.subr.bf16.mxu1 %v11705_v38 }
 0x5ce   : > { %8354 = vmatprep.subr.bf16.mxu0 %v11707_v47 }
 0x5d0   : > { %8027 = vmatpush1.bf16.msra.mxu1 %v11704_v49 }
 0x5d1   : > { %8355 = vmatpush1.bf16.msra.mxu0 %v11706_v52  ;;  %8028 = vmatprep.subr.bf16.mxu1 %v11713_v10 }
 0x5d2   : > { %8356 = vmatprep.subr.bf16.mxu0 %v11715_v6 }
 0x5d4   : > { %8029 = vmatpush1.bf16.msra.mxu1 %v11712_v40  ;;  %v12302_v40 = vld [vmem:[#allocation10 + $0xc] ss:$16 sps:$4 sm:$0xff] (!%p11764_p5)  }
 0x5d5   : > { %8357 = vmatpush1.bf16.msra.mxu0 %v11714_v20  ;;  %8030 = vmatprep.subr.bf16.mxu1 %v11721_v32  ;;  %v12304_v20 = vld [vmem:[#allocation10] ss:$16 sps:$4 sm:$0xff] (!%p11764_p5)   ;;  %v12305_v32 = vld [vmem:[#allocation10 + $0x8] ss:$16 sps:$4 sm:$0xff] (!%p11764_p5)  }
 0x5d6   : > { %8358 = vmatprep.subr.bf16.mxu0 %v11723_v37  ;;  %v12306_v37 = vld [vmem:[#allocation10 + $0x24] ss:$16 sps:$4 sm:$0xff] (!%p11764_p5)  }
 0x5d8   : > { %8031 = vmatpush1.bf16.msra.mxu1 %v11720_v5  ;;  %v12314_v5 = vld [vmem:[#allocation10 + $0x4c] ss:$16 sps:$4 sm:$0xff] (!%p11764_p5)  }
 0x5d9   : > { %8359 = vmatpush1.bf16.msra.mxu0 %v11722_v39  ;;  %8032 = vmatprep.subr.bf16.mxu1 %v11729_v15  ;;  %v12316_v39 = vld [vmem:[#allocation10 + $0x40] ss:$16 sps:$4 sm:$0xff] (!%p11764_p5)   ;;  %v12317_v15 = vld [vmem:[#allocation10 + $0x48] ss:$16 sps:$4 sm:$0xff] (!%p11764_p5)  }
 0x5da   : > { %8360 = vmatprep.subr.bf16.mxu0 %v11731_v16  ;;  %v12318_v16 = vld [vmem:[#allocation10 + $0x64] ss:$16 sps:$4 sm:$0xff] (!%p11764_p5)  }
 0x5dc   : > { %8033 = vmatpush1.bf16.msra.mxu1 %v11728_v46  ;;  %v12326_v46 = vld [vmem:[#allocation10 + $0x8c] ss:$16 sps:$4 sm:$0xff] (!%p11764_p5)  }
 0x5dd   : > { %8361 = vmatpush1.bf16.msra.mxu0 %v11730_v4  ;;  %8034 = vmatprep.subr.bf16.mxu1 %v11737_v21  ;;  %v12328_v4 = vld [vmem:[#allocation10 + $0x80] ss:$16 sps:$4 sm:$0xff] (!%p11764_p5)   ;;  %v12329_v21 = vld [vmem:[#allocation10 + $0x88] ss:$16 sps:$4 sm:$0xff] (!%p11764_p5)  }
 0x5de   : > { %8362 = vmatprep.subr.bf16.mxu0 %v11739_v23  ;;  %v12330_v23 = vld [vmem:[#allocation10 + $0xa4] ss:$16 sps:$4 sm:$0xff] (!%p11764_p5)  }
 0x5e0   : > { %8035 = vmatpush1.bf16.msra.mxu1 %v11736_v27  ;;  %v12338_v27 = vld [vmem:[#allocation10 + $0xcc] ss:$16 sps:$4 sm:$0xff] (!%p11764_p5)  }
 0x5e1   : > { %8363 = vmatpush1.bf16.msra.mxu0 %v11738_v28  ;;  %8036 = vmatprep.subr.bf16.mxu1 %v11745_v30  ;;  %v12340_v28 = vld [vmem:[#allocation10 + $0xc0] ss:$16 sps:$4 sm:$0xff] (!%p11764_p5)   ;;  %v12341_v30 = vld [vmem:[#allocation10 + $0xc8] ss:$16 sps:$4 sm:$0xff] (!%p11764_p5)  }
 0x5e2   : > { %8364 = vmatprep.subr.bf16.mxu0 %v11747_v7  ;;  %v12342_v7 = vld [vmem:[#allocation10 + $0xe4] ss:$16 sps:$4 sm:$0xff] (!%p11764_p5)  }
 0x5e4   : > { %8037 = vmatpush1.bf16.msra.mxu1 %v11744_v45  ;;  %v12350_v45 = vld [vmem:[#allocation10 + $0x10c] ss:$16 sps:$4 sm:$0xff] (!%p11764_p5)  }
 0x5e5   : > { %8365 = vmatpush1.bf16.msra.mxu0 %v11746_v61  ;;  %8038 = vmatprep.subr.bf16.mxu1 %v11753_v54  ;;  %v12352_v61 = vld [vmem:[#allocation10 + $0x100] ss:$16 sps:$4 sm:$0xff] (!%p11764_p5)   ;;  %v12353_v54 = vld [vmem:[#allocation10 + $0x108] ss:$16 sps:$4 sm:$0xff] (!%p11764_p5)  }
 0x5e6   : > { %8366 = vmatprep.subr.bf16.mxu0 %v11755_v53  ;;  %v12354_v53 = vld [vmem:[#allocation10 + $0x124] ss:$16 sps:$4 sm:$0xff] (!%p11764_p5)  }
 0x5e8   : > { %8039 = vmatpush1.bf16.msra.mxu1 %v11752_v56  ;;  %v12362_v56 = vld [vmem:[#allocation10 + $0x14c] ss:$16 sps:$4 sm:$0xff] (!%p11764_p5)  }
 0x5e9   : > { %8367 = vmatpush1.bf16.msra.mxu0 %v11754_v29  ;;  %8040 = vmatprep.subr.bf16.mxu1 %v11761_v31  ;;  %v12364_v29 = vld [vmem:[#allocation10 + $0x140] ss:$16 sps:$4 sm:$0xff] (!%p11764_p5)   ;;  %v12365_v31 = vld [vmem:[#allocation10 + $0x148] ss:$16 sps:$4 sm:$0xff] (!%p11764_p5)  }
 0x5ea   : > { %8368 = vmatprep.subr.bf16.mxu0 %v11763_v60  ;;  %v14467_v60 = vsub.s32 (!%p11764_p5), 0, %v13307_v17 }
 0x5ec   : > { %8041 = vmatpush1.bf16.msra.mxu1 %v11760_v62  ;;  %v12366_v62 = vld [vmem:[#allocation10 + $0x164] ss:$16 sps:$4 sm:$0xff] (!%p11764_p5)  }
 0x5ed   : > { %8369 = vmatpush1.bf16.msra.mxu0 %v11762_v41  ;;  %10332 = vmatprep.subr.bf16.mxu1 (!%p11764_p5), %v12302_v40  ;;  %v14470_v41 = vsub.s32 (!%p11764_p5), 1, %v13307_v17 }
 0x5ef   : > { %8043 = vmatmul.mubr.bf16.vlgmr.msra.gmra.mrb[4].mxu1 %v13921_v58 }
 0x5f0   : > { %8371 = vmatmul.mubr.bf16.vlgmr.msra.gmra.mrb[12].mxu0 %v13921_v58  ;;  %v12300_v58 = vld [vmem:[#allocation10 + $0x4] ss:$16 sps:$4 sm:$0xff] (!%p11764_p5)   ;;  %10333 = vmatpush1.bf16.msra.mxu1 (!%p11764_p5), %v12305_v32  ;;  %v12376_v32 = vld [vmem:[#allocation10 + $0x180] ss:$16 sps:$4 sm:$0xff] (!%p11764_p5)  }
 0x5f1   : > { %10168 = vmatprep.subr.bf16.mxu0 (!%p11764_p5), %v12300_v58  ;;  %10334 = vmatprep.subr.bf16.mxu1 (!%p11764_p5), %v12308_v2 }
 0x5f2   : > { %10169 = vmatpush1.bf16.msra.mxu0 (!%p11764_p5), %v12304_v20 }
 0x5f3   : > { %10170 = vmatprep.subr.bf16.mxu0 (!%p11764_p5), %v12306_v37 }
 0x5f4   : > { %10335 = vmatpush1.bf16.msra.mxu1 (!%p11764_p5), %v12311_v12  ;;  %v12378_v12 = vld [vmem:[#allocation10 + $0x1a4] ss:$16 sps:$4 sm:$0xff] (!%p11764_p5)  }
 0x5f5   : > { %10336 = vmatprep.subr.bf16.mxu1 (!%p11764_p5), %v12314_v5 }
 0x5f6   : > { %10171 = vmatpush1.bf16.msra.mxu0 (!%p11764_p5), %v12310_v11  ;;  %v12377_v11 = vld [vmem:[#allocation10 + $0x188] ss:$16 sps:$4 sm:$0xff] (!%p11764_p5)  }
 0x5f7   : > { %10172 = vmatprep.subr.bf16.mxu0 (!%p11764_p5), %v12312_v13 }
 0x5f8   : > { %10337 = vmatpush1.bf16.msra.mxu1 (!%p11764_p5), %v12317_v15 }
 0x5f9   : > { %10338 = vmatprep.subr.bf16.mxu1 (!%p11764_p5), %v12320_v18  ;;  %v8431_v18 = vld [vmem:[#allocation2] sm:$0xff] (!%p11764_p5) }
 0x5fa   : > { %10173 = vmatpush1.bf16.msra.mxu0 (!%p11764_p5), %v12316_v39  ;;  %v12380_v39 = vld [vmem:[#allocation10 + $0x1ac] ss:$16 sps:$4 sm:$0xff] (!%p11764_p5)  }
 0x5fb   : > { %10174 = vmatprep.subr.bf16.mxu0 (!%p11764_p5), %v12318_v16 }
 0x5fc   : > { %10339 = vmatpush1.bf16.msra.mxu1 (!%p11764_p5), %v12323_v36  ;;  %v12382_v36 = vld [vmem:[#allocation10 + $0x1a0] ss:$16 sps:$4 sm:$0xff] (!%p11764_p5)  }
 0x5fd   : > { %10340 = vmatprep.subr.bf16.mxu1 (!%p11764_p5), %v12326_v46  ;;  %v12383_v46 = vld [vmem:[#allocation10 + $0x1a8] ss:$16 sps:$4 sm:$0xff] (!%p11764_p5)  }
 0x5fe   : > { %10175 = vmatpush1.bf16.msra.mxu0 (!%p11764_p5), %v12322_v50 }
 0x5ff   : > { %10176 = vmatprep.subr.bf16.mxu0 (!%p11764_p5), %v12324_v19 }
 0x600   : > { %10341 = vmatpush1.bf16.msra.mxu1 (!%p11764_p5), %v12329_v21 }
 0x601   : > { %10342 = vmatprep.subr.bf16.mxu1 (!%p11764_p5), %v12332_v24 }
 0x602   : > { %10177 = vmatpush1.bf16.msra.mxu0 (!%p11764_p5), %v12328_v4  ;;  %v12384_v4 = vld [vmem:[#allocation10 + $0x1c4] ss:$16 sps:$4 sm:$0xff] (!%p11764_p5)  }
 0x603   : > { %10178 = vmatprep.subr.bf16.mxu0 (!%p11764_p5), %v12330_v23  ;;  %v12386_v23 = vld [vmem:[#allocation10 + $0x1cc] ss:$16 sps:$4 sm:$0xff] (!%p11764_p5)  }
 0x604   : > { %10343 = vmatpush1.bf16.msra.mxu1 (!%p11764_p5), %v12335_v26 }
 0x605   : > { %10344 = vmatprep.subr.bf16.mxu1 (!%p11764_p5), %v12338_v27  ;;  %v12390_v27 = vld [vmem:[#allocation10 + $0x1e4] ss:$16 sps:$4 sm:$0xff] (!%p11764_p5)  }
 0x606   : > { %10179 = vmatpush1.bf16.msra.mxu0 (!%p11764_p5), %v12334_v25  ;;  %v12388_v25 = vld [vmem:[#allocation10 + $0x1c0] ss:$16 sps:$4 sm:$0xff] (!%p11764_p5)  }
 0x607   : > { %10180 = vmatprep.subr.bf16.mxu0 (!%p11764_p5), %v12336_v44  ;;  %v12389_v44 = vld [vmem:[#allocation10 + $0x1c8] ss:$16 sps:$4 sm:$0xff] (!%p11764_p5)  }
 0x608   : > { %10345 = vmatpush1.bf16.msra.mxu1 (!%p11764_p5), %v12341_v30 }
 0x609   : > { %10346 = vmatprep.subr.bf16.mxu1 (!%p11764_p5), %v12344_v33 }
 0x60a   : > { %10181 = vmatpush1.bf16.msra.mxu0 (!%p11764_p5), %v12340_v28  ;;  %v12392_v28 = vld [vmem:[#allocation10 + $0x1ec] ss:$16 sps:$4 sm:$0xff] (!%p11764_p5)  }
 0x60b   : > { %10182 = vmatprep.subr.bf16.mxu0 (!%p11764_p5), %v12342_v7 }
 0x60c   : > { %10347 = vmatpush1.bf16.msra.mxu1 (!%p11764_p5), %v12347_v35  ;;  %v12395_v35 = vld [vmem:[#allocation10 + $0x1e8] ss:$16 sps:$4 sm:$0xff] (!%p11764_p5)  }
 0x60d   : > { %10348 = vmatprep.subr.bf16.mxu1 (!%p11764_p5), %v12350_v45  ;;  %v12398_v45 = vld [vmem:[#allocation10 + $0x204] ss:$16 sps:$4 sm:$0xff] (!%p11764_p5)  }
 0x60e   : > { %10183 = vmatpush1.bf16.msra.mxu0 (!%p11764_p5), %v12346_v34  ;;  %v12394_v34 = vld [vmem:[#allocation10 + $0x1e0] ss:$16 sps:$4 sm:$0xff] (!%p11764_p5)  }
 0x60f   : > { %10184 = vmatprep.subr.bf16.mxu0 (!%p11764_p5), %v12348_v42 }
 0x610   : > { %10349 = vmatpush1.bf16.msra.mxu1 (!%p11764_p5), %v12353_v54  ;;  %v12401_v54 = vld [vmem:[#allocation10 + $0x20c] ss:$16 sps:$4 sm:$0xff] (!%p11764_p5)  }
 0x611   : > { %10350 = vmatprep.subr.bf16.mxu1 (!%p11764_p5), %v12356_v51  ;;  %v12396_v51 = vld [vmem:[#allocation10 + $0x200] ss:$16 sps:$4 sm:$0xff] (!%p11764_p5)  }
 0x612   : > { %10185 = vmatpush1.bf16.msra.mxu0 (!%p11764_p5), %v12352_v61 }
 0x613   : > { %10186 = vmatprep.subr.bf16.mxu0 (!%p11764_p5), %v12354_v53 }
 0x614   : > { %10351 = vmatpush1.bf16.msra.mxu1 (!%p11764_p5), %v12359_v57 }
 0x615   : > { %10352 = vmatprep.subr.bf16.mxu1 (!%p11764_p5), %v12362_v56  ;;  %v12404_v56 = vld [vmem:[#allocation10 + $0x224] ss:$16 sps:$4 sm:$0xff] (!%p11764_p5)  }
 0x616   : > { %10187 = vmatpush1.bf16.msra.mxu0 (!%p11764_p5), %v12358_v55 }
 0x617   : > { %10188 = vmatprep.subr.bf16.mxu0 (!%p11764_p5), %v12360_v59  ;;  %v12399_v59 = vld [vmem:[#allocation10 + $0x208] ss:$16 sps:$4 sm:$0xff] (!%p11764_p5)  }
 0x618   : > { %10353 = vmatpush1.bf16.msra.mxu1 (!%p11764_p5), %v12365_v31 }
 0x61a   : > { %10189 = vmatpush1.bf16.msra.mxu0 (!%p11764_p5), %v12364_v29  ;;  %v12407_v29 = vld [vmem:[#allocation10 + $0x22c] ss:$16 sps:$4 sm:$0xff] (!%p11764_p5)  }
 0x61b   : > { %10190 = vmatprep.subr.bf16.mxu0 (!%p11764_p5), %v12366_v62  ;;  %v12402_v62 = vld [vmem:[#allocation10 + $0x220] ss:$16 sps:$4 sm:$0xff] (!%p11764_p5)  }
 0x6c2   : > { %v8044_v63 = vpop.f32.mrb[4].mxu1 }
 0x6c3   : > { %v8372_v38 = vpop.f32.mrb[12].mxu0  ;;  %v8046_v47 = vpop.f32.mrb[5].mxu1 }
 0x6c4   : > { %v8404_v0 = vcombine.low %v8044_v63, %v8046_v47  ;;  %v8374_v1 = vpop.f32.mrb[13].mxu0  ;;  %v8048_v43 = vpop.f32.mrb[6].mxu1  ;;  %v14473_v63 = vsub.s32 (!%p11764_p5), 2, %v13307_v17  ;;  %v14476_v47 = vsub.s32 (!%p11764_p5), 3, %v13307_v17 }
 0x6c5   : > { %v8405_v48 = vcombine.low %v8372_v38, %v8374_v1  ;;  %v8376_v49 = vpop.f32.mrb[14].mxu0  ;;  %v8049_v52 = vpop.f32.mrb[7].mxu1  ;;  %v12368_v38 = vld [vmem:[#allocation10 + $0x16c] ss:$16 sps:$4 sm:$0xff] (!%p11764_p5)  }
 0x6c6   : > { %v8412_v10 = vrot.slane %v8404_v0, %v13314_v22  ;;  %v8377_v6 = vpop.f32.mrb[15].mxu0  ;;  %v12370_v0 = vld [vmem:[#allocation10 + $0x160] ss:$16 sps:$4 sm:$0xff] (!%p11764_p5)   ;;  %v12372_v49 = vld [vmem:[#allocation10 + $0x184] ss:$16 sps:$4 sm:$0xff] (!%p11764_p5)   ;;  %10354 = vmatprep.subr.bf16.mxu1 (!%p11764_p5), %v12368_v38 }
 0x6c7   : > { %v8419_v8 = vrot.slane %v8405_v48, %v13314_v22  ;;  %8430 = sbr.rel (%p11764_p5) target bundleno = 2336 (0x920), region = 76  ;;  %v14478_v1 = vld [vmem:[#allocation9] ss:$2 sm:$0xff] (!%p11764_p5)  ;;  %v14480_v43 = vld [vmem:[#allocation9 + $0x1] ss:$2 sm:$0xff] (!%p11764_p5)  ;;  %10191 = vmatpush1.bf16.msra.mxu0 (!%p11764_p5), %v12370_v0 }
 0x6c8   : > { %v12371_v48 = vld [vmem:[#allocation10 + $0x168] ss:$16 sps:$4 sm:$0xff] (!%p11764_p5)   ;;  %v8438_v52 = vrot.slane (!%p11764_p5), %v14478_v1, %v14467_v60  ;;  %v8446_v6 = vrot.slane (!%p11764_p5), %v14478_v1, %v14473_v63  ;;  %v8519_v40 = vrot.slane (!%p11764_p5), %v14480_v43, %v14473_v63  ;;  %v8523_v20 = vrot.slane (!%p11764_p5), %v14480_v43, %v14476_v47  ;;  %10192 = vmatprep.subr.bf16.mxu0 (!%p11764_p5), %v12372_v49  ;;  %v12410_v0 = vld [vmem:[#allocation10 + $0x244] ss:$16 sps:$4 sm:$0xff] (!%p11764_p5)   ;;  %v12408_v49 = vld [vmem:[#allocation10 + $0x240] ss:$16 sps:$4 sm:$0xff] (!%p11764_p5)  }
 0x6c9   : > { %v8420_v14 = vcombine.low %v8412_v10, %v8419_v8  ;;  %v8442_v10 = vrot.slane (!%p11764_p5), %v14478_v1, %v14470_v41  ;;  %v12374_v8 = vld [vmem:[#allocation10 + $0x18c] ss:$16 sps:$4 sm:$0xff] (!%p11764_p5)   ;;  %10355 = vmatpush1.bf16.msra.mxu1 (!%p11764_p5), %v12371_v48  ;;  %v12405_v38 = vld [vmem:[#allocation10 + $0x228] ss:$16 sps:$4 sm:$0xff] (!%p11764_p5)  }
 0x6ca   : > { %v8541_v5 = vcombine.low (!%p11764_p5), %v8519_v40, %v8523_v20  ;;  %10356 = vmatprep.subr.bf16.mxu1 (!%p11764_p5), %v12374_v8  ;;  %v12413_v48 = vld [vmem:[#allocation10 + $0x24c] ss:$16 sps:$4 sm:$0xff] (!%p11764_p5)   ;;  %v12414_v8 = vld [vmem:[#allocation10 + $0x260] ss:$16 sps:$4 sm:$0xff] (!%p11764_p5)   ;;  %v12423_v40 = vld [vmem:[#allocation10 + $0x288] ss:$16 sps:$4 sm:$0xff] (!%p11764_p5)  }
 0x6cb   : > { %v8424_v3 = vadd.f32 %v8420_v14, %v814_v9  ;;  %v8450_v9 = vrot.slane (!%p11764_p5), %v14478_v1, %v14476_v47  ;;  %v8511_v14 = vrot.slane (!%p11764_p5), %v14480_v43, %v14467_v60  ;;  %v8467_v58 = vcombine.low (!%p11764_p5), %v8438_v52, %v8442_v10  ;;  %10193 = vmatpush1.bf16.msra.mxu0 (!%p11764_p5), %v12376_v32  ;;  %v12411_v52 = vld [vmem:[#allocation10 + $0x248] ss:$16 sps:$4 sm:$0xff] (!%p11764_p5)   ;;  %v12416_v10 = vld [vmem:[#allocation10 + $0x264] ss:$16 sps:$4 sm:$0xff] (!%p11764_p5)   ;;  %v12431_v32 = vld [vmem:[#allocation10 + $0x2ac] ss:$16 sps:$4 sm:$0xff] (!%p11764_p5)  }
 0x6cc   : > { %v8555_v50 = vrot.slane (!%p11764_p5), %v8541_v5, %v13314_v22  ;;  %10194 = vmatprep.subr.bf16.mxu0 (!%p11764_p5), %v12378_v12  ;;  %v12428_v20 = vld [vmem:[#allocation10 + $0x2a4] ss:$16 sps:$4 sm:$0xff] (!%p11764_p5)   ;;  %v12437_v12 = vld [vmem:[#allocation10 + $0x2cc] ss:$16 sps:$4 sm:$0xff] (!%p11764_p5)   ;;  %v12435_v5 = vld [vmem:[#allocation10 + $0x2c8] ss:$16 sps:$4 sm:$0xff] (!%p11764_p5)  }
 0x6cd   : > { %8426 = vst [vmem:[#allocation2 + $0x8] sm:$0xff] %v8424_v3  ;;  %v8515_v3 = vrot.slane (!%p11764_p5), %v14480_v43, %v14470_v41  ;;  %v8468_v37 = vcombine.low (!%p11764_p5), %v8446_v6, %v8450_v9  ;;  %v8475_v13 = vrot.slane (!%p11764_p5), %v8467_v58, %v13314_v22  ;;  %10357 = vmatpush1.bf16.msra.mxu1 (!%p11764_p5), %v12377_v11  ;;  %v12419_v6 = vld [vmem:[#allocation10 + $0x26c] ss:$16 sps:$4 sm:$0xff] (!%p11764_p5)   ;;  %v12417_v9 = vld [vmem:[#allocation10 + $0x268] ss:$16 sps:$4 sm:$0xff] (!%p11764_p5)  }
 0x6ce   : > { %10358 = vmatprep.subr.bf16.mxu1 %v12380_v39  ;;  %v12420_v58 = vld [vmem:[#allocation10 + $0x280] ss:$16 sps:$4 sm:$0xff]   ;;  %v12434_v11 = vld [vmem:[#allocation10 + $0x2c4] ss:$16 sps:$4 sm:$0xff]  }
 0x6cf   : > { %v8540_v2 = vcombine.low %v8511_v14, %v8515_v3  ;;  %v8482_v15 = vrot.slane %v8468_v37, %v13314_v22  ;;  %10195 = vmatpush1.bf16.msra.mxu0 %v12382_v36  ;;  %v12422_v14 = vld [vmem:[#allocation10 + $0x284] ss:$16 sps:$4 sm:$0xff]   ;;  %v12425_v3 = vld [vmem:[#allocation10 + $0x28c] ss:$16 sps:$4 sm:$0xff]   ;;  %v12426_v37 = vld [vmem:[#allocation10 + $0x2a0] ss:$16 sps:$4 sm:$0xff]  }
 0x6d0   : > { %10196 = vmatprep.subr.bf16.mxu0 %v12384_v4  ;;  %v12440_v39 = vld [vmem:[#allocation10 + $0x2e4] ss:$16 sps:$4 sm:$0xff]   ;;  %v12449_v36 = vld [vmem:[#allocation10 + $0x30c] ss:$16 sps:$4 sm:$0xff]  }
 0x6d1   : > { %v8548_v16 = vrot.slane %v8540_v2, %v13314_v22  ;;  %v8483_v19 = vcombine.low %v8475_v13, %v8482_v15  ;;  %10359 = vmatpush1.bf16.msra.mxu1 %v12383_v46  ;;  %v12429_v2 = vld [vmem:[#allocation10 + $0x2a8] ss:$16 sps:$4 sm:$0xff]   ;;  %v12432_v13 = vld [vmem:[#allocation10 + $0x2c0] ss:$16 sps:$4 sm:$0xff]   ;;  %v12443_v15 = vld [vmem:[#allocation10 + $0x2ec] ss:$16 sps:$4 sm:$0xff]  }
 0x6d2   : > { %10360 = vmatprep.subr.bf16.mxu1 %v12386_v23  ;;  %v12447_v46 = vld [vmem:[#allocation10 + $0x308] ss:$16 sps:$4 sm:$0xff]   ;;  %v12452_v4 = vld [vmem:[#allocation10 + $0x324] ss:$16 sps:$4 sm:$0xff]   ;;  %v12450_v23 = vld [vmem:[#allocation10 + $0x320] ss:$16 sps:$4 sm:$0xff]  }
 0x6d3   : > { %v8556_v21 = vcombine.low %v8548_v16, %v8555_v50  ;;  %v8503_v24 = vmul.f32 %v8483_v19, %v8431_v18  ;;  %10197 = vmatpush1.bf16.msra.mxu0 %v12388_v25  ;;  %v12438_v16 = vld [vmem:[#allocation10 + $0x2e0] ss:$16 sps:$4 sm:$0xff]   ;;  %v12441_v18 = vld [vmem:[#allocation10 + $0x2e8] ss:$16 sps:$4 sm:$0xff]   ;;  %v12446_v50 = vld [vmem:[#allocation10 + $0x304] ss:$16 sps:$4 sm:$0xff]  }
 0x6d4   : > { %10198 = vmatprep.subr.bf16.mxu0 %v12390_v27  ;;  %v12444_v19 = vld [vmem:[#allocation10 + $0x300] ss:$16 sps:$4 sm:$0xff]   ;;  %v12458_v25 = vld [vmem:[#allocation10 + $0x344] ss:$16 sps:$4 sm:$0xff]   ;;  %v12459_v27 = vld [vmem:[#allocation10 + $0x348] ss:$16 sps:$4 sm:$0xff]  }
 0x6d5   : > { %v8576_v26 = vadd.f32 %v8556_v21, %v8503_v24  ;;  %10361 = vmatpush1.bf16.msra.mxu1 %v12389_v44  ;;  %v12455_v21 = vld [vmem:[#allocation10 + $0x32c] ss:$16 sps:$4 sm:$0xff]   ;;  %v12453_v24 = vld [vmem:[#allocation10 + $0x328] ss:$16 sps:$4 sm:$0xff]   ;;  %v12456_v44 = vld [vmem:[#allocation10 + $0x340] ss:$16 sps:$4 sm:$0xff]  }
 0x6d6   : > { %10362 = vmatprep.subr.bf16.mxu1 %v12392_v28  ;;  %v12464_v28 = vld [vmem:[#allocation10 + $0x364] ss:$16 sps:$4 sm:$0xff]  }
 0x6d7   : > { %v8578_v30 = vmax.f32 %v8576_v26, 0.0  ;;  %10199 = vmatpush1.bf16.msra.mxu0 %v12394_v34  ;;  %v12461_v26 = vld [vmem:[#allocation10 + $0x34c] ss:$16 sps:$4 sm:$0xff]   ;;  %v12470_v34 = vld [vmem:[#allocation10 + $0x384] ss:$16 sps:$4 sm:$0xff]  }
 0x6d8   : > { %10209 = vmatprep.subr.bf16.mxu0 %v12398_v45  ;;  %v8457_v45 = vsub.s32 5, %v13307_v17 }
 0x6d9   : > { %v8589_v7 = vrot.slane %v8578_v30, %v13314_v22  ;;  %v8582_v33 = vcombine.high %v8578_v30, %v8578_v30  ;;  %10363 = vmatpush1.bf16.msra.mxu1 %v12395_v35  ;;  %v12467_v30 = vld [vmem:[#allocation10 + $0x36c] ss:$16 sps:$4 sm:$0xff]  }
 0x6da   : > { %10373 = vmatprep.subr.bf16.mxu1 %v12401_v54  ;;  %v12473_v35 = vld [vmem:[#allocation10 + $0x38c] ss:$16 sps:$4 sm:$0xff]   ;;  %v8461_v54 = vsub.s32 6, %v13307_v17 }
 0x6db   : > { %v8597_v42 = vcombine.high %v8589_v7, %v8589_v7  ;;  %v14504_v61 = vrot.slane %v8582_v33, %v13314_v22  ;;  %v8624_v55 = vpack.c.bf16 %v8589_v7, %v8589_v7  ;;  %v12462_v7 = vld [vmem:[#allocation10 + $0x360] ss:$16 sps:$4 sm:$0xff]   ;;  %v12465_v33 = vld [vmem:[#allocation10 + $0x368] ss:$16 sps:$4 sm:$0xff]  }
 0x6dd   : > { %v8625_v53 = vpack.c.bf16 %v8597_v42, %v8597_v42  ;;  %v8598_v57 = vcombine.high %v14504_v61, %v14504_v61  ;;  %v8453_v42 = vsub.s32 4, %v13307_v17 }
 0x6df   : > { %10200 = vmatprep.mubr.bf16.mxu0 %v8625_v53  ;;  %10364 = vmatprep.mubr.bf16.mxu1 %v8625_v53  ;;  %v8627_v31 = vpack.c.bf16 %v8598_v57, %v8598_v57  ;;  %v8465_v53 = vsub.s32 7, %v13307_v17  ;;  %v12476_v57 = vld [vmem:[#allocation10 + $0x3a4] ss:$16 sps:$4 sm:$0xff]   ;;  %v12477_v17 = vld [vmem:[#allocation10 + $0x3a8] ss:$16 sps:$4 sm:$0xff]  }
 0x6e0   : > { %10201 = vmatmul.mubr.bf16.vlgmr.msra.gmra.mrb[0].mxu0 %v8624_v55  ;;  %10365 = vmatmul.mubr.bf16.vlgmr.msra.gmra.mrb[0].mxu1 %v8624_v55  ;;  %v12471_v55 = vld [vmem:[#allocation10 + $0x388] ss:$16 sps:$4 sm:$0xff]  }
 0x6e1   : > { %10210 = vmatpush1.bf16.msra.mxu0 %v12396_v51  ;;  %10374 = vmatpush1.bf16.msra.mxu1 %v12399_v59  ;;  %v12468_v51 = vld [vmem:[#allocation10 + $0x380] ss:$16 sps:$4 sm:$0xff]   ;;  %v12479_v59 = vld [vmem:[#allocation10 + $0x3ac] ss:$16 sps:$4 sm:$0xff]  }
 0x6e2   : > { %10211 = vmatprep.subr.bf16.mxu0 %v12404_v56  ;;  %10375 = vmatprep.subr.bf16.mxu1 %v12407_v29  ;;  %v8454_v56 = vrot.slane %v14478_v1, %v8453_v42  ;;  %v8458_v29 = vrot.slane %v14478_v1, %v8457_v45 }
 0x6e3   : > { %10241 = vmatprep.mubr.bf16.mxu0 %v8627_v31  ;;  %10405 = vmatprep.mubr.bf16.mxu1 %v8627_v31  ;;  %v8462_v31 = vrot.slane %v14478_v1, %v8461_v54 }
 0x6e5   : > { %10212 = vmatpush1.bf16.msra.mxu0 %v12402_v62  ;;  %10376 = vmatpush1.bf16.msra.mxu1 %v12405_v38  ;;  %v8466_v62 = vrot.slane %v14478_v1, %v8465_v53  ;;  %v12474_v38 = vld [vmem:[#allocation10 + $0x3a0] ss:$16 sps:$4 sm:$0xff]   ;;  %v12483_v1 = vld [vmem:[#allocation10 + $0x3c8] ss:$16 sps:$4 sm:$0xff]  }
 0x6e6   : > { %10213 = vmatprep.subr.bf16.mxu0 %v12410_v0  ;;  %10377 = vmatprep.subr.bf16.mxu1 %v12413_v48  ;;  %v8527_v0 = vrot.slane %v14480_v43, %v8453_v42  ;;  %v12482_v48 = vld [vmem:[#allocation10 + $0x3c4] ss:$16 sps:$4 sm:$0xff]  }
 0x6e7   : > { %v12518_v42 = vld [vmem:[#allocation10 + $0x484] ss:$16 sps:$4 sm:$0xff]  }
 0x6e9   : > { %10214 = vmatpush1.bf16.msra.mxu0 %v12408_v49  ;;  %10378 = vmatpush1.bf16.msra.mxu1 %v12411_v52  ;;  %v8531_v49 = vrot.slane %v14480_v43, %v8457_v45  ;;  %v8535_v52 = vrot.slane %v14480_v43, %v8461_v54  ;;  %v12521_v54 = vld [vmem:[#allocation10 + $0x48c] ss:$16 sps:$4 sm:$0xff]  }
 0x6ea   : > { %10215 = vmatprep.subr.bf16.mxu0 %v12416_v10  ;;  %10379 = vmatprep.subr.bf16.mxu1 %v12419_v6  ;;  %v8539_v10 = vrot.slane %v14480_v43, %v8465_v53  ;;  %v12485_v6 = vld [vmem:[#allocation10 + $0x3cc] ss:$16 sps:$4 sm:$0xff]   ;;  %v12486_v43 = vld [vmem:[#allocation10 + $0x3e0] ss:$16 sps:$4 sm:$0xff]  }
 0x6eb   : > { %v12516_v53 = vld [vmem:[#allocation10 + $0x480] ss:$16 sps:$4 sm:$0xff]  }
 0x6ed   : > { %10216 = vmatpush1.bf16.msra.mxu0 %v12414_v8  ;;  %10380 = vmatpush1.bf16.msra.mxu1 %v12417_v9  ;;  %v8484_v8 = vcombine.low %v8454_v56, %v8458_v29  ;;  %v8485_v9 = vcombine.low %v8462_v31, %v8466_v62  ;;  %v12525_v56 = vld [vmem:[#allocation10 + $0x4a8] ss:$16 sps:$4 sm:$0xff]   ;;  %v12530_v29 = vld [vmem:[#allocation10 + $0x4c4] ss:$16 sps:$4 sm:$0xff]   ;;  %v12533_v31 = vld [vmem:[#allocation10 + $0x4cc] ss:$16 sps:$4 sm:$0xff]  }
 0x6ee   : > { %10217 = vmatprep.subr.bf16.mxu0 %v12422_v14  ;;  %10381 = vmatprep.subr.bf16.mxu1 %v12425_v3  ;;  %v12480_v14 = vld [vmem:[#allocation10 + $0x3c0] ss:$16 sps:$4 sm:$0xff]   ;;  %v12488_v3 = vld [vmem:[#allocation10 + $0x3e4] ss:$16 sps:$4 sm:$0xff]  }
 0x6ef   : > { %v12528_v62 = vld [vmem:[#allocation10 + $0x4c0] ss:$16 sps:$4 sm:$0xff]  }
 0x6f1   : > { %10218 = vmatpush1.bf16.msra.mxu0 %v12420_v58  ;;  %10382 = vmatpush1.bf16.msra.mxu1 %v12423_v40  ;;  %v8557_v58 = vcombine.low %v8527_v0, %v8531_v49  ;;  %v8558_v40 = vcombine.low %v8535_v52, %v8539_v10  ;;  %v12536_v0 = vld [vmem:[#allocation10 + $0x4e4] ss:$16 sps:$4 sm:$0xff]   ;;  %v12537_v49 = vld [vmem:[#allocation10 + $0x4e8] ss:$16 sps:$4 sm:$0xff]   ;;  %v12545_v10 = vld [vmem:[#allocation10 + $0x50c] ss:$16 sps:$4 sm:$0xff]  }
 0x6f2   : > { %10219 = vmatprep.subr.bf16.mxu0 %v12428_v20  ;;  %10383 = vmatprep.subr.bf16.mxu1 %v12431_v32  ;;  %v12491_v20 = vld [vmem:[#allocation10 + $0x3ec] ss:$16 sps:$4 sm:$0xff]   ;;  %v8492_v32 = vrot.slane %v8484_v8, %v13314_v22  ;;  %v12542_v52 = vld [vmem:[#allocation10 + $0x504] ss:$16 sps:$4 sm:$0xff]   ;;  %v12543_v8 = vld [vmem:[#allocation10 + $0x508] ss:$16 sps:$4 sm:$0xff]  }
 0x6f5   : > { %10220 = vmatpush1.bf16.msra.mxu0 %v12426_v37  ;;  %10384 = vmatpush1.bf16.msra.mxu1 %v12429_v2  ;;  %v8499_v37 = vrot.slane %v8485_v9, %v13314_v22  ;;  %v12489_v2 = vld [vmem:[#allocation10 + $0x3e8] ss:$16 sps:$4 sm:$0xff]   ;;  %v12548_v9 = vld [vmem:[#allocation10 + $0x524] ss:$16 sps:$4 sm:$0xff]  }
 0x6f6   : > { %10221 = vmatprep.subr.bf16.mxu0 %v12434_v11  ;;  %10385 = vmatprep.subr.bf16.mxu1 %v12437_v12  ;;  %v12494_v11 = vld [vmem:[#allocation10 + $0x404] ss:$16 sps:$4 sm:$0xff]   ;;  %v8565_v12 = vrot.slane %v8557_v58, %v13314_v22 }
 0x6f7   : > { %v12554_v58 = vld [vmem:[#allocation10 + $0x544] ss:$16 sps:$4 sm:$0xff]  }
 0x6f9   : > { %10222 = vmatpush1.bf16.msra.mxu0 %v12432_v13  ;;  %10386 = vmatpush1.bf16.msra.mxu1 %v12435_v5  ;;  %v8572_v13 = vrot.slane %v8558_v40, %v13314_v22  ;;  %v12497_v5 = vld [vmem:[#allocation10 + $0x40c] ss:$16 sps:$4 sm:$0xff]  }
 0x6fa   : > { %10223 = vmatprep.subr.bf16.mxu0 %v12440_v39  ;;  %10387 = vmatprep.subr.bf16.mxu1 %v12443_v15  ;;  %v8500_v39 = vcombine.low %v8492_v32, %v8499_v37  ;;  %v12492_v15 = vld [vmem:[#allocation10 + $0x400] ss:$16 sps:$4 sm:$0xff]   ;;  %v12557_v40 = vld [vmem:[#allocation10 + $0x54c] ss:$16 sps:$4 sm:$0xff]   ;;  %v12555_v32 = vld [vmem:[#allocation10 + $0x548] ss:$16 sps:$4 sm:$0xff]  }
 0x6fb   : > { %v12560_v37 = vld [vmem:[#allocation10 + $0x564] ss:$16 sps:$4 sm:$0xff]  }
 0x6fd   : > { %10224 = vmatpush1.bf16.msra.mxu0 %v12438_v16  ;;  %10388 = vmatpush1.bf16.msra.mxu1 %v12441_v18  ;;  %v12495_v16 = vld [vmem:[#allocation10 + $0x408] ss:$16 sps:$4 sm:$0xff]   ;;  %v8626_v18 = vpack.c.bf16 %v14504_v61, %v14504_v61  ;;  %v12509_v61 = vld [vmem:[#allocation10 + $0x44c] ss:$16 sps:$4 sm:$0xff]  }
 0x6fe   : > { %10225 = vmatprep.subr.bf16.mxu0 %v12446_v50  ;;  %10389 = vmatprep.subr.bf16.mxu1 %v12449_v36  ;;  %v12500_v50 = vld [vmem:[#allocation10 + $0x424] ss:$16 sps:$4 sm:$0xff]   ;;  %v12503_v36 = vld [vmem:[#allocation10 + $0x42c] ss:$16 sps:$4 sm:$0xff]  }
 0x701   : > { %10226 = vmatpush1.bf16.msra.mxu0 %v12444_v19  ;;  %10390 = vmatpush1.bf16.msra.mxu1 %v12447_v46  ;;  %v8573_v19 = vcombine.low %v8565_v12, %v8572_v13  ;;  %v8432_v46 = vld [vmem:[#allocation2 + $0x8] sm:$0xff] }
 0x702   : > { %10227 = vmatprep.subr.bf16.mxu0 %v12452_v4  ;;  %10391 = vmatprep.subr.bf16.mxu1 %v12455_v21  ;;  %v8504_v4 = vmul.f32 %v8500_v39, %v8432_v46  ;;  %v12498_v21 = vld [vmem:[#allocation10 + $0x420] ss:$16 sps:$4 sm:$0xff]   ;;  %v12566_v12 = vld [vmem:[#allocation10 + $0x584] ss:$16 sps:$4 sm:$0xff]   ;;  %v12569_v13 = vld [vmem:[#allocation10 + $0x58c] ss:$16 sps:$4 sm:$0xff]  }
 0x703   : > { %v12567_v39 = vld [vmem:[#allocation10 + $0x588] ss:$16 sps:$4 sm:$0xff]  }
 0x705   : > { %10228 = vmatpush1.bf16.msra.mxu0 %v12450_v23  ;;  %10392 = vmatpush1.bf16.msra.mxu1 %v12453_v24  ;;  %v12501_v23 = vld [vmem:[#allocation10 + $0x428] ss:$16 sps:$4 sm:$0xff]   ;;  %v12506_v24 = vld [vmem:[#allocation10 + $0x444] ss:$16 sps:$4 sm:$0xff]  }
 0x706   : > { %10229 = vmatprep.subr.bf16.mxu0 %v12458_v25  ;;  %10393 = vmatprep.subr.bf16.mxu1 %v12461_v26  ;;  %v8577_v25 = vadd.f32 %v8573_v19, %v8504_v4  ;;  %v12581_v19 = vld [vmem:[#allocation10 + $0x5cc] ss:$16 sps:$4 sm:$0xff]   ;;  %v12576_v4 = vld [vmem:[#allocation10 + $0x5c0] ss:$16 sps:$4 sm:$0xff]  }
 0x708   : > { %v14526_v26 = vmax.f32 %v8577_v25, 0.0 }
 0x709   : > { %10230 = vmatpush1.bf16.msra.mxu0 %v12456_v44  ;;  %10394 = vmatpush1.bf16.msra.mxu1 %v12459_v27  ;;  %v12504_v44 = vld [vmem:[#allocation10 + $0x440] ss:$16 sps:$4 sm:$0xff]   ;;  %v12507_v27 = vld [vmem:[#allocation10 + $0x448] ss:$16 sps:$4 sm:$0xff]  }
 0x70a   : > { %10231 = vmatprep.subr.bf16.mxu0 %v12464_v28  ;;  %10395 = vmatprep.subr.bf16.mxu1 %v12467_v30  ;;  %v12512_v28 = vld [vmem:[#allocation10 + $0x464] ss:$16 sps:$4 sm:$0xff]   ;;  %v14530_v30 = vrot.slane %v14526_v26, %v13314_v22  ;;  %v8599_v46 = vcombine.high %v14526_v26, %v14526_v26 }
 0x70c   : > { %v14537_v25 = vrot.slane %v8599_v46, %v13314_v22  ;;  %v12596_v22 = vld [vmem:[#allocation10 + $0x624] ss:$16 sps:$4 sm:$0xff]   ;;  %v12665_v46 = vld [vmem:[#allocation10 + $0x78c] ss:$16 sps:$4 sm:$0xff]  }
 0x70d   : > { %10232 = vmatpush1.bf16.msra.mxu0 %v12462_v7  ;;  %10396 = vmatpush1.bf16.msra.mxu1 %v12465_v33  ;;  %v12515_v7 = vld [vmem:[#allocation10 + $0x46c] ss:$16 sps:$4 sm:$0xff]   ;;  %v8614_v33 = vcombine.high %v14530_v30, %v14530_v30 }
 0x70e   : > { %10233 = vmatprep.subr.bf16.mxu0 %v12470_v34  ;;  %10397 = vmatprep.subr.bf16.mxu1 %v12473_v35  ;;  %v12510_v34 = vld [vmem:[#allocation10 + $0x460] ss:$16 sps:$4 sm:$0xff]   ;;  %v12513_v35 = vld [vmem:[#allocation10 + $0x468] ss:$16 sps:$4 sm:$0xff]   ;;  %v8615_v26 = vcombine.high %v14537_v25, %v14537_v25 }
 0x70f   : > { %v8629_v45 = vpack.c.bf16 %v8614_v33, %v8614_v33  ;;  %v12588_v33 = vld [vmem:[#allocation10 + $0x600] ss:$16 sps:$4 sm:$0xff]  }
 0x711   : > { %10234 = vmatpush1.bf16.msra.mxu0 %v12468_v51  ;;  %10398 = vmatpush1.bf16.msra.mxu1 %v12471_v55  ;;  %v12519_v51 = vld [vmem:[#allocation10 + $0x488] ss:$16 sps:$4 sm:$0xff]   ;;  %v12524_v55 = vld [vmem:[#allocation10 + $0x4a4] ss:$16 sps:$4 sm:$0xff]  }
 0x712   : > { %10235 = vmatprep.subr.bf16.mxu0 %v12476_v57  ;;  %10399 = vmatprep.subr.bf16.mxu1 %v12479_v59  ;;  %v12527_v57 = vld [vmem:[#allocation10 + $0x4ac] ss:$16 sps:$4 sm:$0xff]   ;;  %v12522_v59 = vld [vmem:[#allocation10 + $0x4a0] ss:$16 sps:$4 sm:$0xff]  }
 0x715   : > { %10236 = vmatpush1.bf16.msra.mxu0 %v12474_v38  ;;  %10400 = vmatpush1.bf16.msra.mxu1 %v12477_v17  ;;  %v12531_v38 = vld [vmem:[#allocation10 + $0x4c8] ss:$16 sps:$4 sm:$0xff]   ;;  %v12539_v17 = vld [vmem:[#allocation10 + $0x4ec] ss:$16 sps:$4 sm:$0xff]  }
 0x716   : > { %10237 = vmatprep.subr.bf16.mxu0 %v12482_v48  ;;  %10401 = vmatprep.subr.bf16.mxu1 %v12485_v6  ;;  %v12534_v48 = vld [vmem:[#allocation10 + $0x4e0] ss:$16 sps:$4 sm:$0xff]  }
 0x717   : > { %v12540_v6 = vld [vmem:[#allocation10 + $0x500] ss:$16 sps:$4 sm:$0xff]  }
 0x719   : > { %10238 = vmatpush1.bf16.msra.mxu0 %v12480_v14  ;;  %10402 = vmatpush1.bf16.msra.mxu1 %v12483_v1  ;;  %v12551_v14 = vld [vmem:[#allocation10 + $0x52c] ss:$16 sps:$4 sm:$0xff]   ;;  %v12546_v1 = vld [vmem:[#allocation10 + $0x520] ss:$16 sps:$4 sm:$0xff]  }
 0x71a   : > { %10239 = vmatprep.subr.bf16.mxu0 %v12488_v3  ;;  %10403 = vmatprep.subr.bf16.mxu1 %v12491_v20  ;;  %v12549_v3 = vld [vmem:[#allocation10 + $0x528] ss:$16 sps:$4 sm:$0xff]   ;;  %v12552_v20 = vld [vmem:[#allocation10 + $0x540] ss:$16 sps:$4 sm:$0xff]  }
 0x71d   : > { %10240 = vmatpush1.bf16.msra.mxu0 %v12486_v43  ;;  %10404 = vmatpush1.bf16.msra.mxu1 %v12489_v2  ;;  %v12563_v43 = vld [vmem:[#allocation10 + $0x56c] ss:$16 sps:$4 sm:$0xff]   ;;  %v12558_v2 = vld [vmem:[#allocation10 + $0x560] ss:$16 sps:$4 sm:$0xff]  }
 0x71e   : > { %10250 = vmatprep.subr.bf16.mxu0 %v12494_v11  ;;  %10414 = vmatprep.subr.bf16.mxu1 %v12497_v5  ;;  %v12561_v11 = vld [vmem:[#allocation10 + $0x568] ss:$16 sps:$4 sm:$0xff]   ;;  %v12564_v5 = vld [vmem:[#allocation10 + $0x580] ss:$16 sps:$4 sm:$0xff]  }
 0x720   : > { %10242 = vmatmul.mubr.bf16.vlgmr.msra.gmra.mrb[0].mxu0 %v8626_v18  ;;  %10406 = vmatmul.mubr.bf16.vlgmr.msra.gmra.mrb[0].mxu1 %v8626_v18  ;;  %v12570_v18 = vld [vmem:[#allocation10 + $0x5a0] ss:$16 sps:$4 sm:$0xff]  }
 0x721   : > { %10251 = vmatpush1.bf16.msra.mxu0 %v12492_v15  ;;  %10415 = vmatpush1.bf16.msra.mxu1 %v12495_v16  ;;  %v12572_v15 = vld [vmem:[#allocation10 + $0x5a4] ss:$16 sps:$4 sm:$0xff]   ;;  %v12575_v16 = vld [vmem:[#allocation10 + $0x5ac] ss:$16 sps:$4 sm:$0xff]  }
 0x722   : > { %10252 = vmatprep.subr.bf16.mxu0 %v12500_v50  ;;  %10416 = vmatprep.subr.bf16.mxu1 %v12503_v36  ;;  %v12573_v50 = vld [vmem:[#allocation10 + $0x5a8] ss:$16 sps:$4 sm:$0xff]   ;;  %v12578_v36 = vld [vmem:[#allocation10 + $0x5c4] ss:$16 sps:$4 sm:$0xff]  }
 0x723   : > { %10282 = vmatprep.mubr.bf16.mxu0 %v8629_v45  ;;  %10446 = vmatprep.mubr.bf16.mxu1 %v8629_v45  ;;  %v12594_v45 = vld [vmem:[#allocation10 + $0x620] ss:$16 sps:$4 sm:$0xff]  }
 0x725   : > { %10253 = vmatpush1.bf16.msra.mxu0 %v12498_v21  ;;  %10417 = vmatpush1.bf16.msra.mxu1 %v12501_v23  ;;  %v12579_v21 = vld [vmem:[#allocation10 + $0x5c8] ss:$16 sps:$4 sm:$0xff]   ;;  %v12584_v23 = vld [vmem:[#allocation10 + $0x5e4] ss:$16 sps:$4 sm:$0xff]  }
 0x726   : > { %10254 = vmatprep.subr.bf16.mxu0 %v12506_v24  ;;  %10418 = vmatprep.subr.bf16.mxu1 %v12509_v61  ;;  %v12587_v24 = vld [vmem:[#allocation10 + $0x5ec] ss:$16 sps:$4 sm:$0xff]   ;;  %v12582_v61 = vld [vmem:[#allocation10 + $0x5e0] ss:$16 sps:$4 sm:$0xff]  }
 0x729   : > { %10255 = vmatpush1.bf16.msra.mxu0 %v12504_v44  ;;  %10419 = vmatpush1.bf16.msra.mxu1 %v12507_v27  ;;  %v12585_v44 = vld [vmem:[#allocation10 + $0x5e8] ss:$16 sps:$4 sm:$0xff]   ;;  %v12590_v27 = vld [vmem:[#allocation10 + $0x604] ss:$16 sps:$4 sm:$0xff]  }
 0x72a   : > { %10256 = vmatprep.subr.bf16.mxu0 %v12512_v28  ;;  %10420 = vmatprep.subr.bf16.mxu1 %v12515_v7  ;;  %v12593_v28 = vld [vmem:[#allocation10 + $0x60c] ss:$16 sps:$4 sm:$0xff]   ;;  %v8628_v7 = vpack.c.bf16 %v14530_v30, %v14530_v30  ;;  %v12600_v30 = vld [vmem:[#allocation10 + $0x640] ss:$16 sps:$4 sm:$0xff]  }
 0x72d   : > { %10257 = vmatpush1.bf16.msra.mxu0 %v12510_v34  ;;  %10421 = vmatpush1.bf16.msra.mxu1 %v12513_v35  ;;  %v12591_v34 = vld [vmem:[#allocation10 + $0x608] ss:$16 sps:$4 sm:$0xff]   ;;  %v12599_v35 = vld [vmem:[#allocation10 + $0x62c] ss:$16 sps:$4 sm:$0xff]  }
 0x72e   : > { %10258 = vmatprep.subr.bf16.mxu0 %v12518_v42  ;;  %10422 = vmatprep.subr.bf16.mxu1 %v12521_v54  ;;  %v8631_v42 = vpack.c.bf16 %v8615_v26, %v8615_v26  ;;  %v12597_v54 = vld [vmem:[#allocation10 + $0x628] ss:$16 sps:$4 sm:$0xff]   ;;  %v12672_v26 = vld [vmem:[#allocation10 + $0x7c0] ss:$16 sps:$4 sm:$0xff]  }
 0x731   : > { %10259 = vmatpush1.bf16.msra.mxu0 %v12516_v53  ;;  %10423 = vmatpush1.bf16.msra.mxu1 %v12519_v51  ;;  %v12602_v53 = vld [vmem:[#allocation10 + $0x644] ss:$16 sps:$4 sm:$0xff]   ;;  %v12605_v51 = vld [vmem:[#allocation10 + $0x64c] ss:$16 sps:$4 sm:$0xff]  }
 0x732   : > { %10260 = vmatprep.subr.bf16.mxu0 %v12524_v55  ;;  %10424 = vmatprep.subr.bf16.mxu1 %v12527_v57  ;;  %v12603_v55 = vld [vmem:[#allocation10 + $0x648] ss:$16 sps:$4 sm:$0xff]   ;;  %v12608_v57 = vld [vmem:[#allocation10 + $0x664] ss:$16 sps:$4 sm:$0xff]  }
 0x735   : > { %10261 = vmatpush1.bf16.msra.mxu0 %v12522_v59  ;;  %10425 = vmatpush1.bf16.msra.mxu1 %v12525_v56  ;;  %v12611_v59 = vld [vmem:[#allocation10 + $0x66c] ss:$16 sps:$4 sm:$0xff]   ;;  %v12606_v56 = vld [vmem:[#allocation10 + $0x660] ss:$16 sps:$4 sm:$0xff]  }
 0x736   : > { %10262 = vmatprep.subr.bf16.mxu0 %v12530_v29  ;;  %10426 = vmatprep.subr.bf16.mxu1 %v12533_v31  ;;  %v12609_v29 = vld [vmem:[#allocation10 + $0x668] ss:$16 sps:$4 sm:$0xff]   ;;  %v12614_v31 = vld [vmem:[#allocation10 + $0x684] ss:$16 sps:$4 sm:$0xff]  }
 0x739   : > { %10263 = vmatpush1.bf16.msra.mxu0 %v12528_v62  ;;  %10427 = vmatpush1.bf16.msra.mxu1 %v12531_v38  ;;  %v12617_v62 = vld [vmem:[#allocation10 + $0x68c] ss:$16 sps:$4 sm:$0xff]   ;;  %v12612_v38 = vld [vmem:[#allocation10 + $0x680] ss:$16 sps:$4 sm:$0xff]  }
 0x73a   : > { %10264 = vmatprep.subr.bf16.mxu0 %v12536_v0  ;;  %10428 = vmatprep.subr.bf16.mxu1 %v12539_v17  ;;  %v12615_v0 = vld [vmem:[#allocation10 + $0x688] ss:$16 sps:$4 sm:$0xff]   ;;  %v12620_v17 = vld [vmem:[#allocation10 + $0x6a4] ss:$16 sps:$4 sm:$0xff]  }
 0x73d   : > { %10265 = vmatpush1.bf16.msra.mxu0 %v12534_v48  ;;  %10429 = vmatpush1.bf16.msra.mxu1 %v12537_v49  ;;  %v12623_v48 = vld [vmem:[#allocation10 + $0x6ac] ss:$16 sps:$4 sm:$0xff]   ;;  %v12618_v49 = vld [vmem:[#allocation10 + $0x6a0] ss:$16 sps:$4 sm:$0xff]  }
 0x73e   : > { %10266 = vmatprep.subr.bf16.mxu0 %v12542_v52  ;;  %10430 = vmatprep.subr.bf16.mxu1 %v12545_v10  ;;  %v12621_v52 = vld [vmem:[#allocation10 + $0x6a8] ss:$16 sps:$4 sm:$0xff]   ;;  %v12626_v10 = vld [vmem:[#allocation10 + $0x6c4] ss:$16 sps:$4 sm:$0xff]  }
 0x741   : > { %10267 = vmatpush1.bf16.msra.mxu0 %v12540_v6  ;;  %10431 = vmatpush1.bf16.msra.mxu1 %v12543_v8  ;;  %v12629_v6 = vld [vmem:[#allocation10 + $0x6cc] ss:$16 sps:$4 sm:$0xff]   ;;  %v12624_v8 = vld [vmem:[#allocation10 + $0x6c0] ss:$16 sps:$4 sm:$0xff]  }
 0x742   : > { %10268 = vmatprep.subr.bf16.mxu0 %v12548_v9  ;;  %10432 = vmatprep.subr.bf16.mxu1 %v12551_v14  ;;  %v12627_v9 = vld [vmem:[#allocation10 + $0x6c8] ss:$16 sps:$4 sm:$0xff]   ;;  %v12632_v14 = vld [vmem:[#allocation10 + $0x6e4] ss:$16 sps:$4 sm:$0xff]  }
 0x745   : > { %10269 = vmatpush1.bf16.msra.mxu0 %v12546_v1  ;;  %10433 = vmatpush1.bf16.msra.mxu1 %v12549_v3  ;;  %v12635_v1 = vld [vmem:[#allocation10 + $0x6ec] ss:$16 sps:$4 sm:$0xff]   ;;  %v12630_v3 = vld [vmem:[#allocation10 + $0x6e0] ss:$16 sps:$4 sm:$0xff]  }
 0x746   : > { %10270 = vmatprep.subr.bf16.mxu0 %v12554_v58  ;;  %10434 = vmatprep.subr.bf16.mxu1 %v12557_v40  ;;  %v12633_v58 = vld [vmem:[#allocation10 + $0x6e8] ss:$16 sps:$4 sm:$0xff]   ;;  %v12638_v40 = vld [vmem:[#allocation10 + $0x704] ss:$16 sps:$4 sm:$0xff]  }
 0x749   : > { %10271 = vmatpush1.bf16.msra.mxu0 %v12552_v20  ;;  %10435 = vmatpush1.bf16.msra.mxu1 %v12555_v32  ;;  %v12641_v20 = vld [vmem:[#allocation10 + $0x70c] ss:$16 sps:$4 sm:$0xff]   ;;  %v12636_v32 = vld [vmem:[#allocation10 + $0x700] ss:$16 sps:$4 sm:$0xff]  }
 0x74a   : > { %10272 = vmatprep.subr.bf16.mxu0 %v12560_v37  ;;  %10436 = vmatprep.subr.bf16.mxu1 %v12563_v43  ;;  %v12639_v37 = vld [vmem:[#allocation10 + $0x708] ss:$16 sps:$4 sm:$0xff]   ;;  %v12644_v43 = vld [vmem:[#allocation10 + $0x724] ss:$16 sps:$4 sm:$0xff]  }
 0x74d   : > { %10273 = vmatpush1.bf16.msra.mxu0 %v12558_v2  ;;  %10437 = vmatpush1.bf16.msra.mxu1 %v12561_v11  ;;  %v12647_v2 = vld [vmem:[#allocation10 + $0x72c] ss:$16 sps:$4 sm:$0xff]   ;;  %v12642_v11 = vld [vmem:[#allocation10 + $0x720] ss:$16 sps:$4 sm:$0xff]  }
 0x74e   : > { %10274 = vmatprep.subr.bf16.mxu0 %v12566_v12  ;;  %10438 = vmatprep.subr.bf16.mxu1 %v12569_v13  ;;  %v12645_v12 = vld [vmem:[#allocation10 + $0x728] ss:$16 sps:$4 sm:$0xff]   ;;  %v12650_v13 = vld [vmem:[#allocation10 + $0x744] ss:$16 sps:$4 sm:$0xff]  }
 0x751   : > { %10275 = vmatpush1.bf16.msra.mxu0 %v12564_v5  ;;  %10439 = vmatpush1.bf16.msra.mxu1 %v12567_v39  ;;  %v12653_v5 = vld [vmem:[#allocation10 + $0x74c] ss:$16 sps:$4 sm:$0xff]   ;;  %v12648_v39 = vld [vmem:[#allocation10 + $0x740] ss:$16 sps:$4 sm:$0xff]  }
 0x752   : > { %10276 = vmatprep.subr.bf16.mxu0 %v12572_v15  ;;  %10440 = vmatprep.subr.bf16.mxu1 %v12575_v16  ;;  %v12651_v15 = vld [vmem:[#allocation10 + $0x748] ss:$16 sps:$4 sm:$0xff]   ;;  %v12656_v16 = vld [vmem:[#allocation10 + $0x764] ss:$16 sps:$4 sm:$0xff]  }
 0x755   : > { %10277 = vmatpush1.bf16.msra.mxu0 %v12570_v18  ;;  %10441 = vmatpush1.bf16.msra.mxu1 %v12573_v50  ;;  %v12659_v18 = vld [vmem:[#allocation10 + $0x76c] ss:$16 sps:$4 sm:$0xff]   ;;  %v12654_v50 = vld [vmem:[#allocation10 + $0x760] ss:$16 sps:$4 sm:$0xff]  }
 0x756   : > { %10278 = vmatprep.subr.bf16.mxu0 %v12578_v36  ;;  %10442 = vmatprep.subr.bf16.mxu1 %v12581_v19  ;;  %v12657_v36 = vld [vmem:[#allocation10 + $0x768] ss:$16 sps:$4 sm:$0xff]   ;;  %v12662_v19 = vld [vmem:[#allocation10 + $0x784] ss:$16 sps:$4 sm:$0xff]  }
 0x759   : > { %10279 = vmatpush1.bf16.msra.mxu0 %v12576_v4  ;;  %10443 = vmatpush1.bf16.msra.mxu1 %v12579_v21  ;;  %v12660_v4 = vld [vmem:[#allocation10 + $0x780] ss:$16 sps:$4 sm:$0xff]   ;;  %v12663_v21 = vld [vmem:[#allocation10 + $0x788] ss:$16 sps:$4 sm:$0xff]  }
 0x75a   : > { %10280 = vmatprep.subr.bf16.mxu0 %v12584_v23  ;;  %10444 = vmatprep.subr.bf16.mxu1 %v12587_v24  ;;  %v12668_v23 = vld [vmem:[#allocation10 + $0x7a4] ss:$16 sps:$4 sm:$0xff]   ;;  %v12671_v24 = vld [vmem:[#allocation10 + $0x7ac] ss:$16 sps:$4 sm:$0xff]  }
 0x75d   : > { %10281 = vmatpush1.bf16.msra.mxu0 %v12582_v61  ;;  %10445 = vmatpush1.bf16.msra.mxu1 %v12585_v44  ;;  %v12666_v61 = vld [vmem:[#allocation10 + $0x7a0] ss:$16 sps:$4 sm:$0xff]   ;;  %v12669_v44 = vld [vmem:[#allocation10 + $0x7a8] ss:$16 sps:$4 sm:$0xff]  }
 0x75e   : > { %10291 = vmatprep.subr.bf16.mxu0 %v12590_v27  ;;  %10455 = vmatprep.subr.bf16.mxu1 %v12593_v28  ;;  %v12674_v27 = vld [vmem:[#allocation10 + $0x7c4] ss:$16 sps:$4 sm:$0xff]   ;;  %v12677_v28 = vld [vmem:[#allocation10 + $0x7cc] ss:$16 sps:$4 sm:$0xff]  }
 0x760   : > { %10283 = vmatmul.mubr.bf16.vlgmr.msra.gmra.mrb[0].mxu0 %v8628_v7  ;;  %10447 = vmatmul.mubr.bf16.vlgmr.msra.gmra.mrb[0].mxu1 %v8628_v7  ;;  %v12675_v7 = vld [vmem:[#allocation10 + $0x7c8] ss:$16 sps:$4 sm:$0xff]  }
 0x761   : > { %10292 = vmatpush1.bf16.msra.mxu0 %v12588_v33  ;;  %10456 = vmatpush1.bf16.msra.mxu1 %v12591_v34  ;;  %v12680_v33 = vld [vmem:[#allocation10 + $0x7e4] ss:$16 sps:$4 sm:$0xff]   ;;  %v12683_v34 = vld [vmem:[#allocation10 + $0x7ec] ss:$16 sps:$4 sm:$0xff]  }
 0x762   : > { %10293 = vmatprep.subr.bf16.mxu0 %v12596_v22  ;;  %10457 = vmatprep.subr.bf16.mxu1 %v12599_v35  ;;  %v12678_v22 = vld [vmem:[#allocation10 + $0x7e0] ss:$16 sps:$4 sm:$0xff]   ;;  %v12681_v35 = vld [vmem:[#allocation10 + $0x7e8] ss:$16 sps:$4 sm:$0xff]  }
 0x763   : > { %10323 = vmatprep.mubr.bf16.mxu0 %v8631_v42  ;;  %10487 = vmatprep.mubr.bf16.mxu1 %v8631_v42  ;;  %v8630_v42 = vpack.c.bf16 %v14537_v25, %v14537_v25  ;;  %v10554_v25 = vld [vmem:[#allocation12 + $0x2] ss:$4 sm:$0xf] }
 0x765   : > { %10294 = vmatpush1.bf16.msra.mxu0 %v12594_v45  ;;  %10458 = vmatpush1.bf16.msra.mxu1 %v12597_v54  ;;  %v10496_v45 = vld [vmem:[#allocation12] ss:$4 sm:$0xf]  ;;  %v10523_v54 = vld [vmem:[#allocation12 + $0x1] ss:$4 sm:$0xf] }
 0x766   : > { %10295 = vmatprep.subr.bf16.mxu0 %v12602_v53  ;;  %10459 = vmatprep.subr.bf16.mxu1 %v12605_v51  ;;  %v10501_v53 = vrot.slane %v10496_v45, %v14467_v60  ;;  %v10509_v51 = vrot.slane %v10496_v45, %v14473_v63 }
 0x769   : > { %10296 = vmatpush1.bf16.msra.mxu0 %v12600_v30  ;;  %10460 = vmatpush1.bf16.msra.mxu1 %v12603_v55  ;;  %v10505_v30 = vrot.slane %v10496_v45, %v14470_v41  ;;  %v10513_v55 = vrot.slane %v10496_v45, %v14476_v47 }
 0x76a   : > { %10297 = vmatprep.subr.bf16.mxu0 %v12608_v57  ;;  %10461 = vmatprep.subr.bf16.mxu1 %v12611_v59  ;;  %v10528_v57 = vrot.slane %v10523_v54, %v14467_v60  ;;  %v10536_v59 = vrot.slane %v10523_v54, %v14473_v63 }
 0x76d   : > { %10298 = vmatpush1.bf16.msra.mxu0 %v12606_v56  ;;  %10462 = vmatpush1.bf16.msra.mxu1 %v12609_v29 }
 0x76e   : > { %10299 = vmatprep.subr.bf16.mxu0 %v12614_v31  ;;  %10463 = vmatprep.subr.bf16.mxu1 %v12617_v62  ;;  %v10532_v31 = vrot.slane %v10523_v54, %v14470_v41  ;;  %v10540_v62 = vrot.slane %v10523_v54, %v14476_v47 }
 0x771   : > { %10300 = vmatpush1.bf16.msra.mxu0 %v12612_v38  ;;  %10464 = vmatpush1.bf16.msra.mxu1 %v12615_v0 }
 0x772   : > { %10301 = vmatprep.subr.bf16.mxu0 %v12620_v17  ;;  %10465 = vmatprep.subr.bf16.mxu1 %v12623_v48 }
 0x775   : > { %10302 = vmatpush1.bf16.msra.mxu0 %v12618_v49  ;;  %10466 = vmatpush1.bf16.msra.mxu1 %v12621_v52 }
 0x776   : > { %10303 = vmatprep.subr.bf16.mxu0 %v12626_v10  ;;  %10467 = vmatprep.subr.bf16.mxu1 %v12629_v6 }
 0x779   : > { %10304 = vmatpush1.bf16.msra.mxu0 %v12624_v8  ;;  %10468 = vmatpush1.bf16.msra.mxu1 %v12627_v9  ;;  %v10559_v9 = vrot.slane %v10554_v25, %v14467_v60 }
 0x77a   : > { %10305 = vmatprep.subr.bf16.mxu0 %v12632_v14  ;;  %10469 = vmatprep.subr.bf16.mxu1 %v12635_v1 }
 0x77d   : > { %10306 = vmatpush1.bf16.msra.mxu0 %v12630_v3  ;;  %10470 = vmatpush1.bf16.msra.mxu1 %v12633_v58 }
 0x77e   : > { %10307 = vmatprep.subr.bf16.mxu0 %v12638_v40  ;;  %10471 = vmatprep.subr.bf16.mxu1 %v12641_v20  ;;  %v10563_v40 = vrot.slane %v10554_v25, %v14470_v41 }
 0x781   : > { %10308 = vmatpush1.bf16.msra.mxu0 %v12636_v32  ;;  %10472 = vmatpush1.bf16.msra.mxu1 %v12639_v37  ;;  %v10567_v32 = vrot.slane %v10554_v25, %v14473_v63  ;;  %v12021_v63 = vld [vmem:[#allocation12 + $0x3] ss:$0 sm:$0xff] }
 0x782   : > { %10309 = vmatprep.subr.bf16.mxu0 %v12644_v43  ;;  %10473 = vmatprep.subr.bf16.mxu1 %v12647_v2 }
 0x785   : > { %10310 = vmatpush1.bf16.msra.mxu0 %v12642_v11  ;;  %10474 = vmatpush1.bf16.msra.mxu1 %v12645_v12  ;;  %v10571_v12 = vrot.slane %v10554_v25, %v14476_v47 }
 0x786   : > { %10311 = vmatprep.subr.bf16.mxu0 %v12650_v13  ;;  %10475 = vmatprep.subr.bf16.mxu1 %v12653_v5 }
 0x789   : > { %10312 = vmatpush1.bf16.msra.mxu0 %v12648_v39  ;;  %10476 = vmatpush1.bf16.msra.mxu1 %v12651_v15 }
 0x78a   : > { %10313 = vmatprep.subr.bf16.mxu0 %v12656_v16  ;;  %10477 = vmatprep.subr.bf16.mxu1 %v12659_v18 }
 0x78d   : > { %10314 = vmatpush1.bf16.msra.mxu0 %v12654_v50  ;;  %10478 = vmatpush1.bf16.msra.mxu1 %v12657_v36 }
 0x78e   : > { %10315 = vmatprep.subr.bf16.mxu0 %v12662_v19  ;;  %10479 = vmatprep.subr.bf16.mxu1 %v12665_v46 }
 0x791   : > { %10316 = vmatpush1.bf16.msra.mxu0 %v12660_v4  ;;  %10480 = vmatpush1.bf16.msra.mxu1 %v12663_v21 }
 0x792   : > { %10317 = vmatprep.subr.bf16.mxu0 %v12668_v23  ;;  %10481 = vmatprep.subr.bf16.mxu1 %v12671_v24 }
 0x795   : > { %10318 = vmatpush1.bf16.msra.mxu0 %v12666_v61  ;;  %10482 = vmatpush1.bf16.msra.mxu1 %v12669_v44 }
 0x796   : > { %10319 = vmatprep.subr.bf16.mxu0 %v12674_v27  ;;  %10483 = vmatprep.subr.bf16.mxu1 %v12677_v28 }
 0x799   : > { %10320 = vmatpush1.bf16.msra.mxu0 %v12672_v26  ;;  %10484 = vmatpush1.bf16.msra.mxu1 %v12675_v7 }
 0x79a   : > { %10321 = vmatprep.subr.bf16.mxu0 %v12680_v33  ;;  %10485 = vmatprep.subr.bf16.mxu1 %v12683_v34 }
 0x79d   : > { %10322 = vmatpush1.bf16.msra.mxu0 %v12678_v22  ;;  %10486 = vmatpush1.bf16.msra.mxu1 %v12681_v35 }
 0x7a0   : > { %10324 = vmatmul.mubr.bf16.vlgmr.msra.gmra.mrb[0].mxu0 %v8630_v42  ;;  %10488 = vmatmul.mubr.bf16.vlgmr.msra.gmra.mrb[0].mxu1 %v8630_v42 }
 0x873   : > { %v10325_v56 = vpop.f32.mrb[0].mxu0  ;;  %v10489_v29 = vpop.f32.mrb[0].mxu1 }
 0x874   : > { %v10518_v38 = vmul.f32 %v10501_v53, %v10325_v56  ;;  %v10520_v0 = vmul.f32 %v10509_v51, %v10489_v29  ;;  %v10327_v17 = vpop.f32.mrb[1].mxu0  ;;  %v10491_v48 = vpop.f32.mrb[1].mxu1 }
 0x875   : > { %v10519_v49 = vmul.f32 %v10505_v30, %v10327_v17  ;;  %v10521_v52 = vmul.f32 %v10513_v55, %v10491_v48  ;;  %v10329_v10 = vpop.f32.mrb[2].mxu0  ;;  %v10493_v6 = vpop.f32.mrb[2].mxu1 }
 0x876   : > { %v10545_v8 = vadd.f32 %v10528_v57, %v10518_v38  ;;  %v10547_v14 = vadd.f32 %v10536_v59, %v10520_v0  ;;  %v10330_v1 = vpop.f32.mrb[3].mxu0  ;;  %v10494_v3 = vpop.f32.mrb[3].mxu1 }
 0x877   : > { %v10546_v58 = vadd.f32 %v10532_v31, %v10519_v49  ;;  %v10548_v20 = vadd.f32 %v10540_v62, %v10521_v52 }
 0x878   : > { %v10549_v37 = vmax.f32 %v10545_v8, 0.0  ;;  %v10551_v43 = vmax.f32 %v10547_v14, 0.0 }
 0x879   : > { %v10550_v2 = vmax.f32 %v10546_v58, 0.0  ;;  %v10552_v11 = vmax.f32 %v10548_v20, 0.0 }
 0x87a   : > { %v10576_v13 = vmul.f32 %v10559_v9, %v10549_v37  ;;  %v10578_v39 = vmul.f32 %v10567_v32, %v10551_v43 }
 0x87b   : > { %v10577_v5 = vmul.f32 %v10563_v40, %v10550_v2  ;;  %v10579_v15 = vmul.f32 %v10571_v12, %v10552_v11 }
 0x87c   : > { %v10581_v60 = vsel %vm10580_vm3, %v10576_v13, 0.0  ;;  %v10584_v50 = vsel %vm10580_vm3, %v10578_v39, 0.0 }
 0x87d   : > { %v10582_v16 = vsel %vm10580_vm3, %v10577_v5, 0.0  ;;  %v10586_v41 = vsel %vm10580_vm3, %v10579_v15, 0.0 }
 0x87e   : > { %v10583_v18 = vadd.f32 %v10582_v16, %v10581_v60 }
 0x880   : > { %v10585_v36 = vadd.f32 %v10584_v50, %v10583_v18 }
 0x882   : > { %v10587_v19 = vadd.f32 %v10586_v41, %v10585_v36 }
 0x884   : > { %10588 = vadd.xlane.f32.xlu0 %v10587_v19 }
 0x911   : > { %v10589_v46 = vpop.xlane.xlu0 %10588 }
 0x912   : > { %v10595_v4 = vadd.f32 %v12021_v63, %v10589_v46 }
 0x914   : > { %12684 = vtanh.f32 %v10595_v4 }
 0x91e   : > { %v12685_v21 = vpop.eup %12684 }
 0x91f   : > { %10598 = vst.msk [vmem:[%s14580_s7] sm:$0x3] %vm10597_vm4, %v12685_v21 }
 0x920 PF: > { %p19_p12 = scmp.ge.s32.totalorder %s13061_s20, 4   ;;  %s14598_s24 = smov %s12866_s25 }
 0x921   : > { %s14599_s25 = smov %s12870_s26  ;;  %s14600_s26 = smov %s13072_s9 }
 0x922   : > { %s14601_s27 = smov %s13061_s20  ;;  %21 = sbr.rel (!%p19_p12) target bundleno = 5 (0x5), region = 115 }
 0x929   :  { %10610 = vsyncpa [#allocation6], 1 }
 0x92a   :  { %10612 = vsyncpa [#allocation6 + $0x1], 1 }
 0x92b   :  { %10613 = vsyncpa [#allocation8], 1 }
 0x92c   :  { %10615 = vsyncpa [#allocation8 + $0x1], 1 }
 0x92d   :  { %10616 = vsyncpa [#allocation11], 1 }

</bundles_post_ra>
